<compile_context>
chip_gen: v5e
topology: v5e:2x2
jax: 0.10.0
libtpu: 0.0.40
codegen_flags: <defaults>
</compile_context>

<pallas_src>
import jax
import jax.numpy as jnp
from jax import lax
from jax.experimental import pallas as pl
from jax.experimental.pallas import tpu as pltpu


def siamese_kernel(x_ref, w1_ref, w2_ref, b2_ref, w3_ref, b3_ref, w4_ref, b4_ref,
                   out_ref):
    # x_ref: (2*TB, D+1) bf16 -- x1 tile stacked on x2 tile, last column == 1
    # so layer-1's bias is folded into w1 (extra K row).
    tb = x_ref.shape[0] // 2
    x = x_ref[...]

    h = jnp.dot(x, w1_ref[...], preferred_element_type=jnp.float32)          # bias folded
    h = jnp.maximum(h, 0.0).astype(jnp.bfloat16)     # ReLU (Dropout == identity at inference)
    h = jnp.dot(h, w2_ref[...], preferred_element_type=jnp.float32) + b2_ref[...]
    h = jnp.maximum(h, 0.0).astype(jnp.bfloat16)
    h = jnp.dot(h, w3_ref[...], preferred_element_type=jnp.float32) + b3_ref[...]
    h = jnp.maximum(h, 0.0).astype(jnp.bfloat16)
    o = jnp.dot(h, w4_ref[...], preferred_element_type=jnp.float32) + b4_ref[...]  # (2*TB, 32) f32

    o1 = o[:tb, :]
    o2 = o[tb:, :]

    # torch.cosine_similarity(eps=1e-8): x / max(||x||, eps);
    # max(||x||, eps) == sqrt(max(||x||^2, eps^2)) -> clamp squared norms, one rsqrt.
    eps2 = jnp.float32(1e-16)
    dot = jnp.sum(o1 * o2, axis=1)
    s1 = jnp.sum(o1 * o1, axis=1)
    s2 = jnp.sum(o2 * o2, axis=1)
    sim = dot * lax.rsqrt(jnp.maximum(s1, eps2) * jnp.maximum(s2, eps2))

    out_ref[...] = sim[None, :]                      # lane-dense (1, TB) store


def prepare_params(params):
    """One-time prep: fold b1 into w1 (extra K row), cast matmul weights to bf16.

    Keeps b2/b3/b4 in f32 for the in-kernel epilogue adds.
    """
    w1 = jnp.concatenate([params["w1"], params["b1"]], axis=0).astype(jnp.bfloat16)
    return {
        "w1": w1,
        "w2": params["w2"].astype(jnp.bfloat16), "b2": params["b2"],
        "w3": params["w3"].astype(jnp.bfloat16), "b3": params["b3"],
        "w4": params["w4"].astype(jnp.bfloat16), "b4": params["b4"],
    }


def siamese_forward(x1, x2, kparams, *, tb=512):
    """x1, x2: (B, D) float32.  kparams: output of prepare_params()."""
    B, D = x1.shape
    # Clamp the tile for small batches (avoid huge padding), keep it a 128-multiple.
    tb = max(128, min(tb, pl.cdiv(B, 128) * 128))
    g = pl.cdiv(B, tb)
    bp = g * tb
    if bp != B:                                      # pad batch to a tile multiple
        pad = ((0, bp - B), (0, 0))
        x1 = jnp.pad(x1, pad)
        x2 = jnp.pad(x2, pad)

    # Append the ones column (folds b1 into w1) and pre-stack both branches so the
    # kernel gets ONE (2*tb, D+1) block per step: one DMA, no in-kernel concat.
    ones = jnp.ones((bp, 1), x1.dtype)
    d1 = D + 1
    x1a = jnp.concatenate([x1, ones], axis=1).reshape(g, tb, d1)
    x2a = jnp.concatenate([x2, ones], axis=1).reshape(g, tb, d1)
    xs = jnp.concatenate([x1a, x2a], axis=1).astype(jnp.bfloat16)   # (g, 2*tb, D+1)

    x_spec = pl.BlockSpec((None, 2 * tb, d1), lambda i: (i, 0, 0))

    def resident(a):                                 # whole array, VMEM-resident across grid
        return pl.BlockSpec(a.shape, lambda i: (0, 0))

    w1, w2, w3, w4 = kparams["w1"], kparams["w2"], kparams["w3"], kparams["w4"]
    b2, b3, b4 = kparams["b2"], kparams["b3"], kparams["b4"]

    out = pl.pallas_call(
        siamese_kernel,
        out_shape=jax.ShapeDtypeStruct((1, bp), jnp.float32),
        grid=(g,),
        in_specs=[x_spec,
                  resident(w1),
                  resident(w2), resident(b2),
                  resident(w3), resident(b3),
                  resident(w4), resident(b4)],
        out_specs=pl.BlockSpec((1, tb), lambda i: (0, i)),
        compiler_params=pltpu.CompilerParams(
            dimension_semantics=("parallel",),       # v7x: shard batch tiles across both TCs
        ),
    )(xs, w1, w2, b2, w3, b3, w4, b4)
    return out[0, :B]                                # (B,) — matches torch output shape


def init_params(key, input_dim):
    """Deterministic init mimicking PyTorch Linear default U(-1/sqrt(fan_in), +).

    Weights stored transposed as (in, out); biases as (1, out).
    """
    dims = [(input_dim, 256), (256, 128), (128, 64), (64, 32)]
    params = {}
    keys = jax.random.split(key, 2 * len(dims))
    for i, (fan_in, fan_out) in enumerate(dims):
        bound = 1.0 / jnp.sqrt(jnp.float32(fan_in))
        params[f"w{i + 1}"] = jax.random.uniform(
            keys[2 * i], (fan_in, fan_out), minval=-bound, maxval=bound, dtype=jnp.float32)
        params[f"b{i + 1}"] = jax.random.uniform(
            keys[2 * i + 1], (1, fan_out), minval=-bound, maxval=bound, dtype=jnp.float32)
    return params


def reference_forward(x1, x2, params, compute_dtype=jnp.float32):
    """Pure-JAX reference; compute_dtype=bfloat16 mimics the kernel's MXU casts."""
    def cast(a):
        return a.astype(compute_dtype)

    def mlp(x):
        h = jnp.maximum(jnp.dot(cast(x), cast(params["w1"]),
                                preferred_element_type=jnp.float32) + params["b1"], 0.0)
        h = jnp.maximum(jnp.dot(cast(h), cast(params["w2"]),
                                preferred_element_type=jnp.float32) + params["b2"], 0.0)
        h = jnp.maximum(jnp.dot(cast(h), cast(params["w3"]),
                                preferred_element_type=jnp.float32) + params["b3"], 0.0)
        return jnp.dot(cast(h), cast(params["w4"]),
                       preferred_element_type=jnp.float32) + params["b4"]

    o1, o2 = mlp(x1), mlp(x2)
    eps = 1e-8
    dot = jnp.sum(o1 * o2, axis=1)
    n1 = jnp.maximum(jnp.linalg.norm(o1, axis=1), eps)
    n2 = jnp.maximum(jnp.linalg.norm(o2, axis=1), eps)
    return dot / (n1 * n2)


if __name__ == "__main__":
    key = jax.random.PRNGKey(0)
    k_params, k_x1, k_x2 = jax.random.split(key, 3)

    batch = 1024                                     # 2 grid steps at TB=512 (both v7x TCs busy)
    input_dim = 64                                   # small synthetic feature dim

    params = init_params(k_params, input_dim)
    kparams = prepare_params(params)                 # one-time fold + bf16 cast (hoisted)
    x1 = jax.random.normal(k_x1, (batch, input_dim), dtype=jnp.float32)
    x2 = jax.random.normal(k_x2, (batch, input_dim), dtype=jnp.float32)

    sim = siamese_forward(x1, x2, kparams)
    sim = jax.block_until_ready(sim)
    assert sim.shape == (batch,)

    # Tight check vs a reference using the same bf16 matmul operands.
    ref_bf16 = reference_forward(x1, x2, params, jnp.bfloat16)
    assert jnp.allclose(sim, ref_bf16, atol=5e-3, rtol=5e-3), \
        float(jnp.max(jnp.abs(sim - ref_bf16)))

    # Loose check vs the full-f32 (torch-equivalent) math: deviation is only
    # the intentional bf16 matmul rounding.
    ref_f32 = reference_forward(x1, x2, params, jnp.float32)
    assert jnp.allclose(sim, ref_f32, atol=5e-2, rtol=0), \
        float(jnp.max(jnp.abs(sim - ref_f32)))

    print("KERNEL_OK")
</pallas_src>

<mosaic_0001>
module attributes {stable_mosaic.version = 11 : i64} {
  func.func @siamese_kernel(%arg0: i32, %arg1: memref<1x1024x65xbf16, #tpu.memory_space<vmem>>, %arg2: memref<65x256xbf16, #tpu.memory_space<vmem>>, %arg3: memref<256x128xbf16, #tpu.memory_space<vmem>>, %arg4: memref<1x128xf32, #tpu.memory_space<vmem>>, %arg5: memref<128x64xbf16, #tpu.memory_space<vmem>>, %arg6: memref<1x64xf32, #tpu.memory_space<vmem>>, %arg7: memref<64x32xbf16, #tpu.memory_space<vmem>>, %arg8: memref<1x32xf32, #tpu.memory_space<vmem>>, %arg9: memref<1x512xf32, #tpu.memory_space<vmem>>) attributes {dimension_semantics = [#tpu.dimension_semantics<parallel>], iteration_bounds = array<i64: 2>, scalar_prefetch = 0 : i64, scratch_operands = 0 : i64, tpu.core_type = #tpu.core_type<tc>, window_params = [{transform_indices = @transform_0, window_bounds = array<i64: 1, 1024, 65>}, {pipeline_mode = #tpu.pipeline_mode<synchronous>, transform_indices = @transform_1, window_bounds = array<i64: 65, 256>}, {pipeline_mode = #tpu.pipeline_mode<synchronous>, transform_indices = @transform_2, window_bounds = array<i64: 256, 128>}, {pipeline_mode = #tpu.pipeline_mode<synchronous>, transform_indices = @transform_3, window_bounds = array<i64: 1, 128>}, {pipeline_mode = #tpu.pipeline_mode<synchronous>, transform_indices = @transform_4, window_bounds = array<i64: 128, 64>}, {pipeline_mode = #tpu.pipeline_mode<synchronous>, transform_indices = @transform_5, window_bounds = array<i64: 1, 64>}, {pipeline_mode = #tpu.pipeline_mode<synchronous>, transform_indices = @transform_6, window_bounds = array<i64: 64, 32>}, {pipeline_mode = #tpu.pipeline_mode<synchronous>, transform_indices = @transform_7, window_bounds = array<i64: 1, 32>}, {transform_indices = @transform_8, window_bounds = array<i64: 1, 512>}]} {
    %c0 = arith.constant 0 : index
    %c0_0 = arith.constant 0 : index
    %c0_1 = arith.constant 0 : index
    %0 = vector.load %arg1[%c0, %c0_0, %c0_1] : memref<1x1024x65xbf16, #tpu.memory_space<vmem>>, vector<1x1024x65xbf16>
    %1 = vector.shape_cast %0 : vector<1x1024x65xbf16> to vector<1024x65xbf16>
    %c0_2 = arith.constant 0 : index
    %c0_3 = arith.constant 0 : index
    %2 = vector.load %arg2[%c0_2, %c0_3] : memref<65x256xbf16, #tpu.memory_space<vmem>>, vector<65x256xbf16>
    %cst = arith.constant dense<0.000000e+00> : vector<1024x256xf32>
    %3 = tpu.matmul %1, %2, %cst {dimension_numbers = #tpu.dot_dimension_numbers<[1], [0], [0], [1], [0, 0, 1, 1], [], []>} : vector<1024x65xbf16>, vector<65x256xbf16>, vector<1024x256xf32> -> vector<1024x256xf32>
    %cst_4 = arith.constant 0.000000e+00 : f32
    %4 = vector.broadcast %cst_4 : f32 to vector<1024x256xf32>
    %5 = arith.maximumf %3, %4 : vector<1024x256xf32>
    %6 = arith.truncf %5 : vector<1024x256xf32> to vector<1024x256xbf16>
    %c0_5 = arith.constant 0 : index
    %c0_6 = arith.constant 0 : index
    %7 = vector.load %arg3[%c0_5, %c0_6] : memref<256x128xbf16, #tpu.memory_space<vmem>>, vector<256x128xbf16>
    %cst_7 = arith.constant dense<0.000000e+00> : vector<1024x128xf32>
    %8 = tpu.matmul %6, %7, %cst_7 {dimension_numbers = #tpu.dot_dimension_numbers<[1], [0], [0], [1], [0, 0, 1, 1], [], []>} : vector<1024x256xbf16>, vector<256x128xbf16>, vector<1024x128xf32> -> vector<1024x128xf32>
    %c0_8 = arith.constant 0 : index
    %c0_9 = arith.constant 0 : index
    %9 = vector.load %arg4[%c0_8, %c0_9] : memref<1x128xf32, #tpu.memory_space<vmem>>, vector<1x128xf32>
    %10 = vector.broadcast %9 : vector<1x128xf32> to vector<1024x128xf32>
    %11 = arith.addf %8, %10 : vector<1024x128xf32>
    %cst_10 = arith.constant 0.000000e+00 : f32
    %12 = vector.broadcast %cst_10 : f32 to vector<1024x128xf32>
    %13 = arith.maximumf %11, %12 : vector<1024x128xf32>
    %14 = arith.truncf %13 : vector<1024x128xf32> to vector<1024x128xbf16>
    %c0_11 = arith.constant 0 : index
    %c0_12 = arith.constant 0 : index
    %15 = vector.load %arg5[%c0_11, %c0_12] : memref<128x64xbf16, #tpu.memory_space<vmem>>, vector<128x64xbf16>
    %cst_13 = arith.constant dense<0.000000e+00> : vector<1024x64xf32>
    %16 = tpu.matmul %14, %15, %cst_13 {dimension_numbers = #tpu.dot_dimension_numbers<[1], [0], [0], [1], [0, 0, 1, 1], [], []>} : vector<1024x128xbf16>, vector<128x64xbf16>, vector<1024x64xf32> -> vector<1024x64xf32>
    %c0_14 = arith.constant 0 : index
    %c0_15 = arith.constant 0 : index
    %17 = vector.load %arg6[%c0_14, %c0_15] : memref<1x64xf32, #tpu.memory_space<vmem>>, vector<1x64xf32>
    %18 = vector.broadcast %17 : vector<1x64xf32> to vector<1024x64xf32>
    %19 = arith.addf %16, %18 : vector<1024x64xf32>
    %cst_16 = arith.constant 0.000000e+00 : f32
    %20 = vector.broadcast %cst_16 : f32 to vector<1024x64xf32>
    %21 = arith.maximumf %19, %20 : vector<1024x64xf32>
    %22 = arith.truncf %21 : vector<1024x64xf32> to vector<1024x64xbf16>
    %c0_17 = arith.constant 0 : index
    %c0_18 = arith.constant 0 : index
    %23 = vector.load %arg7[%c0_17, %c0_18] : memref<64x32xbf16, #tpu.memory_space<vmem>>, vector<64x32xbf16>
    %cst_19 = arith.constant dense<0.000000e+00> : vector<1024x32xf32>
    %24 = tpu.matmul %22, %23, %cst_19 {dimension_numbers = #tpu.dot_dimension_numbers<[1], [0], [0], [1], [0, 0, 1, 1], [], []>} : vector<1024x64xbf16>, vector<64x32xbf16>, vector<1024x32xf32> -> vector<1024x32xf32>
    %c0_20 = arith.constant 0 : index
    %c0_21 = arith.constant 0 : index
    %25 = vector.load %arg8[%c0_20, %c0_21] : memref<1x32xf32, #tpu.memory_space<vmem>>, vector<1x32xf32>
    %26 = vector.broadcast %25 : vector<1x32xf32> to vector<1024x32xf32>
    %27 = arith.addf %24, %26 : vector<1024x32xf32>
    %28 = vector.extract_strided_slice %27 {offsets = [0, 0], sizes = [512, 32], strides = [1, 1]} : vector<1024x32xf32> to vector<512x32xf32>
    %29 = vector.extract_strided_slice %27 {offsets = [512, 0], sizes = [512, 32], strides = [1, 1]} : vector<1024x32xf32> to vector<512x32xf32>
    %30 = arith.mulf %28, %29 : vector<512x32xf32>
    %cst_22 = arith.constant dense<0.000000e+00> : vector<512xf32>
    %31 = vector.multi_reduction <add>, %30, %cst_22 [1] : vector<512x32xf32> to vector<512xf32>
    %32 = arith.mulf %28, %28 : vector<512x32xf32>
    %cst_23 = arith.constant dense<0.000000e+00> : vector<512xf32>
    %33 = vector.multi_reduction <add>, %32, %cst_23 [1] : vector<512x32xf32> to vector<512xf32>
    %34 = arith.mulf %29, %29 : vector<512x32xf32>
    %cst_24 = arith.constant dense<0.000000e+00> : vector<512xf32>
    %35 = vector.multi_reduction <add>, %34, %cst_24 [1] : vector<512x32xf32> to vector<512xf32>
    %cst_25 = arith.constant 1.000000e-16 : f32
    %36 = vector.broadcast %cst_25 : f32 to vector<512xf32>
    %37 = arith.maximumf %33, %36 : vector<512xf32>
    %cst_26 = arith.constant 1.000000e-16 : f32
    %38 = vector.broadcast %cst_26 : f32 to vector<512xf32>
    %39 = arith.maximumf %35, %38 : vector<512xf32>
    %40 = arith.mulf %37, %39 : vector<512xf32>
    %41 = math.rsqrt %40 : vector<512xf32>
    %42 = arith.mulf %31, %41 : vector<512xf32>
    %43 = vector.shape_cast %42 : vector<512xf32> to vector<1x512xf32>
    %c0_27 = arith.constant 0 : index
    %c0_28 = arith.constant 0 : index
    %44 = vector.load %arg9[%c0_27, %c0_28] : memref<1x512xf32, #tpu.memory_space<vmem>>, vector<1x512xf32>
    tpu.vector_store %arg9[%c0_27, %c0_28], %43 {strides = array<i32>} : memref<1x512xf32, #tpu.memory_space<vmem>>, vector<1x512xf32>,
    return
  }
  func.func @transform_0(%arg0: i32) -> (i32, i32, i32) {
    %c0_i32 = arith.constant 0 : i32
    %c0_i32_0 = arith.constant 0 : i32
    %c0_i32_1 = arith.constant 0 : i32
    return %arg0, %c0_i32, %c0_i32_0 : i32, i32, i32
  }
  func.func @transform_1(%arg0: i32) -> (i32, i32) {
    %c0_i32 = arith.constant 0 : i32
    %c0_i32_0 = arith.constant 0 : i32
    %c0_i32_1 = arith.constant 0 : i32
    return %c0_i32, %c0_i32_0 : i32, i32
  }
  func.func @transform_2(%arg0: i32) -> (i32, i32) {
    %c0_i32 = arith.constant 0 : i32
    %c0_i32_0 = arith.constant 0 : i32
    %c0_i32_1 = arith.constant 0 : i32
    return %c0_i32, %c0_i32_0 : i32, i32
  }
  func.func @transform_3(%arg0: i32) -> (i32, i32) {
    %c0_i32 = arith.constant 0 : i32
    %c0_i32_0 = arith.constant 0 : i32
    %c0_i32_1 = arith.constant 0 : i32
    return %c0_i32, %c0_i32_0 : i32, i32
  }
  func.func @transform_4(%arg0: i32) -> (i32, i32) {
    %c0_i32 = arith.constant 0 : i32
    %c0_i32_0 = arith.constant 0 : i32
    %c0_i32_1 = arith.constant 0 : i32
    return %c0_i32, %c0_i32_0 : i32, i32
  }
  func.func @transform_5(%arg0: i32) -> (i32, i32) {
    %c0_i32 = arith.constant 0 : i32
    %c0_i32_0 = arith.constant 0 : i32
    %c0_i32_1 = arith.constant 0 : i32
    return %c0_i32, %c0_i32_0 : i32, i32
  }
  func.func @transform_6(%arg0: i32) -> (i32, i32) {
    %c0_i32 = arith.constant 0 : i32
    %c0_i32_0 = arith.constant 0 : i32
    %c0_i32_1 = arith.constant 0 : i32
    return %c0_i32, %c0_i32_0 : i32, i32
  }
  func.func @transform_7(%arg0: i32) -> (i32, i32) {
    %c0_i32 = arith.constant 0 : i32
    %c0_i32_0 = arith.constant 0 : i32
    %c0_i32_1 = arith.constant 0 : i32
    return %c0_i32, %c0_i32_0 : i32, i32
  }
  func.func @transform_8(%arg0: i32) -> (i32, i32) {
    %c0_i32 = arith.constant 0 : i32
    %c0_i32_0 = arith.constant 0 : i32
    return %c0_i32, %arg0 : i32, i32
  }
}

</mosaic_0001>

<bundles_post_ra>
// kernel: tpu_custom_call.1
= control target key start
LH: loop header
LB: loop body
LE: loop exit
PB: predicated region body
PF: predicated region fallthrough
CT: control target
= control target key end

     0   :  { %13 = vsyncpa [#allocation3], 0  ;;  %s11701_s0 = inlined_call_operand.vmem [shape: bf16[2,1024,65], index: 0, kind: input, shape index: {}]   ;;  %s11702_s1 = inlined_call_operand.vmem [shape: bf16[65,256], index: 1, kind: input, shape index: {}]   ;;  %s11703_s2 = inlined_call_operand.vmem [shape: bf16[256,128], index: 2, kind: input, shape index: {}]   ;;  %s11704_s3 = inlined_call_operand.vmem [shape: f32[1,128], index: 3, kind: input, shape index: {}]   ;;  %s11705_s4 = inlined_call_operand.vmem [shape: bf16[128,64], index: 4, kind: input, shape index: {}]   ;;  %s11706_s5 = inlined_call_operand.vmem [shape: f32[1,64], index: 5, kind: input, shape index: {}]   ;;  %s11707_s6 = inlined_call_operand.vmem [shape: bf16[64,32], index: 6, kind: input, shape index: {}]   ;;  %s11708_s7 = inlined_call_operand.vmem [shape: f32[1,32], index: 7, kind: input, shape index: {}]   ;;  %s11709_s8 = inlined_call_operand.hbm [shape: f32[1,1024], index: 8, kind: output, shape index: {}]  }
   0x1   :  { %15 = vsyncpa [#allocation3 + $0x1], 0  ;;  %s8465_s27 = smov 0   ;;  %s8467_s28 = smov 0  }
   0x2   :  { %s8469_s29 = smov 0   ;;  %s8471_s30 = smov 0  }
   0x3 LB: > { %s8486_s9 = sadd.s32 4294967295, %s8417_s30   ;;  %s7442_s10 = sadd.s32 4294967294, %s8417_s30   ;;  %s8417_s30 = sphi %s8471_s30, %s12047_s30   ;;  %s8413_s29 = sphi %s8469_s29, %s12046_s29   ;;  %s8409_s28 = sphi %s8467_s28, %s12045_s28   ;;  %s8405_s27 = sphi %s8465_s27, %s12044_s27  }
   0x4   : > { %s8490_s11 = sadd.s32 1, %s8417_s30   ;;  %s201_s12 = sadd.s32 1, %s8413_s29 }
   0x5   : > { %s198_s13 = ssub.s32 %s8417_s30, %s8490_s11  ;;  %p211_p0 = scmp.ne.s32.totalorder %s8413_s29, %s8409_s28 }
   0x6   : > { %p199_p1 = scmp.eq.s32.totalorder %s198_s13, 0  ;;  %p212_p2 = scmp.eq.s32.totalorder %s8486_s9, 1 }
   0x7   : > { %p217_p3 = scmp.ne.s32.totalorder %s8409_s28, %s8405_s27  ;;  %p218_p4 = scmp.eq.s32.totalorder %s7442_s10, 1 }
   0x8   : > { %s8501_s14 = scalar_select %p199_p1, %s8413_s29, %s201_s12  }
   0x9   : > { %p8503_p5 = por %p212_p2, %p211_p0  ;;  %p8507_p6 = por %p218_p4, %p217_p3 }
   0xa   : > { %p7445_p7 = scmp.ge.s32.totalorder %s8417_s30, 1  ;;  %p265_p8 = scmp.lt.s32.totalorder %s8417_s30, 3 }
   0xc   : > { %p266_p9 = pnand %p7445_p7, %p265_p8 }
   0xe   : > { %269 = sbr.rel (%p266_p9) target bundleno = 3077 (0xc05), region = 52 }
  0x13   : > { %v442_v0 = vld [vmem:[%s11702_s1 + $0x40] sm:$0x11]  ;;  %vm11749_vm0 = vcmask 1040384   ;;  %v8419_v3 = vmov 0   ;;  %v7731_v7 = vld [vmem:[%s11702_s1 + $0x30] sm:$0xf] }
  0x14   : > { %v788_v1 = vunpack.c.l.b16 %v442_v0  ;;  %v789_v2 = vunpack.c.h.b16 %v442_v0  ;;  %8204 = vset.pattern.permute.xlu0 %v8419_v3  ;;  %8205 = vset.pattern.permute.xlu1 %v8419_v3  ;;  %v1003_v4 = vsel %vm11749_vm0, 65535, %v8419_v3  ;;  %v8117_v8 = vld [vmem:[%s11702_s1 + $0x34] sm:$0xf0]  ;;  %v8116_v9 = vld [vmem:[%s11702_s1 + $0x34] sm:$0xf]  ;;  %p299_p10 = scmp.lt.s32.totalorder %s8486_s9, 1 }
  0x15   : > { %8206 = vset.pattern.permute.xlu2 %v8419_v3  ;;  %v7733_v10 = vld [vmem:[%s11702_s1 + $0x38] sm:$0xf0]  ;;  %v7723_v13 = vld [vmem:[%s11702_s1 + $0x20] sm:$0xf]  ;;  %v7732_v14 = vor.u32 %v8117_v8, %v7731_v7  ;;  %v8115_v16 = vld [vmem:[%s11702_s1 + $0x24] sm:$0xf0] }
  0x16   : > { %v798_v5 = vpack.c.b16 %v788_v1, %v788_v1  ;;  %v799_v6 = vpack.c.b16 %v789_v2, %v789_v2  ;;  %v7736_v15 = vor.u32 %v8116_v9, %v7733_v10  ;;  %v8114_v17 = vld [vmem:[%s11702_s1 + $0x24] sm:$0xf]  ;;  %v7725_v18 = vld [vmem:[%s11702_s1 + $0x28] sm:$0xf0]  ;;  %v7724_v19 = vor.u32 %v8115_v16, %v7723_v13  ;;  %v7715_v21 = vld [vmem:[%s11702_s1 + $0x10] sm:$0xf] }
  0x17   : > { %v7728_v20 = vor.u32 %v8114_v17, %v7725_v18  ;;  %v8113_v22 = vld [vmem:[%s11702_s1 + $0x14] sm:$0xf0]  ;;  %v8112_v23 = vld [vmem:[%s11702_s1 + $0x14] sm:$0xf]  ;;  %v7717_v24 = vld [vmem:[%s11702_s1 + $0x18] sm:$0xf0] }
  0x18   : > { %v1005_v11 = vand.u32 %v1003_v4, %v798_v5  ;;  %v1008_v12 = vand.u32 %v1003_v4, %v799_v6  ;;  %s300_s17 = scalar_select %p299_p10, %s8486_s9, 1  ;;  %v7716_v25 = vor.u32 %v8113_v22, %v7715_v21  ;;  %v7720_v26 = vor.u32 %v8112_v23, %v7717_v24  ;;  %v7707_v27 = vld [vmem:[%s11702_s1] sm:$0xf]  ;;  %v8111_v28 = vld [vmem:[%s11702_s1 + $0x4] sm:$0xf0]  ;;  %v8133_v33 = vld [vmem:[%s11703_s2 + $0x78] sm:$0xff] }
  0x19   : > { %v8110_v29 = vld [vmem:[%s11702_s1 + $0x4] sm:$0xf]  ;;  %v7709_v30 = vld [vmem:[%s11702_s1 + $0x8] sm:$0xf0]  ;;  %v7708_v31 = vor.u32 %v8111_v28, %v7707_v27  ;;  %v8125_v34 = vld [vmem:[%s11703_s2 + $0x38] sm:$0xff]  ;;  %vm808_vm1 = vcmask 531456  }
  0x1a   : > { %8146 = vmatpush.bf16.msra.mxu2 %v1005_v11  ;;  %8151 = vmatpush.bf16.msra.mxu3 %v1008_v12  ;;  %s8045_s26 = sshll.u32 %s300_s17, 9  ;;  %v7712_v32 = vor.u32 %v8110_v29, %v7709_v30  ;;  %v8132_v39 = vld [vmem:[%s11703_s2 + $0x70] sm:$0xff]  ;;  %v8131_v46 = vld [vmem:[%s11703_s2 + $0x68] sm:$0xff]  ;;  %v8617_v47 = vld [vmem:[%s11705_s4 + $0x38] sm:$0xff]  ;;  %vm3659_vm2 = vcmask 523264   ;;  %vm4245_vm3 = vcmask 261120  }
  0x1b   : > { %1013 = vmatpush.bf16.msra.mxu0 %v1005_v11  ;;  %1342 = vmatpush.bf16.msra.mxu1 %v1008_v12  ;;  %s8572_s13 = scalar_lea.vmem %s11701_s0, %s8045_s26  ;;  %v8124_v40 = vld [vmem:[%s11703_s2 + $0x30] sm:$0xff]  ;;  %v8123_v49 = vld [vmem:[%s11703_s2 + $0x28] sm:$0xff]  ;;  %v8130_v13 = vld [vmem:[%s11703_s2 + $0x60] sm:$0xff]  ;;  %s296_s23 = sand.u32 1, %s8409_s28  }
  0x1c   : > { %v8079_v35 = vld [vmem:[%s8572_s13 + $0x108] sm:$0xff]  ;;  %v8078_v36 = vld [vmem:[%s8572_s13 + $0x100] sm:$0xff]  ;;  %v8080_v37 = vld [vmem:[%s8572_s13 + $0x110] sm:$0xff]  ;;  %s7446_s24 = sshll.u32 %s296_s23, 2  ;;  %s8042_s25 = sshll.u32 %s8486_s9, 2 }
  0x1d   : > { %v8081_v38 = vld [vmem:[%s8572_s13 + $0x118] sm:$0xff]  ;;  %v8082_v41 = vld [vmem:[%s8572_s13 + $0x120] sm:$0xff]  ;;  %v8083_v42 = vld [vmem:[%s8572_s13 + $0x128] sm:$0xff]  ;;  %s7378_s12 = scalar_lea.hbm %s11709_s8, %s8042_s25  ;;  %s298_s9 = scalar_lea.vmem [#allocation2], %s7446_s24 }
  0x1e   : > { %8147 = vmatpush.bf16.msra.mxu2 %v7732_v14  ;;  %8152 = vmatpush.bf16.msra.mxu3 %v7736_v15  ;;  %v8084_v43 = vld [vmem:[%s8572_s13 + $0x130] sm:$0xff]  ;;  %v8046_v44 = vld [vmem:[%s8572_s13] sm:$0xff]  ;;  %v8085_v45 = vld [vmem:[%s8572_s13 + $0x138] sm:$0xff]  ;;  %s7380_s18 = sshll.u32 %s298_s9, 4  ;;  %s7382_s19 = sshll.u32 %s7378_s12, 4  ;;  %s7381_s18 = int_to_ptr.vmem [resolvable:$true] %s7380_s18  ;;  %s7383_s19 = int_to_ptr.hbm [resolvable:$true] %s7382_s19 }
  0x1f   : > { %1014 = vmatpush.bf16.msra.mxu0 %v7732_v14  ;;  %1343 = vmatpush.bf16.msra.mxu1 %v7736_v15  ;;  %v8047_v48 = vld [vmem:[%s8572_s13 + $0x8] sm:$0xff]  ;;  %v8086_v50 = vld [vmem:[%s8572_s13 + $0x140] sm:$0xff]  ;;  %v8048_v51 = vld [vmem:[%s8572_s13 + $0x10] sm:$0xff]  ;;  %s7368_s20 = scalar_lea.sflag [#allocation3], %s296_s23  ;;  %s8369_s17 = sshra.s32 %s7383_s19, 4  ;;  %s8370_s17 = int_to_ptr.hbm [resolvable:$true] %s8369_s17 }
  0x20   : > { %v8087_v52 = vld [vmem:[%s8572_s13 + $0x148] sm:$0xff]  ;;  %v8049_v55 = vld [vmem:[%s8572_s13 + $0x18] sm:$0xff]  ;;  %v8088_v62 = vld [vmem:[%s8572_s13 + $0x150] sm:$0xff]  ;;  %s8371_s21 = scalar_lea.hbm %s8370_s17, 4  ;;  %s8375_s24 = scalar_lea.hbm %s11709_s8, 8 }
  0x21   : > { %v8050_v3 = vld [vmem:[%s8572_s13 + $0x20] sm:$0xff]  ;;  %v8089_v10 = vld [vmem:[%s8572_s13 + $0x158] sm:$0xff]  ;;  %v8661_v16 = vld [vmem:[%s11705_s4 + $0x30] sm:$0xff]  ;;  %p8372_p11 = scmp.ne.s32.totalorder %s8370_s17, %s8371_s21  ;;  %p8376_p0 = scmp.lt.s32.totalorder %s8370_s17, %s11709_s8 }
  0x22   : > { %8148 = vmatpush.bf16.msra.mxu2 %v7724_v19  ;;  %8153 = vmatpush.bf16.msra.mxu3 %v7728_v20  ;;  %v8122_v17 = vld [vmem:[%s11703_s2 + $0x20] sm:$0xff]  ;;  %v8051_v18 = vld [vmem:[%s8572_s13 + $0x28] sm:$0xff]  ;;  %v8052_v30 = vld [vmem:[%s8572_s13 + $0x30] sm:$0xff]  ;;  %p8377_p1 = scmp.lt.s32.totalorder %s8375_s24, %s8371_s21 }
  0x23   : > { %1015 = vmatpush.bf16.msra.mxu0 %v7724_v19  ;;  %1344 = vmatpush.bf16.msra.mxu1 %v7728_v20  ;;  %p8373_p12 = pnand %p8372_p11, %p8503_p5 }
  0x24   : > { %p8378_p2 = por %p8377_p1, %p8376_p0 }
  0x25   : > { %p8374_p13 = pneg %p8373_p12 }
  0x26   : > { %8149 = vmatpush.bf16.msra.mxu2 %v7716_v25  ;;  %8154 = vmatpush.bf16.msra.mxu3 %v7720_v26 }
  0x27   : > { %1016 = vmatpush.bf16.msra.mxu0 %v7716_v25  ;;  %1345 = vmatpush.bf16.msra.mxu1 %v7720_v26  ;;  %v8090_v25 = vld [vmem:[%s8572_s13 + $0x160] sm:$0xff]  ;;  %p8379_p3 = pnand %p8378_p2, %p8374_p13 }
  0x2a   : > { %8150 = vmatpush.bf16.msra.mxu2 %v7708_v31  ;;  %8155 = vmatpush.bf16.msra.mxu3 %v7712_v32 }
  0x2b   : > { %1017 = vmatpush.bf16.msra.mxu0 %v7708_v31  ;;  %1346 = vmatpush.bf16.msra.mxu1 %v7712_v32 }
  0x2d   : > { %7770 = vmatmul.msk.bf16.vlgmr.msra.gmra.mxu2 %vm808_vm1, %v8079_v35  ;;  %7833 = vmatmul.msk.bf16.vlgmr.msra.gmra.mxu3 %vm808_vm1, %v8078_v36 }
  0x2e   : > { %2513 = vmatpush.bf16.msrb.mxu3 %v8133_v33  ;;  %2184 = vmatpush.bf16.msrb.mxu2 %v8125_v34 }
  0x2f   : > { %7737 = vmatmul.msk.bf16.vlgmr.msra.gmra.mxu0 %vm808_vm1, %v8046_v44  ;;  %7801 = vmatmul.msk.bf16.vlgmr.msra.gmra.mxu1 %vm808_vm1, %v8046_v44 }
  0x30   : > { %3102 = vmatpush.bf16.msrb.mxu0 %v8617_v47 }
  0x32   : > { %2514 = vmatpush.bf16.msrb.mxu3 %v8132_v39  ;;  %2185 = vmatpush.bf16.msrb.mxu2 %v8124_v40 }
  0x34   : > { %3103 = vmatpush.bf16.msrb.mxu0 %v8661_v16 }
  0x36   : > { %2515 = vmatpush.bf16.msrb.mxu3 %v8131_v46  ;;  %2186 = vmatpush.bf16.msrb.mxu2 %v8123_v49 }
  0x3a   : > { %2516 = vmatpush.bf16.msrb.mxu3 %v8130_v13  ;;  %2187 = vmatpush.bf16.msrb.mxu2 %v8122_v17  ;;  %v8121_v13 = vld [vmem:[%s11703_s2 + $0x18] sm:$0xff] }
  0x3d   : > { %7771 = vmatmul.msk.bf16.gmra.mxu2 %vm808_vm1, %v8080_v37  ;;  %7834 = vmatmul.msk.bf16.gmra.mxu3 %vm808_vm1, %v8079_v35 }
  0x3e   : > { %2188 = vmatpush.bf16.msrb.mxu2 %v8121_v13 }
  0x3f   : > { %7738 = vmatmul.msk.bf16.gmra.mxu0 %vm808_vm1, %v8047_v48  ;;  %7802 = vmatmul.msk.bf16.gmra.mxu1 %vm808_vm1, %v8047_v48 }
  0x4d   : > { %7772 = vmatmul.msk.bf16.gmra.mxu2 %vm808_vm1, %v8081_v38  ;;  %7835 = vmatmul.msk.bf16.gmra.mxu3 %vm808_vm1, %v8080_v37  ;;  %v8091_v37 = vld [vmem:[%s8572_s13 + $0x168] sm:$0xff] }
  0x4f   : > { %7739 = vmatmul.msk.bf16.gmra.mxu0 %vm808_vm1, %v8048_v51  ;;  %7803 = vmatmul.msk.bf16.gmra.mxu1 %vm808_vm1, %v8048_v51 }
  0x5d   : > { %7773 = vmatmul.msk.bf16.gmra.mxu2 %vm808_vm1, %v8082_v41  ;;  %7836 = vmatmul.msk.bf16.gmra.mxu3 %vm808_vm1, %v8081_v38 }
  0x5f   : > { %7740 = vmatmul.msk.bf16.gmra.mxu0 %vm808_vm1, %v8049_v55  ;;  %7804 = vmatmul.msk.bf16.gmra.mxu1 %vm808_vm1, %v8049_v55 }
  0x6d   : > { %7774 = vmatmul.msk.bf16.gmra.mxu2 %vm808_vm1, %v8083_v42  ;;  %7837 = vmatmul.msk.bf16.gmra.mxu3 %vm808_vm1, %v8082_v41 }
  0x6f   : > { %7741 = vmatmul.msk.bf16.gmra.mxu0 %vm808_vm1, %v8050_v3  ;;  %7805 = vmatmul.msk.bf16.gmra.mxu1 %vm808_vm1, %v8050_v3 }
  0x7d   : > { %7775 = vmatmul.msk.bf16.gmra.mxu2 %vm808_vm1, %v8084_v43  ;;  %7838 = vmatmul.msk.bf16.gmra.mxu3 %vm808_vm1, %v8083_v42  ;;  %v8053_v42 = vld [vmem:[%s8572_s13 + $0x38] sm:$0xff] }
  0x7f   : > { %7742 = vmatmul.msk.bf16.gmra.mxu0 %vm808_vm1, %v8051_v18  ;;  %7806 = vmatmul.msk.bf16.gmra.mxu1 %vm808_vm1, %v8051_v18 }
  0x8d   : > { %7776 = vmatmul.msk.bf16.gmra.mxu2 %vm808_vm1, %v8085_v45  ;;  %7839 = vmatmul.msk.bf16.gmra.mxu3 %vm808_vm1, %v8084_v43 }
  0x8f   : > { %7743 = vmatmul.msk.bf16.gmra.mxu0 %vm808_vm1, %v8052_v30  ;;  %7807 = vmatmul.msk.bf16.gmra.mxu1 %vm808_vm1, %v8052_v30 }
  0x9d   : > { %7777 = vmatmul.msk.bf16.gmra.mxu2 %vm808_vm1, %v8086_v50  ;;  %7840 = vmatmul.msk.bf16.gmra.mxu3 %vm808_vm1, %v8085_v45 }
  0x9f   : > { %7744 = vmatmul.msk.bf16.gmra.mxu0 %vm808_vm1, %v8053_v42  ;;  %7808 = vmatmul.msk.bf16.gmra.mxu1 %vm808_vm1, %v8053_v42 }
  0xac   : > { %v1019_v55 = vpop.f32.mrf.mxu0 }
  0xad   : > { %7778 = vmatmul.msk.bf16.gmra.mxu2 %vm808_vm1, %v8087_v52  ;;  %7841 = vmatmul.msk.bf16.gmra.mxu3 %vm808_vm1, %v8086_v50  ;;  %v8092_v50 = vld [vmem:[%s8572_s13 + $0x170] sm:$0xff] }
  0xb0   : > { %v1184_v53 = vpop.f32.mrf.mxu2  ;;  %v1508_v54 = vpop.f32.mrf.mxu3 }
  0xb1   : > { %v1800_v56 = vmax.f32 %v1184_v53, 0.0  ;;  %v1797_v59 = vmax.f32 %v1508_v54, 0.0 }
  0xb8   : > { %v1186_v57 = vpop.f32.mrf.mxu2  ;;  %v1510_v58 = vpop.f32.mrf.mxu3 }
  0xb9   : > { %v1802_v60 = vmax.f32 %v1186_v57, 0.0  ;;  %v1799_v61 = vmax.f32 %v1510_v58, 0.0 }
  0xbb   : > { %v8639_v63 = vpack.c.bf16 %v1802_v60, %v1800_v56  ;;  %v8641_v0 = vpack.c.bf16 %v1799_v61, %v1797_v59  ;;  %v8054_v56 = vld [vmem:[%s8572_s13 + $0x40] sm:$0xff] }
  0xbc   : > { %7745 = vmatmul.msk.bf16.gmra.mxu0 %vm808_vm1, %v8054_v56  ;;  %7809 = vmatmul.msk.bf16.gmra.mxu1 %vm808_vm1, %v8054_v56 }
  0xbd   : > { %7779 = vmatmul.msk.bf16.gmra.mxu2 %vm808_vm1, %v8088_v62  ;;  %7842 = vmatmul.msk.bf16.gmra.mxu3 %vm808_vm1, %v8087_v52 }
  0xc0   : > { %v1189_v1 = vpop.f32.mrf.mxu2  ;;  %v1513_v2 = vpop.f32.mrf.mxu3 }
  0xc1   : > { %v1804_v4 = vmax.f32 %v1189_v1, 0.0  ;;  %v1801_v7 = vmax.f32 %v1513_v2, 0.0  ;;  %v8093_v1 = vld [vmem:[%s8572_s13 + $0x178] sm:$0xff]  ;;  %v1668_v2 = vmax.f32 %v1019_v55, 0.0 }
  0xc8   : > { %v1191_v5 = vpop.f32.mrf.mxu2  ;;  %v1515_v6 = vpop.f32.mrf.mxu3 }
  0xc9   : > { %v1806_v8 = vmax.f32 %v1191_v5, 0.0  ;;  %v1803_v9 = vmax.f32 %v1515_v6, 0.0  ;;  %v1021_v5 = vpop.f32.mrf.mxu0 }
  0xca   : > { %v1670_v6 = vmax.f32 %v1021_v5, 0.0 }
  0xcb   : > { %v8649_v11 = vpack.c.bf16 %v1806_v8, %v1804_v4  ;;  %v8651_v12 = vpack.c.bf16 %v1803_v9, %v1801_v7  ;;  %v8129_v7 = vld [vmem:[%s11703_s2 + $0x58] sm:$0xff] }
  0xcc   : > { %v8710_v8 = vpack.c.bf16 %v1670_v6, %v1668_v2  ;;  %2517 = vmatpush.bf16.msrb.mxu3 %v8129_v7  ;;  %v8096_v6 = vld [vmem:[%s8572_s13 + $0x190] sm:$0xff] }
  0xcd   : > { %11757 = vst [vmem:[#allocation5_spill] sm:$0xff] %v8649_v11  ;;  %7780 = vmatmul.msk.bf16.gmra.mxu2 %vm808_vm1, %v8089_v10  ;;  %7843 = vmatmul.msk.bf16.gmra.mxu3 %vm808_vm1, %v8088_v62 }
  0xce   : > { %11758 = vst [vmem:[#allocation6_spill] sm:$0xff] %v8651_v12 }
  0xd0   : > { %v1194_v14 = vpop.f32.mrf.mxu2  ;;  %v1518_v15 = vpop.f32.mrf.mxu3 }
  0xd1   : > { %v1808_v19 = vmax.f32 %v1194_v14, 0.0  ;;  %v1805_v22 = vmax.f32 %v1518_v15, 0.0  ;;  %v8718_v14 = vld [vmem:[%s11705_s4 + $0x28] sm:$0xff]  ;;  %v1024_v17 = vpop.f32.mrf.mxu0 }
  0xd2   : > { %v8055_v15 = vld [vmem:[%s8572_s13 + $0x48] sm:$0xff]  ;;  %3104 = vmatpush.bf16.msrb.mxu0 %v8718_v14 }
  0xd3   : > { %7746 = vmatmul.msk.bf16.gmra.mxu0 %vm808_vm1, %v8055_v15  ;;  %7810 = vmatmul.msk.bf16.gmra.mxu1 %vm808_vm1, %v8055_v15 }
  0xd8   : > { %v1196_v20 = vpop.f32.mrf.mxu2  ;;  %v1520_v21 = vpop.f32.mrf.mxu3 }
  0xd9   : > { %v1810_v23 = vmax.f32 %v1196_v20, 0.0  ;;  %v1807_v24 = vmax.f32 %v1520_v21, 0.0  ;;  %v1026_v30 = vpop.f32.mrf.mxu0 }
  0xdb   : > { %v8671_v26 = vpack.c.bf16 %v1810_v23, %v1808_v19  ;;  %v8673_v27 = vpack.c.bf16 %v1807_v24, %v1805_v22  ;;  %v8094_v24 = vld [vmem:[%s8572_s13 + $0x180] sm:$0xff] }
  0xdd   : > { %11759 = vst [vmem:[#allocation7_spill] sm:$0xff] %v8671_v26  ;;  %7781 = vmatmul.msk.bf16.gmra.mxu2 %vm808_vm1, %v8090_v25  ;;  %7844 = vmatmul.msk.bf16.gmra.mxu3 %vm808_vm1, %v8089_v10 }
  0xde   : > { %11760 = vst [vmem:[#allocation8_spill] sm:$0xff] %v8673_v27 }
  0xe0   : > { %v1199_v28 = vpop.f32.mrf.mxu2  ;;  %v1523_v29 = vpop.f32.mrf.mxu3 }
  0xe1   : > { %v1812_v31 = vmax.f32 %v1199_v28, 0.0  ;;  %v1809_v34 = vmax.f32 %v1523_v29, 0.0 }
  0xe8   : > { %v1201_v32 = vpop.f32.mrf.mxu2  ;;  %v1525_v33 = vpop.f32.mrf.mxu3 }
  0xe9   : > { %v1814_v35 = vmax.f32 %v1201_v32, 0.0  ;;  %v1811_v36 = vmax.f32 %v1525_v33, 0.0 }
  0xeb   : > { %v8681_v38 = vpack.c.bf16 %v1814_v35, %v1812_v31  ;;  %v8683_v39 = vpack.c.bf16 %v1811_v36, %v1809_v34  ;;  %v1674_v31 = vmax.f32 %v1026_v30, 0.0  ;;  %v8056_v35 = vld [vmem:[%s8572_s13 + $0x50] sm:$0xff]  ;;  %v1029_v36 = vpop.f32.mrf.mxu0 }
  0xec   : > { %7747 = vmatmul.msk.bf16.gmra.mxu0 %vm808_vm1, %v8056_v35  ;;  %7811 = vmatmul.msk.bf16.gmra.mxu1 %vm808_vm1, %v8056_v35 }
  0xed   : > { %11761 = vst [vmem:[#allocation9_spill] sm:$0xff] %v8681_v38  ;;  %7782 = vmatmul.msk.bf16.gmra.mxu2 %vm808_vm1, %v8091_v37  ;;  %7845 = vmatmul.msk.bf16.gmra.mxu3 %vm808_vm1, %v8090_v25  ;;  %v1672_v25 = vmax.f32 %v1024_v17, 0.0 }
  0xee   : > { %11762 = vst [vmem:[#allocation10_spill] sm:$0xff] %v8683_v39 }
  0xef   : > { %v8731_v32 = vpack.c.bf16 %v1674_v31, %v1672_v25 }
  0xf0   : > { %v1204_v40 = vpop.f32.mrf.mxu2  ;;  %v1528_v41 = vpop.f32.mrf.mxu3 }
  0xf1   : > { %v1816_v43 = vmax.f32 %v1204_v40, 0.0  ;;  %v1813_v46 = vmax.f32 %v1528_v41, 0.0 }
  0xf8   : > { %v1206_v44 = vpop.f32.mrf.mxu2  ;;  %v1530_v45 = vpop.f32.mrf.mxu3 }
  0xf9   : > { %v1818_v48 = vmax.f32 %v1206_v44, 0.0  ;;  %v1815_v49 = vmax.f32 %v1530_v45, 0.0  ;;  %v8095_v45 = vld [vmem:[%s8572_s13 + $0x188] sm:$0xff] }
  0xfb   : > { %v8691_v51 = vpack.c.bf16 %v1818_v48, %v1816_v43  ;;  %v8693_v52 = vpack.c.bf16 %v1815_v49, %v1813_v46  ;;  %v1676_v46 = vmax.f32 %v1029_v36, 0.0 }
  0xfd   : > { %11763 = vst [vmem:[#allocation11_spill] sm:$0xff] %v8691_v51  ;;  %7783 = vmatmul.msk.bf16.gmra.mxu2 %vm808_vm1, %v8092_v50  ;;  %7846 = vmatmul.msk.bf16.gmra.mxu3 %vm808_vm1, %v8091_v37 }
  0xfe   : > { %11764 = vst [vmem:[#allocation12_spill] sm:$0xff] %v8693_v52 }
 0x100   : > { %v1209_v53 = vpop.f32.mrf.mxu2  ;;  %v1533_v54 = vpop.f32.mrf.mxu3 }
 0x101   : > { %v1820_v57 = vmax.f32 %v1209_v53, 0.0  ;;  %v1817_v60 = vmax.f32 %v1533_v54, 0.0  ;;  %v1031_v53 = vpop.f32.mrf.mxu0 }
 0x102   : > { %v1678_v54 = vmax.f32 %v1031_v53, 0.0 }
 0x104   : > { %v8746_v55 = vpack.c.bf16 %v1678_v54, %v1676_v46  ;;  %v8783_v46 = vld [vmem:[%s11705_s4 + $0x20] sm:$0xff] }
 0x105   : > { %3105 = vmatpush.bf16.msrb.mxu0 %v8783_v46 }
 0x108   : > { %v1211_v58 = vpop.f32.mrf.mxu2  ;;  %v1535_v59 = vpop.f32.mrf.mxu3 }
 0x109   : > { %v1822_v61 = vmax.f32 %v1211_v58, 0.0  ;;  %v1819_v62 = vmax.f32 %v1535_v59, 0.0  ;;  %v8057_v58 = vld [vmem:[%s8572_s13 + $0x58] sm:$0xff]  ;;  %v1034_v59 = vpop.f32.mrf.mxu0 }
 0x10a   : > { %7748 = vmatmul.msk.bf16.gmra.mxu0 %vm808_vm1, %v8057_v58  ;;  %7812 = vmatmul.msk.bf16.gmra.mxu1 %vm808_vm1, %v8057_v58  ;;  %v1680_v7 = vmax.f32 %v1034_v59, 0.0 }
 0x10b   : > { %v8701_v3 = vpack.c.bf16 %v1822_v61, %v1820_v57  ;;  %v8703_v4 = vpack.c.bf16 %v1819_v62, %v1817_v60 }
 0x10d   : > { %11765 = vst [vmem:[#allocation13_spill] sm:$0xff] %v8701_v3  ;;  %7784 = vmatmul.msk.bf16.gmra.mxu2 %vm808_vm1, %v8093_v1  ;;  %7847 = vmatmul.msk.bf16.gmra.mxu3 %vm808_vm1, %v8092_v50  ;;  %v8145_v50 = vld [vmem:[%s11707_s6 + $0x18] sm:$0xff] }
 0x10e   : > { %11766 = vst [vmem:[#allocation14_spill] sm:$0xff] %v8703_v4  ;;  %3856 = vmatpush.bf16.msrb.mxu1 %v8145_v50  ;;  %v8786_v50 = vld [vmem:[%s8572_s13 + $0x68] sm:$0xff] }
 0x110   : > { %v1214_v9 = vpop.f32.mrf.mxu2  ;;  %v1538_v10 = vpop.f32.mrf.mxu3 }
 0x111   : > { %v1824_v18 = vmax.f32 %v1214_v9, 0.0  ;;  %v1821_v21 = vmax.f32 %v1538_v10, 0.0  ;;  %v1036_v13 = vpop.f32.mrf.mxu0 }
 0x112   : > { %v1682_v15 = vmax.f32 %v1036_v13, 0.0 }
 0x114   : > { %v8758_v17 = vpack.c.bf16 %v1682_v15, %v1680_v7 }
 0x118   : > { %v1216_v19 = vpop.f32.mrf.mxu2  ;;  %v1540_v20 = vpop.f32.mrf.mxu3 }
 0x119   : > { %v1826_v22 = vmax.f32 %v1216_v19, 0.0  ;;  %v1823_v23 = vmax.f32 %v1540_v20, 0.0  ;;  %v8761_v20 = vld [vmem:[%s8572_s13 + $0x60] sm:$0xff] }
 0x11a   : > { %7749 = vmatmul.msk.bf16.gmra.mxu0 %vm808_vm1, %v8761_v20 }
 0x11b   : > { %v8725_v28 = vpack.c.bf16 %v1826_v22, %v1824_v18  ;;  %v8727_v29 = vpack.c.bf16 %v1823_v23, %v1821_v21  ;;  %v1039_v21 = vpop.f32.mrf.mxu0 }
 0x11d   : > { %11767 = vst [vmem:[#allocation15_spill] sm:$0xff] %v8725_v28  ;;  %7785 = vmatmul.msk.bf16.gmra.mxu2 %vm808_vm1, %v8094_v24  ;;  %7848 = vmatmul.msk.bf16.gmra.mxu3 %vm808_vm1, %v8093_v1 }
 0x11e   : > { %11768 = vst [vmem:[#allocation16_spill] sm:$0xff] %v8727_v29 }
 0x120   : > { %v1219_v33 = vpop.f32.mrf.mxu2  ;;  %v1543_v34 = vpop.f32.mrf.mxu3 }
 0x121   : > { %v1828_v37 = vmax.f32 %v1219_v33, 0.0  ;;  %v1825_v42 = vmax.f32 %v1543_v34, 0.0  ;;  %v8097_v33 = vld [vmem:[%s8572_s13 + $0x198] sm:$0xff]  ;;  %v1684_v34 = vmax.f32 %v1039_v21, 0.0 }
 0x128   : > { %v1221_v40 = vpop.f32.mrf.mxu2  ;;  %v1545_v41 = vpop.f32.mrf.mxu3 }
 0x129   : > { %v1830_v43 = vmax.f32 %v1221_v40, 0.0  ;;  %v1827_v44 = vmax.f32 %v1545_v41, 0.0  ;;  %v8128_v41 = vld [vmem:[%s11703_s2 + $0x50] sm:$0xff] }
 0x12a   : > { %2518 = vmatpush.bf16.msrb.mxu3 %v8128_v41  ;;  %7750 = vmatmul.msk.bf16.gmra.mxu0 %vm808_vm1, %v8786_v50 }
 0x12b   : > { %v8737_v48 = vpack.c.bf16 %v1830_v43, %v1828_v37  ;;  %v8739_v49 = vpack.c.bf16 %v1827_v44, %v1825_v42  ;;  %v1041_v37 = vpop.f32.mrf.mxu0 }
 0x12c   : > { %v1686_v40 = vmax.f32 %v1041_v37, 0.0 }
 0x12d   : > { %11769 = vst [vmem:[#allocation17_spill] sm:$0xff] %v8737_v48  ;;  %7786 = vmatmul.msk.bf16.gmra.mxu2 %vm808_vm1, %v8095_v45  ;;  %7849 = vmatmul.msk.bf16.gmra.mxu3 %vm808_vm1, %v8094_v24 }
 0x12e   : > { %11770 = vst [vmem:[#allocation18_spill] sm:$0xff] %v8739_v49  ;;  %v8775_v42 = vpack.c.bf16 %v1686_v40, %v1684_v34 }
 0x130   : > { %v1224_v56 = vpop.f32.mrf.mxu2  ;;  %v1548_v57 = vpop.f32.mrf.mxu3 }
 0x131   : > { %v1832_v60 = vmax.f32 %v1224_v56, 0.0  ;;  %v1829_v1 = vmax.f32 %v1548_v57, 0.0 }
 0x133   : > { %v1044_v53 = vpop.f32.mrf.mxu0 }
 0x138   : > { %v1226_v61 = vpop.f32.mrf.mxu2  ;;  %v1550_v62 = vpop.f32.mrf.mxu3 }
 0x139   : > { %v1834_v2 = vmax.f32 %v1226_v61, 0.0  ;;  %v1831_v5 = vmax.f32 %v1550_v62, 0.0  ;;  %v8098_v61 = vld [vmem:[%s8572_s13 + $0x1a0] sm:$0xff]  ;;  %v1688_v62 = vmax.f32 %v1044_v53, 0.0  ;;  %v8815_v53 = vld [vmem:[%s8572_s13 + $0x78] sm:$0xff] }
 0x13b   : > { %v8752_v9 = vpack.c.bf16 %v1834_v2, %v1832_v60  ;;  %v8754_v10 = vpack.c.bf16 %v1831_v5, %v1829_v1  ;;  %v1046_v5 = vpop.f32.mrf.mxu0 }
 0x13d   : > { %11771 = vst [vmem:[#allocation19_spill] sm:$0xff] %v8752_v9  ;;  %7787 = vmatmul.msk.bf16.gmra.mxu2 %vm808_vm1, %v8096_v6  ;;  %7850 = vmatmul.msk.bf16.gmra.mxu3 %vm808_vm1, %v8095_v45  ;;  %v8120_v45 = vld [vmem:[%s11703_s2 + $0x10] sm:$0xff] }
 0x13e   : > { %11772 = vst [vmem:[#allocation20_spill] sm:$0xff] %v8754_v10  ;;  %2189 = vmatpush.bf16.msrb.mxu2 %v8120_v45 }
 0x140   : > { %v1229_v18 = vpop.f32.mrf.mxu2  ;;  %v1553_v19 = vpop.f32.mrf.mxu3 }
 0x141   : > { %v1836_v22 = vmax.f32 %v1229_v18, 0.0  ;;  %v1833_v25 = vmax.f32 %v1553_v19, 0.0  ;;  %v8801_v18 = vld [vmem:[%s8572_s13 + $0x70] sm:$0xff] }
 0x142   : > { %7751 = vmatmul.msk.bf16.gmra.mxu0 %vm808_vm1, %v8801_v18 }
 0x143   : > { %v1049_v19 = vpop.f32.mrf.mxu0 }
 0x144   : > { %v1692_v34 = vmax.f32 %v1049_v19, 0.0 }
 0x148   : > { %v1231_v23 = vpop.f32.mrf.mxu2  ;;  %v1555_v24 = vpop.f32.mrf.mxu3 }
 0x149   : > { %v1838_v30 = vmax.f32 %v1231_v23, 0.0  ;;  %v1835_v31 = vmax.f32 %v1555_v24, 0.0 }
 0x14b   : > { %v8766_v35 = vpack.c.bf16 %v1838_v30, %v1836_v22  ;;  %v8768_v36 = vpack.c.bf16 %v1835_v31, %v1833_v25  ;;  %v8099_v31 = vld [vmem:[%s8572_s13 + $0x1a8] sm:$0xff]  ;;  %v1051_v40 = vpop.f32.mrf.mxu0 }
 0x14c   : > { %v1694_v41 = vmax.f32 %v1051_v40, 0.0 }
 0x14d   : > { %11773 = vst [vmem:[#allocation21_spill] sm:$0xff] %v8766_v35  ;;  %7788 = vmatmul.msk.bf16.gmra.mxu2 %vm808_vm1, %v8097_v33  ;;  %7851 = vmatmul.msk.bf16.gmra.mxu3 %vm808_vm1, %v8096_v6  ;;  %v1690_v6 = vmax.f32 %v1046_v5, 0.0  ;;  %v8100_v5 = vld [vmem:[%s8572_s13 + $0x1b0] sm:$0xff] }
 0x14e   : > { %11774 = vst [vmem:[#allocation22_spill] sm:$0xff] %v8768_v36 }
 0x14f   : > { %v8798_v7 = vpack.c.bf16 %v1690_v6, %v1688_v62 }
 0x150   : > { %v1234_v43 = vpop.f32.mrf.mxu2  ;;  %v1558_v44 = vpop.f32.mrf.mxu3 }
 0x151   : > { %v1840_v54 = vmax.f32 %v1234_v43, 0.0  ;;  %v1837_v58 = vmax.f32 %v1558_v44, 0.0  ;;  %v8812_v43 = vpack.c.bf16 %v1694_v41, %v1692_v34 }
 0x152   : > { %7752 = vmatmul.msk.bf16.gmra.mxu0 %vm808_vm1, %v8815_v53 }
 0x158   : > { %v1236_v56 = vpop.f32.mrf.mxu2  ;;  %v1560_v57 = vpop.f32.mrf.mxu3 }
 0x159   : > { %v1842_v59 = vmax.f32 %v1236_v56, 0.0  ;;  %v1839_v60 = vmax.f32 %v1560_v57, 0.0 }
 0x15b   : > { %v8792_v1 = vpack.c.bf16 %v1842_v59, %v1840_v54  ;;  %v8794_v2 = vpack.c.bf16 %v1839_v60, %v1837_v58  ;;  %v1054_v54 = vpop.f32.mrf.mxu0 }
 0x15c   : > { %v1696_v6 = vmax.f32 %v1054_v54, 0.0  ;;  %v8101_v54 = vld [vmem:[%s8572_s13 + $0x1b8] sm:$0xff] }
 0x15d   : > { %11775 = vst [vmem:[#allocation23_spill] sm:$0xff] %v8792_v1  ;;  %7789 = vmatmul.msk.bf16.gmra.mxu2 %vm808_vm1, %v8098_v61  ;;  %7852 = vmatmul.msk.bf16.gmra.mxu3 %vm808_vm1, %v8097_v33 }
 0x15e   : > { %11776 = vst [vmem:[#allocation24_spill] sm:$0xff] %v8794_v2 }
 0x160   : > { %v1239_v13 = vpop.f32.mrf.mxu2  ;;  %v1563_v15 = vpop.f32.mrf.mxu3 }
 0x161   : > { %v1844_v21 = vmax.f32 %v1239_v13, 0.0  ;;  %v1841_v24 = vmax.f32 %v1563_v15, 0.0 }
 0x163   : > { %v1056_v15 = vpop.f32.mrf.mxu0 }
 0x164   : > { %v1698_v19 = vmax.f32 %v1056_v15, 0.0 }
 0x168   : > { %v1241_v22 = vpop.f32.mrf.mxu2  ;;  %v1565_v23 = vpop.f32.mrf.mxu3 }
 0x169   : > { %v1846_v25 = vmax.f32 %v1241_v22, 0.0  ;;  %v1843_v30 = vmax.f32 %v1565_v23, 0.0 }
 0x16b   : > { %v8806_v33 = vpack.c.bf16 %v1846_v25, %v1844_v21  ;;  %v8808_v37 = vpack.c.bf16 %v1843_v30, %v1841_v24  ;;  %v8826_v21 = vpack.c.bf16 %v1698_v19, %v1696_v6  ;;  %v8829_v24 = vld [vmem:[%s8572_s13 + $0x80] sm:$0xff]  ;;  %v1059_v25 = vpop.f32.mrf.mxu0 }
 0x16c   : > { %7753 = vmatmul.msk.bf16.gmra.mxu0 %vm808_vm1, %v8829_v24 }
 0x16d   : > { %11777 = vst [vmem:[#allocation25_spill] sm:$0xff] %v8806_v33  ;;  %7790 = vmatmul.msk.bf16.gmra.mxu2 %vm808_vm1, %v8099_v31  ;;  %7853 = vmatmul.msk.bf16.gmra.mxu3 %vm808_vm1, %v8098_v61 }
 0x16e   : > { %11778 = vst [vmem:[#allocation26_spill] sm:$0xff] %v8808_v37 }
 0x170   : > { %v1244_v44 = vpop.f32.mrf.mxu2  ;;  %v1568_v45 = vpop.f32.mrf.mxu3 }
 0x171   : > { %v1848_v56 = vmax.f32 %v1244_v44, 0.0  ;;  %v1845_v59 = vmax.f32 %v1568_v45, 0.0 }
 0x178   : > { %v1246_v57 = vpop.f32.mrf.mxu2  ;;  %v1570_v58 = vpop.f32.mrf.mxu3 }
 0x179   : > { %v1850_v60 = vmax.f32 %v1246_v57, 0.0  ;;  %v1847_v62 = vmax.f32 %v1570_v58, 0.0  ;;  %v1061_v58 = vpop.f32.mrf.mxu0 }
 0x17b   : > { %v8820_v61 = vpack.c.bf16 %v1850_v60, %v1848_v56  ;;  %v8822_v13 = vpack.c.bf16 %v1847_v62, %v1845_v59  ;;  %v1700_v56 = vmax.f32 %v1059_v25, 0.0  ;;  %v1702_v59 = vmax.f32 %v1061_v58, 0.0  ;;  %v8127_v60 = vld [vmem:[%s11703_s2 + $0x48] sm:$0xff] }
 0x17c   : > { %v8119_v62 = vld [vmem:[%s11703_s2 + $0x8] sm:$0xff]  ;;  %2519 = vmatpush.bf16.msrb.mxu3 %v8127_v60 }
 0x17d   : > { %11779 = vst [vmem:[#allocation27_spill] sm:$0xff] %v8820_v61  ;;  %7791 = vmatmul.msk.bf16.gmra.mxu2 %vm808_vm1, %v8100_v5  ;;  %7854 = vmatmul.msk.bf16.gmra.mxu3 %vm808_vm1, %v8099_v31  ;;  %v8846_v6 = vpack.c.bf16 %v1702_v59, %v1700_v56 }
 0x17e   : > { %11780 = vst [vmem:[#allocation28_spill] sm:$0xff] %v8822_v13  ;;  %2190 = vmatpush.bf16.msrb.mxu2 %v8119_v62 }
 0x180   : > { %v1249_v22 = vpop.f32.mrf.mxu2  ;;  %v1573_v23 = vpop.f32.mrf.mxu3 }
 0x181   : > { %v1852_v30 = vmax.f32 %v1249_v22, 0.0  ;;  %v1849_v41 = vmax.f32 %v1573_v23, 0.0  ;;  %v8849_v22 = vld [vmem:[%s8572_s13 + $0x88] sm:$0xff]  ;;  %v1064_v23 = vpop.f32.mrf.mxu0 }
 0x182   : > { %7754 = vmatmul.msk.bf16.gmra.mxu0 %vm808_vm1, %v8849_v22  ;;  %v1704_v56 = vmax.f32 %v1064_v23, 0.0 }
 0x188   : > { %v1251_v34 = vpop.f32.mrf.mxu2  ;;  %v1575_v40 = vpop.f32.mrf.mxu3 }
 0x189   : > { %v1854_v44 = vmax.f32 %v1251_v34, 0.0  ;;  %v1851_v45 = vmax.f32 %v1575_v40, 0.0  ;;  %v1066_v60 = vpop.f32.mrf.mxu0 }
 0x18a   : > { %v1706_v62 = vmax.f32 %v1066_v60, 0.0 }
 0x18b   : > { %v8834_v31 = vpack.c.bf16 %v1854_v44, %v1852_v30  ;;  %v8836_v57 = vpack.c.bf16 %v1851_v45, %v1849_v41  ;;  %v8102_v45 = vld [vmem:[%s8572_s13 + $0x1c0] sm:$0xff] }
 0x18d   : > { %11781 = vst [vmem:[#allocation29_spill] sm:$0xff] %v8834_v31  ;;  %7792 = vmatmul.msk.bf16.gmra.mxu2 %vm808_vm1, %v8101_v54  ;;  %7855 = vmatmul.msk.bf16.gmra.mxu3 %vm808_vm1, %v8100_v5  ;;  %v8854_v5 = vld [vmem:[%s11705_s4 + $0x18] sm:$0xff] }
 0x18e   : > { %11782 = vst [vmem:[#allocation30_spill] sm:$0xff] %v8836_v57  ;;  %3106 = vmatpush.bf16.msrb.mxu0 %v8854_v5 }
 0x190   : > { %v1254_v15 = vpop.f32.mrf.mxu2  ;;  %v1578_v19 = vpop.f32.mrf.mxu3 }
 0x191   : > { %v1856_v25 = vmax.f32 %v1254_v15, 0.0  ;;  %v1853_v40 = vmax.f32 %v1578_v19, 0.0  ;;  %v8866_v15 = vpack.c.bf16 %v1706_v62, %v1704_v56  ;;  %v1348_v19 = vpop.f32.mrf.mxu1 }
 0x198   : > { %v1256_v30 = vpop.f32.mrf.mxu2  ;;  %v1580_v34 = vpop.f32.mrf.mxu3 }
 0x199   : > { %v1858_v41 = vmax.f32 %v1256_v30, 0.0  ;;  %v1855_v44 = vmax.f32 %v1580_v34, 0.0  ;;  %v8869_v30 = vld [vmem:[%s8572_s13 + $0x90] sm:$0xff]  ;;  %v1069_v34 = vpop.f32.mrf.mxu0 }
 0x19a   : > { %7755 = vmatmul.msk.bf16.gmra.mxu0 %vm808_vm1, %v8869_v30  ;;  %v1708_v56 = vmax.f32 %v1069_v34, 0.0 }
 0x19b   : > { %v8860_v58 = vpack.c.bf16 %v1858_v41, %v1856_v25  ;;  %v8862_v59 = vpack.c.bf16 %v1855_v44, %v1853_v40  ;;  %v1669_v41 = vmax.f32 %v1348_v19, 0.0 }
 0x19d   : > { %11783 = vst [vmem:[#allocation31_spill] sm:$0xff] %v8860_v58  ;;  %7793 = vmatmul.msk.bf16.gmra.mxu2 %vm808_vm1, %v8102_v45  ;;  %7856 = vmatmul.msk.bf16.gmra.mxu3 %vm808_vm1, %v8101_v54  ;;  %v8103_v58 = vld [vmem:[%s8572_s13 + $0x1c8] sm:$0xff]  ;;  %v1350_v54 = vpop.f32.mrf.mxu1 }
 0x19e   : > { %11784 = vst [vmem:[#allocation32_spill] sm:$0xff] %v8862_v59  ;;  %7813 = vmatmul.msk.bf16.gmra.mxu1 %vm808_vm1, %v8761_v20  ;;  %v1671_v62 = vmax.f32 %v1350_v54, 0.0 }
 0x1a0   : > { %v1259_v57 = vpop.f32.mrf.mxu2  ;;  %v1583_v31 = vpop.f32.mrf.mxu3 }
 0x1a1   : > { %v1860_v23 = vmax.f32 %v1259_v57, 0.0  ;;  %v1857_v44 = vmax.f32 %v1583_v31, 0.0  ;;  %v8144_v57 = vld [vmem:[%s11707_s6 + $0x10] sm:$0xff]  ;;  %v1071_v19 = vpop.f32.mrf.mxu0  ;;  %v8883_v31 = vpack.c.bf16 %v1671_v62, %v1669_v41 }
 0x1a2   : > { %3857 = vmatpush.bf16.msrb.mxu1 %v8144_v57 }
 0x1a8   : > { %v1261_v25 = vpop.f32.mrf.mxu2  ;;  %v1585_v40 = vpop.f32.mrf.mxu3 }
 0x1a9   : > { %v1862_v60 = vmax.f32 %v1261_v25, 0.0  ;;  %v1859_v59 = vmax.f32 %v1585_v40, 0.0  ;;  %v1710_v25 = vmax.f32 %v1071_v19, 0.0  ;;  %v8890_v40 = vld [vmem:[%s8572_s13 + $0x98] sm:$0xff] }
 0x1aa   : > { %7756 = vmatmul.msk.bf16.gmra.mxu0 %vm808_vm1, %v8890_v40 }
 0x1ab   : > { %v8876_v13 = vpack.c.bf16 %v1862_v60, %v1860_v23  ;;  %v8878_v61 = vpack.c.bf16 %v1859_v59, %v1857_v44  ;;  %v8887_v20 = vpack.c.bf16 %v1710_v25, %v1708_v56  ;;  %v1353_v59 = vpop.f32.mrf.mxu1  ;;  %v1074_v44 = vpop.f32.mrf.mxu0 }
 0x1ac   : > { %v1673_v62 = vmax.f32 %v1353_v59, 0.0  ;;  %v1712_v57 = vmax.f32 %v1074_v44, 0.0  ;;  %v8908_v44 = vld [vmem:[%s8572_s13 + $0xa0] sm:$0xff] }
 0x1ad   : > { %11785 = vst [vmem:[#allocation33_spill] sm:$0xff] %v8876_v13  ;;  %7794 = vmatmul.msk.bf16.gmra.mxu2 %vm808_vm1, %v8103_v58  ;;  %7857 = vmatmul.msk.bf16.gmra.mxu3 %vm808_vm1, %v8102_v45  ;;  %v8104_v13 = vld [vmem:[%s8572_s13 + $0x1d0] sm:$0xff] }
 0x1ae   : > { %11786 = vst [vmem:[#allocation34_spill] sm:$0xff] %v8878_v61 }
 0x1b0   : > { %v1264_v34 = vpop.f32.mrf.mxu2  ;;  %v1588_v23 = vpop.f32.mrf.mxu3 }
 0x1b1   : > { %v1864_v41 = vmax.f32 %v1264_v34, 0.0  ;;  %v1861_v19 = vmax.f32 %v1588_v23, 0.0 }
 0x1b3   : > { %v1355_v56 = vpop.f32.mrf.mxu1  ;;  %7814 = vmatmul.msk.bf16.gmra.mxu1 %vm808_vm1, %v8786_v50  ;;  %v1076_v2 = vpop.f32.mrf.mxu0 }
 0x1b4   : > { %v1675_v25 = vmax.f32 %v1355_v56, 0.0  ;;  %v1714_v1 = vmax.f32 %v1076_v2, 0.0 }
 0x1b6   : > { %v8901_v34 = vpack.c.bf16 %v1675_v25, %v1673_v62  ;;  %v8905_v23 = vpack.c.bf16 %v1714_v1, %v1712_v57  ;;  %v8105_v25 = vld [vmem:[%s8572_s13 + $0x1d8] sm:$0xff] }
 0x1b8   : > { %v1266_v60 = vpop.f32.mrf.mxu2  ;;  %v1590_v54 = vpop.f32.mrf.mxu3 }
 0x1b9   : > { %v1866_v61 = vmax.f32 %v1266_v60, 0.0  ;;  %v1863_v45 = vmax.f32 %v1590_v54, 0.0 }
 0x1ba   : > { %7757 = vmatmul.msk.bf16.gmra.mxu0 %vm808_vm1, %v8908_v44 }
 0x1bb   : > { %v8897_v37 = vpack.c.bf16 %v1866_v61, %v1864_v41  ;;  %v8899_v33 = vpack.c.bf16 %v1863_v45, %v1861_v19  ;;  %v1358_v50 = vpop.f32.mrf.mxu1  ;;  %v1079_v61 = vpop.f32.mrf.mxu0 }
 0x1bc   : > { %v1677_v2 = vmax.f32 %v1358_v50, 0.0  ;;  %v1716_v1 = vmax.f32 %v1079_v61, 0.0 }
 0x1bd   : > { %11787 = vst [vmem:[#allocation35_spill] sm:$0xff] %v8897_v37  ;;  %7795 = vmatmul.msk.bf16.gmra.mxu2 %vm808_vm1, %v8104_v13  ;;  %7858 = vmatmul.msk.bf16.gmra.mxu3 %vm808_vm1, %v8103_v58 }
 0x1be   : > { %11788 = vst [vmem:[#allocation36_spill] sm:$0xff] %v8899_v33 }
 0x1c0   : > { %v1269_v59 = vpop.f32.mrf.mxu2  ;;  %v1593_v60 = vpop.f32.mrf.mxu3 }
 0x1c1   : > { %v1868_v41 = vmax.f32 %v1269_v59, 0.0  ;;  %v1865_v19 = vmax.f32 %v1593_v60, 0.0  ;;  %v8118_v60 = vld [vmem:[%s11703_s2] sm:$0xff] }
 0x1c2   : > { %2191 = vmatpush.bf16.msrb.mxu2 %v8118_v60 }
 0x1c3   : > { %v1360_v58 = vpop.f32.mrf.mxu1  ;;  %7815 = vmatmul.msk.bf16.gmra.mxu1 %vm808_vm1, %v8801_v18  ;;  %v1081_v36 = vpop.f32.mrf.mxu0  ;;  %v8126_v18 = vld [vmem:[%s11703_s2 + $0x40] sm:$0xff] }
 0x1c4   : > { %v1679_v57 = vmax.f32 %v1360_v58, 0.0  ;;  %v1718_v35 = vmax.f32 %v1081_v36, 0.0  ;;  %2520 = vmatpush.bf16.msrb.mxu3 %v8126_v18 }
 0x1c6   : > { %v8919_v59 = vpack.c.bf16 %v1679_v57, %v1677_v2  ;;  %v8929_v50 = vpack.c.bf16 %v1718_v35, %v1716_v1  ;;  %8156 = vmatpush.bf16.msra.mxu2 %v8617_v47  ;;  %v8106_v1 = vld [vmem:[%s8572_s13 + $0x1e0] sm:$0xff] }
 0x1c8   : > { %v1271_v54 = vpop.f32.mrf.mxu2  ;;  %v1595_v62 = vpop.f32.mrf.mxu3 }
 0x1c9   : > { %v1870_v45 = vmax.f32 %v1271_v54, 0.0  ;;  %v1867_v56 = vmax.f32 %v1595_v62, 0.0  ;;  %v8933_v54 = vld [vmem:[%s8572_s13 + $0xa8] sm:$0xff] }
 0x1ca   : > { %7758 = vmatmul.msk.bf16.gmra.mxu0 %vm808_vm1, %v8933_v54  ;;  %8157 = vmatpush.bf16.msra.mxu2 %v8661_v16 }
 0x1cb   : > { %v8915_v33 = vpack.c.bf16 %v1870_v45, %v1868_v41  ;;  %v8917_v37 = vpack.c.bf16 %v1867_v56, %v1865_v19  ;;  %v1363_v36 = vpop.f32.mrf.mxu1 }
 0x1cc   : > { %v1681_v19 = vmax.f32 %v1363_v36, 0.0 }
 0x1cd   : > { %11789 = vst [vmem:[#allocation37_spill] sm:$0xff] %v8915_v33  ;;  %7796 = vmatmul.msk.bf16.gmra.mxu2 %vm808_vm1, %v8105_v25  ;;  %7859 = vmatmul.msk.bf16.gmra.mxu3 %vm808_vm1, %v8104_v13  ;;  %v1084_v13 = vpop.f32.mrf.mxu0 }
 0x1ce   : > { %11790 = vst [vmem:[#allocation38_spill] sm:$0xff] %v8917_v37  ;;  %8158 = vmatpush.bf16.msra.mxu2 %v8718_v14  ;;  %v1720_v57 = vmax.f32 %v1084_v13, 0.0 }
 0x1d0   : > { %v1274_v61 = vpop.f32.mrf.mxu2  ;;  %v1598_v41 = vpop.f32.mrf.mxu3 }
 0x1d1   : > { %v1872_v62 = vmax.f32 %v1274_v61, 0.0  ;;  %v1869_v45 = vmax.f32 %v1598_v41, 0.0  ;;  %v8136_v61 = vld [vmem:[%s11705_s4 + $0x10] sm:$0xff] }
 0x1d2   : > { %8159 = vmatpush.bf16.msra.mxu2 %v8783_v46  ;;  %3107 = vmatpush.bf16.msrb.mxu0 %v8136_v61 }
 0x1d3   : > { %v1365_v47 = vpop.f32.mrf.mxu1  ;;  %7816 = vmatmul.msk.bf16.gmra.mxu1 %vm808_vm1, %v8815_v53 }
 0x1d4   : > { %v1683_v60 = vmax.f32 %v1365_v47, 0.0 }
 0x1d5   : > { %v1086_v14 = vpop.f32.mrf.mxu0 }
 0x1d6   : > { %v8949_v41 = vpack.c.bf16 %v1683_v60, %v1681_v19  ;;  %v1722_v36 = vmax.f32 %v1086_v14, 0.0  ;;  %8160 = vmatpush.bf16.msra.mxu2 %v8854_v5  ;;  %v8107_v60 = vld [vmem:[%s8572_s13 + $0x1e8] sm:$0xff] }
 0x1d8   : > { %v1276_v2 = vpop.f32.mrf.mxu2  ;;  %v1600_v35 = vpop.f32.mrf.mxu3  ;;  %v8954_v53 = vpack.c.bf16 %v1722_v36, %v1720_v57 }
 0x1d9   : > { %v1874_v56 = vmax.f32 %v1276_v2, 0.0  ;;  %v1871_v58 = vmax.f32 %v1600_v35, 0.0  ;;  %v8958_v35 = vld [vmem:[%s8572_s13 + $0xb0] sm:$0xff] }
 0x1da   : > { %7759 = vmatmul.msk.bf16.gmra.mxu0 %vm808_vm1, %v8958_v35  ;;  %8161 = vmatpush.bf16.msra.mxu2 %v8136_v61 }
 0x1db   : > { %v8942_v18 = vpack.c.bf16 %v1874_v56, %v1872_v62  ;;  %v8944_v16 = vpack.c.bf16 %v1871_v58, %v1869_v45  ;;  %v1368_v2 = vpop.f32.mrf.mxu1 }
 0x1dd   : > { %11791 = vst [vmem:[#allocation39_spill] sm:$0xff] %v8942_v18  ;;  %7797 = vmatmul.msk.bf16.gmra.mxu2 %vm808_vm1, %v8106_v1  ;;  %7860 = vmatmul.msk.bf16.gmra.mxu3 %vm808_vm1, %v8105_v25  ;;  %v1089_v19 = vpop.f32.mrf.mxu0  ;;  %v1685_v25 = vmax.f32 %v1368_v2, 0.0 }
 0x1de   : > { %11792 = vst [vmem:[#allocation40_spill] sm:$0xff] %v8944_v16  ;;  %v1724_v5 = vmax.f32 %v1089_v19, 0.0  ;;  %v8976_v19 = vld [vmem:[%s8572_s13 + $0xb8] sm:$0xff] }
 0x1e0   : > { %v1279_v13 = vpop.f32.mrf.mxu2  ;;  %v1603_v62 = vpop.f32.mrf.mxu3 }
 0x1e1   : > { %v1876_v46 = vmax.f32 %v1279_v13, 0.0  ;;  %v1873_v58 = vmax.f32 %v1603_v62, 0.0 }
 0x1e3   : > { %v1370_v14 = vpop.f32.mrf.mxu1  ;;  %7817 = vmatmul.msk.bf16.gmra.mxu1 %vm808_vm1, %v8829_v24 }
 0x1e4   : > { %v1687_v36 = vmax.f32 %v1370_v14, 0.0 }
 0x1e5   : > { %v1091_v61 = vpop.f32.mrf.mxu0 }
 0x1e6   : > { %v8969_v13 = vpack.c.bf16 %v1687_v36, %v1685_v25  ;;  %v1726_v37 = vmax.f32 %v1091_v61, 0.0  ;;  %v8108_v61 = vld [vmem:[%s8572_s13 + $0x1f0] sm:$0xff] }
 0x1e8   : > { %v1281_v45 = vpop.f32.mrf.mxu2  ;;  %v1605_v56 = vpop.f32.mrf.mxu3  ;;  %v8973_v62 = vpack.c.bf16 %v1726_v37, %v1724_v5 }
 0x1e9   : > { %v1878_v47 = vmax.f32 %v1281_v45, 0.0  ;;  %v1875_v57 = vmax.f32 %v1605_v56, 0.0 }
 0x1ea   : > { %7760 = vmatmul.msk.bf16.gmra.mxu0 %vm808_vm1, %v8976_v19 }
 0x1eb   : > { %v8965_v16 = vpack.c.bf16 %v1878_v47, %v1876_v46  ;;  %v8967_v18 = vpack.c.bf16 %v1875_v57, %v1873_v58  ;;  %v1373_v24 = vpop.f32.mrf.mxu1 }
 0x1ec   : > { %v1689_v47 = vmax.f32 %v1373_v24, 0.0 }
 0x1ed   : > { %11793 = vst [vmem:[#allocation41_spill] sm:$0xff] %v8965_v16  ;;  %7798 = vmatmul.msk.bf16.gmra.mxu2 %vm808_vm1, %v8107_v60  ;;  %7861 = vmatmul.msk.bf16.gmra.mxu3 %vm808_vm1, %v8106_v1  ;;  %v1094_v46 = vpop.f32.mrf.mxu0 }
 0x1ee   : > { %11794 = vst [vmem:[#allocation42_spill] sm:$0xff] %v8967_v18  ;;  %v1728_v1 = vmax.f32 %v1094_v46, 0.0  ;;  %v8994_v46 = vld [vmem:[%s8572_s13 + $0xc0] sm:$0xff] }
 0x1f0   : > { %v1284_v2 = vpop.f32.mrf.mxu2  ;;  %v1608_v45 = vpop.f32.mrf.mxu3 }
 0x1f1   : > { %v1880_v56 = vmax.f32 %v1284_v2, 0.0  ;;  %v1877_v57 = vmax.f32 %v1608_v45, 0.0 }
 0x1f3   : > { %v1375_v37 = vpop.f32.mrf.mxu1  ;;  %7818 = vmatmul.msk.bf16.gmra.mxu1 %vm808_vm1, %v8849_v22 }
 0x1f4   : > { %v1691_v5 = vmax.f32 %v1375_v37, 0.0 }
 0x1f5   : > { %v1096_v33 = vpop.f32.mrf.mxu0 }
 0x1f6   : > { %v8987_v2 = vpack.c.bf16 %v1691_v5, %v1689_v47  ;;  %v1730_v10 = vmax.f32 %v1096_v33, 0.0  ;;  %v8109_v5 = vld [vmem:[%s8572_s13 + $0x1f8] sm:$0xff] }
 0x1f8   : > { %v1286_v25 = vpop.f32.mrf.mxu2  ;;  %v1610_v58 = vpop.f32.mrf.mxu3  ;;  %v8991_v45 = vpack.c.bf16 %v1730_v10, %v1728_v1 }
 0x1f9   : > { %v1882_v14 = vmax.f32 %v1286_v25, 0.0  ;;  %v1879_v36 = vmax.f32 %v1610_v58, 0.0 }
 0x1fa   : > { %7761 = vmatmul.msk.bf16.gmra.mxu0 %vm808_vm1, %v8994_v46 }
 0x1fb   : > { %v8983_v18 = vpack.c.bf16 %v1882_v14, %v1880_v56  ;;  %v8985_v16 = vpack.c.bf16 %v1879_v36, %v1877_v57  ;;  %v1378_v22 = vpop.f32.mrf.mxu1 }
 0x1fc   : > { %v1693_v33 = vmax.f32 %v1378_v22, 0.0 }
 0x1fd   : > { %11795 = vst [vmem:[#allocation43_spill] sm:$0xff] %v8983_v18  ;;  %7799 = vmatmul.msk.bf16.gmra.mxu2 %vm808_vm1, %v8108_v61  ;;  %7862 = vmatmul.msk.bf16.gmra.mxu3 %vm808_vm1, %v8107_v60  ;;  %v1099_v56 = vpop.f32.mrf.mxu0 }
 0x1fe   : > { %11796 = vst [vmem:[#allocation44_spill] sm:$0xff] %v8985_v16  ;;  %v1732_v60 = vmax.f32 %v1099_v56, 0.0 }
 0x200   : > { %v1289_v24 = vpop.f32.mrf.mxu2  ;;  %v1613_v25 = vpop.f32.mrf.mxu3 }
 0x201   : > { %v1884_v58 = vmax.f32 %v1289_v24, 0.0  ;;  %v1881_v14 = vmax.f32 %v1613_v25, 0.0 }
 0x203   : > { %v1380_v10 = vpop.f32.mrf.mxu1  ;;  %7819 = vmatmul.msk.bf16.gmra.mxu1 %vm808_vm1, %v8869_v30  ;;  %v9012_v30 = vld [vmem:[%s8572_s13 + $0xc8] sm:$0xff] }
 0x204   : > { %v1695_v1 = vmax.f32 %v1380_v10, 0.0 }
 0x205   : > { %v1101_v9 = vpop.f32.mrf.mxu0 }
 0x206   : > { %v9005_v24 = vpack.c.bf16 %v1695_v1, %v1693_v33  ;;  %v1734_v49 = vmax.f32 %v1101_v9, 0.0 }
 0x208   : > { %v1291_v47 = vpop.f32.mrf.mxu2  ;;  %v1615_v57 = vpop.f32.mrf.mxu3  ;;  %v9009_v25 = vpack.c.bf16 %v1734_v49, %v1732_v60 }
 0x209   : > { %v1886_v36 = vmax.f32 %v1291_v47, 0.0  ;;  %v1883_v37 = vmax.f32 %v1615_v57, 0.0 }
 0x20a   : > { %7762 = vmatmul.msk.bf16.gmra.mxu0 %vm808_vm1, %v9012_v30 }
 0x20b   : > { %v9001_v16 = vpack.c.bf16 %v1886_v36, %v1884_v58  ;;  %v9003_v18 = vpack.c.bf16 %v1883_v37, %v1881_v14  ;;  %v1383_v57 = vpop.f32.mrf.mxu1 }
 0x20c   : > { %v1697_v36 = vmax.f32 %v1383_v57, 0.0 }
 0x20d   : > { %11797 = vst [vmem:[#allocation45_spill] sm:$0xff] %v9001_v16  ;;  %7800 = vmatmul.msk.bf16.gmra.mxu2 %vm808_vm1, %v8109_v5  ;;  %7863 = vmatmul.msk.bf16.gmra.mxu3 %vm808_vm1, %v8108_v61  ;;  %v1104_v56 = vpop.f32.mrf.mxu0 }
 0x20e   : > { %11798 = vst [vmem:[#allocation46_spill] sm:$0xff] %v9003_v18  ;;  %v1736_v49 = vmax.f32 %v1104_v56, 0.0 }
 0x210   : > { %v1294_v22 = vpop.f32.mrf.mxu2  ;;  %v1618_v47 = vpop.f32.mrf.mxu3 }
 0x211   : > { %v1888_v58 = vmax.f32 %v1294_v22, 0.0  ;;  %v1885_v9 = vmax.f32 %v1618_v47, 0.0  ;;  %v8135_v22 = vld [vmem:[%s11705_s4 + $0x8] sm:$0xff] }
 0x212   : > { %3108 = vmatpush.bf16.msrb.mxu0 %v8135_v22  ;;  %8162 = vmatpush.bf16.msra.mxu2 %v8135_v22 }
 0x213   : > { %v1385_v1 = vpop.f32.mrf.mxu1  ;;  %7820 = vmatmul.msk.bf16.gmra.mxu1 %vm808_vm1, %v8890_v40 }
 0x214   : > { %v1699_v61 = vmax.f32 %v1385_v1, 0.0 }
 0x215   : > { %v1106_v16 = vpop.f32.mrf.mxu0 }
 0x216   : > { %v9025_v57 = vpack.c.bf16 %v1699_v61, %v1697_v36  ;;  %v1738_v47 = vmax.f32 %v1106_v16, 0.0 }
 0x218   : > { %v1296_v14 = vpop.f32.mrf.mxu2  ;;  %v1620_v33 = vpop.f32.mrf.mxu3  ;;  %v9029_v40 = vpack.c.bf16 %v1738_v47, %v1736_v49 }
 0x219   : > { %v1890_v37 = vmax.f32 %v1296_v14, 0.0  ;;  %v1887_v10 = vmax.f32 %v1620_v33, 0.0  ;;  %v9032_v33 = vld [vmem:[%s8572_s13 + $0xd0] sm:$0xff] }
 0x21a   : > { %7763 = vmatmul.msk.bf16.gmra.mxu0 %vm808_vm1, %v9032_v33 }
 0x21b   : > { %v9018_v60 = vpack.c.bf16 %v1890_v37, %v1888_v58  ;;  %v9020_v18 = vpack.c.bf16 %v1887_v10, %v1885_v9  ;;  %v1388_v14 = vpop.f32.mrf.mxu1 }
 0x21c   : > { %v1701_v10 = vmax.f32 %v1388_v14, 0.0 }
 0x21d   : > { %11799 = vst [vmem:[#allocation47_spill] sm:$0xff] %v9018_v60  ;;  %7864 = vmatmul.msk.bf16.gmra.mxu3 %vm808_vm1, %v8109_v5  ;;  %2192 = vmatmul.bf16.vlgmr.msrb.gmra.mxu2 %v8710_v8  ;;  %v1109_v9 = vpop.f32.mrf.mxu0 }
 0x21e   : > { %11800 = vst [vmem:[#allocation48_spill] sm:$0xff] %v9020_v18  ;;  %v1740_v49 = vmax.f32 %v1109_v9, 0.0 }
 0x220   : > { %v1299_v56 = vpop.f32.mrf.mxu2  ;;  %v1623_v58 = vpop.f32.mrf.mxu3 }
 0x221   : > { %v1892_v36 = vmax.f32 %v1299_v56, 0.0  ;;  %v1889_v5 = vmax.f32 %v1623_v58, 0.0  ;;  %v8143_v56 = vld [vmem:[%s11707_s6 + $0x8] sm:$0xff] }
 0x222   : > { %3858 = vmatpush.bf16.msrb.mxu1 %v8143_v56 }
 0x223   : > { %v1390_v61 = vpop.f32.mrf.mxu1  ;;  %7821 = vmatmul.msk.bf16.gmra.mxu1 %vm808_vm1, %v8908_v44 }
 0x224   : > { %v1703_v22 = vmax.f32 %v1390_v61, 0.0 }
 0x225   : > { %v1111_v60 = vpop.f32.mrf.mxu0 }
 0x226   : > { %v9045_v14 = vpack.c.bf16 %v1703_v22, %v1701_v10  ;;  %v1742_v58 = vmax.f32 %v1111_v60, 0.0 }
 0x228   : > { %v1301_v37 = vpop.f32.mrf.mxu2  ;;  %v1625_v16 = vpop.f32.mrf.mxu3  ;;  %v9049_v44 = vpack.c.bf16 %v1742_v58, %v1740_v49 }
 0x229   : > { %v1894_v1 = vmax.f32 %v1301_v37, 0.0  ;;  %v1891_v8 = vmax.f32 %v1625_v16, 0.0  ;;  %v9052_v16 = vld [vmem:[%s8572_s13 + $0xd8] sm:$0xff] }
 0x22a   : > { %7764 = vmatmul.msk.bf16.gmra.mxu0 %vm808_vm1, %v9052_v16 }
 0x22b   : > { %v9038_v47 = vpack.c.bf16 %v1894_v1, %v1892_v36  ;;  %v9040_v18 = vpack.c.bf16 %v1891_v8, %v1889_v5  ;;  %v1393_v37 = vpop.f32.mrf.mxu1 }
 0x22c   : > { %v1705_v60 = vmax.f32 %v1393_v37, 0.0 }
 0x22d   : > { %11801 = vst [vmem:[#allocation49_spill] sm:$0xff] %v9038_v47  ;;  %2197 = vmatmul.bf16.gmra.mxu2 %v8731_v32  ;;  %2521 = vmatmul.bf16.vlgmr.msrb.gmra.mxu3 %v8883_v31  ;;  %v1114_v5 = vpop.f32.mrf.mxu0 }
 0x22e   : > { %11802 = vst [vmem:[#allocation50_spill] sm:$0xff] %v9040_v18  ;;  %v1744_v49 = vmax.f32 %v1114_v5, 0.0 }
 0x230   : > { %v1304_v9 = vpop.f32.mrf.mxu2  ;;  %v1628_v36 = vpop.f32.mrf.mxu3 }
 0x231   : > { %v1896_v1 = vmax.f32 %v1304_v9, 0.0  ;;  %v1893_v61 = vmax.f32 %v1628_v36, 0.0 }
 0x233   : > { %v1395_v31 = vpop.f32.mrf.mxu1  ;;  %7822 = vmatmul.msk.bf16.gmra.mxu1 %vm808_vm1, %v8933_v54  ;;  %v9069_v54 = vld [vmem:[%s8572_s13 + $0xe0] sm:$0xff] }
 0x234   : > { %v1707_v56 = vmax.f32 %v1395_v31, 0.0 }
 0x235   : > { %v1116_v47 = vpop.f32.mrf.mxu0 }
 0x236   : > { %v9062_v48 = vpack.c.bf16 %v1707_v56, %v1705_v60  ;;  %v1746_v9 = vmax.f32 %v1116_v47, 0.0 }
 0x238   : > { %v1306_v10 = vpop.f32.mrf.mxu2  ;;  %v1630_v8 = vpop.f32.mrf.mxu3  ;;  %v9066_v36 = vpack.c.bf16 %v1746_v9, %v1744_v49 }
 0x239   : > { %v1898_v32 = vmax.f32 %v1306_v10, 0.0  ;;  %v1895_v22 = vmax.f32 %v1630_v8, 0.0 }
 0x23a   : > { %7765 = vmatmul.msk.bf16.gmra.mxu0 %vm808_vm1, %v9069_v54 }
 0x23b   : > { %v9058_v58 = vpack.c.bf16 %v1898_v32, %v1896_v1  ;;  %v9060_v18 = vpack.c.bf16 %v1895_v22, %v1893_v61  ;;  %v1398_v8 = vpop.f32.mrf.mxu1 }
 0x23c   : > { %v1709_v32 = vmax.f32 %v1398_v8, 0.0 }
 0x23d   : > { %11803 = vst [vmem:[#allocation51_spill] sm:$0xff] %v9058_v58  ;;  %2202 = vmatmul.bf16.gmra.mxu2 %v8746_v55  ;;  %2526 = vmatmul.bf16.gmra.mxu3 %v8901_v34  ;;  %v1119_v5 = vpop.f32.mrf.mxu0 }
 0x23e   : > { %11804 = vst [vmem:[#allocation52_spill] sm:$0xff] %v9060_v18  ;;  %v1748_v31 = vmax.f32 %v1119_v5, 0.0 }
 0x240   : > { %v1309_v37 = vpop.f32.mrf.mxu2  ;;  %v1633_v10 = vpop.f32.mrf.mxu3 }
 0x241   : > { %v1900_v1 = vmax.f32 %v1309_v37, 0.0  ;;  %v1897_v47 = vmax.f32 %v1633_v10, 0.0 }
 0x243   : > { %v1400_v34 = vpop.f32.mrf.mxu1  ;;  %7823 = vmatmul.msk.bf16.gmra.mxu1 %vm808_vm1, %v8958_v35  ;;  %v9086_v35 = vld [vmem:[%s8572_s13 + $0xe8] sm:$0xff] }
 0x244   : > { %v1711_v49 = vmax.f32 %v1400_v34, 0.0 }
 0x245   : > { %v1121_v18 = vpop.f32.mrf.mxu0 }
 0x246   : > { %v9079_v58 = vpack.c.bf16 %v1711_v49, %v1709_v32  ;;  %v1750_v37 = vmax.f32 %v1121_v18, 0.0 }
 0x248   : > { %v1311_v61 = vpop.f32.mrf.mxu2  ;;  %v1635_v60 = vpop.f32.mrf.mxu3  ;;  %v9083_v10 = vpack.c.bf16 %v1750_v37, %v1748_v31 }
 0x249   : > { %v1902_v22 = vmax.f32 %v1311_v61, 0.0  ;;  %v1899_v55 = vmax.f32 %v1635_v60, 0.0 }
 0x24a   : > { %7766 = vmatmul.msk.bf16.gmra.mxu0 %vm808_vm1, %v9086_v35 }
 0x24b   : > { %v9075_v56 = vpack.c.bf16 %v1902_v22, %v1900_v1  ;;  %v9077_v9 = vpack.c.bf16 %v1899_v55, %v1897_v47  ;;  %v1403_v60 = vpop.f32.mrf.mxu1 }
 0x24c   : > { %v1713_v18 = vmax.f32 %v1403_v60, 0.0 }
 0x24d   : > { %11805 = vst [vmem:[#allocation53_spill] sm:$0xff] %v9075_v56  ;;  %2207 = vmatmul.bf16.gmra.mxu2 %v8758_v17  ;;  %2531 = vmatmul.bf16.gmra.mxu3 %v8919_v59  ;;  %v9088_v5 = vpop.f32.mrf.mxu0 }
 0x24e   : > { %11806 = vst [vmem:[#allocation54_spill] sm:$0xff] %v9077_v9 }
 0x250   : > { %v1314_v8 = vpop.f32.mrf.mxu2  ;;  %v1638_v61 = vpop.f32.mrf.mxu3 }
 0x251   : > { %v1904_v1 = vmax.f32 %v1314_v8, 0.0  ;;  %v1901_v22 = vmax.f32 %v1638_v61, 0.0  ;;  %v8134_v8 = vld [vmem:[%s11705_s4] sm:$0xff] }
 0x252   : > { %3109 = vmatpush.bf16.msrb.mxu0 %v8134_v8  ;;  %8163 = vmatpush.bf16.msra.mxu2 %v8134_v8 }
 0x253   : > { %v1405_v59 = vpop.f32.mrf.mxu1  ;;  %7824 = vmatmul.msk.bf16.gmra.mxu1 %vm808_vm1, %v8976_v19 }
 0x254   : > { %v1715_v34 = vmax.f32 %v1405_v59, 0.0 }
 0x255   : > { %v9098_v37 = vpop.f32.mrf.mxu0 }
 0x256   : > { %v9100_v9 = vpack.c.bf16 %v1715_v34, %v1713_v18 }
 0x258   : > { %v1316_v32 = vpop.f32.mrf.mxu2  ;;  %v1640_v47 = vpop.f32.mrf.mxu3 }
 0x259   : > { %v1906_v17 = vmax.f32 %v1316_v32, 0.0  ;;  %v1903_v55 = vmax.f32 %v1640_v47, 0.0 }
 0x25b   : > { %v9094_v31 = vpack.c.bf16 %v1906_v17, %v1904_v1  ;;  %v9096_v49 = vpack.c.bf16 %v1903_v55, %v1901_v22  ;;  %v1408_v60 = vpop.f32.mrf.mxu1  ;;  %v9108_v1 = vld [vmem:[%s8572_s13 + $0xf0] sm:$0xff] }
 0x25c   : > { %7767 = vmatmul.msk.bf16.gmra.mxu0 %vm808_vm1, %v9108_v1 }
 0x25d   : > { %11807 = vst [vmem:[#allocation55_spill] sm:$0xff] %v9094_v31  ;;  %2212 = vmatmul.bf16.gmra.mxu2 %v8775_v42  ;;  %2536 = vmatmul.bf16.gmra.mxu3 %v8949_v41  ;;  %v9110_v32 = vpop.f32.mrf.mxu0  ;;  %v1717_v41 = vmax.f32 %v1408_v60, 0.0 }
 0x25e   : > { %11808 = vst [vmem:[#allocation56_spill] sm:$0xff] %v9096_v49 }
 0x260   : > { %v1319_v19 = vpop.f32.mrf.mxu2  ;;  %v1643_v61 = vpop.f32.mrf.mxu3 }
 0x261   : > { %v1908_v47 = vmax.f32 %v1319_v19, 0.0  ;;  %v1905_v22 = vmax.f32 %v1643_v61, 0.0 }
 0x263   : > { %v1410_v59 = vpop.f32.mrf.mxu1  ;;  %7825 = vmatmul.msk.bf16.gmra.mxu1 %vm808_vm1, %v8994_v46 }
 0x264   : > { %v1719_v34 = vmax.f32 %v1410_v59, 0.0 }
 0x265   : > { %v9120_v31 = vpop.f32.mrf.mxu0 }
 0x266   : > { %v9122_v56 = vpack.c.bf16 %v1719_v34, %v1717_v41 }
 0x268   : > { %v1321_v42 = vpop.f32.mrf.mxu2  ;;  %v1645_v18 = vpop.f32.mrf.mxu3 }
 0x269   : > { %v1910_v17 = vmax.f32 %v1321_v42, 0.0  ;;  %v1907_v55 = vmax.f32 %v1645_v18, 0.0  ;;  %v9127_v42 = vld [vmem:[%s8572_s13 + $0xf8] sm:$0xff] }
 0x26b   : > { %v9116_v8 = vpack.c.bf16 %v1910_v17, %v1908_v47  ;;  %v9118_v49 = vpack.c.bf16 %v1907_v55, %v1905_v22  ;;  %v1413_v60 = vpop.f32.mrf.mxu1 }
 0x26c   : > { %7768 = vmatmul.msk.bf16.gmra.mxu0 %vm808_vm1, %v9127_v42  ;;  %v1721_v17 = vmax.f32 %v1413_v60, 0.0 }
 0x26d   : > { %11809 = vst [vmem:[#allocation57_spill] sm:$0xff] %v9116_v8  ;;  %2217 = vmatmul.bf16.gmra.mxu2 %v8798_v7  ;;  %2541 = vmatmul.bf16.gmra.mxu3 %v8969_v13  ;;  %v9131_v46 = vpop.f32.mrf.mxu0 }
 0x26e   : > { %11810 = vst [vmem:[#allocation58_spill] sm:$0xff] %v9118_v49 }
 0x270   : > { %v1324_v19 = vpop.f32.mrf.mxu2  ;;  %v1648_v61 = vpop.f32.mrf.mxu3 }
 0x271   : > { %v1912_v47 = vmax.f32 %v1324_v19, 0.0  ;;  %v1909_v41 = vmax.f32 %v1648_v61, 0.0 }
 0x273   : > { %v1415_v59 = vpop.f32.mrf.mxu1  ;;  %7826 = vmatmul.msk.bf16.gmra.mxu1 %vm808_vm1, %v9012_v30 }
 0x274   : > { %v1723_v13 = vmax.f32 %v1415_v59, 0.0 }
 0x275   : > { %v9143_v19 = vpop.f32.mrf.mxu0 }
 0x276   : > { %v9139_v8 = vpack.c.bf16 %v1723_v13, %v1721_v17 }
 0x278   : > { %v1326_v18 = vpop.f32.mrf.mxu2  ;;  %v1650_v22 = vpop.f32.mrf.mxu3 }
 0x279   : > { %v1914_v55 = vmax.f32 %v1326_v18, 0.0  ;;  %v1911_v7 = vmax.f32 %v1650_v22, 0.0  ;;  %v8338_v22 = vld [vmem:[%s8572_s13 + $0x100] sm:$0xff] }
 0x27b   : > { %v9135_v34 = vpack.c.bf16 %v1914_v55, %v1912_v47  ;;  %v9137_v49 = vpack.c.bf16 %v1911_v7, %v1909_v41  ;;  %v1418_v18 = vpop.f32.mrf.mxu1 }
 0x27c   : > { %7769 = vmatmul.msk.bf16.gmra.mxu0 %vm808_vm1, %v8338_v22  ;;  %v1725_v55 = vmax.f32 %v1418_v18, 0.0 }
 0x27d   : > { %11811 = vst [vmem:[#allocation59_spill] sm:$0xff] %v9135_v34  ;;  %2222 = vmatmul.bf16.gmra.mxu2 %v8812_v43  ;;  %2546 = vmatmul.bf16.gmra.mxu3 %v8987_v2  ;;  %v9147_v13 = vpop.f32.mrf.mxu0 }
 0x27e   : > { %11812 = vst [vmem:[#allocation60_spill] sm:$0xff] %v9137_v49 }
 0x280   : > { %v1329_v61 = vpop.f32.mrf.mxu2  ;;  %v1653_v60 = vpop.f32.mrf.mxu3 }
 0x281   : > { %v1916_v30 = vmax.f32 %v1329_v61, 0.0  ;;  %v1913_v41 = vmax.f32 %v1653_v60, 0.0 }
 0x283   : > { %v1420_v43 = vpop.f32.mrf.mxu1  ;;  %7827 = vmatmul.msk.bf16.gmra.mxu1 %vm808_vm1, %v9032_v33 }
 0x284   : > { %v1727_v2 = vmax.f32 %v1420_v43, 0.0 }
 0x285   : > { %v9159_v22 = vpop.f32.mrf.mxu0 }
 0x286   : > { %v9155_v29 = vpack.c.bf16 %v1727_v2, %v1725_v55 }
 0x288   : > { %v1331_v59 = vpop.f32.mrf.mxu2  ;;  %v1655_v47 = vpop.f32.mrf.mxu3 }
 0x289   : > { %v1918_v7 = vmax.f32 %v1331_v59, 0.0  ;;  %v1915_v17 = vmax.f32 %v1655_v47, 0.0 }
 0x28b   : > { %v9151_v49 = vpack.c.bf16 %v1918_v7, %v1916_v30  ;;  %v9153_v34 = vpack.c.bf16 %v1915_v17, %v1913_v41  ;;  %v1423_v18 = vpop.f32.mrf.mxu1 }
 0x28c   : > { %v1729_v33 = vmax.f32 %v1423_v18, 0.0 }
 0x28d   : > { %11813 = vst [vmem:[#allocation61_spill] sm:$0xff] %v9151_v49  ;;  %2227 = vmatmul.bf16.gmra.mxu2 %v8826_v21  ;;  %2551 = vmatmul.bf16.gmra.mxu3 %v9005_v24  ;;  %v9171_v2 = vpop.f32.mrf.mxu0 }
 0x28e   : > { %11814 = vst [vmem:[#allocation62_spill] sm:$0xff] %v9153_v34 }
 0x290   : > { %v1334_v61 = vpop.f32.mrf.mxu2  ;;  %v1658_v60 = vpop.f32.mrf.mxu3 }
 0x291   : > { %v1920_v59 = vmax.f32 %v1334_v61, 0.0  ;;  %v1917_v43 = vmax.f32 %v1658_v60, 0.0 }
 0x293   : > { %v1425_v41 = vpop.f32.mrf.mxu1  ;;  %7828 = vmatmul.msk.bf16.gmra.mxu1 %vm808_vm1, %v9052_v16 }
 0x294   : > { %v1731_v55 = vmax.f32 %v1425_v41, 0.0 }
 0x295   : > { %v9173_v18 = vpop.f32.mrf.mxu0 }
 0x296   : > { %v9167_v17 = vpack.c.bf16 %v1731_v55, %v1729_v33 }
 0x298   : > { %v1336_v47 = vpop.f32.mrf.mxu2  ;;  %v1660_v28 = vpop.f32.mrf.mxu3 }
 0x299   : > { %v1922_v30 = vmax.f32 %v1336_v47, 0.0  ;;  %v1919_v7 = vmax.f32 %v1660_v28, 0.0 }
 0x29b   : > { %v9163_v21 = vpack.c.bf16 %v1922_v30, %v1920_v59  ;;  %v9165_v24 = vpack.c.bf16 %v1919_v7, %v1917_v43  ;;  %v1428_v28 = vpop.f32.mrf.mxu1 }
 0x29c   : > { %v1733_v41 = vmax.f32 %v1428_v28, 0.0 }
 0x29d   : > { %11815 = vst [vmem:[#allocation63_spill] sm:$0xff] %v9163_v21  ;;  %2232 = vmatmul.bf16.gmra.mxu2 %v8846_v6  ;;  %2556 = vmatmul.bf16.gmra.mxu3 %v9025_v57  ;;  %v8142_v57 = vld [vmem:[%s11707_s6] sm:$0xff]  ;;  %v9191_v28 = vpop.f32.mrf.mxu0 }
 0x29e   : > { %11816 = vst [vmem:[#allocation64_spill] sm:$0xff] %v9165_v24  ;;  %3859 = vmatpush.bf16.msrb.mxu1 %v8142_v57 }
 0x2a0   : > { %v1663_v61 = vpop.f32.mrf.mxu3  ;;  %v2193_v60 = vpop.f32.mrf.mxu2 }
 0x2a1   : > { %v1921_v59 = vmax.f32 %v1663_v61, 0.0 }
 0x2a3   : > { %v1430_v43 = vpop.f32.mrf.mxu1  ;;  %7829 = vmatmul.msk.bf16.gmra.mxu1 %vm808_vm1, %v9069_v54  ;;  %v9189_v54 = vld [vmem:[%s11704_s3] ss:$0 sm:$0xff] }
 0x2a4   : > { %v1735_v33 = vmax.f32 %v1430_v43, 0.0 }
 0x2a5   : > { %v9197_v34 = vpop.f32.mrf.mxu0 }
 0x2a6   : > { %v9182_v7 = vpack.c.bf16 %v1735_v33, %v1733_v41 }
 0x2a8   : > { %v1665_v47 = vpop.f32.mrf.mxu3  ;;  %v2195_v16 = vpop.f32.mrf.mxu2 }
 0x2a9   : > { %v1923_v30 = vmax.f32 %v1665_v47, 0.0  ;;  %v2196_v41 = vadd.f32 %v9189_v54, %v2195_v16 }
 0x2ab   : > { %v9177_v6 = vpack.c.bf16 %v1923_v30, %v1921_v59  ;;  %v1433_v47 = vpop.f32.mrf.mxu1  ;;  %v2194_v59 = vadd.f32 %v9189_v54, %v2193_v60 }
 0x2ac   : > { %v1737_v33 = vmax.f32 %v1433_v47, 0.0 }
 0x2ad   : > { %11817 = vst [vmem:[#allocation65_spill] sm:$0xff] %v9177_v6  ;;  %2237 = vmatmul.bf16.gmra.mxu2 %v8866_v15  ;;  %2561 = vmatmul.bf16.gmra.mxu3 %v9045_v14 }
 0x2b0   : > { %v2198_v55 = vpop.f32.mrf.mxu2  ;;  %v2522_v61 = vpop.f32.mrf.mxu3 }
 0x2b1   : > { %v2523_v30 = vadd.f32 %v2522_v61, %v2194_v59  ;;  %v2199_v47 = vadd.f32 %v9189_v54, %v2198_v55  ;;  %v9204_v59 = vpop.f32.mrf.mxu0 }
 0x2b3   : > { %v1435_v57 = vpop.f32.mrf.mxu1  ;;  %7830 = vmatmul.msk.bf16.gmra.mxu1 %vm808_vm1, %v9086_v35  ;;  %v2842_v24 = vmax.f32 %v2523_v30, 0.0 }
 0x2b4   : > { %v1739_v6 = vmax.f32 %v1435_v57, 0.0 }
 0x2b6   : > { %v9199_v49 = vpack.c.bf16 %v1739_v6, %v1737_v33 }
 0x2b8   : > { %v2200_v43 = vpop.f32.mrf.mxu2  ;;  %v2524_v15 = vpop.f32.mrf.mxu3 }
 0x2b9   : > { %v2525_v14 = vadd.f32 %v2524_v15, %v2196_v41  ;;  %v2201_v35 = vadd.f32 %v9189_v54, %v2200_v43  ;;  %v9213_v43 = vpop.f32.mrf.mxu0 }
 0x2bb   : > { %v2843_v21 = vmax.f32 %v2525_v14, 0.0  ;;  %v1438_v61 = vpop.f32.mrf.mxu1 }
 0x2bc   : > { %v1741_v6 = vmax.f32 %v1438_v61, 0.0 }
 0x2bd   : > { %v2970_v4 = vpack.c.bf16 %v2843_v21, %v2842_v24  ;;  %2242 = vmatmul.bf16.gmra.mxu2 %v8887_v20  ;;  %2566 = vmatmul.bf16.gmra.mxu3 %v9062_v48 }
 0x2bf   : > { %3110 = vmatmul.bf16.vlgmr.msrb.gmra.mxu0 %v2970_v4 }
 0x2c0   : > { %v2203_v60 = vpop.f32.mrf.mxu2  ;;  %v2527_v16 = vpop.f32.mrf.mxu3 }
 0x2c1   : > { %v2528_v41 = vadd.f32 %v2527_v16, %v2199_v47  ;;  %v2204_v61 = vadd.f32 %v9189_v54, %v2203_v60 }
 0x2c3   : > { %v1440_v21 = vpop.f32.mrf.mxu1  ;;  %7831 = vmatmul.msk.bf16.gmra.mxu1 %vm808_vm1, %v9108_v1  ;;  %v2844_v4 = vmax.f32 %v2528_v41, 0.0 }
 0x2c4   : > { %v1743_v48 = vmax.f32 %v1440_v21, 0.0 }
 0x2c6   : > { %v9209_v24 = vpack.c.bf16 %v1743_v48, %v1741_v6 }
 0x2c8   : > { %v2205_v30 = vpop.f32.mrf.mxu2  ;;  %v2529_v15 = vpop.f32.mrf.mxu3 }
 0x2c9   : > { %v2530_v33 = vadd.f32 %v2529_v15, %v2201_v35  ;;  %v2206_v1 = vadd.f32 %v9189_v54, %v2205_v30 }
 0x2cb   : > { %v2845_v20 = vmax.f32 %v2530_v33, 0.0  ;;  %v1443_v16 = vpop.f32.mrf.mxu1  ;;  %v9217_v33 = vpop.f32.mrf.mxu0 }
 0x2cc   : > { %v1745_v15 = vmax.f32 %v1443_v16, 0.0 }
 0x2cd   : > { %2247 = vmatmul.bf16.gmra.mxu2 %v8905_v23  ;;  %2571 = vmatmul.bf16.gmra.mxu3 %v9079_v58  ;;  %v2971_v55 = vpack.c.bf16 %v2845_v20, %v2844_v4 }
 0x2cf   : > { %3115 = vmatmul.bf16.gmra.mxu0 %v2971_v55 }
 0x2d0   : > { %v2208_v14 = vpop.f32.mrf.mxu2  ;;  %v2532_v57 = vpop.f32.mrf.mxu3 }
 0x2d1   : > { %v2533_v47 = vadd.f32 %v2532_v57, %v2204_v61  ;;  %v2209_v16 = vadd.f32 %v9189_v54, %v2208_v14 }
 0x2d3   : > { %v1445_v23 = vpop.f32.mrf.mxu1  ;;  %7832 = vmatmul.msk.bf16.gmra.mxu1 %vm808_vm1, %v9127_v42  ;;  %v2846_v21 = vmax.f32 %v2533_v47, 0.0  ;;  %v9227_v57 = vpop.f32.mrf.mxu0 }
 0x2d4   : > { %v1747_v58 = vmax.f32 %v1445_v23, 0.0 }
 0x2d6   : > { %v9221_v4 = vpack.c.bf16 %v1747_v58, %v1745_v15 }
 0x2d8   : > { %v2210_v35 = vpop.f32.mrf.mxu2  ;;  %v2534_v41 = vpop.f32.mrf.mxu3 }
 0x2d9   : > { %v2535_v6 = vadd.f32 %v2534_v41, %v2206_v1  ;;  %v2211_v42 = vadd.f32 %v9189_v54, %v2210_v35 }
 0x2db   : > { %v2847_v48 = vmax.f32 %v2535_v6, 0.0  ;;  %v9225_v55 = vpop.f32.mrf.mxu1  ;;  %v9235_v23 = vpop.f32.mrf.mxu0 }
 0x2dd   : > { %2252 = vmatmul.bf16.gmra.mxu2 %v8929_v50  ;;  %2576 = vmatmul.bf16.gmra.mxu3 %v9100_v9  ;;  %v2972_v60 = vpack.c.bf16 %v2847_v48, %v2846_v21 }
 0x2df   : > { %3120 = vmatmul.bf16.gmra.mxu0 %v2972_v60 }
 0x2e0   : > { %v2213_v30 = vpop.f32.mrf.mxu2  ;;  %v2537_v20 = vpop.f32.mrf.mxu3 }
 0x2e1   : > { %v2538_v61 = vadd.f32 %v2537_v20, %v2209_v16  ;;  %v2214_v35 = vadd.f32 %v9189_v54, %v2213_v30 }
 0x2e3   : > { %v9231_v15 = vpop.f32.mrf.mxu1  ;;  %v2848_v50 = vmax.f32 %v2538_v61, 0.0  ;;  %v9241_v20 = vpop.f32.mrf.mxu0 }
 0x2e8   : > { %v2215_v1 = vpop.f32.mrf.mxu2  ;;  %v2539_v47 = vpop.f32.mrf.mxu3 }
 0x2e9   : > { %v2540_v41 = vadd.f32 %v2539_v47, %v2211_v42  ;;  %v2216_v48 = vadd.f32 %v9189_v54, %v2215_v1 }
 0x2eb   : > { %v2849_v9 = vmax.f32 %v2540_v41, 0.0  ;;  %v9237_v21 = vpop.f32.mrf.mxu1 }
 0x2ed   : > { %2257 = vmatmul.bf16.gmra.mxu2 %v8954_v53  ;;  %2581 = vmatmul.bf16.gmra.mxu3 %v9122_v56  ;;  %v2973_v6 = vpack.c.bf16 %v2849_v9, %v2848_v50  ;;  %v9247_v9 = vpop.f32.mrf.mxu0 }
 0x2ef   : > { %3125 = vmatmul.bf16.gmra.mxu0 %v2973_v6 }
 0x2f0   : > { %v2218_v58 = vpop.f32.mrf.mxu2  ;;  %v2542_v14 = vpop.f32.mrf.mxu3 }
 0x2f1   : > { %v2543_v60 = vadd.f32 %v2542_v14, %v2214_v35  ;;  %v2219_v6 = vadd.f32 %v9189_v54, %v2218_v58 }
 0x2f3   : > { %v9243_v61 = vpop.f32.mrf.mxu1  ;;  %v2850_v56 = vmax.f32 %v2543_v60, 0.0 }
 0x2f5   : > { %v9253_v3 = vpop.f32.mrf.mxu0 }
 0x2f8   : > { %v2220_v16 = vpop.f32.mrf.mxu2  ;;  %v2544_v42 = vpop.f32.mrf.mxu3 }
 0x2f9   : > { %v2545_v53 = vadd.f32 %v2544_v42, %v2216_v48  ;;  %v2221_v14 = vadd.f32 %v9189_v54, %v2220_v16 }
 0x2fb   : > { %v2851_v47 = vmax.f32 %v2545_v53, 0.0  ;;  %v9249_v1 = vpop.f32.mrf.mxu1 }
 0x2fd   : > { %2262 = vmatmul.bf16.gmra.mxu2 %v8973_v62  ;;  %2586 = vmatmul.bf16.gmra.mxu3 %v9139_v8  ;;  %v2974_v41 = vpack.c.bf16 %v2851_v47, %v2850_v56 }
 0x2ff   : > { %3130 = vmatmul.bf16.gmra.mxu0 %v2974_v41  ;;  %v9260_v41 = vpop.f32.mrf.mxu0 }
 0x300   : > { %v2223_v50 = vpop.f32.mrf.mxu2  ;;  %v2547_v30 = vpop.f32.mrf.mxu3 }
 0x301   : > { %v2548_v35 = vadd.f32 %v2547_v30, %v2219_v6  ;;  %v2224_v16 = vadd.f32 %v9189_v54, %v2223_v50 }
 0x303   : > { %v2852_v53 = vmax.f32 %v2548_v35, 0.0  ;;  %v9257_v56 = vpop.f32.mrf.mxu1 }
 0x308   : > { %v2225_v48 = vpop.f32.mrf.mxu2  ;;  %v2549_v60 = vpop.f32.mrf.mxu3 }
 0x309   : > { %v2550_v42 = vadd.f32 %v2549_v60, %v2221_v14  ;;  %v2226_v30 = vadd.f32 %v9189_v54, %v2225_v48 }
 0x30b   : > { %v2853_v62 = vmax.f32 %v2550_v42, 0.0  ;;  %v9263_v14 = vpop.f32.mrf.mxu1 }
 0x30d   : > { %2267 = vmatmul.bf16.gmra.mxu2 %v8991_v45  ;;  %2591 = vmatmul.bf16.gmra.mxu3 %v9155_v29  ;;  %v2975_v8 = vpack.c.bf16 %v2853_v62, %v2852_v53  ;;  %v9267_v62 = vpop.f32.mrf.mxu0 }
 0x30f   : > { %3135 = vmatmul.bf16.gmra.mxu0 %v2975_v8 }
 0x310   : > { %v2228_v47 = vpop.f32.mrf.mxu2  ;;  %v2552_v58 = vpop.f32.mrf.mxu3 }
 0x311   : > { %v2553_v6 = vadd.f32 %v2552_v58, %v2224_v16  ;;  %v2229_v48 = vadd.f32 %v9189_v54, %v2228_v47 }
 0x313   : > { %v2854_v42 = vmax.f32 %v2553_v6, 0.0  ;;  %v9269_v52 = vpop.f32.mrf.mxu1 }
 0x318   : > { %v2230_v35 = vpop.f32.mrf.mxu2  ;;  %v2554_v60 = vpop.f32.mrf.mxu3 }
 0x319   : > { %v2555_v45 = vadd.f32 %v2554_v60, %v2226_v30  ;;  %v2231_v58 = vadd.f32 %v9189_v54, %v2230_v35 }
 0x31b   : > { %v2855_v29 = vmax.f32 %v2555_v45, 0.0  ;;  %v9273_v45 = vpop.f32.mrf.mxu0 }
 0x31d   : > { %2272 = vmatmul.bf16.gmra.mxu2 %v9009_v25  ;;  %2596 = vmatmul.bf16.gmra.mxu3 %v9167_v17  ;;  %v2976_v53 = vpack.c.bf16 %v2855_v29, %v2854_v42  ;;  %v9275_v42 = vpop.f32.mrf.mxu1 }
 0x31f   : > { %3140 = vmatmul.bf16.gmra.mxu0 %v2976_v53 }
 0x320   : > { %v2233_v50 = vpop.f32.mrf.mxu2  ;;  %v2557_v8 = vpop.f32.mrf.mxu3 }
 0x321   : > { %v2558_v16 = vadd.f32 %v2557_v8, %v2229_v48  ;;  %v2234_v35 = vadd.f32 %v9189_v54, %v2233_v50  ;;  %v9290_v50 = vld [vmem:[%s11706_s5] ss:$0 sm:$0xff] }
 0x323   : > { %v2856_v25 = vmax.f32 %v2558_v16, 0.0  ;;  %v9279_v51 = vpop.f32.mrf.mxu0 }
 0x325   : > { %v9282_v8 = vpop.f32.mrf.mxu1 }
 0x328   : > { %v2235_v30 = vpop.f32.mrf.mxu2  ;;  %v2559_v6 = vpop.f32.mrf.mxu3 }
 0x329   : > { %v2560_v60 = vadd.f32 %v2559_v6, %v2231_v58  ;;  %v2236_v48 = vadd.f32 %v9189_v54, %v2235_v30 }
 0x32b   : > { %v2857_v17 = vmax.f32 %v2560_v60, 0.0 }
 0x32d   : > { %2277 = vmatmul.bf16.gmra.mxu2 %v9029_v40  ;;  %2601 = vmatmul.bf16.gmra.mxu3 %v9182_v7  ;;  %v2977_v29 = vpack.c.bf16 %v2857_v17, %v2856_v25  ;;  %v9292_v25 = vpop.f32.mrf.mxu1 }
 0x32f   : > { %3145 = vmatmul.bf16.gmra.mxu0 %v2977_v29 }
 0x330   : > { %v2238_v53 = vpop.f32.mrf.mxu2  ;;  %v2562_v47 = vpop.f32.mrf.mxu3 }
 0x331   : > { %v2563_v58 = vadd.f32 %v2562_v47, %v2234_v35  ;;  %v2239_v35 = vadd.f32 %v9189_v54, %v2238_v53 }
 0x333   : > { %v2858_v39 = vmax.f32 %v2563_v58, 0.0 }
 0x335   : > { %v9298_v27 = vpop.f32.mrf.mxu1 }
 0x338   : > { %v2240_v16 = vpop.f32.mrf.mxu2  ;;  %v2564_v6 = vpop.f32.mrf.mxu3 }
 0x339   : > { %v2565_v60 = vadd.f32 %v2564_v6, %v2236_v48 }
 0x33b   : > { %v2859_v40 = vmax.f32 %v2565_v60, 0.0 }
 0x33c   : > { %v3111_v38 = vpop.f32.mrf.mxu0 }
 0x33d   : > { %2282 = vmatmul.bf16.gmra.mxu2 %v9049_v44  ;;  %2606 = vmatmul.bf16.gmra.mxu3 %v9199_v49  ;;  %v2978_v7 = vpack.c.bf16 %v2859_v40, %v2858_v39  ;;  %v3112_v29 = vadd.f32 %v9290_v50, %v3111_v38  ;;  %v2241_v49 = vadd.f32 %v9189_v54, %v2240_v16 }
 0x33f   : > { %3150 = vmatmul.bf16.gmra.mxu0 %v2978_v7  ;;  %v3431_v39 = vmax.f32 %v3112_v29, 0.0 }
 0x340   : > { %v2243_v30 = vpop.f32.mrf.mxu2  ;;  %v2567_v17 = vpop.f32.mrf.mxu3 }
 0x341   : > { %v2568_v48 = vadd.f32 %v2567_v17, %v2239_v35 }
 0x343   : > { %v2860_v26 = vmax.f32 %v2568_v48, 0.0 }
 0x344   : > { %v3113_v47 = vpop.f32.mrf.mxu0 }
 0x345   : > { %v3114_v44 = vadd.f32 %v9290_v50, %v3113_v47  ;;  %v9304_v47 = vpop.f32.mrf.mxu1 }
 0x347   : > { %v3432_v58 = vmax.f32 %v3114_v44, 0.0  ;;  %v2244_v44 = vadd.f32 %v9189_v54, %v2243_v30 }
 0x348   : > { %v2245_v6 = vpop.f32.mrf.mxu2  ;;  %v2569_v60 = vpop.f32.mrf.mxu3 }
 0x349   : > { %v3559_v40 = vpack.c.bf16 %v3432_v58, %v3431_v39  ;;  %v2570_v7 = vadd.f32 %v2569_v60, %v2241_v49  ;;  %v2246_v39 = vadd.f32 %v9189_v54, %v2245_v6 }
 0x34b   : > { %v2861_v12 = vmax.f32 %v2570_v7, 0.0  ;;  %7977 = vmatmul.msk.bf16.vlgmr.msrb.gmra.mxu1 %vm3659_vm2, %v3559_v40 }
 0x34c   : > { %v3116_v38 = vpop.f32.mrf.mxu0 }
 0x34d   : > { %2287 = vmatmul.bf16.gmra.mxu2 %v9066_v36  ;;  %2611 = vmatmul.bf16.gmra.mxu3 %v9209_v24  ;;  %v2979_v53 = vpack.c.bf16 %v2861_v12, %v2860_v26  ;;  %v3117_v29 = vadd.f32 %v9290_v50, %v3116_v38 }
 0x34f   : > { %3155 = vmatmul.bf16.gmra.mxu0 %v2979_v53  ;;  %v3433_v48 = vmax.f32 %v3117_v29, 0.0  ;;  %v9312_v53 = vpop.f32.mrf.mxu1 }
 0x350   : > { %v2248_v16 = vpop.f32.mrf.mxu2  ;;  %v2572_v17 = vpop.f32.mrf.mxu3 }
 0x351   : > { %v2573_v58 = vadd.f32 %v2572_v17, %v2244_v44  ;;  %v2249_v44 = vadd.f32 %v9189_v54, %v2248_v16 }
 0x353   : > { %v2862_v40 = vmax.f32 %v2573_v58, 0.0 }
 0x354   : > { %v3118_v35 = vpop.f32.mrf.mxu0 }
 0x355   : > { %v3119_v49 = vadd.f32 %v9290_v50, %v3118_v35 }
 0x357   : > { %v3434_v36 = vmax.f32 %v3119_v49, 0.0 }
 0x358   : > { %v2250_v60 = vpop.f32.mrf.mxu2  ;;  %v2574_v24 = vpop.f32.mrf.mxu3 }
 0x359   : > { %v3560_v12 = vpack.c.bf16 %v3434_v36, %v3433_v48  ;;  %v2575_v26 = vadd.f32 %v2574_v24, %v2246_v39  ;;  %v1752_v39 = vmax.f32 %v9088_v5, 0.0  ;;  %v1754_v48 = vmax.f32 %v9098_v37, 0.0 }
 0x35a   : > { %v2251_v58 = vadd.f32 %v9189_v54, %v2250_v60 }
 0x35b   : > { %v2863_v7 = vmax.f32 %v2575_v26, 0.0  ;;  %7978 = vmatmul.msk.bf16.gmra.mxu1 %vm3659_vm2, %v3560_v12  ;;  %v9322_v26 = vpop.f32.mrf.mxu1 }
 0x35c   : > { %v3121_v38 = vpop.f32.mrf.mxu0 }
 0x35d   : > { %2292 = vmatmul.bf16.gmra.mxu2 %v9083_v10  ;;  %2616 = vmatmul.bf16.gmra.mxu3 %v9221_v4  ;;  %v2980_v30 = vpack.c.bf16 %v2863_v7, %v2862_v40  ;;  %v3122_v29 = vadd.f32 %v9290_v50, %v3121_v38  ;;  %v1749_v10 = vmax.f32 %v9225_v55, 0.0  ;;  %v1751_v4 = vmax.f32 %v9231_v15, 0.0 }
 0x35f   : > { %3160 = vmatmul.bf16.gmra.mxu0 %v2980_v30  ;;  %v3435_v36 = vmax.f32 %v3122_v29, 0.0  ;;  %v1966_v30 = vpack.c.bf16 %v1754_v48, %v1752_v39  ;;  %v1756_v48 = vmax.f32 %v9110_v32, 0.0 }
 0x360   : > { %v2253_v6 = vpop.f32.mrf.mxu2  ;;  %v2577_v17 = vpop.f32.mrf.mxu3 }
 0x361   : > { %v2578_v24 = vadd.f32 %v2577_v17, %v2249_v44 }
 0x363   : > { %v2864_v5 = vmax.f32 %v2578_v24, 0.0  ;;  %v9325_v17 = vpop.f32.mrf.mxu1 }
 0x364   : > { %v3123_v35 = vpop.f32.mrf.mxu0 }
 0x365   : > { %v3124_v49 = vadd.f32 %v9290_v50, %v3123_v35  ;;  %v1965_v35 = vpack.c.bf16 %v1751_v4, %v1749_v10  ;;  %v1758_v10 = vmax.f32 %v9120_v31, 0.0  ;;  %v1753_v4 = vmax.f32 %v9237_v21, 0.0 }
 0x367   : > { %v3436_v12 = vmax.f32 %v3124_v49, 0.0  ;;  %v2254_v49 = vadd.f32 %v9189_v54, %v2253_v6  ;;  %v1968_v6 = vpack.c.bf16 %v1758_v10, %v1756_v48  ;;  %v1762_v48 = vmax.f32 %v9143_v19, 0.0 }
 0x368   : > { %v2255_v40 = vpop.f32.mrf.mxu2  ;;  %v2579_v7 = vpop.f32.mrf.mxu3  ;;  %v1757_v10 = vmax.f32 %v9249_v1, 0.0 }
 0x369   : > { %v3561_v16 = vpack.c.bf16 %v3436_v12, %v3435_v36  ;;  %v2580_v38 = vadd.f32 %v2579_v7, %v2251_v58  ;;  %v2256_v58 = vadd.f32 %v9189_v54, %v2255_v40 }
 0x36b   : > { %v2865_v11 = vmax.f32 %v2580_v38, 0.0  ;;  %7979 = vmatmul.msk.bf16.gmra.mxu1 %vm3659_vm2, %v3561_v16  ;;  %v9336_v31 = vpop.f32.mrf.mxu1 }
 0x36c   : > { %v3126_v37 = vpop.f32.mrf.mxu0 }
 0x36d   : > { %2297 = vmatmul.bf16.gmra.mxu2 %v1966_v30  ;;  %2621 = vmatmul.bf16.gmra.mxu3 %v1965_v35  ;;  %v2981_v55 = vpack.c.bf16 %v2865_v11, %v2864_v5  ;;  %v3127_v29 = vadd.f32 %v9290_v50, %v3126_v37  ;;  %v1755_v11 = vmax.f32 %v9243_v61, 0.0 }
 0x36f   : > { %3165 = vmatmul.bf16.gmra.mxu0 %v2981_v55  ;;  %v3437_v36 = vmax.f32 %v3127_v29, 0.0  ;;  %v1967_v35 = vpack.c.bf16 %v1755_v11, %v1753_v4  ;;  %v1759_v4 = vmax.f32 %v9257_v56, 0.0 }
 0x370   : > { %v2258_v15 = vpop.f32.mrf.mxu2  ;;  %v2582_v60 = vpop.f32.mrf.mxu3 }
 0x371   : > { %v2583_v24 = vadd.f32 %v2582_v60, %v2254_v49  ;;  %v2259_v29 = vadd.f32 %v9189_v54, %v2258_v15 }
 0x373   : > { %v2866_v5 = vmax.f32 %v2583_v24, 0.0  ;;  %v9341_v49 = vpop.f32.mrf.mxu1 }
 0x374   : > { %v3128_v44 = vpop.f32.mrf.mxu0 }
 0x375   : > { %v3129_v39 = vadd.f32 %v9290_v50, %v3128_v44 }
 0x377   : > { %v3438_v12 = vmax.f32 %v3129_v39, 0.0  ;;  %v1760_v39 = vmax.f32 %v9131_v46, 0.0 }
 0x378   : > { %v2260_v7 = vpop.f32.mrf.mxu2  ;;  %v2584_v16 = vpop.f32.mrf.mxu3 }
 0x379   : > { %v3562_v38 = vpack.c.bf16 %v3438_v12, %v3437_v36  ;;  %v2585_v30 = vadd.f32 %v2584_v16, %v2256_v58  ;;  %v2261_v11 = vadd.f32 %v9189_v54, %v2260_v7 }
 0x37b   : > { %v2867_v37 = vmax.f32 %v2585_v30, 0.0  ;;  %7980 = vmatmul.msk.bf16.gmra.mxu1 %vm3659_vm2, %v3562_v38  ;;  %v1970_v30 = vpack.c.bf16 %v1762_v48, %v1760_v39  ;;  %v9349_v1 = vpop.f32.mrf.mxu1 }
 0x37c   : > { %v3131_v32 = vpop.f32.mrf.mxu0 }
 0x37d   : > { %2302 = vmatmul.bf16.gmra.mxu2 %v1968_v6  ;;  %2626 = vmatmul.bf16.gmra.mxu3 %v1967_v35  ;;  %v2982_v21 = vpack.c.bf16 %v2867_v37, %v2866_v5  ;;  %v3132_v55 = vadd.f32 %v9290_v50, %v3131_v32  ;;  %v1969_v6 = vpack.c.bf16 %v1759_v4, %v1757_v10 }
 0x37f   : > { %3170 = vmatmul.bf16.gmra.mxu0 %v2982_v21  ;;  %v3439_v58 = vmax.f32 %v3132_v55, 0.0  ;;  %v1764_v55 = vmax.f32 %v9147_v13, 0.0 }
 0x380   : > { %v2263_v61 = vpop.f32.mrf.mxu2  ;;  %v2587_v40 = vpop.f32.mrf.mxu3 }
 0x381   : > { %v2588_v36 = vadd.f32 %v2587_v40, %v2259_v29  ;;  %v2264_v21 = vadd.f32 %v9189_v54, %v2263_v61  ;;  %v1761_v29 = vmax.f32 %v9263_v14, 0.0 }
 0x383   : > { %v2868_v35 = vmax.f32 %v2588_v36, 0.0 }
 0x384   : > { %v3133_v60 = vpop.f32.mrf.mxu0 }
 0x385   : > { %v3134_v44 = vadd.f32 %v9290_v50, %v3133_v60  ;;  %v1766_v60 = vmax.f32 %v9159_v22, 0.0 }
 0x387   : > { %v3440_v24 = vmax.f32 %v3134_v44, 0.0  ;;  %v1763_v44 = vmax.f32 %v9269_v52, 0.0 }
 0x388   : > { %v2265_v12 = vpop.f32.mrf.mxu2  ;;  %v2589_v16 = vpop.f32.mrf.mxu3 }
 0x389   : > { %v3563_v15 = vpack.c.bf16 %v3440_v24, %v3439_v58  ;;  %v2590_v38 = vadd.f32 %v2589_v16, %v2261_v11  ;;  %v2266_v39 = vadd.f32 %v9189_v54, %v2265_v12  ;;  %v9359_v24 = vpop.f32.mrf.mxu1  ;;  %v1972_v16 = vpack.c.bf16 %v1766_v60, %v1764_v55 }
 0x38b   : > { %v2869_v5 = vmax.f32 %v2590_v38, 0.0  ;;  %7981 = vmatmul.msk.bf16.gmra.mxu1 %vm3659_vm2, %v3563_v15  ;;  %v1971_v15 = vpack.c.bf16 %v1763_v44, %v1761_v29 }
 0x38c   : > { %v3136_v46 = vpop.f32.mrf.mxu0 }
 0x38d   : > { %2307 = vmatmul.bf16.gmra.mxu2 %v1970_v30  ;;  %2631 = vmatmul.bf16.gmra.mxu3 %v1969_v6  ;;  %v2983_v19 = vpack.c.bf16 %v2869_v5, %v2868_v35  ;;  %v3137_v37 = vadd.f32 %v9290_v50, %v3136_v46 }
 0x38f   : > { %3175 = vmatmul.bf16.gmra.mxu0 %v2983_v19  ;;  %v3441_v48 = vmax.f32 %v3137_v37, 0.0  ;;  %v1768_v19 = vmax.f32 %v9171_v2, 0.0  ;;  %v1765_v37 = vmax.f32 %v9275_v42, 0.0 }
 0x390   : > { %v2268_v56 = vpop.f32.mrf.mxu2  ;;  %v2592_v7 = vpop.f32.mrf.mxu3 }
 0x391   : > { %v2593_v10 = vadd.f32 %v2592_v7, %v2264_v21  ;;  %v9363_v6 = vpop.f32.mrf.mxu1  ;;  %v2269_v5 = vadd.f32 %v9189_v54, %v2268_v56  ;;  %v1770_v7 = vmax.f32 %v9173_v18, 0.0 }
 0x393   : > { %v2870_v13 = vmax.f32 %v2593_v10, 0.0  ;;  %v1974_v56 = vpack.c.bf16 %v1770_v7, %v1768_v19 }
 0x394   : > { %v3138_v32 = vpop.f32.mrf.mxu0 }
 0x395   : > { %v3139_v40 = vadd.f32 %v9290_v50, %v3138_v32  ;;  %v1767_v32 = vmax.f32 %v9282_v8, 0.0 }
 0x397   : > { %v3442_v4 = vmax.f32 %v3139_v40, 0.0  ;;  %v1973_v10 = vpack.c.bf16 %v1767_v32, %v1765_v37 }
 0x398   : > { %v2270_v11 = vpop.f32.mrf.mxu2  ;;  %v2594_v58 = vpop.f32.mrf.mxu3 }
 0x399   : > { %v3564_v36 = vpack.c.bf16 %v3442_v4, %v3441_v48  ;;  %v2595_v61 = vadd.f32 %v2594_v58, %v2266_v39  ;;  %v2271_v21 = vadd.f32 %v9189_v54, %v2270_v11  ;;  %v9373_v18 = vpop.f32.mrf.mxu1 }
 0x39b   : > { %v2871_v38 = vmax.f32 %v2595_v61, 0.0  ;;  %7982 = vmatmul.msk.bf16.gmra.mxu1 %vm3659_vm2, %v3564_v36 }
 0x39c   : > { %v3141_v22 = vpop.f32.mrf.mxu0 }
 0x39d   : > { %2312 = vmatmul.bf16.gmra.mxu2 %v1972_v16  ;;  %2636 = vmatmul.bf16.gmra.mxu3 %v1971_v15  ;;  %v2984_v52 = vpack.c.bf16 %v2871_v38, %v2870_v13  ;;  %v3142_v30 = vadd.f32 %v9290_v50, %v3141_v22  ;;  %v1772_v13 = vmax.f32 %v9191_v28, 0.0  ;;  %v1774_v38 = vmax.f32 %v9197_v34, 0.0 }
 0x39e   : > { %v1769_v22 = vmax.f32 %v9292_v25, 0.0 }
 0x39f   : > { %3180 = vmatmul.bf16.gmra.mxu0 %v2984_v52  ;;  %v3443_v40 = vmax.f32 %v3142_v30, 0.0  ;;  %v1771_v52 = vmax.f32 %v9298_v27, 0.0  ;;  %v1976_v32 = vpack.c.bf16 %v1774_v38, %v1772_v13 }
 0x3a0   : > { %v2273_v14 = vpop.f32.mrf.mxu2  ;;  %v2597_v12 = vpop.f32.mrf.mxu3 }
 0x3a1   : > { %v2598_v55 = vadd.f32 %v2597_v12, %v2269_v5  ;;  %v2274_v16 = vadd.f32 %v9189_v54, %v2273_v14 }
 0x3a3   : > { %v2872_v4 = vmax.f32 %v2598_v55, 0.0 }
 0x3a4   : > { %v3143_v35 = vpop.f32.mrf.mxu0 }
 0x3a5   : > { %v3144_v46 = vadd.f32 %v9290_v50, %v3143_v35  ;;  %v9383_v35 = vpop.f32.mrf.mxu1 }
 0x3a7   : > { %v3444_v60 = vmax.f32 %v3144_v46, 0.0 }
 0x3a8   : > { %v2275_v29 = vpop.f32.mrf.mxu2  ;;  %v2599_v44 = vpop.f32.mrf.mxu3 }
 0x3a9   : > { %v3565_v39 = vpack.c.bf16 %v3444_v60, %v3443_v40  ;;  %v2600_v48 = vadd.f32 %v2599_v44, %v2271_v21  ;;  %v2276_v12 = vadd.f32 %v9189_v54, %v2275_v29  ;;  %v1975_v21 = vpack.c.bf16 %v1771_v52, %v1769_v22 }
 0x3ab   : > { %v2873_v58 = vmax.f32 %v2600_v48, 0.0  ;;  %7983 = vmatmul.msk.bf16.gmra.mxu1 %vm3659_vm2, %v3565_v39 }
 0x3ac   : > { %v3146_v2 = vpop.f32.mrf.mxu0 }
 0x3ad   : > { %2317 = vmatmul.bf16.gmra.mxu2 %v1974_v56  ;;  %2641 = vmatmul.bf16.gmra.mxu3 %v1973_v10  ;;  %v2985_v42 = vpack.c.bf16 %v2873_v58, %v2872_v4  ;;  %v3147_v36 = vadd.f32 %v9290_v50, %v3146_v2  ;;  %v9386_v60 = vpop.f32.mrf.mxu1  ;;  %v1776_v56 = vmax.f32 %v9204_v59, 0.0  ;;  %v1778_v10 = vmax.f32 %v9213_v43, 0.0  ;;  %v9398_v2 = vld [vmem:[%s11708_s7] ss:$0 sm:$0xff] }
 0x3ae   : > { %v1773_v4 = vmax.f32 %v9304_v47, 0.0  ;;  %v1775_v58 = vmax.f32 %v9312_v53, 0.0 }
 0x3af   : > { %3185 = vmatmul.bf16.gmra.mxu0 %v2985_v42  ;;  %v3445_v30 = vmax.f32 %v3147_v36, 0.0  ;;  %v1978_v43 = vpack.c.bf16 %v1778_v10, %v1776_v56 }
 0x3b0   : > { %v2278_v8 = vpop.f32.mrf.mxu2  ;;  %v2602_v11 = vpop.f32.mrf.mxu3  ;;  %v1977_v53 = vpack.c.bf16 %v1775_v58, %v1773_v4 }
 0x3b1   : > { %v2603_v5 = vadd.f32 %v2602_v11, %v2274_v16  ;;  %v2279_v39 = vadd.f32 %v9189_v54, %v2278_v8 }
 0x3b3   : > { %v2874_v28 = vmax.f32 %v2603_v5, 0.0 }
 0x3b4   : > { %v3148_v61 = vpop.f32.mrf.mxu0 }
 0x3b5   : > { %v3149_v15 = vadd.f32 %v9290_v50, %v3148_v61 }
 0x3b7   : > { %v3446_v46 = vmax.f32 %v3149_v15, 0.0 }
 0x3b8   : > { %v2280_v19 = vpop.f32.mrf.mxu2  ;;  %v2604_v7 = vpop.f32.mrf.mxu3 }
 0x3b9   : > { %v3566_v14 = vpack.c.bf16 %v3446_v46, %v3445_v30  ;;  %v2605_v37 = vadd.f32 %v2604_v7, %v2276_v12  ;;  %v2281_v42 = vadd.f32 %v9189_v54, %v2280_v19 }
 0x3bb   : > { %v2875_v40 = vmax.f32 %v2605_v37, 0.0  ;;  %7984 = vmatmul.msk.bf16.gmra.mxu1 %vm3659_vm2, %v3566_v14 }
 0x3bc   : > { %v3151_v34 = vpop.f32.mrf.mxu0 }
 0x3bd   : > { %2322 = vmatmul.bf16.gmra.mxu2 %v1976_v32  ;;  %2646 = vmatmul.bf16.gmra.mxu3 %v1975_v21  ;;  %v2986_v27 = vpack.c.bf16 %v2875_v40, %v2874_v28  ;;  %v3152_v29 = vadd.f32 %v9290_v50, %v3151_v34  ;;  %v1780_v28 = vmax.f32 %v9217_v33, 0.0 }
 0x3bf   : > { %3190 = vmatmul.bf16.gmra.mxu0 %v2986_v27  ;;  %v3447_v11 = vmax.f32 %v3152_v29, 0.0  ;;  %v1782_v27 = vmax.f32 %v9227_v57, 0.0  ;;  %v1779_v29 = vmax.f32 %v9325_v17, 0.0 }
 0x3c0   : > { %v2283_v25 = vpop.f32.mrf.mxu2  ;;  %v2607_v55 = vpop.f32.mrf.mxu3 }
 0x3c1   : > { %v2608_v36 = vadd.f32 %v2607_v55, %v2279_v39  ;;  %v2284_v40 = vadd.f32 %v9189_v54, %v2283_v25  ;;  %v1777_v55 = vmax.f32 %v9322_v26, 0.0  ;;  %v1980_v57 = vpack.c.bf16 %v1782_v27, %v1780_v28 }
 0x3c3   : > { %v2876_v38 = vmax.f32 %v2608_v36, 0.0  ;;  %v1979_v26 = vpack.c.bf16 %v1779_v29, %v1777_v55 }
 0x3c4   : > { %v3153_v44 = vpop.f32.mrf.mxu0 }
 0x3c5   : > { %v3154_v48 = vadd.f32 %v9290_v50, %v3153_v44 }
 0x3c7   : > { %v3448_v8 = vmax.f32 %v3154_v48, 0.0 }
 0x3c8   : > { %v2285_v61 = vpop.f32.mrf.mxu2  ;;  %v2609_v16 = vpop.f32.mrf.mxu3 }
 0x3c9   : > { %v3567_v15 = vpack.c.bf16 %v3448_v8, %v3447_v11  ;;  %v2610_v59 = vadd.f32 %v2609_v16, %v2281_v42  ;;  %v3861_v13 = vpop.f32.mrf.mxu1  ;;  %v2286_v39 = vadd.f32 %v9189_v54, %v2285_v61 }
 0x3ca   : > { %v9402_v47 = vadd.f32 %v9398_v2, %v3861_v13 }
 0x3cb   : > { %v2877_v22 = vmax.f32 %v2610_v59, 0.0  ;;  %7985 = vmatmul.msk.bf16.gmra.mxu1 %vm3659_vm2, %v3567_v15 }
 0x3cc   : > { %v3156_v52 = vpop.f32.mrf.mxu0  ;;  %v4438_v12 = vmul.f32 %v9402_v47, %v9402_v47 }
 0x3cd   : > { %2327 = vmatmul.bf16.gmra.mxu2 %v1978_v43  ;;  %2651 = vmatmul.bf16.gmra.mxu3 %v1977_v53  ;;  %v2987_v30 = vpack.c.bf16 %v2877_v22, %v2876_v38  ;;  %v3157_v37 = vadd.f32 %v9290_v50, %v3156_v52 }
 0x3ce   : > { %v4502_v5 = vsel %vm4245_vm3, %v4438_v12, 0.0  ;;  %v1784_v12 = vmax.f32 %v9235_v23, 0.0 }
 0x3cf   : > { %4503 = vadd.xlane.f32.xlu1 %v4502_v5  ;;  %3195 = vmatmul.bf16.gmra.mxu0 %v2987_v30  ;;  %v3449_v48 = vmax.f32 %v3157_v37, 0.0  ;;  %v1783_v37 = vmax.f32 %v9341_v49, 0.0 }
 0x3d0   : > { %v2288_v46 = vpop.f32.mrf.mxu2  ;;  %v2612_v19 = vpop.f32.mrf.mxu3 }
 0x3d1   : > { %v3863_v7 = vpop.f32.mrf.mxu1  ;;  %v2613_v56 = vadd.f32 %v2612_v19, %v2284_v40  ;;  %v2289_v30 = vadd.f32 %v9189_v54, %v2288_v46  ;;  %v1786_v19 = vmax.f32 %v9241_v20, 0.0 }
 0x3d2   : > { %v9409_v14 = vadd.f32 %v9398_v2, %v3863_v7  ;;  %v1781_v7 = vmax.f32 %v9336_v31, 0.0 }
 0x3d3   : > { %v2878_v36 = vmax.f32 %v2613_v56, 0.0  ;;  %v1982_v20 = vpack.c.bf16 %v1786_v19, %v1784_v12 }
 0x3d4   : > { %v3158_v32 = vpop.f32.mrf.mxu0  ;;  %v4439_v21 = vmul.f32 %v9409_v14, %v9409_v14  ;;  %v1981_v31 = vpack.c.bf16 %v1783_v37, %v1781_v7 }
 0x3d5   : > { %v3159_v34 = vadd.f32 %v9290_v50, %v3158_v32 }
 0x3d6   : > { %v4505_v44 = vsel %vm4245_vm3, %v4439_v21, 0.0 }
 0x3d7   : > { %v3450_v10 = vmax.f32 %v3159_v34, 0.0  ;;  %4506 = vadd.xlane.f32.xlu2 %v4505_v44 }
 0x3d8   : > { %v2290_v4 = vpop.f32.mrf.mxu2  ;;  %v2614_v33 = vpop.f32.mrf.mxu3 }
 0x3d9   : > { %v3568_v58 = vpack.c.bf16 %v3450_v10, %v3449_v48  ;;  %v2615_v25 = vadd.f32 %v2614_v33, %v2286_v39  ;;  %v3866_v42 = vpop.f32.mrf.mxu1  ;;  %v2291_v21 = vadd.f32 %v9189_v54, %v2290_v4 }
 0x3da   : > { %v9423_v11 = vadd.f32 %v9398_v2, %v3866_v42 }
 0x3db   : > { %v2879_v17 = vmax.f32 %v2615_v25, 0.0  ;;  %7986 = vmatmul.msk.bf16.gmra.mxu1 %vm3659_vm2, %v3568_v58 }
 0x3dc   : > { %v3161_v8 = vpop.f32.mrf.mxu0  ;;  %v4440_v61 = vmul.f32 %v9423_v11, %v9423_v11 }
 0x3dd   : > { %2332 = vmatmul.bf16.gmra.mxu2 %v1980_v57  ;;  %2656 = vmatmul.bf16.gmra.mxu3 %v1979_v26  ;;  %v2988_v16 = vpack.c.bf16 %v2879_v17, %v2878_v36  ;;  %v3162_v38 = vadd.f32 %v9290_v50, %v3161_v8  ;;  %v1788_v36 = vmax.f32 %v9247_v9, 0.0  ;;  %v9460_v17 = vld [vmem:[%s11704_s3] ss:$0 sm:$0xff] }
 0x3de   : > { %v4508_v15 = vsel %vm4245_vm3, %v4440_v61, 0.0 }
 0x3df   : > { %4509 = vadd.xlane.f32.xlu0 %v4508_v15  ;;  %3200 = vmatmul.bf16.gmra.mxu0 %v2988_v16  ;;  %v3451_v28 = vmax.f32 %v3162_v38, 0.0  ;;  %v1790_v16 = vmax.f32 %v9253_v3, 0.0  ;;  %v1785_v15 = vmax.f32 %v9349_v1, 0.0 }
 0x3e0   : > { %v2293_v59 = vpop.f32.mrf.mxu2  ;;  %v2617_v13 = vpop.f32.mrf.mxu3 }
 0x3e1   : > { %v3868_v43 = vpop.f32.mrf.mxu1  ;;  %v2618_v40 = vadd.f32 %v2617_v13, %v2289_v30  ;;  %v2294_v8 = vadd.f32 %v9460_v17, %v2293_v59  ;;  %v1787_v13 = vmax.f32 %v9359_v24, 0.0  ;;  %v1984_v3 = vpack.c.bf16 %v1790_v16, %v1788_v36 }
 0x3e2   : > { %v9430_v53 = vadd.f32 %v9398_v2, %v3868_v43 }
 0x3e3   : > { %v2880_v39 = vmax.f32 %v2618_v40, 0.0  ;;  %v1983_v1 = vpack.c.bf16 %v1787_v13, %v1785_v15 }
 0x3e4   : > { %v3163_v22 = vpop.f32.mrf.mxu0  ;;  %v4441_v52 = vmul.f32 %v9430_v53, %v9430_v53 }
 0x3e5   : > { %v3164_v5 = vadd.f32 %v9290_v50, %v3163_v22 }
 0x3e6   : > { %v4511_v32 = vsel %vm4245_vm3, %v4441_v52, 0.0 }
 0x3e7   : > { %v3452_v34 = vmax.f32 %v3164_v5, 0.0  ;;  %4512 = vadd.xlane.f32.xlu1 %v4511_v32 }
 0x3e8   : > { %v2295_v27 = vpop.f32.mrf.mxu2  ;;  %v2619_v23 = vpop.f32.mrf.mxu3 }
 0x3e9   : > { %v3569_v55 = vpack.c.bf16 %v3452_v34, %v3451_v28  ;;  %v2620_v46 = vadd.f32 %v2619_v23, %v2291_v21  ;;  %v3871_v29 = vpop.f32.mrf.mxu1  ;;  %v2296_v38 = vadd.f32 %v9460_v17, %v2295_v27 }
 0x3ea   : > { %v9444_v44 = vadd.f32 %v9398_v2, %v3871_v29 }
 0x3eb   : > { %v2881_v49 = vmax.f32 %v2620_v46, 0.0  ;;  %7987 = vmatmul.msk.bf16.gmra.mxu1 %vm3659_vm2, %v3569_v55 }
 0x3ec   : > { %v3166_v48 = vpop.f32.mrf.mxu0  ;;  %v4442_v54 = vmul.f32 %v9444_v44, %v9444_v44 }
 0x3ed   : > { %2337 = vmatmul.bf16.gmra.mxu2 %v1982_v20  ;;  %2661 = vmatmul.bf16.gmra.mxu3 %v1981_v31  ;;  %v2989_v56 = vpack.c.bf16 %v2881_v49, %v2880_v39  ;;  %v3167_v42 = vadd.f32 %v9290_v50, %v3166_v48  ;;  %v1792_v31 = vmax.f32 %v9260_v41, 0.0  ;;  %v1794_v48 = vmax.f32 %v9267_v62, 0.0 }
 0x3ee   : > { %v4514_v10 = vsel %vm4245_vm3, %v4442_v54, 0.0  ;;  %v1789_v54 = vmax.f32 %v9363_v6, 0.0 }
 0x3ef   : > { %4515 = vadd.xlane.f32.xlu2 %v4514_v10  ;;  %3205 = vmatmul.bf16.gmra.mxu0 %v2989_v56  ;;  %v3453_v9 = vmax.f32 %v3167_v42, 0.0  ;;  %v1791_v56 = vmax.f32 %v9373_v18, 0.0  ;;  %v1986_v62 = vpack.c.bf16 %v1794_v48, %v1792_v31 }
 0x3f0   : > { %v2298_v4 = vpop.f32.mrf.mxu2  ;;  %v2622_v33 = vpop.f32.mrf.mxu3 }
 0x3f1   : > { %v3873_v58 = vpop.f32.mrf.mxu1  ;;  %v2623_v22 = vadd.f32 %v2622_v33, %v2294_v8  ;;  %v2299_v39 = vadd.f32 %v9460_v17, %v2298_v4  ;;  %v1985_v6 = vpack.c.bf16 %v1791_v56, %v1789_v54 }
 0x3f2   : > { %v9451_v25 = vadd.f32 %v9398_v2, %v3873_v58 }
 0x3f3   : > { %v2882_v37 = vmax.f32 %v2623_v22, 0.0 }
 0x3f4   : > { %v3168_v57 = vpop.f32.mrf.mxu0  ;;  %v4443_v26 = vmul.f32 %v9451_v25, %v9451_v25 }
 0x3f5   : > { %v3169_v61 = vadd.f32 %v9290_v50, %v3168_v57 }
 0x3f6   : > { %v4517_v43 = vsel %vm4245_vm3, %v4443_v26, 0.0 }
 0x3f7   : > { %v3454_v52 = vmax.f32 %v3169_v61, 0.0  ;;  %4518 = vadd.xlane.f32.xlu0 %v4517_v43 }
 0x3f8   : > { %v2300_v12 = vpop.f32.mrf.mxu2  ;;  %v2624_v30 = vpop.f32.mrf.mxu3 }
 0x3f9   : > { %v3570_v5 = vpack.c.bf16 %v3454_v52, %v3453_v9  ;;  %v2625_v59 = vadd.f32 %v2624_v30, %v2296_v38  ;;  %v3876_v19 = vpop.f32.mrf.mxu1  ;;  %v2301_v33 = vadd.f32 %v9460_v17, %v2300_v12 }
 0x3fa   : > { %v9470_v7 = vadd.f32 %v9398_v2, %v3876_v19  ;;  %v1796_v19 = vmax.f32 %v9273_v45, 0.0 }
 0x3fb   : > { %v2883_v24 = vmax.f32 %v2625_v59, 0.0  ;;  %7988 = vmatmul.msk.bf16.gmra.mxu1 %vm3659_vm2, %v3570_v5 }
 0x3fc   : > { %v3171_v32 = vpop.f32.mrf.mxu0  ;;  %v4444_v21 = vmul.f32 %v9470_v7, %v9470_v7 }
 0x3fd   : > { %2342 = vmatmul.bf16.gmra.mxu2 %v1984_v3  ;;  %2666 = vmatmul.bf16.gmra.mxu3 %v1983_v1  ;;  %v2990_v28 = vpack.c.bf16 %v2883_v24, %v2882_v37  ;;  %v3172_v46 = vadd.f32 %v9290_v50, %v3171_v32  ;;  %v1798_v37 = vmax.f32 %v9279_v51, 0.0  ;;  %v1793_v24 = vmax.f32 %v9383_v35, 0.0 }
 0x3fe   : > { %v4520_v40 = vsel %vm4245_vm3, %v4444_v21, 0.0  ;;  %v1795_v32 = vmax.f32 %v9386_v60, 0.0 }
 0x3ff   : > { %4521 = vadd.xlane.f32.xlu1 %v4520_v40  ;;  %3210 = vmatmul.bf16.gmra.mxu0 %v2990_v28  ;;  %v3455_v58 = vmax.f32 %v3172_v46, 0.0  ;;  %v1988_v51 = vpack.c.bf16 %v1798_v37, %v1796_v19 }
 0x400   : > { %v2303_v34 = vpop.f32.mrf.mxu2  ;;  %v2627_v27 = vpop.f32.mrf.mxu3  ;;  %v1987_v35 = vpack.c.bf16 %v1795_v32, %v1793_v24 }
 0x401   : > { %v3878_v23 = vpop.f32.mrf.mxu1  ;;  %v2628_v42 = vadd.f32 %v2627_v27, %v2299_v39  ;;  %v2304_v3 = vadd.f32 %v9460_v17, %v2303_v34 }
 0x402   : > { %v9477_v55 = vadd.f32 %v9398_v2, %v3878_v23 }
 0x403   : > { %v2884_v16 = vmax.f32 %v2628_v42, 0.0 }
 0x404   : > { %v3173_v29 = vpop.f32.mrf.mxu0  ;;  %v4445_v20 = vmul.f32 %v9477_v55, %v9477_v55 }
 0x405   : > { %v3174_v49 = vadd.f32 %v9290_v50, %v3173_v29 }
 0x406   : > { %v4523_v10 = vsel %vm4245_vm3, %v4445_v20, 0.0 }
 0x407   : > { %v3456_v57 = vmax.f32 %v3174_v49, 0.0  ;;  %4524 = vadd.xlane.f32.xlu2 %v4523_v10 }
 0x408   : > { %v2305_v26 = vpop.f32.mrf.mxu2  ;;  %v2629_v41 = vpop.f32.mrf.mxu3 }
 0x409   : > { %v3571_v36 = vpack.c.bf16 %v3456_v57, %v3455_v58  ;;  %v2630_v4 = vadd.f32 %v2629_v41, %v2301_v33  ;;  %v3881_v8 = vpop.f32.mrf.mxu1  ;;  %v2306_v28 = vadd.f32 %v9460_v17, %v2305_v26 }
 0x40a   : > { %v9491_v61 = vadd.f32 %v9398_v2, %v3881_v8 }
 0x40b   : > { %v2885_v18 = vmax.f32 %v2630_v4, 0.0  ;;  %7989 = vmatmul.msk.bf16.gmra.mxu1 %vm3659_vm2, %v3571_v36 }
 0x40c   : > { %v3176_v15 = vpop.f32.mrf.mxu0  ;;  %v4446_v13 = vmul.f32 %v9491_v61, %v9491_v61 }
 0x40d   : > { %2347 = vmatmul.bf16.gmra.mxu2 %v1986_v62  ;;  %2671 = vmatmul.bf16.gmra.mxu3 %v1985_v6  ;;  %v2991_v43 = vpack.c.bf16 %v2885_v18, %v2884_v16  ;;  %v3177_v30 = vadd.f32 %v9290_v50, %v3176_v15 }
 0x40e   : > { %v4526_v38 = vsel %vm4245_vm3, %v4446_v13, 0.0 }
 0x40f   : > { %4527 = vadd.xlane.f32.xlu0 %v4526_v38  ;;  %3215 = vmatmul.bf16.gmra.mxu0 %v2991_v43  ;;  %v3457_v40 = vmax.f32 %v3177_v30, 0.0 }
 0x410   : > { %v2308_v9 = vpop.f32.mrf.mxu2  ;;  %v2632_v22 = vpop.f32.mrf.mxu3 }
 0x411   : > { %v3883_v52 = vpop.f32.mrf.mxu1  ;;  %v2633_v27 = vadd.f32 %v2632_v22, %v2304_v3  ;;  %v2309_v36 = vadd.f32 %v9460_v17, %v2308_v9 }
 0x412   : > { %v9498_v12 = vadd.f32 %v9398_v2, %v3883_v52 }
 0x413   : > { %v2886_v39 = vmax.f32 %v2633_v27, 0.0 }
 0x414   : > { %v3178_v5 = vpop.f32.mrf.mxu0  ;;  %v4447_v59 = vmul.f32 %v9498_v12, %v9498_v12 }
 0x415   : > { %v3179_v1 = vadd.f32 %v9290_v50, %v3178_v5 }
 0x416   : > { %v4529_v21 = vsel %vm4245_vm3, %v4447_v59, 0.0 }
 0x417   : > { %v3458_v23 = vmax.f32 %v3179_v1, 0.0  ;;  %4530 = vadd.xlane.f32.xlu1 %v4529_v21 }
 0x418   : > { %v2310_v46 = vpop.f32.mrf.mxu2  ;;  %v2634_v45 = vpop.f32.mrf.mxu3 }
 0x419   : > { %v3572_v29 = vpack.c.bf16 %v3458_v23, %v3457_v40  ;;  %v2635_v34 = vadd.f32 %v2634_v45, %v2306_v28  ;;  %v3886_v20 = vpop.f32.mrf.mxu1  ;;  %v2311_v62 = vadd.f32 %v9460_v17, %v2310_v46 }
 0x41a   : > { %v9512_v31 = vadd.f32 %v9398_v2, %v3886_v20 }
 0x41b   : > { %v2887_v60 = vmax.f32 %v2635_v34, 0.0  ;;  %7990 = vmatmul.msk.bf16.gmra.mxu1 %vm3659_vm2, %v3572_v29 }
 0x41c   : > { %v3181_v49 = vpop.f32.mrf.mxu0  ;;  %v4448_v48 = vmul.f32 %v9512_v31, %v9512_v31 }
 0x41d   : > { %2352 = vmatmul.bf16.gmra.mxu2 %v1988_v51  ;;  %2676 = vmatmul.bf16.gmra.mxu3 %v1987_v35  ;;  %v2992_v54 = vpack.c.bf16 %v2887_v60, %v2886_v39  ;;  %v3182_v57 = vadd.f32 %v9290_v50, %v3181_v49 }
 0x41e   : > { %v4532_v56 = vsel %vm4245_vm3, %v4448_v48, 0.0 }
 0x41f   : > { %4533 = vadd.xlane.f32.xlu2 %v4532_v56  ;;  %3220 = vmatmul.bf16.gmra.mxu0 %v2992_v54  ;;  %v3459_v6 = vmax.f32 %v3182_v57, 0.0  ;;  %v11818_v56 = vld [vmem:[#allocation5_spill] sm:$0xff] }
 0x420   : > { %v2313_v10 = vpop.f32.mrf.mxu2  ;;  %v2637_v33 = vpop.f32.mrf.mxu3 }
 0x421   : > { %v3888_v58 = vpop.f32.mrf.mxu1  ;;  %v2638_v16 = vadd.f32 %v2637_v33, %v2309_v36 }
 0x422   : > { %v9519_v42 = vadd.f32 %v9398_v2, %v3888_v58 }
 0x423   : > { %v2888_v30 = vmax.f32 %v2638_v16, 0.0 }
 0x424   : > { %v3183_v26 = vpop.f32.mrf.mxu0  ;;  %v4449_v41 = vmul.f32 %v9519_v42, %v9519_v42 }
 0x425   : > { %v3184_v4 = vadd.f32 %v9290_v50, %v3183_v26 }
 0x426   : > { %v4535_v8 = vsel %vm4245_vm3, %v4449_v41, 0.0 }
 0x427   : > { %v3460_v18 = vmax.f32 %v3184_v4, 0.0  ;;  %4536 = vadd.xlane.f32.xlu0 %v4535_v8  ;;  %v9562_v4 = vld [vmem:[%s11706_s5] ss:$0 sm:$0xff] }
 0x428   : > { %v2315_v15 = vpop.f32.mrf.mxu2  ;;  %v2639_v13 = vpop.f32.mrf.mxu3 }
 0x429   : > { %v3573_v43 = vpack.c.bf16 %v3460_v18, %v3459_v6  ;;  %v2640_v38 = vadd.f32 %v2639_v13, %v2311_v62  ;;  %v3891_v22 = vpop.f32.mrf.mxu1  ;;  %v2316_v23 = vadd.f32 %v9460_v17, %v2315_v15 }
 0x42a   : > { %v9529_v52 = vadd.f32 %v9398_v2, %v3891_v22 }
 0x42b   : > { %v2889_v9 = vmax.f32 %v2640_v38, 0.0  ;;  %7991 = vmatmul.msk.bf16.gmra.mxu1 %vm3659_vm2, %v3573_v43 }
 0x42c   : > { %v3186_v5 = vpop.f32.mrf.mxu0  ;;  %v4450_v59 = vmul.f32 %v9529_v52, %v9529_v52 }
 0x42d   : > { %2357 = vmatmul.bf16.gmra.mxu2 %v8639_v63  ;;  %2681 = vmatmul.bf16.gmra.mxu3 %v8641_v0  ;;  %v2993_v19 = vpack.c.bf16 %v2889_v9, %v2888_v30  ;;  %v3187_v21 = vadd.f32 %v9290_v50, %v3186_v5  ;;  %v2314_v63 = vadd.f32 %v9460_v17, %v2313_v10  ;;  %v11819_v10 = vld [vmem:[#allocation6_spill] sm:$0xff] }
 0x42e   : > { %v4538_v3 = vsel %vm4245_vm3, %v4450_v59, 0.0 }
 0x42f   : > { %4539 = vadd.xlane.f32.xlu1 %v4538_v3  ;;  %3225 = vmatmul.bf16.gmra.mxu0 %v2993_v19  ;;  %v3461_v46 = vmax.f32 %v3187_v21, 0.0 }
 0x430   : > { %v2318_v1 = vpop.f32.mrf.mxu2  ;;  %v2642_v37 = vpop.f32.mrf.mxu3 }
 0x431   : > { %v3893_v24 = vpop.f32.mrf.mxu1  ;;  %v2643_v45 = vadd.f32 %v2642_v37, %v2314_v63  ;;  %v2319_v16 = vadd.f32 %v9460_v17, %v2318_v1 }
 0x432   : > { %v9538_v32 = vadd.f32 %v9398_v2, %v3893_v24 }
 0x433   : > { %v2890_v49 = vmax.f32 %v2643_v45, 0.0 }
 0x434   : > { %v3188_v28 = vpop.f32.mrf.mxu0  ;;  %v4451_v40 = vmul.f32 %v9538_v32, %v9538_v32 }
 0x435   : > { %v3189_v0 = vadd.f32 %v9290_v50, %v3188_v28  ;;  %v11820_v28 = vld [vmem:[#allocation7_spill] sm:$0xff] }
 0x436   : > { %v4541_v27 = vsel %vm4245_vm3, %v4451_v40, 0.0  ;;  %v11821_v40 = vld [vmem:[#allocation8_spill] sm:$0xff] }
 0x437   : > { %v3462_v29 = vmax.f32 %v3189_v0, 0.0  ;;  %4542 = vadd.xlane.f32.xlu2 %v4541_v27 }
 0x438   : > { %v2320_v34 = vpop.f32.mrf.mxu2  ;;  %v2644_v20 = vpop.f32.mrf.mxu3 }
 0x439   : > { %v3574_v51 = vpack.c.bf16 %v3462_v29, %v3461_v46  ;;  %v2645_v35 = vadd.f32 %v2644_v20, %v2316_v23  ;;  %v3896_v39 = vpop.f32.mrf.mxu1  ;;  %v2321_v13 = vadd.f32 %v9460_v17, %v2320_v34 }
 0x43a   : > { %v9548_v60 = vadd.f32 %v9398_v2, %v3896_v39 }
 0x43b   : > { %v2891_v48 = vmax.f32 %v2645_v35, 0.0  ;;  %7992 = vmatmul.msk.bf16.gmra.mxu1 %vm3659_vm2, %v3574_v51 }
 0x43c   : > { %v3191_v50 = vpop.f32.mrf.mxu0  ;;  %v4452_v54 = vmul.f32 %v9548_v60, %v9548_v60 }
 0x43d   : > { %2362 = vmatmul.bf16.gmra.mxu2 %v11818_v56  ;;  %2686 = vmatmul.bf16.gmra.mxu3 %v11819_v10  ;;  %v2994_v33 = vpack.c.bf16 %v2891_v48, %v2890_v49  ;;  %v3192_v8 = vadd.f32 %v9562_v4, %v3191_v50 }
 0x43e   : > { %v4544_v58 = vsel %vm4245_vm3, %v4452_v54, 0.0 }
 0x43f   : > { %4545 = vadd.xlane.f32.xlu0 %v4544_v58  ;;  %3230 = vmatmul.bf16.gmra.mxu0 %v2994_v33  ;;  %v3463_v43 = vmax.f32 %v3192_v8, 0.0 }
 0x440   : > { %v2323_v57 = vpop.f32.mrf.mxu2  ;;  %v2647_v26 = vpop.f32.mrf.mxu3 }
 0x441   : > { %v3898_v41 = vpop.f32.mrf.mxu1  ;;  %v2648_v38 = vadd.f32 %v2647_v26, %v2319_v16  ;;  %v2324_v51 = vadd.f32 %v9460_v17, %v2323_v57  ;;  %v11822_v16 = vld [vmem:[#allocation9_spill] sm:$0xff] }
 0x442   : > { %v9557_v36 = vadd.f32 %v9398_v2, %v3898_v41 }
 0x443   : > { %v2892_v37 = vmax.f32 %v2648_v38, 0.0 }
 0x444   : > { %v3193_v62 = vpop.f32.mrf.mxu0  ;;  %v4453_v6 = vmul.f32 %v9557_v36, %v9557_v36 }
 0x445   : > { %v3194_v18 = vadd.f32 %v9562_v4, %v3193_v62 }
 0x446   : > { %v4547_v15 = vsel %vm4245_vm3, %v4453_v6, 0.0 }
 0x447   : > { %v3464_v22 = vmax.f32 %v3194_v18, 0.0  ;;  %4548 = vadd.xlane.f32.xlu1 %v4547_v15  ;;  %v11823_v18 = vld [vmem:[#allocation10_spill] sm:$0xff] }
 0x448   : > { %v2325_v30 = vpop.f32.mrf.mxu2  ;;  %v2649_v9 = vpop.f32.mrf.mxu3 }
 0x449   : > { %v3575_v5 = vpack.c.bf16 %v3464_v22, %v3463_v43  ;;  %v2650_v59 = vadd.f32 %v2649_v9, %v2321_v13  ;;  %v3901_v19 = vpop.f32.mrf.mxu1  ;;  %v2326_v49 = vadd.f32 %v9460_v17, %v2325_v30 }
 0x44a   : > { %v9572_v3 = vadd.f32 %v9398_v2, %v3901_v19 }
 0x44b   : > { %v2893_v1 = vmax.f32 %v2650_v59, 0.0  ;;  %7993 = vmatmul.msk.bf16.gmra.mxu1 %vm3659_vm2, %v3575_v5 }
 0x44c   : > { %v3196_v24 = vpop.f32.mrf.mxu0  ;;  %v4454_v21 = vmul.f32 %v9572_v3, %v9572_v3 }
 0x44d   : > { %2367 = vmatmul.bf16.gmra.mxu2 %v11820_v28  ;;  %2691 = vmatmul.bf16.gmra.mxu3 %v11821_v40  ;;  %v2995_v63 = vpack.c.bf16 %v2893_v1, %v2892_v37  ;;  %v3197_v29 = vadd.f32 %v9562_v4, %v3196_v24 }
 0x44e   : > { %v4550_v0 = vsel %vm4245_vm3, %v4454_v21, 0.0 }
 0x44f   : > { %4551 = vadd.xlane.f32.xlu2 %v4550_v0  ;;  %3235 = vmatmul.bf16.gmra.mxu0 %v2995_v63  ;;  %v3465_v48 = vmax.f32 %v3197_v29, 0.0 }
 0x450   : > { %v2328_v27 = vpop.f32.mrf.mxu2  ;;  %v2652_v23 = vpop.f32.mrf.mxu3 }
 0x451   : > { %v3903_v46 = vpop.f32.mrf.mxu1  ;;  %v2653_v50 = vadd.f32 %v2652_v23, %v2324_v51  ;;  %v2329_v19 = vadd.f32 %v9460_v17, %v2328_v27 }
 0x452   : > { %v9581_v45 = vadd.f32 %v9398_v2, %v3903_v46 }
 0x453   : > { %v2894_v8 = vmax.f32 %v2653_v50, 0.0 }
 0x454   : > { %v3198_v34 = vpop.f32.mrf.mxu0  ;;  %v4455_v20 = vmul.f32 %v9581_v45, %v9581_v45 }
 0x455   : > { %v3199_v35 = vadd.f32 %v9562_v4, %v3198_v34 }
 0x456   : > { %v4553_v39 = vsel %vm4245_vm3, %v4455_v20, 0.0 }
 0x457   : > { %v3466_v54 = vmax.f32 %v3199_v35, 0.0  ;;  %4554 = vadd.xlane.f32.xlu0 %v4553_v39  ;;  %v11824_v39 = vld [vmem:[#allocation11_spill] sm:$0xff] }
 0x458   : > { %v2330_v56 = vpop.f32.mrf.mxu2  ;;  %v2654_v10 = vpop.f32.mrf.mxu3 }
 0x459   : > { %v3576_v33 = vpack.c.bf16 %v3466_v54, %v3465_v48  ;;  %v2655_v58 = vadd.f32 %v2654_v10, %v2326_v49  ;;  %v3906_v26 = vpop.f32.mrf.mxu1  ;;  %v2331_v24 = vadd.f32 %v9460_v17, %v2330_v56  ;;  %v11825_v49 = vld [vmem:[#allocation12_spill] sm:$0xff] }
 0x45a   : > { %v9591_v41 = vadd.f32 %v9398_v2, %v3906_v26 }
 0x45b   : > { %v2895_v57 = vmax.f32 %v2655_v58, 0.0  ;;  %7994 = vmatmul.msk.bf16.gmra.mxu1 %vm3659_vm2, %v3576_v33 }
 0x45c   : > { %v3201_v62 = vpop.f32.mrf.mxu0  ;;  %v4456_v6 = vmul.f32 %v9591_v41, %v9591_v41 }
 0x45d   : > { %2372 = vmatmul.bf16.gmra.mxu2 %v11822_v16  ;;  %2696 = vmatmul.bf16.gmra.mxu3 %v11823_v18  ;;  %v2996_v15 = vpack.c.bf16 %v2895_v57, %v2894_v8  ;;  %v3202_v9 = vadd.f32 %v9562_v4, %v3201_v62 }
 0x45e   : > { %v4556_v13 = vsel %vm4245_vm3, %v4456_v6, 0.0 }
 0x45f   : > { %4557 = vadd.xlane.f32.xlu1 %v4556_v13  ;;  %3240 = vmatmul.bf16.gmra.mxu0 %v2996_v15  ;;  %v3467_v21 = vmax.f32 %v3202_v9, 0.0 }
 0x460   : > { %v2333_v43 = vpop.f32.mrf.mxu2  ;;  %v2657_v38 = vpop.f32.mrf.mxu3 }
 0x461   : > { %v3908_v22 = vpop.f32.mrf.mxu1  ;;  %v2658_v28 = vadd.f32 %v2657_v38, %v2329_v19  ;;  %v2334_v57 = vadd.f32 %v9460_v17, %v2333_v43 }
 0x462   : > { %v9600_v30 = vadd.f32 %v9398_v2, %v3908_v22 }
 0x463   : > { %v2896_v20 = vmax.f32 %v2658_v28, 0.0  ;;  %v11827_v28 = vld [vmem:[#allocation14_spill] sm:$0xff] }
 0x464   : > { %v3203_v5 = vpop.f32.mrf.mxu0  ;;  %v4457_v59 = vmul.f32 %v9600_v30, %v9600_v30 }
 0x465   : > { %v3204_v37 = vadd.f32 %v9562_v4, %v3203_v5 }
 0x466   : > { %v4559_v1 = vsel %vm4245_vm3, %v4457_v59, 0.0 }
 0x467   : > { %v3468_v40 = vmax.f32 %v3204_v37, 0.0  ;;  %4560 = vadd.xlane.f32.xlu2 %v4559_v1 }
 0x468   : > { %v2335_v63 = vpop.f32.mrf.mxu2  ;;  %v2659_v0 = vpop.f32.mrf.mxu3 }
 0x469   : > { %v3577_v23 = vpack.c.bf16 %v3468_v40, %v3467_v21  ;;  %v2660_v46 = vadd.f32 %v2659_v0, %v2331_v24  ;;  %v3911_v29 = vpop.f32.mrf.mxu1  ;;  %v2336_v16 = vadd.f32 %v9460_v17, %v2335_v63  ;;  %v11826_v21 = vld [vmem:[#allocation13_spill] sm:$0xff] }
 0x46a   : > { %v9610_v34 = vadd.f32 %v9398_v2, %v3911_v29 }
 0x46b   : > { %v2897_v27 = vmax.f32 %v2660_v46, 0.0  ;;  %7995 = vmatmul.msk.bf16.gmra.mxu1 %vm3659_vm2, %v3577_v23 }
 0x46c   : > { %v3206_v51 = vpop.f32.mrf.mxu0  ;;  %v4458_v35 = vmul.f32 %v9610_v34, %v9610_v34 }
 0x46d   : > { %2377 = vmatmul.bf16.gmra.mxu2 %v11824_v39  ;;  %2701 = vmatmul.bf16.gmra.mxu3 %v11825_v49  ;;  %v2997_v48 = vpack.c.bf16 %v2897_v27, %v2896_v20  ;;  %v3207_v58 = vadd.f32 %v9562_v4, %v3206_v51 }
 0x46e   : > { %v4562_v50 = vsel %vm4245_vm3, %v4458_v35, 0.0 }
 0x46f   : > { %4563 = vadd.xlane.f32.xlu0 %v4562_v50  ;;  %3245 = vmatmul.bf16.gmra.mxu0 %v2997_v48  ;;  %v3469_v18 = vmax.f32 %v3207_v58, 0.0 }
 0x470   : > { %v2338_v54 = vpop.f32.mrf.mxu2  ;;  %v2662_v56 = vpop.f32.mrf.mxu3 }
 0x471   : > { %v3913_v10 = vpop.f32.mrf.mxu1  ;;  %v2663_v15 = vadd.f32 %v2662_v56, %v2334_v57  ;;  %v2339_v35 = vadd.f32 %v9460_v17, %v2338_v54 }
 0x472   : > { %v9619_v33 = vadd.f32 %v9398_v2, %v3913_v10 }
 0x473   : > { %v2898_v37 = vmax.f32 %v2663_v15, 0.0 }
 0x474   : > { %v3208_v26 = vpop.f32.mrf.mxu0  ;;  %v4459_v8 = vmul.f32 %v9619_v33, %v9619_v33 }
 0x475   : > { %v3209_v62 = vadd.f32 %v9562_v4, %v3208_v26 }
 0x476   : > { %v4565_v6 = vsel %vm4245_vm3, %v4459_v8, 0.0 }
 0x477   : > { %v3470_v13 = vmax.f32 %v3209_v62, 0.0  ;;  %4566 = vadd.xlane.f32.xlu1 %v4565_v6 }
 0x478   : > { %v2340_v38 = vpop.f32.mrf.mxu2  ;;  %v2664_v22 = vpop.f32.mrf.mxu3 }
 0x479   : > { %v3578_v9 = vpack.c.bf16 %v3470_v13, %v3469_v18  ;;  %v2665_v5 = vadd.f32 %v2664_v22, %v2336_v16  ;;  %v3916_v59 = vpop.f32.mrf.mxu1  ;;  %v2341_v48 = vadd.f32 %v9460_v17, %v2340_v38  ;;  %v11828_v13 = vld [vmem:[#allocation15_spill] sm:$0xff]  ;;  %v11829_v38 = vld [vmem:[#allocation16_spill] sm:$0xff] }
 0x47a   : > { %v9629_v19 = vadd.f32 %v9398_v2, %v3916_v59 }
 0x47b   : > { %v2899_v43 = vmax.f32 %v2665_v5, 0.0  ;;  %7996 = vmatmul.msk.bf16.gmra.mxu1 %vm3659_vm2, %v3578_v9 }
 0x47c   : > { %v3211_v1 = vpop.f32.mrf.mxu0  ;;  %v4460_v24 = vmul.f32 %v9629_v19, %v9629_v19 }
 0x47d   : > { %2382 = vmatmul.bf16.gmra.mxu2 %v11826_v21  ;;  %2706 = vmatmul.bf16.gmra.mxu3 %v11827_v28  ;;  %v2998_v40 = vpack.c.bf16 %v2899_v43, %v2898_v37  ;;  %v3212_v20 = vadd.f32 %v9562_v4, %v3211_v1 }
 0x47e   : > { %v4568_v63 = vsel %vm4245_vm3, %v4460_v24, 0.0 }
 0x47f   : > { %4569 = vadd.xlane.f32.xlu2 %v4568_v63  ;;  %3250 = vmatmul.bf16.gmra.mxu0 %v2998_v40  ;;  %v3471_v50 = vmax.f32 %v3212_v20, 0.0 }
 0x480   : > { %v2343_v0 = vpop.f32.mrf.mxu2  ;;  %v2667_v23 = vpop.f32.mrf.mxu3 }
 0x481   : > { %v3918_v46 = vpop.f32.mrf.mxu1  ;;  %v2668_v56 = vadd.f32 %v2667_v23, %v2339_v35  ;;  %v2344_v28 = vadd.f32 %v9460_v17, %v2343_v0 }
 0x482   : > { %v9638_v29 = vadd.f32 %v9398_v2, %v3918_v46 }
 0x483   : > { %v2900_v16 = vmax.f32 %v2668_v56, 0.0 }
 0x484   : > { %v3213_v27 = vpop.f32.mrf.mxu0  ;;  %v4461_v51 = vmul.f32 %v9638_v29, %v9638_v29 }
 0x485   : > { %v3214_v39 = vadd.f32 %v9562_v4, %v3213_v27 }
 0x486   : > { %v4571_v49 = vsel %vm4245_vm3, %v4461_v51, 0.0 }
 0x487   : > { %v3472_v10 = vmax.f32 %v3214_v39, 0.0  ;;  %4572 = vadd.xlane.f32.xlu0 %v4571_v49 }
 0x488   : > { %v2345_v58 = vpop.f32.mrf.mxu2  ;;  %v2669_v26 = vpop.f32.mrf.mxu3 }
 0x489   : > { %v3579_v8 = vpack.c.bf16 %v3472_v10, %v3471_v50  ;;  %v2670_v57 = vadd.f32 %v2669_v26, %v2341_v48  ;;  %v3921_v62 = vpop.f32.mrf.mxu1  ;;  %v2346_v23 = vadd.f32 %v9460_v17, %v2345_v58  ;;  %v11832_v26 = vld [vmem:[#allocation17_spill] sm:$0xff] }
 0x48a   : > { %v9648_v6 = vadd.f32 %v9398_v2, %v3921_v62 }
 0x48b   : > { %v2901_v54 = vmax.f32 %v2670_v57, 0.0  ;;  %7997 = vmatmul.msk.bf16.gmra.mxu1 %vm3659_vm2, %v3579_v8  ;;  %v11833_v8 = vld [vmem:[#allocation18_spill] sm:$0xff] }
 0x48c   : > { %v3216_v18 = vpop.f32.mrf.mxu0  ;;  %v4462_v15 = vmul.f32 %v9648_v6, %v9648_v6 }
 0x48d   : > { %2387 = vmatmul.bf16.gmra.mxu2 %v11828_v13  ;;  %2711 = vmatmul.bf16.gmra.mxu3 %v11829_v38  ;;  %v2999_v22 = vpack.c.bf16 %v2901_v54, %v2900_v16  ;;  %v3217_v1 = vadd.f32 %v9562_v4, %v3216_v18 }
 0x48e   : > { %v4574_v9 = vsel %vm4245_vm3, %v4462_v15, 0.0 }
 0x48f   : > { %4575 = vadd.xlane.f32.xlu1 %v4574_v9  ;;  %3255 = vmatmul.bf16.gmra.mxu0 %v2999_v22  ;;  %v3473_v46 = vmax.f32 %v3217_v1, 0.0 }
 0x490   : > { %v2348_v5 = vpop.f32.mrf.mxu2  ;;  %v2672_v59 = vpop.f32.mrf.mxu3 }
 0x491   : > { %v3923_v37 = vpop.f32.mrf.mxu1  ;;  %v2673_v20 = vadd.f32 %v2672_v59, %v2344_v28  ;;  %v2349_v9 = vadd.f32 %v9460_v17, %v2348_v5 }
 0x492   : > { %v9657_v43 = vadd.f32 %v9398_v2, %v3923_v37 }
 0x493   : > { %v2902_v56 = vmax.f32 %v2673_v20, 0.0 }
 0x494   : > { %11830 = vst [vmem:[#allocation5_spill] sm:$0xff] %v9657_v43  ;;  %v3218_v24 = vpop.f32.mrf.mxu0  ;;  %v4463_v21 = vmul.f32 %v9657_v43, %v9657_v43 }
 0x495   : > { %v3219_v40 = vadd.f32 %v9562_v4, %v3218_v24 }
 0x496   : > { %v4577_v63 = vsel %vm4245_vm3, %v4463_v21, 0.0 }
 0x497   : > { %v3474_v27 = vmax.f32 %v3219_v40, 0.0  ;;  %4578 = vadd.xlane.f32.xlu2 %v4577_v63 }
 0x498   : > { %v2350_v51 = vpop.f32.mrf.mxu2  ;;  %v2674_v35 = vpop.f32.mrf.mxu3 }
 0x499   : > { %v3580_v39 = vpack.c.bf16 %v3474_v27, %v3473_v46  ;;  %v2675_v49 = vadd.f32 %v2674_v35, %v2346_v23  ;;  %v3926_v48 = vpop.f32.mrf.mxu1  ;;  %v2351_v1 = vadd.f32 %v9460_v17, %v2350_v51 }
 0x49a   : > { %v9667_v50 = vadd.f32 %v9398_v2, %v3926_v48  ;;  %v11837_v48 = vld [vmem:[#allocation20_spill] sm:$0xff] }
 0x49b   : > { %v2903_v0 = vmax.f32 %v2675_v49, 0.0  ;;  %7998 = vmatmul.msk.bf16.gmra.mxu1 %vm3659_vm2, %v3580_v39  ;;  %v11836_v49 = vld [vmem:[#allocation19_spill] sm:$0xff] }
 0x49c   : > { %11831 = vst [vmem:[#allocation6_spill] sm:$0xff] %v9667_v50  ;;  %v3221_v10 = vpop.f32.mrf.mxu0  ;;  %v4464_v58 = vmul.f32 %v9667_v50, %v9667_v50 }
 0x49d   : > { %2392 = vmatmul.bf16.gmra.mxu2 %v11832_v26  ;;  %2716 = vmatmul.bf16.gmra.mxu3 %v11833_v8  ;;  %v3000_v57 = vpack.c.bf16 %v2903_v0, %v2902_v56  ;;  %v3222_v13 = vadd.f32 %v9562_v4, %v3221_v10 }
 0x49e   : > { %v4580_v62 = vsel %vm4245_vm3, %v4464_v58, 0.0 }
 0x49f   : > { %4581 = vadd.xlane.f32.xlu0 %v4580_v62  ;;  %3260 = vmatmul.bf16.gmra.mxu0 %v3000_v57  ;;  %v3475_v24 = vmax.f32 %v3222_v13, 0.0 }
 0x4a0   : > { %v2353_v16 = vpop.f32.mrf.mxu2  ;;  %v2677_v54 = vpop.f32.mrf.mxu3 }
 0x4a1   : > { %v3928_v18 = vpop.f32.mrf.mxu1  ;;  %v2678_v21 = vadd.f32 %v2677_v54, %v2349_v9 }
 0x4a2   : > { %v9676_v15 = vadd.f32 %v9398_v2, %v3928_v18  ;;  %v2354_v18 = vadd.f32 %v9460_v17, %v2353_v16 }
 0x4a3   : > { %v2904_v35 = vmax.f32 %v2678_v21, 0.0 }
 0x4a4   : > { %11834 = vst [vmem:[#allocation7_spill] sm:$0xff] %v9676_v15  ;;  %v3223_v38 = vpop.f32.mrf.mxu0  ;;  %v4465_v22 = vmul.f32 %v9676_v15, %v9676_v15 }
 0x4a5   : > { %v3224_v59 = vadd.f32 %v9562_v4, %v3223_v38 }
 0x4a6   : > { %v4583_v37 = vsel %vm4245_vm3, %v4465_v22, 0.0 }
 0x4a7   : > { %v3476_v28 = vmax.f32 %v3224_v59, 0.0  ;;  %4584 = vadd.xlane.f32.xlu1 %v4583_v37 }
 0x4a8   : > { %v2355_v40 = vpop.f32.mrf.mxu2  ;;  %v2679_v63 = vpop.f32.mrf.mxu3 }
 0x4a9   : > { %v3581_v23 = vpack.c.bf16 %v3476_v28, %v3475_v24  ;;  %v2680_v46 = vadd.f32 %v2679_v63, %v2351_v1  ;;  %v3931_v20 = vpop.f32.mrf.mxu1  ;;  %v2356_v22 = vadd.f32 %v9460_v17, %v2355_v40  ;;  %v9707_v63 = vld [vmem:[%s11708_s7] ss:$0 sm:$0xff] }
 0x4aa   : > { %v9686_v27 = vadd.f32 %v9398_v2, %v3931_v20 }
 0x4ab   : > { %v2905_v5 = vmax.f32 %v2680_v46, 0.0  ;;  %7999 = vmatmul.msk.bf16.gmra.mxu1 %vm3659_vm2, %v3581_v23 }
 0x4ac   : > { %11835 = vst [vmem:[#allocation8_spill] sm:$0xff] %v9686_v27  ;;  %v3226_v39 = vpop.f32.mrf.mxu0  ;;  %v4466_v51 = vmul.f32 %v9686_v27, %v9686_v27 }
 0x4ad   : > { %2397 = vmatmul.bf16.gmra.mxu2 %v11836_v49  ;;  %2721 = vmatmul.bf16.gmra.mxu3 %v11837_v48  ;;  %v3001_v56 = vpack.c.bf16 %v2905_v5, %v2904_v35  ;;  %v3227_v57 = vadd.f32 %v9562_v4, %v3226_v39  ;;  %v11840_v35 = vld [vmem:[#allocation21_spill] sm:$0xff]  ;;  %v11841_v5 = vld [vmem:[#allocation22_spill] sm:$0xff] }
 0x4ae   : > { %v4586_v0 = vsel %vm4245_vm3, %v4466_v51, 0.0 }
 0x4af   : > { %4587 = vadd.xlane.f32.xlu2 %v4586_v0  ;;  %3265 = vmatmul.bf16.gmra.mxu0 %v3001_v56  ;;  %v3477_v9 = vmax.f32 %v3227_v57, 0.0 }
 0x4b0   : > { %v2358_v10 = vpop.f32.mrf.mxu2  ;;  %v2682_v58 = vpop.f32.mrf.mxu3 }
 0x4b1   : > { %v3933_v26 = vpop.f32.mrf.mxu1  ;;  %v2683_v59 = vadd.f32 %v2682_v58, %v2354_v18 }
 0x4b2   : > { %v9695_v8 = vadd.f32 %v9398_v2, %v3933_v26 }
 0x4b3   : > { %v2906_v23 = vmax.f32 %v2683_v59, 0.0 }
 0x4b4   : > { %11838 = vst [vmem:[#allocation9_spill] sm:$0xff] %v9695_v8  ;;  %v3228_v62 = vpop.f32.mrf.mxu0  ;;  %v4467_v54 = vmul.f32 %v9695_v8, %v9695_v8 }
 0x4b5   : > { %v3229_v13 = vadd.f32 %v9562_v4, %v3228_v62  ;;  %v2359_v62 = vadd.f32 %v9460_v17, %v2358_v10 }
 0x4b6   : > { %v4589_v38 = vsel %vm4245_vm3, %v4467_v54, 0.0 }
 0x4b7   : > { %v3478_v37 = vmax.f32 %v3229_v13, 0.0  ;;  %4590 = vadd.xlane.f32.xlu0 %v4589_v38 }
 0x4b8   : > { %v2360_v2 = vpop.f32.mrf.mxu2  ;;  %v2684_v1 = vpop.f32.mrf.mxu3 }
 0x4b9   : > { %v3582_v24 = vpack.c.bf16 %v3478_v37, %v3477_v9  ;;  %v2685_v21 = vadd.f32 %v2684_v1, %v2356_v22  ;;  %v3936_v28 = vpop.f32.mrf.mxu1  ;;  %v2361_v13 = vadd.f32 %v9460_v17, %v2360_v2 }
 0x4ba   : > { %v9710_v16 = vadd.f32 %v9707_v63, %v3936_v28 }
 0x4bb   : > { %v2907_v46 = vmax.f32 %v2685_v21, 0.0  ;;  %8000 = vmatmul.msk.bf16.gmra.mxu1 %vm3659_vm2, %v3582_v24 }
 0x4bc   : > { %11839 = vst [vmem:[#allocation10_spill] sm:$0xff] %v9710_v16  ;;  %v3231_v40 = vpop.f32.mrf.mxu0  ;;  %v4468_v20 = vmul.f32 %v9710_v16, %v9710_v16 }
 0x4bd   : > { %2402 = vmatmul.bf16.gmra.mxu2 %v11840_v35  ;;  %2726 = vmatmul.bf16.gmra.mxu3 %v11841_v5  ;;  %v3002_v39 = vpack.c.bf16 %v2907_v46, %v2906_v23  ;;  %v3232_v58 = vadd.f32 %v9562_v4, %v3231_v40  ;;  %v11844_v40 = vld [vmem:[#allocation23_spill] sm:$0xff] }
 0x4be   : > { %v4592_v51 = vsel %vm4245_vm3, %v4468_v20, 0.0  ;;  %v11845_v20 = vld [vmem:[#allocation24_spill] sm:$0xff] }
 0x4bf   : > { %4593 = vadd.xlane.f32.xlu1 %v4592_v51  ;;  %3270 = vmatmul.bf16.gmra.mxu0 %v3002_v39  ;;  %v3479_v38 = vmax.f32 %v3232_v58, 0.0 }
 0x4c0   : > { %v2363_v49 = vpop.f32.mrf.mxu2  ;;  %v2687_v48 = vpop.f32.mrf.mxu3 }
 0x4c1   : > { %v3938_v56 = vpop.f32.mrf.mxu1  ;;  %v2688_v22 = vadd.f32 %v2687_v48, %v2359_v62  ;;  %v2364_v62 = vadd.f32 %v9460_v17, %v2363_v49 }
 0x4c2   : > { %v9719_v0 = vadd.f32 %v9707_v63, %v3938_v56 }
 0x4c3   : > { %v2908_v23 = vmax.f32 %v2688_v22, 0.0 }
 0x4c4   : > { %11842 = vst [vmem:[#allocation11_spill] sm:$0xff] %v9719_v0  ;;  %v3233_v26 = vpop.f32.mrf.mxu0  ;;  %v4469_v57 = vmul.f32 %v9719_v0, %v9719_v0 }
 0x4c5   : > { %v3234_v54 = vadd.f32 %v9562_v4, %v3233_v26 }
 0x4c6   : > { %v4595_v18 = vsel %vm4245_vm3, %v4469_v57, 0.0 }
 0x4c7   : > { %v3480_v9 = vmax.f32 %v3234_v54, 0.0  ;;  %4596 = vadd.xlane.f32.xlu2 %v4595_v18 }
 0x4c8   : > { %v2365_v59 = vpop.f32.mrf.mxu2  ;;  %v2689_v37 = vpop.f32.mrf.mxu3 }
 0x4c9   : > { %v3583_v1 = vpack.c.bf16 %v3480_v9, %v3479_v38  ;;  %v2690_v24 = vadd.f32 %v2689_v37, %v2361_v13  ;;  %v3941_v21 = vpop.f32.mrf.mxu1  ;;  %v2366_v13 = vadd.f32 %v9460_v17, %v2365_v59 }
 0x4ca   : > { %v9729_v28 = vadd.f32 %v9707_v63, %v3941_v21 }
 0x4cb   : > { %v2909_v10 = vmax.f32 %v2690_v24, 0.0  ;;  %8001 = vmatmul.msk.bf16.gmra.mxu1 %vm3659_vm2, %v3583_v1 }
 0x4cc   : > { %11843 = vst [vmem:[#allocation12_spill] sm:$0xff] %v9729_v28  ;;  %v3236_v46 = vpop.f32.mrf.mxu0  ;;  %v4470_v2 = vmul.f32 %v9729_v28, %v9729_v28 }
 0x4cd   : > { %2407 = vmatmul.bf16.gmra.mxu2 %v11844_v40  ;;  %2731 = vmatmul.bf16.gmra.mxu3 %v11845_v20  ;;  %v3003_v35 = vpack.c.bf16 %v2909_v10, %v2908_v23  ;;  %v3237_v58 = vadd.f32 %v9562_v4, %v3236_v46  ;;  %v11848_v40 = vld [vmem:[#allocation25_spill] sm:$0xff]  ;;  %v11849_v20 = vld [vmem:[#allocation26_spill] sm:$0xff] }
 0x4ce   : > { %v4598_v5 = vsel %vm4245_vm3, %v4470_v2, 0.0 }
 0x4cf   : > { %4599 = vadd.xlane.f32.xlu0 %v4598_v5  ;;  %3275 = vmatmul.bf16.gmra.mxu0 %v3003_v35  ;;  %v3481_v38 = vmax.f32 %v3237_v58, 0.0 }
 0x4d0   : > { %v2368_v39 = vpop.f32.mrf.mxu2  ;;  %v2692_v51 = vpop.f32.mrf.mxu3 }
 0x4d1   : > { %v3943_v48 = vpop.f32.mrf.mxu1  ;;  %v2693_v22 = vadd.f32 %v2692_v51, %v2364_v62 }
 0x4d2   : > { %v9738_v56 = vadd.f32 %v9707_v63, %v3943_v48 }
 0x4d3   : > { %v2910_v46 = vmax.f32 %v2693_v22, 0.0 }
 0x4d4   : > { %11846 = vst [vmem:[#allocation13_spill] sm:$0xff] %v9738_v56  ;;  %v3238_v26 = vpop.f32.mrf.mxu0  ;;  %v4471_v57 = vmul.f32 %v9738_v56, %v9738_v56 }
 0x4d5   : > { %v3239_v54 = vadd.f32 %v9562_v4, %v3238_v26 }
 0x4d6   : > { %v4601_v18 = vsel %vm4245_vm3, %v4471_v57, 0.0 }
 0x4d7   : > { %v3482_v9 = vmax.f32 %v3239_v54, 0.0  ;;  %4602 = vadd.xlane.f32.xlu1 %v4601_v18  ;;  %v2369_v18 = vadd.f32 %v9460_v17, %v2368_v39 }
 0x4d8   : > { %v2370_v37 = vpop.f32.mrf.mxu2  ;;  %v2694_v1 = vpop.f32.mrf.mxu3 }
 0x4d9   : > { %v3584_v24 = vpack.c.bf16 %v3482_v9, %v3481_v38  ;;  %v2695_v21 = vadd.f32 %v2694_v1, %v2366_v13  ;;  %v3946_v23 = vpop.f32.mrf.mxu1  ;;  %v2371_v22 = vadd.f32 %v9460_v17, %v2370_v37  ;;  %v11852_v37 = vld [vmem:[#allocation27_spill] sm:$0xff] }
 0x4da   : > { %v9748_v10 = vadd.f32 %v9707_v63, %v3946_v23 }
 0x4db   : > { %v2911_v49 = vmax.f32 %v2695_v21, 0.0  ;;  %8002 = vmatmul.msk.bf16.gmra.mxu1 %vm3659_vm2, %v3584_v24 }
 0x4dc   : > { %11847 = vst [vmem:[#allocation14_spill] sm:$0xff] %v9748_v10  ;;  %v3241_v2 = vpop.f32.mrf.mxu0  ;;  %v4472_v59 = vmul.f32 %v9748_v10, %v9748_v10 }
 0x4dd   : > { %2412 = vmatmul.bf16.gmra.mxu2 %v11848_v40  ;;  %2736 = vmatmul.bf16.gmra.mxu3 %v11849_v20  ;;  %v3004_v35 = vpack.c.bf16 %v2911_v49, %v2910_v46  ;;  %v3242_v57 = vadd.f32 %v9562_v4, %v3241_v2 }
 0x4de   : > { %v4604_v5 = vsel %vm4245_vm3, %v4472_v59, 0.0 }
 0x4df   : > { %4605 = vadd.xlane.f32.xlu2 %v4604_v5  ;;  %3280 = vmatmul.bf16.gmra.mxu0 %v3004_v35  ;;  %v3483_v9 = vmax.f32 %v3242_v57, 0.0  ;;  %v11853_v35 = vld [vmem:[#allocation28_spill] sm:$0xff] }
 0x4e0   : > { %v2373_v51 = vpop.f32.mrf.mxu2  ;;  %v2697_v48 = vpop.f32.mrf.mxu3 }
 0x4e1   : > { %v3948_v58 = vpop.f32.mrf.mxu1  ;;  %v2698_v1 = vadd.f32 %v2697_v48, %v2369_v18 }
 0x4e2   : > { %v9757_v26 = vadd.f32 %v9707_v63, %v3948_v58 }
 0x4e3   : > { %v2912_v40 = vmax.f32 %v2698_v1, 0.0 }
 0x4e4   : > { %11850 = vst [vmem:[#allocation15_spill] sm:$0xff] %v9757_v26  ;;  %v3243_v62 = vpop.f32.mrf.mxu0  ;;  %v4473_v54 = vmul.f32 %v9757_v26, %v9757_v26 }
 0x4e5   : > { %v3244_v13 = vadd.f32 %v9562_v4, %v3243_v62 }
 0x4e6   : > { %v4607_v38 = vsel %vm4245_vm3, %v4473_v54, 0.0 }
 0x4e7   : > { %v3484_v24 = vmax.f32 %v3244_v13, 0.0  ;;  %4608 = vadd.xlane.f32.xlu0 %v4607_v38 }
 0x4e8   : > { %v2375_v21 = vpop.f32.mrf.mxu2  ;;  %v2699_v23 = vpop.f32.mrf.mxu3 }
 0x4e9   : > { %v3585_v46 = vpack.c.bf16 %v3484_v24, %v3483_v9  ;;  %v2700_v49 = vadd.f32 %v2699_v23, %v2371_v22  ;;  %v3951_v2 = vpop.f32.mrf.mxu1  ;;  %v9784_v22 = vld [vmem:[%s11704_s3] ss:$0 sm:$0xff] }
 0x4ea   : > { %v9767_v59 = vadd.f32 %v9707_v63, %v3951_v2  ;;  %v2374_v9 = vadd.f32 %v9784_v22, %v2373_v51  ;;  %v2376_v23 = vadd.f32 %v9784_v22, %v2375_v21 }
 0x4eb   : > { %v2913_v39 = vmax.f32 %v2700_v49, 0.0  ;;  %8003 = vmatmul.msk.bf16.gmra.mxu1 %vm3659_vm2, %v3585_v46 }
 0x4ec   : > { %11851 = vst [vmem:[#allocation16_spill] sm:$0xff] %v9767_v59  ;;  %v3246_v20 = vpop.f32.mrf.mxu0  ;;  %v4474_v17 = vmul.f32 %v9767_v59, %v9767_v59 }
 0x4ed   : > { %2417 = vmatmul.bf16.gmra.mxu2 %v11852_v37  ;;  %2741 = vmatmul.bf16.gmra.mxu3 %v11853_v35  ;;  %v3005_v5 = vpack.c.bf16 %v2913_v39, %v2912_v40  ;;  %v3247_v18 = vadd.f32 %v9562_v4, %v3246_v20 }
 0x4ee   : > { %v4610_v48 = vsel %vm4245_vm3, %v4474_v17, 0.0 }
 0x4ef   : > { %4611 = vadd.xlane.f32.xlu1 %v4610_v48  ;;  %3285 = vmatmul.bf16.gmra.mxu0 %v3005_v5  ;;  %v3485_v46 = vmax.f32 %v3247_v18, 0.0 }
 0x4f0   : > { %v2378_v58 = vpop.f32.mrf.mxu2  ;;  %v2702_v57 = vpop.f32.mrf.mxu3 }
 0x4f1   : > { %v3953_v62 = vpop.f32.mrf.mxu1  ;;  %v2703_v49 = vadd.f32 %v2702_v57, %v2374_v9  ;;  %v11857_v57 = vld [vmem:[#allocation30_spill] sm:$0xff] }
 0x4f2   : > { %v9776_v54 = vadd.f32 %v9707_v63, %v3953_v62  ;;  %v11856_v62 = vld [vmem:[#allocation29_spill] sm:$0xff] }
 0x4f3   : > { %v2914_v5 = vmax.f32 %v2703_v49, 0.0 }
 0x4f4   : > { %11854 = vst [vmem:[#allocation17_spill] sm:$0xff] %v9776_v54  ;;  %v3248_v13 = vpop.f32.mrf.mxu0  ;;  %v4475_v38 = vmul.f32 %v9776_v54, %v9776_v54  ;;  %v9987_v54 = vpop.xlane.xlu0 %4509 }
 0x4f5   : > { %v3249_v1 = vadd.f32 %v9562_v4, %v3248_v13 }
 0x4f6   : > { %v4613_v24 = vsel %vm4245_vm3, %v4475_v38, 0.0 }
 0x4f7   : > { %v3486_v2 = vmax.f32 %v3249_v1, 0.0  ;;  %4614 = vadd.xlane.f32.xlu2 %v4613_v24 }
 0x4f8   : > { %v2380_v40 = vpop.f32.mrf.mxu2  ;;  %v2704_v39 = vpop.f32.mrf.mxu3 }
 0x4f9   : > { %v3586_v20 = vpack.c.bf16 %v3486_v2, %v3485_v46  ;;  %v2705_v17 = vadd.f32 %v2704_v39, %v2376_v23  ;;  %v3956_v37 = vpop.f32.mrf.mxu1  ;;  %v2379_v2 = vadd.f32 %v9784_v22, %v2378_v58 }
 0x4fa   : > { %v9791_v35 = vadd.f32 %v9707_v63, %v3956_v37 }
 0x4fb   : > { %v2915_v51 = vmax.f32 %v2705_v17, 0.0  ;;  %8004 = vmatmul.msk.bf16.gmra.mxu1 %vm3659_vm2, %v3586_v20  ;;  %v2381_v17 = vadd.f32 %v9784_v22, %v2380_v40 }
 0x4fc   : > { %11855 = vst [vmem:[#allocation18_spill] sm:$0xff] %v9791_v35  ;;  %v3251_v48 = vpop.f32.mrf.mxu0  ;;  %v4476_v21 = vmul.f32 %v9791_v35, %v9791_v35 }
 0x4fd   : > { %2422 = vmatmul.bf16.gmra.mxu2 %v11856_v62  ;;  %2746 = vmatmul.bf16.gmra.mxu3 %v11857_v57  ;;  %v3006_v18 = vpack.c.bf16 %v2915_v51, %v2914_v5  ;;  %v3252_v23 = vadd.f32 %v9562_v4, %v3251_v48 }
 0x4fe   : > { %v4616_v13 = vsel %vm4245_vm3, %v4476_v21, 0.0 }
 0x4ff   : > { %4617 = vadd.xlane.f32.xlu0 %v4616_v13  ;;  %3290 = vmatmul.bf16.gmra.mxu0 %v3006_v18  ;;  %v3487_v37 = vmax.f32 %v3252_v23, 0.0  ;;  %v11860_v23 = vld [vmem:[#allocation31_spill] sm:$0xff] }
 0x500   : > { %v2383_v38 = vpop.f32.mrf.mxu2  ;;  %v2707_v9 = vpop.f32.mrf.mxu3 }
 0x501   : > { %v3958_v1 = vpop.f32.mrf.mxu1  ;;  %v2708_v5 = vadd.f32 %v2707_v9, %v2379_v2  ;;  %v11861_v9 = vld [vmem:[#allocation32_spill] sm:$0xff] }
 0x502   : > { %v9800_v24 = vadd.f32 %v9707_v63, %v3958_v1 }
 0x503   : > { %v2916_v1 = vmax.f32 %v2708_v5, 0.0 }
 0x504   : > { %11858 = vst [vmem:[#allocation19_spill] sm:$0xff] %v9800_v24  ;;  %v3253_v46 = vpop.f32.mrf.mxu0  ;;  %v4477_v49 = vmul.f32 %v9800_v24, %v9800_v24 }
 0x505   : > { %v3254_v39 = vadd.f32 %v9562_v4, %v3253_v46 }
 0x506   : > { %v4619_v20 = vsel %vm4245_vm3, %v4477_v49, 0.0 }
 0x507   : > { %v3488_v51 = vmax.f32 %v3254_v39, 0.0  ;;  %4620 = vadd.xlane.f32.xlu1 %v4619_v20 }
 0x508   : > { %v2385_v21 = vpop.f32.mrf.mxu2  ;;  %v2709_v62 = vpop.f32.mrf.mxu3 }
 0x509   : > { %v3587_v57 = vpack.c.bf16 %v3488_v51, %v3487_v37  ;;  %v2710_v48 = vadd.f32 %v2709_v62, %v2381_v17  ;;  %v3961_v18 = vpop.f32.mrf.mxu1 }
 0x50a   : > { %v9810_v13 = vadd.f32 %v9707_v63, %v3961_v18 }
 0x50b   : > { %v2917_v58 = vmax.f32 %v2710_v48, 0.0  ;;  %8005 = vmatmul.msk.bf16.gmra.mxu1 %vm3659_vm2, %v3587_v57  ;;  %v2384_v57 = vadd.f32 %v9784_v22, %v2383_v38 }
 0x50c   : > { %11859 = vst [vmem:[#allocation20_spill] sm:$0xff] %v9810_v13  ;;  %v3256_v46 = vpop.f32.mrf.mxu0  ;;  %v4478_v40 = vmul.f32 %v9810_v13, %v9810_v13 }
 0x50d   : > { %2427 = vmatmul.bf16.gmra.mxu2 %v11860_v23  ;;  %2751 = vmatmul.bf16.gmra.mxu3 %v11861_v9  ;;  %v3007_v49 = vpack.c.bf16 %v2917_v58, %v2916_v1  ;;  %v3257_v5 = vadd.f32 %v9562_v4, %v3256_v46  ;;  %v2386_v1 = vadd.f32 %v9784_v22, %v2385_v21 }
 0x50e   : > { %v4622_v2 = vsel %vm4245_vm3, %v4478_v40, 0.0 }
 0x50f   : > { %4623 = vadd.xlane.f32.xlu2 %v4622_v2  ;;  %3295 = vmatmul.bf16.gmra.mxu0 %v3007_v49  ;;  %v3489_v58 = vmax.f32 %v3257_v5, 0.0  ;;  %v11864_v5 = vld [vmem:[#allocation33_spill] sm:$0xff] }
 0x510   : > { %v2388_v39 = vpop.f32.mrf.mxu2  ;;  %v2712_v20 = vpop.f32.mrf.mxu3 }
 0x511   : > { %v3963_v17 = vpop.f32.mrf.mxu1  ;;  %v2713_v40 = vadd.f32 %v2712_v20, %v2384_v57  ;;  %v11865_v20 = vld [vmem:[#allocation34_spill] sm:$0xff] }
 0x512   : > { %v9819_v37 = vadd.f32 %v9707_v63, %v3963_v17 }
 0x514   : > { %11862 = vst [vmem:[#allocation21_spill] sm:$0xff] %v9819_v37  ;;  %v3258_v51 = vpop.f32.mrf.mxu0  ;;  %v4479_v62 = vmul.f32 %v9819_v37, %v9819_v37  ;;  %v2918_v37 = vmax.f32 %v2713_v40, 0.0 }
 0x515   : > { %v3259_v48 = vadd.f32 %v9562_v4, %v3258_v51 }
 0x516   : > { %v4625_v18 = vsel %vm4245_vm3, %v4479_v62, 0.0 }
 0x517   : > { %v3490_v23 = vmax.f32 %v3259_v48, 0.0  ;;  %4626 = vadd.xlane.f32.xlu0 %v4625_v18 }
 0x518   : > { %v2390_v9 = vpop.f32.mrf.mxu2  ;;  %v2714_v49 = vpop.f32.mrf.mxu3 }
 0x519   : > { %v3588_v2 = vpack.c.bf16 %v3490_v23, %v3489_v58  ;;  %v2715_v46 = vadd.f32 %v2714_v49, %v2386_v1  ;;  %v3966_v17 = vpop.f32.mrf.mxu1 }
 0x51a   : > { %v9829_v13 = vadd.f32 %v9707_v63, %v3966_v17  ;;  %v2391_v17 = vadd.f32 %v9784_v22, %v2390_v9 }
 0x51b   : > { %v2919_v38 = vmax.f32 %v2715_v46, 0.0  ;;  %8006 = vmatmul.msk.bf16.gmra.mxu1 %vm3659_vm2, %v3588_v2  ;;  %v2389_v2 = vadd.f32 %v9784_v22, %v2388_v39 }
 0x51c   : > { %11863 = vst [vmem:[#allocation22_spill] sm:$0xff] %v9829_v13  ;;  %v3261_v51 = vpop.f32.mrf.mxu0  ;;  %v4480_v21 = vmul.f32 %v9829_v13, %v9829_v13 }
 0x51d   : > { %2432 = vmatmul.bf16.gmra.mxu2 %v11864_v5  ;;  %2756 = vmatmul.bf16.gmra.mxu3 %v11865_v20  ;;  %v3008_v62 = vpack.c.bf16 %v2919_v38, %v2918_v37  ;;  %v3262_v40 = vadd.f32 %v9562_v4, %v3261_v51 }
 0x51e   : > { %v4628_v57 = vsel %vm4245_vm3, %v4480_v21, 0.0 }
 0x51f   : > { %4629 = vadd.xlane.f32.xlu1 %v4628_v57  ;;  %3300 = vmatmul.bf16.gmra.mxu0 %v3008_v62  ;;  %v3491_v38 = vmax.f32 %v3262_v40, 0.0  ;;  %v11868_v40 = vld [vmem:[#allocation35_spill] sm:$0xff] }
 0x520   : > { %v2393_v48 = vpop.f32.mrf.mxu2  ;;  %v2717_v18 = vpop.f32.mrf.mxu3 }
 0x521   : > { %v3968_v1 = vpop.f32.mrf.mxu1  ;;  %v2718_v21 = vadd.f32 %v2717_v18, %v2389_v2  ;;  %v11869_v18 = vld [vmem:[#allocation36_spill] sm:$0xff] }
 0x522   : > { %v9838_v58 = vadd.f32 %v9707_v63, %v3968_v1 }
 0x524   : > { %11866 = vst [vmem:[#allocation23_spill] sm:$0xff] %v9838_v58  ;;  %v3263_v23 = vpop.f32.mrf.mxu0  ;;  %v4481_v49 = vmul.f32 %v9838_v58, %v9838_v58  ;;  %v2920_v58 = vmax.f32 %v2718_v21, 0.0 }
 0x525   : > { %v3264_v37 = vadd.f32 %v9562_v4, %v3263_v23 }
 0x526   : > { %v4631_v46 = vsel %vm4245_vm3, %v4481_v49, 0.0 }
 0x527   : > { %v3492_v5 = vmax.f32 %v3264_v37, 0.0  ;;  %4632 = vadd.xlane.f32.xlu2 %v4631_v46 }
 0x528   : > { %v2395_v20 = vpop.f32.mrf.mxu2  ;;  %v2719_v62 = vpop.f32.mrf.mxu3 }
 0x529   : > { %v3589_v57 = vpack.c.bf16 %v3492_v5, %v3491_v38  ;;  %v2720_v51 = vadd.f32 %v2719_v62, %v2391_v17  ;;  %v3971_v1 = vpop.f32.mrf.mxu1 }
 0x52a   : > { %v9848_v13 = vadd.f32 %v9707_v63, %v3971_v1  ;;  %v2396_v1 = vadd.f32 %v9784_v22, %v2395_v20 }
 0x52b   : > { %v2921_v39 = vmax.f32 %v2720_v51, 0.0  ;;  %8007 = vmatmul.msk.bf16.gmra.mxu1 %vm3659_vm2, %v3589_v57  ;;  %v2394_v57 = vadd.f32 %v9784_v22, %v2393_v48 }
 0x52c   : > { %11867 = vst [vmem:[#allocation24_spill] sm:$0xff] %v9848_v13  ;;  %v3266_v23 = vpop.f32.mrf.mxu0  ;;  %v4482_v9 = vmul.f32 %v9848_v13, %v9848_v13 }
 0x52d   : > { %2437 = vmatmul.bf16.gmra.mxu2 %v11868_v40  ;;  %2761 = vmatmul.bf16.gmra.mxu3 %v11869_v18  ;;  %v3009_v49 = vpack.c.bf16 %v2921_v39, %v2920_v58  ;;  %v3267_v21 = vadd.f32 %v9562_v4, %v3266_v23 }
 0x52e   : > { %v4634_v2 = vsel %vm4245_vm3, %v4482_v9, 0.0 }
 0x52f   : > { %4635 = vadd.xlane.f32.xlu0 %v4634_v2  ;;  %3305 = vmatmul.bf16.gmra.mxu0 %v3009_v49  ;;  %v3493_v39 = vmax.f32 %v3267_v21, 0.0  ;;  %v11872_v21 = vld [vmem:[#allocation37_spill] sm:$0xff] }
 0x530   : > { %v2398_v37 = vpop.f32.mrf.mxu2  ;;  %v2722_v46 = vpop.f32.mrf.mxu3 }
 0x531   : > { %v3973_v17 = vpop.f32.mrf.mxu1  ;;  %v2723_v9 = vadd.f32 %v2722_v46, %v2394_v57  ;;  %v11873_v46 = vld [vmem:[#allocation38_spill] sm:$0xff] }
 0x532   : > { %v9857_v38 = vadd.f32 %v9707_v63, %v3973_v17 }
 0x534   : > { %11870 = vst [vmem:[#allocation25_spill] sm:$0xff] %v9857_v38  ;;  %v3268_v5 = vpop.f32.mrf.mxu0  ;;  %v4483_v62 = vmul.f32 %v9857_v38, %v9857_v38  ;;  %v2922_v38 = vmax.f32 %v2723_v9, 0.0 }
 0x535   : > { %v3269_v58 = vadd.f32 %v9562_v4, %v3268_v5 }
 0x536   : > { %v4637_v51 = vsel %vm4245_vm3, %v4483_v62, 0.0 }
 0x537   : > { %v3494_v40 = vmax.f32 %v3269_v58, 0.0  ;;  %4638 = vadd.xlane.f32.xlu1 %v4637_v51 }
 0x538   : > { %v2400_v18 = vpop.f32.mrf.mxu2  ;;  %v2724_v49 = vpop.f32.mrf.mxu3 }
 0x539   : > { %v3590_v2 = vpack.c.bf16 %v3494_v40, %v3493_v39  ;;  %v2725_v23 = vadd.f32 %v2724_v49, %v2396_v1  ;;  %v3976_v17 = vpop.f32.mrf.mxu1  ;;  %v9881_v39 = vld [vmem:[%s11706_s5] ss:$0 sm:$0xff]  ;;  %v2399_v49 = vadd.f32 %v9784_v22, %v2398_v37 }
 0x53a   : > { %v9867_v13 = vadd.f32 %v9707_v63, %v3976_v17  ;;  %v2401_v17 = vadd.f32 %v9784_v22, %v2400_v18 }
 0x53b   : > { %v2923_v48 = vmax.f32 %v2725_v23, 0.0  ;;  %8008 = vmatmul.msk.bf16.gmra.mxu1 %vm3659_vm2, %v3590_v2 }
 0x53c   : > { %11871 = vst [vmem:[#allocation26_spill] sm:$0xff] %v9867_v13  ;;  %v3271_v4 = vpop.f32.mrf.mxu0  ;;  %v4484_v20 = vmul.f32 %v9867_v13, %v9867_v13 }
 0x53d   : > { %2442 = vmatmul.bf16.gmra.mxu2 %v11872_v21  ;;  %2766 = vmatmul.bf16.gmra.mxu3 %v11873_v46  ;;  %v3010_v5 = vpack.c.bf16 %v2923_v48, %v2922_v38  ;;  %v3272_v9 = vadd.f32 %v9881_v39, %v3271_v4 }
 0x53e   : > { %v4640_v62 = vsel %vm4245_vm3, %v4484_v20, 0.0 }
 0x53f   : > { %4641 = vadd.xlane.f32.xlu2 %v4640_v62  ;;  %3310 = vmatmul.bf16.gmra.mxu0 %v3010_v5  ;;  %v3495_v48 = vmax.f32 %v3272_v9, 0.0  ;;  %v11876_v9 = vld [vmem:[#allocation39_spill] sm:$0xff] }
 0x540   : > { %v2403_v57 = vpop.f32.mrf.mxu2  ;;  %v2727_v58 = vpop.f32.mrf.mxu3 }
 0x541   : > { %v3978_v51 = vpop.f32.mrf.mxu1  ;;  %v2728_v20 = vadd.f32 %v2727_v58, %v2399_v49  ;;  %v11877_v58 = vld [vmem:[#allocation40_spill] sm:$0xff] }
 0x542   : > { %v9876_v1 = vadd.f32 %v9707_v63, %v3978_v51 }
 0x544   : > { %11874 = vst [vmem:[#allocation27_spill] sm:$0xff] %v9876_v1  ;;  %v3273_v40 = vpop.f32.mrf.mxu0  ;;  %v4485_v38 = vmul.f32 %v9876_v1, %v9876_v1  ;;  %v2924_v1 = vmax.f32 %v2728_v20, 0.0 }
 0x545   : > { %v3274_v2 = vadd.f32 %v9881_v39, %v3273_v40 }
 0x546   : > { %v4643_v23 = vsel %vm4245_vm3, %v4485_v38, 0.0 }
 0x547   : > { %v3496_v21 = vmax.f32 %v3274_v2, 0.0  ;;  %4644 = vadd.xlane.f32.xlu0 %v4643_v23 }
 0x548   : > { %v2405_v46 = vpop.f32.mrf.mxu2  ;;  %v2729_v5 = vpop.f32.mrf.mxu3 }
 0x549   : > { %v3591_v62 = vpack.c.bf16 %v3496_v21, %v3495_v48  ;;  %v2730_v4 = vadd.f32 %v2729_v5, %v2401_v17  ;;  %v3981_v51 = vpop.f32.mrf.mxu1 }
 0x54a   : > { %v9891_v13 = vadd.f32 %v9707_v63, %v3981_v51  ;;  %v2406_v51 = vadd.f32 %v9784_v22, %v2405_v46 }
 0x54b   : > { %v2925_v37 = vmax.f32 %v2730_v4, 0.0  ;;  %8009 = vmatmul.msk.bf16.gmra.mxu1 %vm3659_vm2, %v3591_v62  ;;  %v2404_v62 = vadd.f32 %v9784_v22, %v2403_v57 }
 0x54c   : > { %11875 = vst [vmem:[#allocation28_spill] sm:$0xff] %v9891_v13  ;;  %v3276_v40 = vpop.f32.mrf.mxu0  ;;  %v4486_v18 = vmul.f32 %v9891_v13, %v9891_v13 }
 0x54d   : > { %2447 = vmatmul.bf16.gmra.mxu2 %v11876_v9  ;;  %2771 = vmatmul.bf16.gmra.mxu3 %v11877_v58  ;;  %v3011_v38 = vpack.c.bf16 %v2925_v37, %v2924_v1  ;;  %v3277_v20 = vadd.f32 %v9881_v39, %v3276_v40 }
 0x54e   : > { %v4646_v49 = vsel %vm4245_vm3, %v4486_v18, 0.0 }
 0x54f   : > { %4647 = vadd.xlane.f32.xlu1 %v4646_v49  ;;  %3315 = vmatmul.bf16.gmra.mxu0 %v3011_v38  ;;  %v3497_v37 = vmax.f32 %v3277_v20, 0.0  ;;  %v11880_v20 = vld [vmem:[#allocation41_spill] sm:$0xff] }
 0x550   : > { %v2408_v2 = vpop.f32.mrf.mxu2  ;;  %v2732_v23 = vpop.f32.mrf.mxu3 }
 0x551   : > { %v3983_v17 = vpop.f32.mrf.mxu1  ;;  %v2733_v18 = vadd.f32 %v2732_v23, %v2404_v62  ;;  %v11881_v23 = vld [vmem:[#allocation42_spill] sm:$0xff] }
 0x552   : > { %v9900_v48 = vadd.f32 %v9707_v63, %v3983_v17 }
 0x554   : > { %11878 = vst [vmem:[#allocation29_spill] sm:$0xff] %v9900_v48  ;;  %v3278_v21 = vpop.f32.mrf.mxu0  ;;  %v4487_v5 = vmul.f32 %v9900_v48, %v9900_v48  ;;  %v2926_v48 = vmax.f32 %v2733_v18, 0.0 }
 0x555   : > { %v3279_v1 = vadd.f32 %v9881_v39, %v3278_v21 }
 0x556   : > { %v4649_v4 = vsel %vm4245_vm3, %v4487_v5, 0.0 }
 0x557   : > { %v3498_v9 = vmax.f32 %v3279_v1, 0.0  ;;  %4650 = vadd.xlane.f32.xlu2 %v4649_v4 }
 0x558   : > { %v2410_v58 = vpop.f32.mrf.mxu2  ;;  %v2734_v38 = vpop.f32.mrf.mxu3 }
 0x559   : > { %v3592_v49 = vpack.c.bf16 %v3498_v9, %v3497_v37  ;;  %v2735_v40 = vadd.f32 %v2734_v38, %v2406_v51  ;;  %v3986_v17 = vpop.f32.mrf.mxu1 }
 0x55a   : > { %v9910_v13 = vadd.f32 %v9707_v63, %v3986_v17  ;;  %v2411_v17 = vadd.f32 %v9784_v22, %v2410_v58 }
 0x55b   : > { %v2927_v57 = vmax.f32 %v2735_v40, 0.0  ;;  %8010 = vmatmul.msk.bf16.gmra.mxu1 %vm3659_vm2, %v3592_v49  ;;  %v2409_v49 = vadd.f32 %v9784_v22, %v2408_v2 }
 0x55c   : > { %11879 = vst [vmem:[#allocation30_spill] sm:$0xff] %v9910_v13  ;;  %v3281_v21 = vpop.f32.mrf.mxu0  ;;  %v4488_v46 = vmul.f32 %v9910_v13, %v9910_v13 }
 0x55d   : > { %2452 = vmatmul.bf16.gmra.mxu2 %v11880_v20  ;;  %2776 = vmatmul.bf16.gmra.mxu3 %v11881_v23  ;;  %v3012_v5 = vpack.c.bf16 %v2927_v57, %v2926_v48  ;;  %v3282_v18 = vadd.f32 %v9881_v39, %v3281_v21 }
 0x55e   : > { %v4652_v62 = vsel %vm4245_vm3, %v4488_v46, 0.0 }
 0x55f   : > { %4653 = vadd.xlane.f32.xlu0 %v4652_v62  ;;  %3320 = vmatmul.bf16.gmra.mxu0 %v3012_v5  ;;  %v3499_v57 = vmax.f32 %v3282_v18, 0.0  ;;  %v11884_v18 = vld [vmem:[#allocation43_spill] sm:$0xff] }
 0x560   : > { %v2413_v1 = vpop.f32.mrf.mxu2  ;;  %v2737_v4 = vpop.f32.mrf.mxu3 }
 0x561   : > { %v3988_v51 = vpop.f32.mrf.mxu1  ;;  %v2738_v46 = vadd.f32 %v2737_v4, %v2409_v49  ;;  %v11885_v4 = vld [vmem:[#allocation44_spill] sm:$0xff] }
 0x562   : > { %v9919_v37 = vadd.f32 %v9707_v63, %v3988_v51 }
 0x564   : > { %11882 = vst [vmem:[#allocation31_spill] sm:$0xff] %v9919_v37  ;;  %v3283_v9 = vpop.f32.mrf.mxu0  ;;  %v4489_v38 = vmul.f32 %v9919_v37, %v9919_v37  ;;  %v2928_v37 = vmax.f32 %v2738_v46, 0.0 }
 0x565   : > { %v3284_v48 = vadd.f32 %v9881_v39, %v3283_v9 }
 0x566   : > { %v4655_v40 = vsel %vm4245_vm3, %v4489_v38, 0.0 }
 0x567   : > { %v3500_v20 = vmax.f32 %v3284_v48, 0.0  ;;  %4656 = vadd.xlane.f32.xlu2 %v4655_v40 }
 0x568   : > { %v2415_v23 = vpop.f32.mrf.mxu2  ;;  %v2739_v5 = vpop.f32.mrf.mxu3 }
 0x569   : > { %v3593_v62 = vpack.c.bf16 %v3500_v20, %v3499_v57  ;;  %v2740_v21 = vadd.f32 %v2739_v5, %v2411_v17  ;;  %v3991_v51 = vpop.f32.mrf.mxu1 }
 0x56a   : > { %v9929_v13 = vadd.f32 %v9707_v63, %v3991_v51  ;;  %v2416_v51 = vadd.f32 %v9784_v22, %v2415_v23 }
 0x56b   : > { %v2929_v2 = vmax.f32 %v2740_v21, 0.0  ;;  %8011 = vmatmul.msk.bf16.gmra.mxu1 %vm3659_vm2, %v3593_v62  ;;  %v2414_v62 = vadd.f32 %v9784_v22, %v2413_v1 }
 0x56c   : > { %11883 = vst [vmem:[#allocation32_spill] sm:$0xff] %v9929_v13  ;;  %v3286_v9 = vpop.f32.mrf.mxu0  ;;  %v4490_v58 = vmul.f32 %v9929_v13, %v9929_v13 }
 0x56d   : > { %2457 = vmatmul.bf16.gmra.mxu2 %v11884_v18  ;;  %2781 = vmatmul.bf16.gmra.mxu3 %v11885_v4  ;;  %v3013_v38 = vpack.c.bf16 %v2929_v2, %v2928_v37  ;;  %v3287_v46 = vadd.f32 %v9881_v39, %v3286_v9 }
 0x56e   : > { %v4658_v49 = vsel %vm4245_vm3, %v4490_v58, 0.0 }
 0x56f   : > { %4659 = vadd.xlane.f32.xlu1 %v4658_v49  ;;  %3325 = vmatmul.bf16.gmra.mxu0 %v3013_v38  ;;  %v3501_v2 = vmax.f32 %v3287_v46, 0.0  ;;  %v11888_v46 = vld [vmem:[#allocation45_spill] sm:$0xff] }
 0x570   : > { %v2418_v48 = vpop.f32.mrf.mxu2  ;;  %v2742_v40 = vpop.f32.mrf.mxu3 }
 0x571   : > { %v3993_v17 = vpop.f32.mrf.mxu1  ;;  %v2743_v58 = vadd.f32 %v2742_v40, %v2414_v62  ;;  %v11889_v40 = vld [vmem:[#allocation46_spill] sm:$0xff] }
 0x572   : > { %v9938_v57 = vadd.f32 %v9707_v63, %v3993_v17 }
 0x574   : > { %11886 = vst [vmem:[#allocation33_spill] sm:$0xff] %v9938_v57  ;;  %v3288_v20 = vpop.f32.mrf.mxu0  ;;  %v4491_v5 = vmul.f32 %v9938_v57, %v9938_v57  ;;  %v2930_v57 = vmax.f32 %v2743_v58, 0.0 }
 0x575   : > { %v3289_v37 = vadd.f32 %v9881_v39, %v3288_v20 }
 0x576   : > { %v4661_v21 = vsel %vm4245_vm3, %v4491_v5, 0.0 }
 0x577   : > { %v3502_v18 = vmax.f32 %v3289_v37, 0.0  ;;  %4662 = vadd.xlane.f32.xlu2 %v4661_v21 }
 0x578   : > { %v2420_v4 = vpop.f32.mrf.mxu2  ;;  %v2744_v38 = vpop.f32.mrf.mxu3 }
 0x579   : > { %v3594_v49 = vpack.c.bf16 %v3502_v18, %v3501_v2  ;;  %v2745_v9 = vadd.f32 %v2744_v38, %v2416_v51  ;;  %v3996_v17 = vpop.f32.mrf.mxu1 }
 0x57a   : > { %v9948_v13 = vadd.f32 %v9707_v63, %v3996_v17  ;;  %v2421_v17 = vadd.f32 %v9784_v22, %v2420_v4 }
 0x57b   : > { %v2931_v1 = vmax.f32 %v2745_v9, 0.0  ;;  %8012 = vmatmul.msk.bf16.gmra.mxu1 %vm3659_vm2, %v3594_v49  ;;  %v2419_v49 = vadd.f32 %v9784_v22, %v2418_v48 }
 0x57c   : > { %11887 = vst [vmem:[#allocation34_spill] sm:$0xff] %v9948_v13  ;;  %v3291_v20 = vpop.f32.mrf.mxu0  ;;  %v4492_v23 = vmul.f32 %v9948_v13, %v9948_v13 }
 0x57d   : > { %2462 = vmatmul.bf16.gmra.mxu2 %v11888_v46  ;;  %2786 = vmatmul.bf16.gmra.mxu3 %v11889_v40  ;;  %v3014_v5 = vpack.c.bf16 %v2931_v1, %v2930_v57  ;;  %v3292_v58 = vadd.f32 %v9881_v39, %v3291_v20 }
 0x57e   : > { %v4664_v62 = vsel %vm4245_vm3, %v4492_v23, 0.0 }
 0x57f   : > { %4665 = vadd.xlane.f32.xlu1 %v4664_v62  ;;  %3330 = vmatmul.bf16.gmra.mxu0 %v3014_v5  ;;  %v3503_v1 = vmax.f32 %v3292_v58, 0.0  ;;  %v11892_v58 = vld [vmem:[#allocation47_spill] sm:$0xff] }
 0x580   : > { %v2423_v37 = vpop.f32.mrf.mxu2  ;;  %v2747_v21 = vpop.f32.mrf.mxu3 }
 0x581   : > { %v3998_v51 = vpop.f32.mrf.mxu1  ;;  %v2748_v23 = vadd.f32 %v2747_v21, %v2419_v49  ;;  %v11893_v21 = vld [vmem:[#allocation48_spill] sm:$0xff] }
 0x582   : > { %v9957_v2 = vadd.f32 %v9707_v63, %v3998_v51 }
 0x584   : > { %11890 = vst [vmem:[#allocation35_spill] sm:$0xff] %v9957_v2  ;;  %v3293_v18 = vpop.f32.mrf.mxu0  ;;  %v4493_v38 = vmul.f32 %v9957_v2, %v9957_v2  ;;  %v2932_v2 = vmax.f32 %v2748_v23, 0.0 }
 0x585   : > { %v3294_v57 = vadd.f32 %v9881_v39, %v3293_v18 }
 0x586   : > { %v4667_v9 = vsel %vm4245_vm3, %v4493_v38, 0.0 }
 0x587   : > { %v3504_v46 = vmax.f32 %v3294_v57, 0.0  ;;  %4668 = vadd.xlane.f32.xlu2 %v4667_v9 }
 0x588   : > { %v2425_v40 = vpop.f32.mrf.mxu2  ;;  %v2749_v5 = vpop.f32.mrf.mxu3 }
 0x589   : > { %v3595_v62 = vpack.c.bf16 %v3504_v46, %v3503_v1  ;;  %v2750_v20 = vadd.f32 %v2749_v5, %v2421_v17  ;;  %v4001_v51 = vpop.f32.mrf.mxu1  ;;  %v9975_v1 = vpop.xlane.xlu1 %4503 }
 0x58a   : > { %v9967_v13 = vadd.f32 %v9707_v63, %v4001_v51 }
 0x58b   : > { %v2933_v48 = vmax.f32 %v2750_v20, 0.0  ;;  %8013 = vmatmul.msk.bf16.gmra.mxu1 %vm3659_vm2, %v3595_v62 }
 0x58c   : > { %11891 = vst [vmem:[#allocation36_spill] sm:$0xff] %v9967_v13  ;;  %v3296_v18 = vpop.f32.mrf.mxu0  ;;  %v4494_v4 = vmul.f32 %v9967_v13, %v9967_v13 }
 0x58d   : > { %2467 = vmatmul.bf16.gmra.mxu2 %v11892_v58  ;;  %2791 = vmatmul.bf16.gmra.mxu3 %v11893_v21  ;;  %v3015_v38 = vpack.c.bf16 %v2933_v48, %v2932_v2  ;;  %v3297_v46 = vadd.f32 %v9881_v39, %v3296_v18  ;;  %v2424_v2 = vadd.f32 %v9784_v22, %v2423_v37 }
 0x58e   : > { %v4670_v49 = vsel %vm4245_vm3, %v4494_v4, 0.0  ;;  %v2426_v48 = vadd.f32 %v9784_v22, %v2425_v40 }
 0x58f   : > { %4671 = vadd.xlane.f32.xlu1 %v4670_v49  ;;  %3335 = vmatmul.bf16.gmra.mxu0 %v3015_v38  ;;  %v3505_v4 = vmax.f32 %v3297_v46, 0.0  ;;  %v11896_v46 = vld [vmem:[#allocation49_spill] sm:$0xff] }
 0x590   : > { %v2428_v57 = vpop.f32.mrf.mxu2  ;;  %v2752_v9 = vpop.f32.mrf.mxu3 }
 0x591   : > { %v4003_v17 = vpop.f32.mrf.mxu1  ;;  %v2753_v58 = vadd.f32 %v2752_v9, %v2424_v2  ;;  %v11897_v2 = vld [vmem:[#allocation50_spill] sm:$0xff] }
 0x592   : > { %v9978_v23 = vadd.f32 %v9707_v63, %v4003_v17 }
 0x594   : > { %11894 = vst [vmem:[#allocation37_spill] sm:$0xff] %v9978_v23  ;;  %v3298_v5 = vpop.f32.mrf.mxu0  ;;  %v4495_v62 = vmul.f32 %v9978_v23, %v9978_v23  ;;  %v9989_v23 = vpop.xlane.xlu1 %4512 }
 0x595   : > { %v3299_v20 = vadd.f32 %v9881_v39, %v3298_v5  ;;  %v2934_v5 = vmax.f32 %v2753_v58, 0.0  ;;  %v10000_v58 = vpop.xlane.xlu0 %4518 }
 0x596   : > { %v4673_v51 = vsel %vm4245_vm3, %v4495_v62, 0.0 }
 0x597   : > { %v3506_v21 = vmax.f32 %v3299_v20, 0.0  ;;  %4674 = vadd.xlane.f32.xlu0 %v4673_v51 }
 0x598   : > { %v2430_v38 = vpop.f32.mrf.mxu2  ;;  %v2754_v49 = vpop.f32.mrf.mxu3 }
 0x599   : > { %v3596_v17 = vpack.c.bf16 %v3506_v21, %v3505_v4  ;;  %v2755_v18 = vadd.f32 %v2754_v49, %v2426_v48  ;;  %v4006_v13 = vpop.f32.mrf.mxu1 }
 0x59a   : > { %v9992_v37 = vadd.f32 %v9707_v63, %v4006_v13 }
 0x59b   : > { %v2935_v62 = vmax.f32 %v2755_v18, 0.0  ;;  %8014 = vmatmul.msk.bf16.gmra.mxu1 %vm3659_vm2, %v3596_v17 }
 0x59c   : > { %11895 = vst [vmem:[#allocation38_spill] sm:$0xff] %v9992_v37  ;;  %v3301_v40 = vpop.f32.mrf.mxu0  ;;  %v4496_v9 = vmul.f32 %v9992_v37, %v9992_v37  ;;  %v10002_v21 = vpop.xlane.xlu1 %4521 }
 0x59d   : > { %2472 = vmatmul.bf16.gmra.mxu2 %v11896_v46  ;;  %2796 = vmatmul.bf16.gmra.mxu3 %v11897_v2  ;;  %v3016_v20 = vpack.c.bf16 %v2935_v62, %v2934_v5  ;;  %v3302_v17 = vadd.f32 %v9881_v39, %v3301_v40  ;;  %v2429_v62 = vadd.f32 %v9784_v22, %v2428_v57  ;;  %v10014_v26 = vpop.xlane.xlu0 %4527 }
 0x59e   : > { %v4676_v51 = vsel %vm4245_vm3, %v4496_v9, 0.0  ;;  %v2431_v2 = vadd.f32 %v9784_v22, %v2430_v38 }
 0x59f   : > { %4677 = vadd.xlane.f32.xlu1 %v4676_v51  ;;  %3340 = vmatmul.bf16.gmra.mxu0 %v3016_v20  ;;  %v3507_v20 = vmax.f32 %v3302_v17, 0.0  ;;  %v11900_v17 = vld [vmem:[#allocation51_spill] sm:$0xff] }
 0x5a0   : > { %v2433_v48 = vpop.f32.mrf.mxu2  ;;  %v2757_v13 = vpop.f32.mrf.mxu3 }
 0x5a1   : > { %v4008_v4 = vpop.f32.mrf.mxu1  ;;  %v2758_v51 = vadd.f32 %v2757_v13, %v2429_v62 }
 0x5a2   : > { %v10005_v49 = vadd.f32 %v9707_v63, %v4008_v4 }
 0x5a4   : > { %11898 = vst [vmem:[#allocation39_spill] sm:$0xff] %v10005_v49  ;;  %v3303_v18 = vpop.f32.mrf.mxu0  ;;  %v4497_v5 = vmul.f32 %v10005_v49, %v10005_v49  ;;  %v10016_v49 = vpop.xlane.xlu1 %4530 }
 0x5a5   : > { %v3304_v9 = vadd.f32 %v9881_v39, %v3303_v18  ;;  %v2936_v18 = vmax.f32 %v2758_v51, 0.0 }
 0x5a6   : > { %v4679_v46 = vsel %vm4245_vm3, %v4497_v5, 0.0 }
 0x5a7   : > { %v3508_v37 = vmax.f32 %v3304_v9, 0.0  ;;  %4680 = vadd.xlane.f32.xlu0 %v4679_v46 }
 0x5a8   : > { %v2435_v4 = vpop.f32.mrf.mxu2  ;;  %v2759_v35 = vpop.f32.mrf.mxu3 }
 0x5a9   : > { %v3597_v24 = vpack.c.bf16 %v3508_v37, %v3507_v20  ;;  %v2760_v40 = vadd.f32 %v2759_v35, %v2431_v2  ;;  %v4011_v10 = vpop.f32.mrf.mxu1  ;;  %v11901_v37 = vld [vmem:[#allocation52_spill] sm:$0xff]  ;;  %v10027_v2 = vpop.xlane.xlu0 %4536 }
 0x5aa   : > { %v10019_v57 = vadd.f32 %v9707_v63, %v4011_v10 }
 0x5ab   : > { %v2937_v5 = vmax.f32 %v2760_v40, 0.0  ;;  %8015 = vmatmul.msk.bf16.gmra.mxu1 %vm3659_vm2, %v3597_v24 }
 0x5ac   : > { %11899 = vst [vmem:[#allocation40_spill] sm:$0xff] %v10019_v57  ;;  %v3306_v38 = vpop.f32.mrf.mxu0  ;;  %v4498_v13 = vmul.f32 %v10019_v57, %v10019_v57  ;;  %v10029_v20 = vpop.xlane.xlu1 %4539 }
 0x5ad   : > { %2477 = vmatmul.bf16.gmra.mxu2 %v11900_v17  ;;  %2801 = vmatmul.bf16.gmra.mxu3 %v11901_v37  ;;  %v3017_v35 = vpack.c.bf16 %v2937_v5, %v2936_v18  ;;  %v3307_v51 = vadd.f32 %v9881_v39, %v3306_v38  ;;  %v2434_v5 = vadd.f32 %v9784_v22, %v2433_v48  ;;  %v10040_v37 = vpop.xlane.xlu2 %4506 }
 0x5ae   : > { %v4682_v62 = vsel %vm4245_vm3, %v4498_v13, 0.0 }
 0x5af   : > { %4683 = vadd.xlane.f32.xlu1 %v4682_v62  ;;  %3345 = vmatmul.bf16.gmra.mxu0 %v3017_v35  ;;  %v2436_v35 = vadd.f32 %v9784_v22, %v2435_v4  ;;  %v3509_v62 = vmax.f32 %v3307_v51, 0.0 }
 0x5b0   : > { %v2438_v9 = vpop.f32.mrf.mxu2  ;;  %v2762_v10 = vpop.f32.mrf.mxu3 }
 0x5b1   : > { %v4013_v46 = vpop.f32.mrf.mxu1  ;;  %v2763_v57 = vadd.f32 %v2762_v10, %v2434_v5 }
 0x5b2   : > { %v10032_v24 = vadd.f32 %v9707_v63, %v4013_v46 }
 0x5b3   : > { %v2938_v10 = vmax.f32 %v2763_v57, 0.0 }
 0x5b4   : > { %11902 = vst [vmem:[#allocation41_spill] sm:$0xff] %v10032_v24  ;;  %v3308_v40 = vpop.f32.mrf.mxu0  ;;  %v4499_v18 = vmul.f32 %v10032_v24, %v10032_v24  ;;  %v10043_v24 = vpop.xlane.xlu0 %4545 }
 0x5b5   : > { %v3309_v13 = vadd.f32 %v9881_v39, %v3308_v40  ;;  %v10045_v48 = vpop.xlane.xlu1 %4548  ;;  %v10050_v40 = vld [vmem:[%s11708_s7] ss:$0 sm:$0xff] }
 0x5b6   : > { %v4685_v17 = vsel %vm4245_vm3, %v4499_v18, 0.0  ;;  %11903 = vst [vmem:[#allocation42_spill] sm:$0xff] %v10045_v48 }
 0x5b7   : > { %v3510_v63 = vmax.f32 %v3309_v13, 0.0  ;;  %4686 = vadd.xlane.f32.xlu0 %v4685_v17  ;;  %v11905_v13 = vld [vmem:[#allocation53_spill] sm:$0xff]  ;;  %v11906_v17 = vld [vmem:[#allocation54_spill] sm:$0xff] }
 0x5b8   : > { %v2440_v46 = vpop.f32.mrf.mxu2  ;;  %v2764_v38 = vpop.f32.mrf.mxu3 }
 0x5b9   : > { %v3598_v59 = vpack.c.bf16 %v3510_v63, %v3509_v62  ;;  %v2765_v0 = vadd.f32 %v2764_v38, %v2436_v35  ;;  %v4016_v28 = vpop.f32.mrf.mxu1  ;;  %v10061_v63 = vpop.xlane.xlu2 %4515  ;;  %v2441_v56 = vadd.f32 %v9784_v22, %v2440_v46 }
 0x5ba   : > { %v10053_v4 = vadd.f32 %v10050_v40, %v4016_v28 }
 0x5bb   : > { %v2939_v51 = vmax.f32 %v2765_v0, 0.0  ;;  %8016 = vmatmul.msk.bf16.gmra.mxu1 %vm3659_vm2, %v3598_v59 }
 0x5bc   : > { %11904 = vst [vmem:[#allocation43_spill] sm:$0xff] %v10053_v4  ;;  %v3311_v18 = vpop.f32.mrf.mxu0  ;;  %v4500_v5 = vmul.f32 %v10053_v4, %v10053_v4  ;;  %v10063_v38 = vpop.xlane.xlu0 %4554 }
 0x5bd   : > { %2482 = vmatmul.bf16.gmra.mxu2 %v11905_v13  ;;  %2806 = vmatmul.bf16.gmra.mxu3 %v11906_v17  ;;  %v3018_v35 = vpack.c.bf16 %v2939_v51, %v2938_v10  ;;  %11907 = vst [vmem:[#allocation44_spill] sm:$0xff] %v10063_v38  ;;  %v10065_v59 = vpop.xlane.xlu1 %4557  ;;  %v3312_v13 = vadd.f32 %v9881_v39, %v3311_v18 }
 0x5be   : > { %v4688_v62 = vsel %vm4245_vm3, %v4500_v5, 0.0  ;;  %11908 = vst [vmem:[#allocation45_spill] sm:$0xff] %v10065_v59  ;;  %v2439_v51 = vadd.f32 %v9784_v22, %v2438_v9 }
 0x5bf   : > { %4689 = vadd.xlane.f32.xlu2 %v4688_v62  ;;  %3350 = vmatmul.bf16.gmra.mxu0 %v3018_v35  ;;  %v3511_v27 = vmax.f32 %v3312_v13, 0.0 }
 0x5c0   : > { %v2443_v28 = vpop.f32.mrf.mxu2  ;;  %v2767_v57 = vpop.f32.mrf.mxu3 }
 0x5c1   : > { %v4018_v0 = vpop.f32.mrf.mxu1  ;;  %v10076_v62 = vpop.xlane.xlu2 %4524  ;;  %v2768_v8 = vadd.f32 %v2767_v57, %v2439_v51  ;;  %v11912_v51 = vld [vmem:[#allocation55_spill] sm:$0xff] }
 0x5c2   : > { %v10068_v4 = vadd.f32 %v10050_v40, %v4018_v0 }
 0x5c4   : > { %11909 = vst [vmem:[#allocation46_spill] sm:$0xff] %v10068_v4  ;;  %v3313_v17 = vpop.f32.mrf.mxu0  ;;  %v4501_v10 = vmul.f32 %v10068_v4, %v10068_v4  ;;  %v10079_v4 = vpop.xlane.xlu0 %4563 }
 0x5c5   : > { %v3314_v5 = vadd.f32 %v9881_v39, %v3313_v17  ;;  %11910 = vst [vmem:[#allocation47_spill] sm:$0xff] %v10079_v4  ;;  %v10081_v9 = vpop.xlane.xlu1 %4566 }
 0x5c6   : > { %v4691_v35 = vsel %vm4245_vm3, %v4501_v10, 0.0  ;;  %11911 = vst [vmem:[#allocation48_spill] sm:$0xff] %v10081_v9  ;;  %v2940_v10 = vmax.f32 %v2768_v8, 0.0 }
 0x5c7   : > { %v3512_v0 = vmax.f32 %v3314_v5, 0.0  ;;  %4692 = vadd.xlane.f32.xlu0 %v4691_v35  ;;  %v11913_v5 = vld [vmem:[#allocation56_spill] sm:$0xff] }
 0x5c8   : > { %v2445_v16 = vpop.f32.mrf.mxu2  ;;  %v2769_v18 = vpop.f32.mrf.mxu3 }
 0x5c9   : > { %v3599_v59 = vpack.c.bf16 %v3512_v0, %v3511_v27  ;;  %v2770_v43 = vadd.f32 %v2769_v18, %v2441_v56  ;;  %v4021_v50 = vpop.f32.mrf.mxu1  ;;  %v10090_v0 = vpop.xlane.xlu2 %4533 }
 0x5ca   : > { %v4022_v17 = vadd.f32 %v10050_v40, %v4021_v50 }
 0x5cb   : > { %v2941_v38 = vmax.f32 %v2770_v43, 0.0  ;;  %8017 = vmatmul.msk.bf16.gmra.mxu1 %vm3659_vm2, %v3599_v59 }
 0x5cc   : > { %v3316_v46 = vpop.f32.mrf.mxu0  ;;  %v4694_v13 = vmul.f32 %v4022_v17, %v4022_v17  ;;  %v4181_v57 = vmul.f32 %v4022_v17, %v9402_v47  ;;  %v10092_v59 = vpop.xlane.xlu0 %4572 }
 0x5cd   : > { %2487 = vmatmul.bf16.gmra.mxu2 %v11912_v51  ;;  %2811 = vmatmul.bf16.gmra.mxu3 %v11913_v5  ;;  %v3019_v27 = vpack.c.bf16 %v2941_v38, %v2940_v10  ;;  %11914 = vst [vmem:[#allocation49_spill] sm:$0xff] %v10092_v59  ;;  %v10094_v47 = vpop.xlane.xlu1 %4575  ;;  %v3317_v38 = vadd.f32 %v9881_v39, %v3316_v46 }
 0x5ce   : > { %v4758_v56 = vsel %vm4245_vm3, %v4694_v13, 0.0  ;;  %v4246_v35 = vsel %vm4245_vm3, %v4181_v57, 0.0  ;;  %11915 = vst [vmem:[#allocation50_spill] sm:$0xff] %v10094_v47  ;;  %v2444_v13 = vadd.f32 %v9784_v22, %v2443_v28 }
 0x5cf   : > { %4759 = vadd.xlane.f32.xlu1 %v4758_v56  ;;  %4247 = vadd.xlane.f32.xlu0 %v4246_v35  ;;  %v3513_v56 = vmax.f32 %v3317_v38, 0.0  ;;  %v11919_v38 = vld [vmem:[#allocation58_spill] sm:$0xff] }
 0x5d0   : > { %3355 = vmatmul.bf16.gmra.mxu0 %v3019_v27  ;;  %v2448_v43 = vpop.f32.mrf.mxu2  ;;  %v2772_v50 = vpop.f32.mrf.mxu3  ;;  %v2446_v27 = vadd.f32 %v9784_v22, %v2445_v16 }
 0x5d1   : > { %v4023_v8 = vpop.f32.mrf.mxu1  ;;  %v10102_v5 = vpop.xlane.xlu2 %4542  ;;  %v2773_v35 = vadd.f32 %v2772_v50, %v2444_v13  ;;  %v11918_v50 = vld [vmem:[#allocation57_spill] sm:$0xff] }
 0x5d2   : > { %v4024_v18 = vadd.f32 %v10050_v40, %v4023_v8 }
 0x5d3   : > { %v2942_v15 = vmax.f32 %v2773_v35, 0.0 }
 0x5d4   : > { %v3318_v17 = vpop.f32.mrf.mxu0  ;;  %v4182_v10 = vmul.f32 %v4024_v18, %v9409_v14  ;;  %v10105_v14 = vpop.xlane.xlu0 %4581 }
 0x5d5   : > { %v3319_v57 = vadd.f32 %v9881_v39, %v3318_v17  ;;  %11916 = vst [vmem:[#allocation51_spill] sm:$0xff] %v10105_v14  ;;  %v10107_v28 = vpop.xlane.xlu1 %4584 }
 0x5d6   : > { %v4249_v51 = vsel %vm4245_vm3, %v4182_v10, 0.0  ;;  %11917 = vst [vmem:[#allocation52_spill] sm:$0xff] %v10107_v28  ;;  %v4695_v10 = vmul.f32 %v4024_v18, %v4024_v18 }
 0x5d7   : > { %v3514_v47 = vmax.f32 %v3319_v57, 0.0  ;;  %4250 = vadd.xlane.f32.xlu0 %v4249_v51 }
 0x5d8   : > { %v2450_v8 = vpop.f32.mrf.mxu2  ;;  %v2774_v59 = vpop.f32.mrf.mxu3  ;;  %v4761_v13 = vsel %vm4245_vm3, %v4695_v10, 0.0 }
 0x5d9   : > { %v3600_v46 = vpack.c.bf16 %v3514_v47, %v3513_v56  ;;  %v2775_v9 = vadd.f32 %v2774_v59, %v2446_v27  ;;  %v4026_v4 = vpop.f32.mrf.mxu1  ;;  %v10116_v57 = vpop.xlane.xlu2 %4551 }
 0x5da   : > { %v4027_v17 = vadd.f32 %v10050_v40, %v4026_v4 }
 0x5db   : > { %v2943_v48 = vmax.f32 %v2775_v9, 0.0  ;;  %8018 = vmatmul.msk.bf16.gmra.mxu1 %vm3659_vm2, %v3600_v46  ;;  %v10128_v46 = vld [vmem:[%s11704_s3] ss:$0 sm:$0xff] }
 0x5dc   : > { %v3321_v16 = vpop.f32.mrf.mxu0  ;;  %v4183_v22 = vmul.f32 %v4027_v17, %v9423_v11  ;;  %v10118_v51 = vpop.xlane.xlu0 %4590  ;;  %v4696_v56 = vmul.f32 %v4027_v17, %v4027_v17  ;;  %v2449_v10 = vadd.f32 %v10128_v46, %v2448_v43  ;;  %v2451_v17 = vadd.f32 %v10128_v46, %v2450_v8 }
 0x5dd   : > { %2492 = vmatmul.bf16.gmra.mxu2 %v11918_v50  ;;  %2816 = vmatmul.bf16.gmra.mxu3 %v11919_v38  ;;  %v3020_v59 = vpack.c.bf16 %v2943_v48, %v2942_v15  ;;  %11920 = vst [vmem:[#allocation53_spill] sm:$0xff] %v10118_v51  ;;  %v10120_v11 = vpop.xlane.xlu1 %4593  ;;  %v3322_v15 = vadd.f32 %v9881_v39, %v3321_v16 }
 0x5de   : > { %v4252_v47 = vsel %vm4245_vm3, %v4183_v22, 0.0  ;;  %11921 = vst [vmem:[#allocation54_spill] sm:$0xff] %v10120_v11  ;;  %v4764_v38 = vsel %vm4245_vm3, %v4696_v56, 0.0 }
 0x5df   : > { %4253 = vadd.xlane.f32.xlu1 %v4252_v47  ;;  %4762 = vadd.xlane.f32.xlu0 %v4761_v13  ;;  %v3515_v16 = vmax.f32 %v3322_v15, 0.0  ;;  %v11925_v15 = vld [vmem:[#allocation59_spill] sm:$0xff] }
 0x5e0   : > { %3360 = vmatmul.bf16.gmra.mxu0 %v3020_v59  ;;  %v2453_v4 = vpop.f32.mrf.mxu2  ;;  %v2777_v9 = vpop.f32.mrf.mxu3 }
 0x5e1   : > { %v4028_v18 = vpop.f32.mrf.mxu1  ;;  %v10134_v59 = vpop.xlane.xlu2 %4560  ;;  %v2778_v47 = vadd.f32 %v2777_v9, %v2449_v10  ;;  %v11926_v10 = vld [vmem:[#allocation60_spill] sm:$0xff] }
 0x5e2   : > { %v4029_v27 = vadd.f32 %v10050_v40, %v4028_v18  ;;  %11922 = vst [vmem:[#allocation55_spill] sm:$0xff] %v10134_v59 }
 0x5e3   : > { %v2944_v14 = vmax.f32 %v2778_v47, 0.0 }
 0x5e4   : > { %v3323_v48 = vpop.f32.mrf.mxu0  ;;  %v4184_v35 = vmul.f32 %v4029_v27, %v9430_v53  ;;  %v10137_v28 = vpop.xlane.xlu0 %4599 }
 0x5e5   : > { %v3324_v22 = vadd.f32 %v9881_v39, %v3323_v48  ;;  %11923 = vst [vmem:[#allocation56_spill] sm:$0xff] %v10137_v28  ;;  %v10139_v48 = vpop.xlane.xlu1 %4602 }
 0x5e6   : > { %v4255_v50 = vsel %vm4245_vm3, %v4184_v35, 0.0  ;;  %11924 = vst [vmem:[#allocation57_spill] sm:$0xff] %v10139_v48  ;;  %v4697_v35 = vmul.f32 %v4029_v27, %v4029_v27 }
 0x5e7   : > { %v3516_v53 = vmax.f32 %v3324_v22, 0.0  ;;  %4256 = vadd.xlane.f32.xlu1 %v4255_v50  ;;  %4765 = vadd.xlane.f32.xlu0 %v4764_v38 }
 0x5e8   : > { %v2455_v13 = vpop.f32.mrf.mxu2  ;;  %v2779_v18 = vpop.f32.mrf.mxu3  ;;  %v4767_v38 = vsel %vm4245_vm3, %v4697_v35, 0.0 }
 0x5e9   : > { %v3601_v11 = vpack.c.bf16 %v3516_v53, %v3515_v16  ;;  %v2780_v51 = vadd.f32 %v2779_v18, %v2451_v17  ;;  %v4031_v43 = vpop.f32.mrf.mxu1  ;;  %v10148_v17 = vpop.xlane.xlu2 %4569 }
 0x5ea   : > { %v4032_v56 = vadd.f32 %v10050_v40, %v4031_v43 }
 0x5eb   : > { %v2945_v59 = vmax.f32 %v2780_v51, 0.0  ;;  %8019 = vmatmul.msk.bf16.gmra.mxu1 %vm3659_vm2, %v3601_v11 }
 0x5ec   : > { %v3326_v8 = vpop.f32.mrf.mxu0  ;;  %v4185_v9 = vmul.f32 %v4032_v56, %v9444_v44  ;;  %v10150_v16 = vpop.xlane.xlu0 %4608  ;;  %v4698_v47 = vmul.f32 %v4032_v56, %v4032_v56 }
 0x5ed   : > { %2497 = vmatmul.bf16.gmra.mxu2 %v11925_v15  ;;  %2821 = vmatmul.bf16.gmra.mxu3 %v11926_v10  ;;  %v3021_v22 = vpack.c.bf16 %v2945_v59, %v2944_v14  ;;  %11927 = vst [vmem:[#allocation58_spill] sm:$0xff] %v10150_v16  ;;  %v10152_v44 = vpop.xlane.xlu1 %4611  ;;  %v3327_v53 = vadd.f32 %v9881_v39, %v3326_v8 }
 0x5ee   : > { %v4258_v50 = vsel %vm4245_vm3, %v4185_v9, 0.0  ;;  %11928 = vst [vmem:[#allocation59_spill] sm:$0xff] %v10152_v44  ;;  %v2454_v59 = vadd.f32 %v10128_v46, %v2453_v4  ;;  %v4770_v35 = vsel %vm4245_vm3, %v4698_v47, 0.0  ;;  %v2456_v15 = vadd.f32 %v10128_v46, %v2455_v13 }
 0x5ef   : > { %4259 = vadd.xlane.f32.xlu2 %v4258_v50  ;;  %4768 = vadd.xlane.f32.xlu0 %v4767_v38  ;;  %v3517_v10 = vmax.f32 %v3327_v53, 0.0 }
 0x5f0   : > { %3365 = vmatmul.bf16.gmra.mxu0 %v3021_v22  ;;  %v2458_v51 = vpop.f32.mrf.mxu2  ;;  %v2782_v27 = vpop.f32.mrf.mxu3 }
 0x5f1   : > { %v4033_v11 = vpop.f32.mrf.mxu1  ;;  %v10159_v9 = vpop.xlane.xlu2 %4578  ;;  %v2783_v22 = vadd.f32 %v2782_v27, %v2454_v59  ;;  %v11931_v59 = vld [vmem:[#allocation61_spill] sm:$0xff] }
 0x5f2   : > { %v4034_v43 = vadd.f32 %v10050_v40, %v4033_v11 }
 0x5f3   : > { %v2946_v48 = vmax.f32 %v2783_v22, 0.0 }
 0x5f4   : > { %v3328_v14 = vpop.f32.mrf.mxu0  ;;  %v10162_v4 = vpop.xlane.xlu0 %4617  ;;  %v4186_v47 = vmul.f32 %v4034_v43, %v9451_v25 }
 0x5f5   : > { %v3329_v18 = vadd.f32 %v9881_v39, %v3328_v14  ;;  %11929 = vst [vmem:[#allocation60_spill] sm:$0xff] %v10162_v4  ;;  %v10164_v14 = vpop.xlane.xlu1 %4620 }
 0x5f6   : > { %11930 = vst [vmem:[#allocation66_spill] sm:$0xff] %v10164_v14 }
 0x5f7   : > { %v3518_v50 = vmax.f32 %v3329_v18, 0.0  ;;  %4771 = vadd.xlane.f32.xlu2 %v4770_v35  ;;  %v11932_v18 = vld [vmem:[#allocation62_spill] sm:$0xff]  ;;  %v4261_v35 = vsel %vm4245_vm3, %v4186_v47, 0.0  ;;  %v2459_v47 = vadd.f32 %v10128_v46, %v2458_v51 }
 0x5f8   : > { %v2460_v56 = vpop.f32.mrf.mxu2  ;;  %v2784_v38 = vpop.f32.mrf.mxu3 }
 0x5f9   : > { %v3602_v8 = vpack.c.bf16 %v3518_v50, %v3517_v10  ;;  %v2785_v44 = vadd.f32 %v2784_v38, %v2456_v15  ;;  %v4036_v16 = vpop.f32.mrf.mxu1  ;;  %v10174_v10 = vpop.xlane.xlu2 %4587 }
 0x5fa   : > { %v4037_v11 = vadd.f32 %v10050_v40, %v4036_v16 }
 0x5fb   : > { %v2947_v28 = vmax.f32 %v2785_v44, 0.0  ;;  %8020 = vmatmul.msk.bf16.gmra.mxu1 %vm3659_vm2, %v3602_v8 }
 0x5fc   : > { %v3331_v13 = vpop.f32.mrf.mxu0  ;;  %v4187_v27 = vmul.f32 %v4037_v11, %v9470_v7  ;;  %v10176_v22 = vpop.xlane.xlu0 %4626 }
 0x5fd   : > { %v3022_v53 = vpack.c.bf16 %v2947_v28, %v2946_v48  ;;  %2502 = vmatmul.bf16.gmra.mxu2 %v11931_v59  ;;  %2826 = vmatmul.bf16.gmra.mxu3 %v11932_v18  ;;  %11933 = vst [vmem:[#allocation61_spill] sm:$0xff] %v10176_v22  ;;  %v10178_v7 = vpop.xlane.xlu1 %4629  ;;  %v4699_v48 = vmul.f32 %v4034_v43, %v4034_v43 }
 0x5fe   : > { %v4264_v15 = vsel %vm4245_vm3, %v4187_v27, 0.0  ;;  %11934 = vst [vmem:[#allocation62_spill] sm:$0xff] %v10178_v7  ;;  %v3332_v50 = vadd.f32 %v9881_v39, %v3331_v13 }
 0x5ff   : > { %4262 = vadd.xlane.f32.xlu2 %v4261_v35  ;;  %4265 = vadd.xlane.f32.xlu0 %v4264_v15  ;;  %v2461_v35 = vadd.f32 %v10128_v46, %v2460_v56 }
 0x600   : > { %3370 = vmatmul.bf16.gmra.mxu0 %v3022_v53  ;;  %v2463_v25 = vpop.f32.mrf.mxu2  ;;  %v2787_v16 = vpop.f32.mrf.mxu3  ;;  %v4773_v53 = vsel %vm4245_vm3, %v4699_v48, 0.0  ;;  %v3519_v15 = vmax.f32 %v3332_v50, 0.0  ;;  %v4700_v48 = vmul.f32 %v4037_v11, %v4037_v11  ;;  %v11936_v50 = vld [vmem:[#allocation63_spill] sm:$0xff] }
 0x601   : > { %v4038_v44 = vpop.f32.mrf.mxu1  ;;  %v10187_v18 = vpop.xlane.xlu2 %4596 }
 0x602   : > { %v4039_v28 = vadd.f32 %v10050_v40, %v4038_v44  ;;  %11935 = vst [vmem:[#allocation67_spill] sm:$0xff] %v10187_v18  ;;  %v2788_v44 = vadd.f32 %v2787_v16, %v2459_v47  ;;  %v11937_v47 = vld [vmem:[#allocation64_spill] sm:$0xff] }
 0x604   : > { %v3333_v38 = vpop.f32.mrf.mxu0  ;;  %v4188_v8 = vmul.f32 %v4039_v28, %v9477_v55  ;;  %v10190_v14 = vpop.xlane.xlu0 %4635  ;;  %v2948_v4 = vmax.f32 %v2788_v44, 0.0 }
 0x605   : > { %v3334_v27 = vadd.f32 %v9881_v39, %v3333_v38  ;;  %v10192_v38 = vpop.xlane.xlu1 %4638 }
 0x606   : > { %v4267_v59 = vsel %vm4245_vm3, %v4188_v8, 0.0  ;;  %v4701_v8 = vmul.f32 %v4039_v28, %v4039_v28 }
 0x607   : > { %v3520_v43 = vmax.f32 %v3334_v27, 0.0  ;;  %4774 = vadd.xlane.f32.xlu2 %v4773_v53  ;;  %4268 = vadd.xlane.f32.xlu1 %v4267_v59 }
 0x608   : > { %v2465_v13 = vpop.f32.mrf.mxu2  ;;  %v2789_v7 = vpop.f32.mrf.mxu3  ;;  %v4779_v53 = vsel %vm4245_vm3, %v4701_v8, 0.0 }
 0x609   : > { %v3603_v55 = vpack.c.bf16 %v3520_v43, %v3519_v15  ;;  %v2790_v22 = vadd.f32 %v2789_v7, %v2461_v35  ;;  %v4041_v51 = vpop.f32.mrf.mxu1  ;;  %v4776_v7 = vsel %vm4245_vm3, %v4700_v48, 0.0  ;;  %v10200_v59 = vpop.xlane.xlu2 %4605  ;;  %v2464_v48 = vadd.f32 %v10128_v46, %v2463_v25 }
 0x60a   : > { %v4042_v27 = vadd.f32 %v10050_v40, %v4041_v51 }
 0x60b   : > { %v2949_v18 = vmax.f32 %v2790_v22, 0.0  ;;  %8021 = vmatmul.msk.bf16.gmra.mxu1 %vm3659_vm2, %v3603_v55 }
 0x60c   : > { %v3336_v56 = vpop.f32.mrf.mxu0  ;;  %v10202_v35 = vpop.xlane.xlu0 %4644  ;;  %v4189_v15 = vmul.f32 %v4042_v27, %v9491_v61  ;;  %v4702_v44 = vmul.f32 %v4042_v27, %v4042_v27  ;;  %v2466_v61 = vadd.f32 %v10128_v46, %v2465_v13 }
 0x60d   : > { %v3023_v16 = vpack.c.bf16 %v2949_v18, %v2948_v4  ;;  %2507 = vmatmul.bf16.gmra.mxu2 %v11936_v50  ;;  %2831 = vmatmul.bf16.gmra.mxu3 %v11937_v47  ;;  %11938 = vst [vmem:[#allocation63_spill] sm:$0xff] %v10202_v35  ;;  %v10204_v4 = vpop.xlane.xlu1 %4647  ;;  %v3337_v43 = vadd.f32 %v9881_v39, %v3336_v56 }
 0x60e   : > { %11939 = vst [vmem:[#allocation64_spill] sm:$0xff] %v10204_v4  ;;  %v4782_v50 = vsel %vm4245_vm3, %v4702_v44, 0.0 }
 0x60f   : > { %4777 = vadd.xlane.f32.xlu2 %v4776_v7  ;;  %4780 = vadd.xlane.f32.xlu1 %v4779_v53  ;;  %v3521_v27 = vmax.f32 %v3337_v43, 0.0 }
 0x610   : > { %3375 = vmatmul.bf16.gmra.mxu0 %v3023_v16  ;;  %v2468_v11 = vpop.f32.mrf.mxu2  ;;  %v2792_v22 = vpop.f32.mrf.mxu3  ;;  %v4270_v16 = vsel %vm4245_vm3, %v4189_v15, 0.0 }
 0x611   : > { %v4043_v28 = vpop.f32.mrf.mxu1  ;;  %v10215_v7 = vpop.xlane.xlu2 %4614  ;;  %v2793_v53 = vadd.f32 %v2792_v22, %v2464_v48 }
 0x612   : > { %v4044_v18 = vadd.f32 %v10050_v40, %v4043_v28 }
 0x613   : > { %v2950_v35 = vmax.f32 %v2793_v53, 0.0 }
 0x614   : > { %v3338_v55 = vpop.f32.mrf.mxu0  ;;  %v4190_v51 = vmul.f32 %v4044_v18, %v9498_v12  ;;  %v10218_v15 = vpop.xlane.xlu0 %4653  ;;  %v4703_v4 = vmul.f32 %v4044_v18, %v4044_v18 }
 0x615   : > { %v3339_v8 = vadd.f32 %v9881_v39, %v3338_v55  ;;  %11940 = vst [vmem:[#allocation68_spill] sm:$0xff] %v10218_v15  ;;  %v10220_v44 = vpop.xlane.xlu1 %4659 }
 0x616   : > { %v4273_v47 = vsel %vm4245_vm3, %v4190_v51, 0.0  ;;  %11941 = vst [vmem:[#allocation69_spill] sm:$0xff] %v10220_v44 }
 0x617   : > { %v3522_v56 = vmax.f32 %v3339_v8, 0.0  ;;  %4271 = vadd.xlane.f32.xlu2 %v4270_v16  ;;  %4783 = vadd.xlane.f32.xlu1 %v4782_v50  ;;  %v11942_v16 = vld [vmem:[#allocation65_spill] sm:$0xff]  ;;  %v4785_v50 = vsel %vm4245_vm3, %v4703_v4, 0.0  ;;  %v10239_v4 = vld [vmem:[%s11706_s5] ss:$0 sm:$0xff] }
 0x618   : > { %4274 = vadd.xlane.f32.xlu0 %v4273_v47  ;;  %v2470_v12 = vpop.f32.mrf.mxu2  ;;  %v2794_v25 = vpop.f32.mrf.mxu3 }
 0x619   : > { %v3604_v28 = vpack.c.bf16 %v3522_v56, %v3521_v27  ;;  %v2795_v39 = vadd.f32 %v2794_v25, %v2466_v61  ;;  %v4046_v55 = vpop.f32.mrf.mxu1  ;;  %v10229_v27 = vpop.xlane.xlu2 %4623 }
 0x61a   : > { %v4047_v51 = vadd.f32 %v10050_v40, %v4046_v55 }
 0x61b   : > { %v2951_v13 = vmax.f32 %v2795_v39, 0.0  ;;  %8022 = vmatmul.msk.bf16.gmra.mxu1 %vm3659_vm2, %v3604_v28 }
 0x61c   : > { %v3341_v22 = vpop.f32.mrf.mxu0  ;;  %v4191_v43 = vmul.f32 %v4047_v51, %v9512_v31  ;;  %v4704_v48 = vmul.f32 %v4047_v51, %v4047_v51 }
 0x61d   : > { %v3024_v8 = vpack.c.bf16 %v2951_v13, %v2950_v35  ;;  %2836 = vmatmul.bf16.gmra.mxu3 %v11942_v16  ;;  %v10231_v31 = vpop.xlane.xlu1 %4665  ;;  %v10233_v35 = vpop.xlane.xlu0 %4674  ;;  %v3342_v28 = vadd.f32 %v10239_v4, %v3341_v22  ;;  %v2469_v13 = vadd.f32 %v10128_v46, %v2468_v11 }
 0x61e   : > { %v4276_v47 = vsel %vm4245_vm3, %v4191_v43, 0.0  ;;  %v4788_v61 = vsel %vm4245_vm3, %v4704_v48, 0.0  ;;  %11943 = vst [vmem:[#allocation65_spill] sm:$0xff] %v10231_v31 }
 0x61f   : > { %4786 = vadd.xlane.f32.xlu2 %v4785_v50  ;;  %4277 = vadd.xlane.f32.xlu1 %v4276_v47  ;;  %11944 = vst [vmem:[#allocation70_spill] sm:$0xff] %v10233_v35  ;;  %v2471_v50 = vadd.f32 %v10128_v46, %v2470_v12  ;;  %v3523_v47 = vmax.f32 %v3342_v28, 0.0 }
 0x620   : > { %4789 = vadd.xlane.f32.xlu0 %v4788_v61  ;;  %3380 = vmatmul.bf16.gmra.mxu0 %v3024_v8  ;;  %v2473_v18 = vpop.f32.mrf.mxu2  ;;  %v2797_v53 = vpop.f32.mrf.mxu3 }
 0x621   : > { %v4048_v56 = vpop.f32.mrf.mxu1  ;;  %v10247_v16 = vpop.xlane.xlu2 %4632  ;;  %v2798_v61 = vadd.f32 %v2797_v53, %v2469_v13 }
 0x622   : > { %v4049_v25 = vadd.f32 %v10050_v40, %v4048_v56 }
 0x624   : > { %v3343_v39 = vpop.f32.mrf.mxu0  ;;  %v4192_v55 = vmul.f32 %v4049_v25, %v9519_v42  ;;  %v4705_v51 = vmul.f32 %v4049_v25, %v4049_v25 }
 0x625   : > { %v3344_v43 = vadd.f32 %v10239_v4, %v3343_v39  ;;  %v10250_v31 = vpop.xlane.xlu1 %4671  ;;  %v10252_v39 = vpop.xlane.xlu0 %4680 }
 0x626   : > { %v4279_v48 = vsel %vm4245_vm3, %v4192_v55, 0.0  ;;  %v4791_v8 = vsel %vm4245_vm3, %v4705_v51, 0.0  ;;  %11945 = vst [vmem:[#allocation71_spill] sm:$0xff] %v10250_v31  ;;  %v2952_v51 = vmax.f32 %v2798_v61, 0.0 }
 0x627   : > { %v3524_v56 = vmax.f32 %v3344_v43, 0.0  ;;  %4280 = vadd.xlane.f32.xlu2 %v4279_v48  ;;  %4792 = vadd.xlane.f32.xlu1 %v4791_v8  ;;  %11946 = vst [vmem:[#allocation72_spill] sm:$0xff] %v10252_v39 }
 0x628   : > { %v2475_v22 = vpop.f32.mrf.mxu2  ;;  %v2799_v42 = vpop.f32.mrf.mxu3 }
 0x629   : > { %v3605_v25 = vpack.c.bf16 %v3524_v56, %v3523_v47  ;;  %v2800_v35 = vadd.f32 %v2799_v42, %v2471_v50  ;;  %v4051_v11 = vpop.f32.mrf.mxu1  ;;  %v10259_v8 = vpop.xlane.xlu2 %4641 }
 0x62a   : > { %v4052_v55 = vadd.f32 %v10050_v40, %v4051_v11 }
 0x62b   : > { %v2953_v44 = vmax.f32 %v2800_v35, 0.0  ;;  %8023 = vmatmul.msk.bf16.gmra.mxu1 %vm3659_vm2, %v3605_v25 }
 0x62c   : > { %v3346_v12 = vpop.f32.mrf.mxu0  ;;  %v4706_v53 = vmul.f32 %v4052_v55, %v4052_v55  ;;  %v4193_v28 = vmul.f32 %v4052_v55, %v9529_v52  ;;  %v2474_v55 = vadd.f32 %v10128_v46, %v2473_v18 }
 0x62d   : > { %v3025_v13 = vpack.c.bf16 %v2953_v44, %v2952_v51  ;;  %v10261_v35 = vpop.xlane.xlu1 %4677  ;;  %v10263_v56 = vpop.xlane.xlu0 %4686  ;;  %v3347_v52 = vadd.f32 %v10239_v4, %v3346_v12 }
 0x62e   : > { %v4794_v43 = vsel %vm4245_vm3, %v4706_v53, 0.0  ;;  %v4282_v48 = vsel %vm4245_vm3, %v4193_v28, 0.0  ;;  %11947 = vst [vmem:[#allocation73_spill] sm:$0xff] %v10261_v35 }
 0x62f   : > { %4795 = vadd.xlane.f32.xlu2 %v4794_v43  ;;  %4283 = vadd.xlane.f32.xlu0 %v4282_v48  ;;  %11948 = vst [vmem:[#allocation74_spill] sm:$0xff] %v10263_v56  ;;  %v2476_v43 = vadd.f32 %v10128_v46, %v2475_v22  ;;  %v3525_v48 = vmax.f32 %v3347_v52, 0.0 }
 0x630   : > { %3385 = vmatmul.bf16.gmra.mxu0 %v3025_v13  ;;  %v2478_v50 = vpop.f32.mrf.mxu2  ;;  %v2802_v47 = vpop.f32.mrf.mxu3 }
 0x631   : > { %v4053_v61 = vpop.f32.mrf.mxu1  ;;  %v10272_v13 = vpop.xlane.xlu2 %4650 }
 0x632   : > { %v4054_v42 = vadd.f32 %v10050_v40, %v4053_v61  ;;  %v2803_v61 = vadd.f32 %v2802_v47, %v2474_v55 }
 0x634   : > { %v3348_v44 = vpop.f32.mrf.mxu0  ;;  %v4194_v25 = vmul.f32 %v4054_v42, %v9538_v32  ;;  %v4707_v11 = vmul.f32 %v4054_v42, %v4054_v42 }
 0x635   : > { %v3349_v51 = vadd.f32 %v10239_v4, %v3348_v44  ;;  %v10275_v35 = vpop.xlane.xlu1 %4683 }
 0x636   : > { %v4285_v53 = vsel %vm4245_vm3, %v4194_v25, 0.0  ;;  %v4797_v28 = vsel %vm4245_vm3, %v4707_v11, 0.0  ;;  %11949 = vst [vmem:[#allocation75_spill] sm:$0xff] %v10275_v35  ;;  %v2954_v11 = vmax.f32 %v2803_v61, 0.0 }
 0x637   : > { %v3526_v56 = vmax.f32 %v3349_v51, 0.0  ;;  %4286 = vadd.xlane.f32.xlu1 %v4285_v53  ;;  %4798 = vadd.xlane.f32.xlu0 %v4797_v28 }
 0x638   : > { %v2480_v12 = vpop.f32.mrf.mxu2  ;;  %v2804_v32 = vpop.f32.mrf.mxu3 }
 0x639   : > { %v3606_v42 = vpack.c.bf16 %v3526_v56, %v3525_v48  ;;  %v2805_v39 = vadd.f32 %v2804_v32, %v2476_v43  ;;  %v4056_v18 = vpop.f32.mrf.mxu1  ;;  %v10284_v53 = vpop.xlane.xlu2 %4656 }
 0x63a   : > { %v4057_v44 = vadd.f32 %v10050_v40, %v4056_v18  ;;  %v10278_v25 = vpop.xlane.xlu0 %4692  ;;  %11951 = vst [vmem:[#allocation77_spill] sm:$0xff] %v10284_v53 }
 0x63b   : > { %11950 = vst [vmem:[#allocation76_spill] sm:$0xff] %v10278_v25  ;;  %v2955_v31 = vmax.f32 %v2805_v39, 0.0  ;;  %8024 = vmatmul.msk.bf16.gmra.mxu1 %vm3659_vm2, %v3606_v42 }
 0x63c   : > { %v3351_v22 = vpop.f32.mrf.mxu0  ;;  %v4195_v47 = vmul.f32 %v4057_v44, %v9548_v60  ;;  %v4708_v52 = vmul.f32 %v4057_v44, %v4057_v44  ;;  %v4950_v60 = vmax.f32 %v9975_v1, 1e-16 }
 0x63d   : > { %v3026_v55 = vpack.c.bf16 %v2955_v31, %v2954_v11  ;;  %v3352_v31 = vadd.f32 %v10239_v4, %v3351_v22 }
 0x63e   : > { %v4288_v51 = vsel %vm4245_vm3, %v4195_v47, 0.0  ;;  %v4800_v56 = vsel %vm4245_vm3, %v4708_v52, 0.0  ;;  %v2479_v47 = vadd.f32 %v10128_v46, %v2478_v50 }
 0x63f   : > { %4289 = vadd.xlane.f32.xlu2 %v4288_v51  ;;  %4801 = vadd.xlane.f32.xlu1 %v4800_v56  ;;  %v2481_v51 = vadd.f32 %v10128_v46, %v2480_v12  ;;  %v3527_v25 = vmax.f32 %v3352_v31, 0.0 }
 0x640   : > { %3390 = vmatmul.bf16.gmra.mxu0 %v3026_v55  ;;  %v2807_v28 = vpop.f32.mrf.mxu3  ;;  %v2483_v43 = vpop.f32.mrf.mxu2 }
 0x641   : > { %v4058_v48 = vpop.f32.mrf.mxu1  ;;  %v2808_v1 = vadd.f32 %v2807_v28, %v2479_v47  ;;  %v10297_v50 = vpop.xlane.xlu2 %4662 }
 0x642   : > { %v4059_v39 = vadd.f32 %v10050_v40, %v4058_v48  ;;  %v4760_v61 = vpop.xlane.xlu1 %4759  ;;  %v10287_v32 = vpop.xlane.xlu0 %4247  ;;  %11952 = vst [vmem:[#allocation78_spill] sm:$0xff] %v10297_v50 }
 0x643   : > { %v5014_v42 = vmax.f32 %v4760_v61, 1e-16  ;;  %v2956_v12 = vmax.f32 %v2808_v1, 0.0 }
 0x644   : > { %v3353_v18 = vpop.f32.mrf.mxu0  ;;  %v4709_v44 = vmul.f32 %v4059_v39, %v4059_v39  ;;  %v4196_v11 = vmul.f32 %v4059_v39, %v9557_v36 }
 0x645   : > { %v5078_v52 = vmul.f32 %v5014_v42, %v4950_v60  ;;  %v3354_v55 = vadd.f32 %v10239_v4, %v3353_v18 }
 0x646   : > { %v4803_v56 = vsel %vm4245_vm3, %v4709_v44, 0.0  ;;  %v4291_v48 = vsel %vm4245_vm3, %v4196_v11, 0.0 }
 0x647   : > { %8210 = vrsqrt.f32 %v5078_v52  ;;  %v3528_v22 = vmax.f32 %v3354_v55, 0.0  ;;  %4804 = vadd.xlane.f32.xlu2 %v4803_v56  ;;  %4292 = vadd.xlane.f32.xlu0 %v4291_v48  ;;  %vm5148_vm5 = vweird.f32 %v5078_v52 }
 0x648   : > { %v2809_v61 = vpop.f32.mrf.mxu3  ;;  %v2485_v31 = vpop.f32.mrf.mxu2 }
 0x649   : > { %v3607_v35 = vpack.c.bf16 %v3528_v22, %v3527_v25  ;;  %v2810_v36 = vadd.f32 %v2809_v61, %v2481_v51  ;;  %v4061_v39 = vpop.f32.mrf.mxu1  ;;  %v10306_v61 = vpop.xlane.xlu2 %4668 }
 0x64a   : > { %v4062_v60 = vadd.f32 %v10050_v40, %v4061_v39  ;;  %v10300_v42 = vpop.xlane.xlu0 %4250  ;;  %11953 = vst [vmem:[#allocation79_spill] sm:$0xff] %v10306_v61  ;;  %v4951_v39 = vmax.f32 %v10040_v37, 1e-16 }
 0x64b   : > { %v2957_v18 = vmax.f32 %v2810_v36, 0.0  ;;  %8025 = vmatmul.msk.bf16.gmra.mxu1 %vm3659_vm2, %v3607_v35 }
 0x64c   : > { %v4197_v28 = vmul.f32 %v4062_v60, %v9572_v3  ;;  %v4710_v44 = vmul.f32 %v4062_v60, %v4062_v60 }
 0x64d   : > { %v8211_v11 = vpop.eup %8210  ;;  %v3027_v47 = vpack.c.bf16 %v2957_v18, %v2956_v12  ;;  %v3356_v55 = vpop.f32.mrf.mxu0 }
 0x64e   : > { %v5143_v25 = vmul.f32 %v8211_v11, %v5078_v52  ;;  %v4294_v51 = vsel %vm4245_vm3, %v4197_v28, 0.0  ;;  %v4806_v56 = vsel %vm4245_vm3, %v4710_v44, 0.0  ;;  %vm5149_vm4 = vweird.f32 %v8211_v11 }
 0x64f   : > { %4295 = vadd.xlane.f32.xlu1 %v4294_v51  ;;  %4807 = vadd.xlane.f32.xlu0 %v4806_v56  ;;  %v3357_v18 = vadd.f32 %v10239_v4, %v3356_v55  ;;  %vm5150_vm6 = vmor %vm5148_vm5, %vm5149_vm4 }
 0x650   : > { %v5144_v48 = vmul.f32 %v8211_v11, %v5143_v25  ;;  %3395 = vmatmul.bf16.gmra.mxu0 %v3027_v47  ;;  %v2812_v1 = vpop.f32.mrf.mxu3  ;;  %v2484_v47 = vadd.f32 %v10128_v46, %v2483_v43 }
 0x651   : > { %v4063_v22 = vpop.f32.mrf.mxu1  ;;  %v3529_v52 = vmax.f32 %v3357_v18, 0.0 }
 0x652   : > { %v5145_v35 = vmul.f32 0.5, %v5144_v48  ;;  %v4064_v3 = vadd.f32 %v10050_v40, %v4063_v22  ;;  %v4763_v36 = vpop.xlane.xlu0 %4762  ;;  %v10315_v48 = vpop.f32.mrf.mxu2  ;;  %v2813_v55 = vadd.f32 %v2812_v1, %v2484_v47 }
 0x653   : > { %v5015_v60 = vmax.f32 %v4763_v36, 1e-16 }
 0x654   : > { %v5146_v12 = vsub.f32 1.5, %v5145_v35  ;;  %v4198_v28 = vmul.f32 %v4064_v3, %v9581_v45  ;;  %v4711_v44 = vmul.f32 %v4064_v3, %v4064_v3  ;;  %v2486_v45 = vadd.f32 %v10128_v46, %v2485_v31 }
 0x655   : > { %v10313_v25 = vmul.f32 %v5015_v60, %v4951_v39  ;;  %v3358_v51 = vpop.f32.mrf.mxu0  ;;  %v2958_v1 = vmax.f32 %v2813_v55, 0.0 }
 0x656   : > { %v5147_v56 = vmul.f32 %v8211_v11, %v5146_v12  ;;  %v3359_v22 = vadd.f32 %v10239_v4, %v3358_v51  ;;  %v4297_v37 = vsel %vm4245_vm3, %v4198_v28, 0.0  ;;  %v4809_v35 = vsel %vm4245_vm3, %v4711_v44, 0.0  ;;  %v10324_v28 = vpop.xlane.xlu2 %4689 }
 0x657   : > { %8212 = vrsqrt.f32 %v10313_v25  ;;  %4298 = vadd.xlane.f32.xlu2 %v4297_v37  ;;  %4810 = vadd.xlane.f32.xlu1 %v4809_v35  ;;  %11954 = vst [vmem:[#allocation80_spill] sm:$0xff] %v10324_v28  ;;  %v4952_v37 = vmax.f32 %v9987_v54, 1e-16  ;;  %vm5158_vm8 = vweird.f32 %v10313_v25 }
 0x658   : > { %v5151_v43 = vsel %vm5150_vm6, %v8211_v11, %v5147_v56  ;;  %v3530_v3 = vmax.f32 %v3359_v22, 0.0  ;;  %v2814_v36 = vpop.f32.mrf.mxu3 }
 0x659   : > { %v5782_v39 = vmul.f32 %v5151_v43, %v10287_v32  ;;  %v2815_v60 = vadd.f32 %v2814_v36, %v2486_v45  ;;  %v4066_v12 = vpop.f32.mrf.mxu1 }
 0x65a   : > { %v3608_v44 = vpack.c.bf16 %v3530_v3, %v3529_v52  ;;  %v4067_v51 = vadd.f32 %v10050_v40, %v4066_v12  ;;  %v4766_v61 = vpop.xlane.xlu0 %4765 }
 0x65b   : > { %v5910_v31 = vperm.slane %v5782_v39, 0  ;;  %v5911_v50 = vperm.slane %v5782_v39, 1  ;;  %v5912_v53 = vperm.slane %v5782_v39, 2  ;;  %v5913_v11 = vperm.slane %v5782_v39, 3 }
 0x65c   : > { %v5914_v18 = vperm.slane %v5782_v39, 4  ;;  %8026 = vmatmul.msk.bf16.gmra.mxu1 %vm3659_vm2, %v3608_v44  ;;  %v2959_v32 = vmax.f32 %v2815_v60, 0.0  ;;  %v5016_v56 = vmax.f32 %v4766_v61, 1e-16  ;;  %v4712_v35 = vmul.f32 %v4067_v51, %v4067_v51  ;;  %v2490_v60 = vpop.f32.mrf.mxu2 }
 0x65d   : > { %v8213_v47 = vpop.eup %8212  ;;  %6422 = vst [vmem:[#allocation1] ss:$9 sm:$0xff] %v5910_v31  ;;  %v3361_v22 = vpop.f32.mrf.mxu0  ;;  %v4199_v45 = vmul.f32 %v4067_v51, %v9591_v41  ;;  %v5915_v43 = vperm.slane %v5782_v39, 5  ;;  %v5916_v52 = vperm.slane %v5782_v39, 6  ;;  %v5917_v44 = vperm.slane %v5782_v39, 7 }
 0x65e   : > { %6424 = vst [vmem:[#allocation1 + $0x1] ss:$9 sm:$0xff] %v5911_v50  ;;  %v5153_v3 = vmul.f32 %v8213_v47, %v10313_v25  ;;  %v3028_v54 = vpack.c.bf16 %v2959_v32, %v2958_v1  ;;  %v10331_v36 = vmul.f32 %v5016_v56, %v4952_v37  ;;  %v4812_v55 = vsel %vm4245_vm3, %v4712_v35, 0.0 }
 0x65f   : > { %6426 = vst [vmem:[#allocation1 + $0x2] ss:$9 sm:$0xff] %v5912_v53  ;;  %v4300_v12 = vsel %vm4245_vm3, %v4199_v45, 0.0  ;;  %4813 = vadd.xlane.f32.xlu2 %v4812_v55  ;;  %v4953_v39 = vmax.f32 %v9989_v23, 1e-16  ;;  %vm5159_vm7 = vweird.f32 %v8213_v47  ;;  %v2489_v56 = vadd.f32 %v10128_v46, %v10315_v48 }
 0x660   : > { %6428 = vst [vmem:[#allocation1 + $0x3] ss:$9 sm:$0xff] %v5913_v11  ;;  %v5154_v61 = vmul.f32 %v8213_v47, %v5153_v3  ;;  %4301 = vadd.xlane.f32.xlu0 %v4300_v12  ;;  %v2817_v41 = vpop.f32.mrf.mxu3  ;;  %8214 = vrsqrt.f32 %v10331_v36  ;;  %3400 = vmatmul.bf16.gmra.mxu0 %v3028_v54  ;;  %v3362_v11 = vadd.f32 %v10239_v4, %v3361_v22  ;;  %vm5160_vm9 = vmor %vm5158_vm8, %vm5159_vm7  ;;  %vm5168_vm11 = vweird.f32 %v10331_v36 }
 0x661   : > { %6430 = vst [vmem:[#allocation1 + $0x4] ss:$9 sm:$0xff] %v5914_v18  ;;  %v4068_v50 = vpop.f32.mrf.mxu1  ;;  %v2818_v54 = vadd.f32 %v2817_v41, %v2489_v56 }
 0x662   : > { %6432 = vst [vmem:[#allocation1 + $0x5] ss:$9 sm:$0xff] %v5915_v43  ;;  %v5155_v53 = vmul.f32 0.5, %v5154_v61  ;;  %v10337_v51 = vadd.f32 %v10050_v40, %v4068_v50  ;;  %v10339_v31 = vpop.xlane.xlu2 %4259  ;;  %v4769_v37 = vpop.xlane.xlu0 %4768  ;;  %v3531_v3 = vmax.f32 %v3362_v11, 0.0 }
 0x663   : > { %6434 = vst [vmem:[#allocation1 + $0x6] ss:$9 sm:$0xff] %v5916_v52  ;;  %v5017_v1 = vmax.f32 %v4769_v37, 1e-16  ;;  %v2491_v52 = vadd.f32 %v10128_v46, %v2490_v60  ;;  %v10363_v60 = vld [vmem:[%s11708_s7] ss:$0 sm:$0xff] }
 0x664   : > { %6436 = vst [vmem:[#allocation1 + $0x7] ss:$9 sm:$0xff] %v5917_v44  ;;  %v5156_v18 = vsub.f32 1.5, %v5155_v53  ;;  %v4200_v32 = vmul.f32 %v10337_v51, %v9600_v30  ;;  %v2493_v53 = vpop.f32.mrf.mxu2 }
 0x665   : > { %v10347_v40 = vmul.f32 %v5017_v1, %v4953_v39  ;;  %v3363_v35 = vpop.f32.mrf.mxu0 }
 0x666   : > { %v5157_v45 = vmul.f32 %v8213_v47, %v5156_v18  ;;  %v3364_v23 = vadd.f32 %v10239_v4, %v3363_v35  ;;  %v4303_v22 = vsel %vm4245_vm3, %v4200_v32, 0.0  ;;  %v10352_v43 = vpop.eup %8214  ;;  %v2960_v35 = vmax.f32 %v2818_v54, 0.0 }
 0x667   : > { %8216 = vrsqrt.f32 %v10347_v40  ;;  %4304 = vadd.xlane.f32.xlu1 %v4303_v22  ;;  %v5163_v48 = vmul.f32 %v10352_v43, %v10331_v36  ;;  %vm5169_vm10 = vweird.f32 %v10352_v43  ;;  %vm5178_vm14 = vweird.f32 %v10347_v40 }
 0x668   : > { %v5161_v30 = vsel %vm5160_vm9, %v8213_v47, %v5157_v45  ;;  %v3532_v55 = vmax.f32 %v3364_v23, 0.0  ;;  %v2819_v25 = vpop.f32.mrf.mxu3  ;;  %vm5170_vm12 = vmor %vm5168_vm11, %vm5169_vm10 }
 0x669   : > { %v5783_v12 = vmul.f32 %v5161_v30, %v10300_v42  ;;  %v2820_v44 = vadd.f32 %v2819_v25, %v2491_v52  ;;  %v4071_v61 = vpop.f32.mrf.mxu1  ;;  %v5164_v50 = vmul.f32 %v10352_v43, %v5163_v48  ;;  %v4954_v42 = vmax.f32 %v10061_v63, 1e-16 }
 0x66a   : > { %v3609_v37 = vpack.c.bf16 %v3532_v55, %v3531_v3  ;;  %v10366_v47 = vadd.f32 %v10363_v60, %v4071_v61  ;;  %v4772_v39 = vpop.xlane.xlu2 %4771 }
 0x66b   : > { %v5918_v41 = vperm.slane %v5783_v12, 0  ;;  %v5919_v11 = vperm.slane %v5783_v12, 1  ;;  %v5920_v1 = vperm.slane %v5783_v12, 2  ;;  %v6437_v18 = vld [vmem:[#allocation1] sm:$0xff]  ;;  %v5921_v32 = vperm.slane %v5783_v12, 3 }
 0x66c   : > { %v5922_v56 = vperm.slane %v5783_v12, 4  ;;  %8027 = vmatmul.msk.bf16.gmra.mxu1 %vm3659_vm2, %v3609_v37  ;;  %v5165_v23 = vmul.f32 0.5, %v5164_v50  ;;  %v2961_v22 = vmax.f32 %v2820_v44, 0.0  ;;  %v5018_v52 = vmax.f32 %v4772_v39, 1e-16 }
 0x66d   : > { %v10370_v45 = vpop.eup %8216  ;;  %6438 = vst [vmem:[#allocation1] ss:$9 sm:$0xff] %v5918_v41  ;;  %v3366_v3 = vpop.f32.mrf.mxu0  ;;  %v4201_v30 = vmul.f32 %v10366_v47, %v9610_v34  ;;  %v5923_v48 = vperm.slane %v5783_v12, 5  ;;  %v5924_v55 = vperm.slane %v5783_v12, 6  ;;  %v5925_v50 = vperm.slane %v5783_v12, 7 }
 0x66e   : > { %6439 = vst [vmem:[#allocation1 + $0x1] ss:$9 sm:$0xff] %v5919_v11  ;;  %v5173_v63 = vmul.f32 %v10370_v45, %v10347_v40  ;;  %v5166_v54 = vsub.f32 1.5, %v5165_v23  ;;  %v3029_v25 = vpack.c.bf16 %v2961_v22, %v2960_v35  ;;  %v10377_v61 = vmul.f32 %v5018_v52, %v4954_v42  ;;  %v4254_v12 = vpop.xlane.xlu1 %4253 }
 0x66f   : > { %6440 = vst [vmem:[#allocation1 + $0x2] ss:$9 sm:$0xff] %v5920_v1  ;;  %v4306_v44 = vsel %vm4245_vm3, %v4201_v30, 0.0  ;;  %v3367_v36 = vadd.f32 %v10239_v4, %v3366_v3  ;;  %v2494_v35 = vadd.f32 %v10128_v46, %v2493_v53  ;;  %vm5179_vm13 = vweird.f32 %v10370_v45 }
 0x670   : > { %6441 = vst [vmem:[#allocation1 + $0x3] ss:$9 sm:$0xff] %v5921_v32  ;;  %v5174_v37 = vmul.f32 %v10370_v45, %v5173_v63  ;;  %4307 = vadd.xlane.f32.xlu2 %v4306_v44  ;;  %v2822_v34 = vpop.f32.mrf.mxu3  ;;  %v5167_v39 = vmul.f32 %v10352_v43, %v5166_v54  ;;  %3405 = vmatmul.bf16.gmra.mxu0 %v3029_v25  ;;  %8218 = vrsqrt.f32 %v10377_v61  ;;  %v2495_v32 = vpop.f32.mrf.mxu2  ;;  %vm5180_vm15 = vmor %vm5178_vm14, %vm5179_vm13  ;;  %vm5188_vm4 = vweird.f32 %v10377_v61 }
 0x671   : > { %6442 = vst [vmem:[#allocation1 + $0x4] ss:$9 sm:$0xff] %v5922_v56  ;;  %v2496_v23 = vadd.f32 %v10128_v46, %v2495_v32  ;;  %v2823_v63 = vadd.f32 %v2822_v34, %v2494_v35  ;;  %v3533_v44 = vmax.f32 %v3367_v36, 0.0  ;;  %v4955_v34 = vmax.f32 %v10000_v58, 1e-16 }
 0x672   : > { %6443 = vst [vmem:[#allocation1 + $0x5] ss:$9 sm:$0xff] %v5923_v48  ;;  %v10386_v41 = vpop.xlane.xlu2 %4262  ;;  %v5171_v11 = vsel %vm5170_vm12, %v10352_v43, %v5167_v39  ;;  %v5175_v42 = vmul.f32 0.5, %v5174_v37 }
 0x673   : > { %6444 = vst [vmem:[#allocation1 + $0x6] ss:$9 sm:$0xff] %v5924_v55  ;;  %v5784_v1 = vmul.f32 %v5171_v11, %v4254_v12 }
 0x674   : > { %6445 = vst [vmem:[#allocation1 + $0x7] ss:$9 sm:$0xff] %v5925_v50  ;;  %7006 = vperm.xlu0 %8204, %v6437_v18   ;;  %v5176_v30 = vsub.f32 1.5, %v5175_v42 }
 0x675   : > { %v3368_v56 = vpop.f32.mrf.mxu0  ;;  %v5926_v52 = vperm.slane %v5784_v1, 0  ;;  %v5927_v43 = vperm.slane %v5784_v1, 1  ;;  %v5928_v25 = vperm.slane %v5784_v1, 2  ;;  %v5929_v3 = vperm.slane %v5784_v1, 3 }
 0x676   : > { %v10392_v22 = vpop.eup %8218  ;;  %v3369_v48 = vadd.f32 %v10239_v4, %v3368_v56  ;;  %v5930_v12 = vperm.slane %v5784_v1, 4  ;;  %v5177_v11 = vmul.f32 %v10370_v45, %v5176_v30  ;;  %v5931_v32 = vperm.slane %v5784_v1, 5 }
 0x677   : > { %v5183_v53 = vmul.f32 %v10392_v22, %v10377_v61  ;;  %v2962_v56 = vmax.f32 %v2823_v63, 0.0  ;;  %v5932_v36 = vperm.slane %v5784_v1, 6  ;;  %v5933_v35 = vperm.slane %v5784_v1, 7  ;;  %v10427_v61 = vld [vmem:[%s11704_s3] ss:$0 sm:$0xff] }
 0x678   : > { %v2824_v55 = vpop.f32.mrf.mxu3  ;;  %v3534_v18 = vmax.f32 %v3369_v48, 0.0  ;;  %v5181_v58 = vsel %vm5180_vm15, %v10370_v45, %v5177_v11  ;;  %v4257_v48 = vpop.xlane.xlu1 %4256  ;;  %vm5189_vm1 = vweird.f32 %v10392_v22 }
 0x679   : > { %v2825_v54 = vadd.f32 %v2824_v55, %v2496_v23  ;;  %v5184_v23 = vmul.f32 %v10392_v22, %v5183_v53  ;;  %v5785_v40 = vmul.f32 %v5181_v58, %v4257_v48  ;;  %vm5190_vm5 = vmor %vm5188_vm4, %vm5189_vm1 }
 0x67a   : > { %v4775_v50 = vpop.xlane.xlu2 %4774  ;;  %v3610_v42 = vpack.c.bf16 %v3534_v18, %v3533_v44 }
 0x67b   : > { %v6446_v37 = vld [vmem:[#allocation1] sm:$0xff]  ;;  %v2963_v46 = vmax.f32 %v2825_v54, 0.0  ;;  %v5019_v39 = vmax.f32 %v4775_v50, 1e-16  ;;  %v5185_v1 = vmul.f32 0.5, %v5184_v23  ;;  %v5935_v18 = vperm.slane %v5785_v40, 1 }
 0x67c   : > { %6447 = vst [vmem:[#allocation1] ss:$9 sm:$0xff] %v5926_v52  ;;  %8028 = vmatmul.msk.bf16.gmra.mxu1 %vm3659_vm2, %v3610_v42 }
 0x67d   : > { %6448 = vst [vmem:[#allocation1 + $0x1] ss:$9 sm:$0xff] %v5927_v43  ;;  %v3030_v52 = vpack.c.bf16 %v2963_v46, %v2962_v56  ;;  %v10403_v30 = vmul.f32 %v5019_v39, %v4955_v34  ;;  %v3371_v55 = vpop.f32.mrf.mxu0  ;;  %v2498_v43 = vpop.f32.mrf.mxu2  ;;  %v5186_v44 = vsub.f32 1.5, %v5185_v1  ;;  %v5937_v46 = vperm.slane %v5785_v40, 3 }
 0x67e   : > { %6449 = vst [vmem:[#allocation1 + $0x2] ss:$9 sm:$0xff] %v5928_v25  ;;  %v5934_v25 = vperm.slane %v5785_v40, 0  ;;  %v5939_v34 = vperm.slane %v5785_v40, 5  ;;  %v5940_v56 = vperm.slane %v5785_v40, 6 }
 0x67f   : > { %6450 = vst [vmem:[#allocation1 + $0x3] ss:$9 sm:$0xff] %v5929_v3  ;;  %8220 = vrsqrt.f32 %v10403_v30  ;;  %v4956_v3 = vmax.f32 %v10002_v21, 1e-16  ;;  %v5187_v11 = vmul.f32 %v10392_v22, %v5186_v44  ;;  %v3372_v21 = vadd.f32 %v10239_v4, %v3371_v55 }
 0x680   : > { %6451 = vst [vmem:[#allocation1 + $0x4] ss:$9 sm:$0xff] %v5930_v12  ;;  %7009 = vperm.xlu1 %8205, %v6446_v37   ;;  %3410 = vmatmul.bf16.gmra.mxu0 %v3030_v52  ;;  %v2827_v50 = vpop.f32.mrf.mxu3  ;;  %v5936_v37 = vperm.slane %v5785_v40, 2  ;;  %v5938_v12 = vperm.slane %v5785_v40, 4  ;;  %v10414_v42 = vpop.xlane.xlu1 %4268  ;;  %vm5198_vm7 = vweird.f32 %v10403_v30 }
 0x681   : > { %6452 = vst [vmem:[#allocation1 + $0x5] ss:$9 sm:$0xff] %v5931_v32  ;;  %v5191_v52 = vsel %vm5190_vm5, %v10392_v22, %v5187_v11  ;;  %v3535_v1 = vmax.f32 %v3372_v21, 0.0 }
 0x682   : > { %6453 = vst [vmem:[#allocation1 + $0x6] ss:$9 sm:$0xff] %v5932_v36  ;;  %v4778_v63 = vpop.xlane.xlu2 %4777  ;;  %v5941_v36 = vperm.slane %v5785_v40, 7  ;;  %v2499_v40 = vadd.f32 %v10427_v61, %v2498_v43 }
 0x683   : > { %6454 = vst [vmem:[#allocation1 + $0x7] ss:$9 sm:$0xff] %v5933_v35  ;;  %v5020_v45 = vmax.f32 %v4778_v63, 1e-16  ;;  %v5786_v63 = vmul.f32 %v5191_v52, %v10339_v31 }
 0x685   : > { %v10407_v54 = vpop.eup %8220  ;;  %v10416_v32 = vmul.f32 %v5020_v45, %v4956_v3  ;;  %v3373_v23 = vpop.f32.mrf.mxu0  ;;  %v5943_v43 = vperm.slane %v5786_v63, 1  ;;  %v5945_v21 = vperm.slane %v5786_v63, 3  ;;  %v5946_v52 = vperm.slane %v5786_v63, 4 }
 0x686   : > { %v5193_v39 = vmul.f32 %v10407_v54, %v10403_v30  ;;  %v2500_v58 = vpop.f32.mrf.mxu2  ;;  %v3374_v48 = vadd.f32 %v10239_v4, %v3373_v23  ;;  %v4957_v23 = vmax.f32 %v10076_v62, 1e-16  ;;  %vm5199_vm6 = vweird.f32 %v10407_v54 }
 0x687   : > { %8222 = vrsqrt.f32 %v10416_v32  ;;  %v2501_v22 = vadd.f32 %v10427_v61, %v2500_v58  ;;  %v4073_v58 = vpop.f32.mrf.mxu1  ;;  %vm5200_vm8 = vmor %vm5198_vm7, %vm5199_vm6  ;;  %vm5208_vm10 = vweird.f32 %v10416_v32 }
 0x688   : > { %v5194_v35 = vmul.f32 %v10407_v54, %v5193_v39  ;;  %v3536_v55 = vmax.f32 %v3374_v48, 0.0  ;;  %v2829_v44 = vpop.f32.mrf.mxu3  ;;  %v4781_v3 = vpop.xlane.xlu1 %4780  ;;  %v4074_v62 = vadd.f32 %v10363_v60, %v4073_v58 }
 0x68a   : > { %v6455_v53 = vld [vmem:[#allocation1] sm:$0xff]  ;;  %v3611_v45 = vpack.c.bf16 %v3536_v55, %v3535_v1  ;;  %v5948_v1 = vperm.slane %v5786_v63, 6  ;;  %v10467_v58 = vpop.xlane.xlu2 %4271 }
 0x68b   : > { %6456 = vst [vmem:[#allocation1] ss:$9 sm:$0xff] %v5934_v25  ;;  %7012 = vperm.xlu2 %8206, %v6455_v53   ;;  %v5195_v25 = vmul.f32 0.5, %v5194_v35  ;;  %v4713_v35 = vmul.f32 %v10337_v51, %v10337_v51 }
 0x68c   : > { %6457 = vst [vmem:[#allocation1 + $0x1] ss:$9 sm:$0xff] %v5935_v18  ;;  %v2828_v18 = vadd.f32 %v2827_v50, %v2499_v40  ;;  %8029 = vmatmul.msk.bf16.gmra.mxu1 %vm3659_vm2, %v3611_v45  ;;  %v5947_v40 = vperm.slane %v5786_v63, 5 }
 0x68d   : > { %6458 = vst [vmem:[#allocation1 + $0x2] ss:$9 sm:$0xff] %v5936_v37  ;;  %v2830_v37 = vadd.f32 %v2829_v44, %v2501_v22  ;;  %v10433_v53 = vpop.eup %8222  ;;  %v5196_v39 = vsub.f32 1.5, %v5195_v25  ;;  %v5949_v22 = vperm.slane %v5786_v63, 7  ;;  %v4815_v25 = vsel %vm4245_vm3, %v4713_v35, 0.0 }
 0x68e   : > { %6459 = vst [vmem:[#allocation1 + $0x3] ss:$9 sm:$0xff] %v5937_v46  ;;  %v5942_v46 = vperm.slane %v5786_v63, 0  ;;  %v5203_v50 = vmul.f32 %v10433_v53, %v10416_v32  ;;  %vm5209_vm9 = vweird.f32 %v10433_v53 }
 0x68f   : > { %6460 = vst [vmem:[#allocation1 + $0x4] ss:$9 sm:$0xff] %v5938_v12  ;;  %v2964_v12 = vmax.f32 %v2828_v18, 0.0  ;;  %v2965_v11 = vmax.f32 %v2830_v37, 0.0  ;;  %v5197_v48 = vmul.f32 %v10407_v54, %v5196_v39  ;;  %v4202_v18 = vmul.f32 %v4074_v62, %v9619_v33  ;;  %vm5210_vm11 = vmor %vm5208_vm10, %vm5209_vm9 }
 0x690   : > { %6461 = vst [vmem:[#allocation1 + $0x5] ss:$9 sm:$0xff] %v5939_v34  ;;  %v5944_v34 = vperm.slane %v5786_v63, 2  ;;  %v5204_v51 = vmul.f32 %v10433_v53, %v5203_v50  ;;  %v4714_v39 = vmul.f32 %v10366_v47, %v10366_v47 }
 0x691   : > { %6462 = vst [vmem:[#allocation1 + $0x6] ss:$9 sm:$0xff] %v5940_v56  ;;  %v5021_v56 = vmax.f32 %v4781_v3, 1e-16  ;;  %v5201_v44 = vsel %vm5200_vm8, %v10407_v54, %v5197_v48  ;;  %v4784_v3 = vpop.xlane.xlu1 %4783 }
 0x692   : > { %6463 = vst [vmem:[#allocation1 + $0x7] ss:$9 sm:$0xff] %v5941_v36  ;;  %v3031_v36 = vpack.c.bf16 %v2965_v11, %v2964_v12  ;;  %v5787_v30 = vmul.f32 %v5201_v44, %v10386_v41  ;;  %v5205_v63 = vmul.f32 0.5, %v5204_v51  ;;  %v5022_v33 = vmax.f32 %v4784_v3, 1e-16  ;;  %v4266_v44 = vpop.xlane.xlu0 %4265 }
 0x693   : > { %v10445_v55 = vmul.f32 %v5021_v56, %v4957_v23  ;;  %v2503_v56 = vpop.f32.mrf.mxu2  ;;  %v4818_v35 = vsel %vm4245_vm3, %v4714_v39, 0.0  ;;  %v4958_v23 = vmax.f32 %v10014_v26, 1e-16 }
 0x694   : > { %3415 = vmatmul.bf16.gmra.mxu0 %v3031_v36  ;;  %v5950_v45 = vperm.slane %v5787_v30, 0  ;;  %v5206_v37 = vsub.f32 1.5, %v5205_v63  ;;  %v5952_v12 = vperm.slane %v5787_v30, 2  ;;  %v5953_v41 = vperm.slane %v5787_v30, 3  ;;  %v3376_v36 = vpop.f32.mrf.mxu0 }
 0x695   : > { %8224 = vrsqrt.f32 %v10445_v55  ;;  %v2504_v39 = vadd.f32 %v10427_v61, %v2503_v56  ;;  %vm5218_vm13 = vweird.f32 %v10445_v55 }
 0x696   : > { %v5207_v50 = vmul.f32 %v10433_v53, %v5206_v37  ;;  %v3377_v37 = vadd.f32 %v10239_v4, %v3376_v36 }
 0x698   : > { %v5211_v26 = vsel %vm5210_vm11, %v10433_v53, %v5207_v50  ;;  %v3537_v36 = vmax.f32 %v3377_v37, 0.0 }
 0x699   : > { %v10435_v31 = vld [vmem:[#allocation1] sm:$0xff]  ;;  %v5788_v32 = vmul.f32 %v5211_v26, %v4266_v44 }
 0x69a   : > { %6465 = vst [vmem:[#allocation1] ss:$9 sm:$0xff] %v5942_v46  ;;  %v4309_v46 = vsel %vm4245_vm3, %v4202_v18, 0.0  ;;  %v4715_v18 = vmul.f32 %v4074_v62, %v4074_v62 }
 0x69b   : > { %6466 = vst [vmem:[#allocation1 + $0x1] ss:$9 sm:$0xff] %v5943_v43  ;;  %v10457_v54 = vpop.eup %8224  ;;  %v5951_v43 = vperm.slane %v5787_v30, 1  ;;  %v5962_v26 = vperm.slane %v5788_v32, 4 }
 0x69c   : > { %6467 = vst [vmem:[#allocation1 + $0x2] ss:$9 sm:$0xff] %v5944_v34  ;;  %v4076_v34 = vpop.f32.mrf.mxu1  ;;  %v5213_v47 = vmul.f32 %v10457_v54, %v10445_v55  ;;  %v3378_v3 = vpop.f32.mrf.mxu0  ;;  %v4821_v53 = vsel %vm4245_vm3, %v4715_v18, 0.0  ;;  %v4959_v18 = vmax.f32 %v10016_v49, 1e-16  ;;  %vm5219_vm12 = vweird.f32 %v10457_v54 }
 0x69d   : > { %6468 = vst [vmem:[#allocation1 + $0x3] ss:$9 sm:$0xff] %v5945_v21  ;;  %v5954_v21 = vperm.slane %v5787_v30, 4  ;;  %v4077_v48 = vadd.f32 %v10363_v60, %v4076_v34  ;;  %v3379_v34 = vadd.f32 %v10239_v4, %v3378_v3  ;;  %vm5220_vm14 = vmor %vm5218_vm13, %vm5219_vm12 }
 0x69e   : > { %6469 = vst [vmem:[#allocation1 + $0x4] ss:$9 sm:$0xff] %v5946_v52  ;;  %4816 = vadd.xlane.f32.xlu0 %v4815_v25  ;;  %v5955_v52 = vperm.slane %v5787_v30, 5  ;;  %v5214_v51 = vmul.f32 %v10457_v54, %v5213_v47  ;;  %v2832_v25 = vpop.f32.mrf.mxu3 }
 0x69f   : > { %6470 = vst [vmem:[#allocation1 + $0x5] ss:$9 sm:$0xff] %v5947_v40  ;;  %v5956_v40 = vperm.slane %v5787_v30, 6  ;;  %v4716_v63 = vmul.f32 %v4077_v48, %v4077_v48  ;;  %v4203_v56 = vmul.f32 %v4077_v48, %v9629_v19  ;;  %v10496_v48 = vpop.xlane.xlu0 %4274 }
 0x6a0   : > { %6471 = vst [vmem:[#allocation1 + $0x6] ss:$9 sm:$0xff] %v5948_v1  ;;  %v5957_v1 = vperm.slane %v5787_v30, 7  ;;  %v5215_v30 = vmul.f32 0.5, %v5214_v51 }
 0x6a1   : > { %6472 = vst [vmem:[#allocation1 + $0x7] ss:$9 sm:$0xff] %v5949_v22  ;;  %v10473_v22 = vmul.f32 %v5022_v33, %v4958_v23  ;;  %v5960_v33 = vperm.slane %v5788_v32, 2  ;;  %v3538_v23 = vmax.f32 %v3379_v34, 0.0 }
 0x6a3   : > { %8226 = vrsqrt.f32 %v10473_v22  ;;  %v3612_v51 = vpack.c.bf16 %v3538_v23, %v3537_v36  ;;  %vm5228_vm1 = vweird.f32 %v10473_v22 }
 0x6a4   : > { %v10483_v62 = vpop.f32.mrf.mxu1 }
 0x6a5   : > { %8030 = vmatmul.msk.bf16.gmra.mxu1 %vm3659_vm2, %v3612_v51  ;;  %v10521_v51 = vpop.xlane.xlu1 %4277 }
 0x6a6   : > { %4310 = vadd.xlane.f32.xlu0 %v4309_v46  ;;  %v4824_v46 = vsel %vm4245_vm3, %v4716_v63, 0.0  ;;  %v4312_v63 = vsel %vm4245_vm3, %v4203_v56, 0.0 }
 0x6a8   : > { %v10459_v11 = vld [vmem:[#allocation1] sm:$0xff] }
 0x6a9   : > { %6474 = vst [vmem:[#allocation1] ss:$9 sm:$0xff] %v5950_v45  ;;  %v2505_v45 = vpop.f32.mrf.mxu2  ;;  %v10486_v47 = vpop.eup %8226 }
 0x6aa   : > { %6475 = vst [vmem:[#allocation1 + $0x1] ss:$9 sm:$0xff] %v5951_v43  ;;  %4819 = vadd.xlane.f32.xlu1 %v4818_v35  ;;  %v5958_v43 = vperm.slane %v5788_v32, 0  ;;  %v2506_v50 = vadd.f32 %v10427_v61, %v2505_v45  ;;  %v2833_v35 = vadd.f32 %v2832_v25, %v2504_v39  ;;  %v5223_v19 = vmul.f32 %v10486_v47, %v10473_v22 }
 0x6ab   : > { %6476 = vst [vmem:[#allocation1 + $0x2] ss:$9 sm:$0xff] %v5952_v12  ;;  %v4787_v12 = vpop.xlane.xlu2 %4786  ;;  %v5964_v25 = vperm.slane %v5788_v32, 6  ;;  %vm5229_vm15 = vweird.f32 %v10486_v47 }
 0x6ac   : > { %6477 = vst [vmem:[#allocation1 + $0x3] ss:$9 sm:$0xff] %v5953_v41  ;;  %v5959_v41 = vperm.slane %v5788_v32, 1  ;;  %v5023_v4 = vmax.f32 %v4787_v12, 1e-16  ;;  %v2966_v37 = vmax.f32 %v2833_v35, 0.0  ;;  %v5224_v39 = vmul.f32 %v10486_v47, %v5223_v19  ;;  %v4081_v12 = vpop.f32.mrf.mxu1  ;;  %vm5230_vm4 = vmor %vm5228_vm1, %vm5229_vm15 }
 0x6ad   : > { %6478 = vst [vmem:[#allocation1 + $0x4] ss:$9 sm:$0xff] %v5954_v21  ;;  %v5216_v21 = vsub.f32 1.5, %v5215_v30  ;;  %v5963_v30 = vperm.slane %v5788_v32, 5  ;;  %v10510_v55 = vadd.f32 %v10363_v60, %v4081_v12  ;;  %v4793_v12 = vpop.xlane.xlu1 %4792 }
 0x6ae   : > { %6479 = vst [vmem:[#allocation1 + $0x5] ss:$9 sm:$0xff] %v5955_v52  ;;  %4825 = vadd.xlane.f32.xlu0 %v4824_v46  ;;  %v5965_v46 = vperm.slane %v5788_v32, 7  ;;  %v10500_v49 = vmul.f32 %v5023_v4, %v4959_v18  ;;  %v5225_v34 = vmul.f32 0.5, %v5224_v39  ;;  %v4960_v4 = vmax.f32 %v10090_v0, 1e-16 }
 0x6af   : > { %6480 = vst [vmem:[#allocation1 + $0x6] ss:$9 sm:$0xff] %v5956_v40  ;;  %v5961_v40 = vperm.slane %v5788_v32, 3  ;;  %v5217_v45 = vmul.f32 %v10457_v54, %v5216_v21  ;;  %v4205_v23 = vmul.f32 %v10510_v55, %v9648_v6 }
 0x6b0   : > { %6481 = vst [vmem:[#allocation1 + $0x7] ss:$9 sm:$0xff] %v5957_v1  ;;  %v2834_v1 = vpop.f32.mrf.mxu3  ;;  %8228 = vrsqrt.f32 %v10500_v49  ;;  %vm5238_vm6 = vweird.f32 %v10500_v49 }
 0x6b1   : > { %v2835_v44 = vadd.f32 %v2834_v1, %v2506_v50  ;;  %v5226_v50 = vsub.f32 1.5, %v5225_v34 }
 0x6b2   : > { %4313 = vadd.xlane.f32.xlu1 %v4312_v63 }
 0x6b3   : > { %v2967_v3 = vmax.f32 %v2835_v44, 0.0  ;;  %v4318_v44 = vsel %vm4245_vm3, %v4205_v23, 0.0  ;;  %v5227_v18 = vmul.f32 %v10486_v47, %v5226_v50 }
 0x6b4   : > { %4822 = vadd.xlane.f32.xlu2 %v4821_v53 }
 0x6b5   : > { %v3032_v53 = vpack.c.bf16 %v2967_v3, %v2966_v37  ;;  %v5231_v37 = vsel %vm5230_vm4, %v10486_v47, %v5227_v18  ;;  %v10555_v18 = vpop.xlane.xlu2 %4280 }
 0x6b6   : > { %4319 = vadd.xlane.f32.xlu0 %v4318_v44  ;;  %v5790_v3 = vmul.f32 %v5231_v37, %v10467_v58 }
 0x6b7   : > { %v10489_v52 = vld [vmem:[#allocation1] sm:$0xff]  ;;  %3420 = vmatmul.bf16.gmra.mxu0 %v3032_v53 }
 0x6b8   : > { %6483 = vst [vmem:[#allocation1] ss:$9 sm:$0xff] %v5958_v43  ;;  %v5221_v43 = vsel %vm5220_vm14, %v10457_v54, %v5217_v45  ;;  %v2837_v19 = vpop.f32.mrf.mxu3  ;;  %v5977_v44 = vperm.slane %v5790_v3, 3 }
 0x6b9   : > { %6484 = vst [vmem:[#allocation1 + $0x1] ss:$9 sm:$0xff] %v5959_v41  ;;  %v5789_v32 = vmul.f32 %v5221_v43, %v10414_v42  ;;  %v4790_v41 = vpop.xlane.xlu0 %4789  ;;  %v3381_v42 = vpop.f32.mrf.mxu0 }
 0x6ba   : > { %6485 = vst [vmem:[#allocation1 + $0x2] ss:$9 sm:$0xff] %v5960_v33  ;;  %v10512_v33 = vpop.eup %8228  ;;  %v5024_v54 = vmax.f32 %v4790_v41, 1e-16  ;;  %v5974_v41 = vperm.slane %v5790_v3, 0 }
 0x6bb   : > { %6486 = vst [vmem:[#allocation1 + $0x3] ss:$9 sm:$0xff] %v5961_v40  ;;  %v5966_v21 = vperm.slane %v5789_v32, 0  ;;  %v5967_v35 = vperm.slane %v5789_v32, 1  ;;  %v5968_v56 = vperm.slane %v5789_v32, 2  ;;  %v2508_v40 = vpop.f32.mrf.mxu2  ;;  %v5969_v1 = vperm.slane %v5789_v32, 3 }
 0x6bc   : > { %6487 = vst [vmem:[#allocation1 + $0x4] ss:$9 sm:$0xff] %v5962_v26  ;;  %v5233_v26 = vmul.f32 %v10512_v33, %v10500_v49  ;;  %v5970_v63 = vperm.slane %v5789_v32, 4  ;;  %v5971_v6 = vperm.slane %v5789_v32, 5  ;;  %v5972_v0 = vperm.slane %v5789_v32, 6 }
 0x6bd   : > { %6488 = vst [vmem:[#allocation1 + $0x5] ss:$9 sm:$0xff] %v5963_v30  ;;  %v10526_v30 = vmul.f32 %v5024_v54, %v4960_v4  ;;  %v2509_v43 = vadd.f32 %v10427_v61, %v2508_v40  ;;  %v4961_v54 = vmax.f32 %v10027_v2, 1e-16  ;;  %vm5239_vm5 = vweird.f32 %v10512_v33 }
 0x6be   : > { %6489 = vst [vmem:[#allocation1 + $0x6] ss:$9 sm:$0xff] %v5964_v25  ;;  %v5973_v25 = vperm.slane %v5789_v32, 7  ;;  %v5234_v45 = vmul.f32 %v10512_v33, %v5233_v26  ;;  %v10538_v32 = vld [vmem:[%s11706_s5] ss:$0 sm:$0xff]  ;;  %vm5240_vm7 = vmor %vm5238_vm6, %vm5239_vm5 }
 0x6bf   : > { %6490 = vst [vmem:[#allocation1 + $0x7] ss:$9 sm:$0xff] %v5965_v46  ;;  %8230 = vrsqrt.f32 %v10526_v30  ;;  %v4083_v46 = vpop.f32.mrf.mxu1  ;;  %v5025_v40 = vmax.f32 %v4793_v12, 1e-16  ;;  %vm5248_vm9 = vweird.f32 %v10526_v30 }
 0x6c0   : > { %v5235_v53 = vmul.f32 0.5, %v5234_v45  ;;  %v10544_v58 = vadd.f32 %v10363_v60, %v4083_v46  ;;  %v5979_v45 = vperm.slane %v5790_v3, 5 }
 0x6c1   : > { %v3383_v22 = vpop.f32.mrf.mxu0  ;;  %v10560_v37 = vmul.f32 %v5025_v40, %v4961_v54 }
 0x6c2   : > { %v3384_v47 = vadd.f32 %v10538_v32, %v3383_v22  ;;  %v4719_v2 = vmul.f32 %v10544_v58, %v10544_v58  ;;  %v5981_v22 = vperm.slane %v5790_v3, 7 }
 0x6c3   : > { %v2510_v39 = vpop.f32.mrf.mxu2  ;;  %8232 = vrsqrt.f32 %v10560_v37  ;;  %vm5258_vm12 = vweird.f32 %v10560_v37 }
 0x6c4   : > { %v2511_v50 = vadd.f32 %v10427_v61, %v2510_v39  ;;  %v4833_v46 = vsel %vm4245_vm3, %v4719_v2, 0.0 }
 0x6c5   : > { %v10546_v34 = vpop.eup %8230  ;;  %4834 = vadd.xlane.f32.xlu0 %v4833_v46 }
 0x6c6   : > { %v10514_v36 = vld [vmem:[#allocation1] sm:$0xff]  ;;  %v5243_v61 = vmul.f32 %v10546_v34, %v10526_v30  ;;  %vm5249_vm8 = vweird.f32 %v10546_v34 }
 0x6c7   : > { %6492 = vst [vmem:[#allocation1] ss:$9 sm:$0xff] %v5966_v21  ;;  %v5236_v21 = vsub.f32 1.5, %v5235_v53  ;;  %v5980_v53 = vperm.slane %v5790_v3, 6  ;;  %vm5250_vm10 = vmor %vm5248_vm9, %vm5249_vm8 }
 0x6c8   : > { %6493 = vst [vmem:[#allocation1 + $0x1] ss:$9 sm:$0xff] %v5967_v35  ;;  %v2838_v35 = vadd.f32 %v2837_v19, %v2509_v43  ;;  %v5244_v43 = vmul.f32 %v10546_v34, %v5243_v61 }
 0x6c9   : > { %6494 = vst [vmem:[#allocation1 + $0x2] ss:$9 sm:$0xff] %v5968_v56  ;;  %v5975_v56 = vperm.slane %v5790_v3, 1  ;;  %v3386_v40 = vpop.f32.mrf.mxu0 }
 0x6ca   : > { %6495 = vst [vmem:[#allocation1 + $0x3] ss:$9 sm:$0xff] %v5969_v1  ;;  %v3540_v1 = vmax.f32 %v3384_v47, 0.0  ;;  %v4796_v47 = vpop.xlane.xlu2 %4795 }
 0x6cb   : > { %6496 = vst [vmem:[#allocation1 + $0x4] ss:$9 sm:$0xff] %v5970_v63  ;;  %7018 = vperm.xlu1 %8205, %v10459_v11   ;;  %v5976_v11 = vperm.slane %v5790_v3, 2  ;;  %v5978_v63 = vperm.slane %v5790_v3, 4  ;;  %v5026_v54 = vmax.f32 %v4796_v47, 1e-16 }
 0x6cc   : > { %6497 = vst [vmem:[#allocation1 + $0x5] ss:$9 sm:$0xff] %v5971_v6  ;;  %7015 = vperm.xlu2 %8206, %v10435_v31   ;;  %v3382_v31 = vadd.f32 %v10538_v32, %v3381_v42  ;;  %v2839_v42 = vpop.f32.mrf.mxu3  ;;  %v5237_v6 = vmul.f32 %v10512_v33, %v5236_v21 }
 0x6cd   : > { %6498 = vst [vmem:[#allocation1 + $0x6] ss:$9 sm:$0xff] %v5972_v0  ;;  %v2840_v26 = vadd.f32 %v2839_v42, %v2511_v50  ;;  %v2968_v0 = vmax.f32 %v2838_v35, 0.0 }
 0x6ce   : > { %6499 = vst [vmem:[#allocation1 + $0x7] ss:$9 sm:$0xff] %v5973_v25  ;;  %v3539_v4 = vmax.f32 %v3382_v31, 0.0  ;;  %v5241_v12 = vsel %vm5240_vm7, %v10512_v33, %v5237_v6  ;;  %v5245_v31 = vmul.f32 0.5, %v5244_v43  ;;  %v4962_v33 = vmax.f32 %v10029_v20, 1e-16 }
 0x6cf   : > { %v2969_v25 = vmax.f32 %v2840_v26, 0.0  ;;  %v5791_v49 = vmul.f32 %v5241_v12, %v10496_v48  ;;  %v4079_v6 = vadd.f32 %v10363_v60, %v10483_v62 }
 0x6d0   : > { %v3613_v19 = vpack.c.bf16 %v3540_v1, %v3539_v4  ;;  %v5246_v21 = vsub.f32 1.5, %v5245_v31  ;;  %v4963_v31 = vmax.f32 %v10102_v5, 1e-16 }
 0x6d1   : > { %v3033_v39 = vpack.c.bf16 %v2969_v25, %v2968_v0  ;;  %v5982_v3 = vperm.slane %v5791_v49, 0  ;;  %v5983_v35 = vperm.slane %v5791_v49, 1  ;;  %v5985_v42 = vperm.slane %v5791_v49, 3  ;;  %v3388_v30 = vpop.f32.mrf.mxu0 }
 0x6d2   : > { %8031 = vmatmul.msk.bf16.gmra.mxu1 %vm3659_vm2, %v3613_v19  ;;  %v5986_v4 = vperm.slane %v5791_v49, 4  ;;  %v5247_v1 = vmul.f32 %v10546_v34, %v5246_v21  ;;  %v5987_v26 = vperm.slane %v5791_v49, 5  ;;  %v5989_v20 = vperm.slane %v5791_v49, 7 }
 0x6d3   : > { %3425 = vmatmul.bf16.vlgmr.msra.gmra.mxu2 %v3033_v39  ;;  %v4204_v46 = vmul.f32 %v4079_v6, %v9638_v29  ;;  %v3389_v60 = vadd.f32 %v10538_v32, %v3388_v30  ;;  %v4717_v5 = vmul.f32 %v4079_v6, %v4079_v6 }
 0x6d4   : > { %v5251_v2 = vsel %vm5250_vm10, %v10546_v34, %v5247_v1 }
 0x6d5   : > { %v10550_v23 = vld [vmem:[#allocation1] sm:$0xff]  ;;  %v5792_v0 = vmul.f32 %v5251_v2, %v10521_v51  ;;  %v4827_v1 = vsel %vm4245_vm3, %v4717_v5, 0.0 }
 0x6d6   : > { %6501 = vst [vmem:[#allocation1] ss:$9 sm:$0xff] %v5974_v41  ;;  %v10571_v41 = vpop.eup %8232 }
 0x6d7   : > { %6502 = vst [vmem:[#allocation1 + $0x1] ss:$9 sm:$0xff] %v5975_v56  ;;  %v5984_v56 = vperm.slane %v5791_v49, 2  ;;  %v5253_v48 = vmul.f32 %v10571_v41, %v10560_v37  ;;  %v5990_v34 = vperm.slane %v5792_v0, 0  ;;  %v5992_v51 = vperm.slane %v5792_v0, 2 }
 0x6d8   : > { %6503 = vst [vmem:[#allocation1 + $0x2] ss:$9 sm:$0xff] %v5976_v11  ;;  %v10578_v11 = vpop.xlane.xlu0 %4283  ;;  %v5993_v47 = vperm.slane %v5792_v0, 3  ;;  %v5994_v21 = vperm.slane %v5792_v0, 4  ;;  %vm5259_vm11 = vweird.f32 %v10571_v41 }
 0x6d9   : > { %6504 = vst [vmem:[#allocation1 + $0x3] ss:$9 sm:$0xff] %v5977_v44  ;;  %v10582_v44 = vmul.f32 %v5026_v54, %v4962_v33  ;;  %v5254_v61 = vmul.f32 %v10571_v41, %v5253_v48  ;;  %7027 = vperm.xlu0 %8204, %v10550_v23   ;;  %v3542_v23 = vmax.f32 %v3389_v60, 0.0  ;;  %v5996_v33 = vperm.slane %v5792_v0, 6  ;;  %vm5260_vm13 = vmor %vm5258_vm12, %vm5259_vm11 }
 0x6da   : > { %6505 = vst [vmem:[#allocation1 + $0x4] ss:$9 sm:$0xff] %v5978_v63  ;;  %v5988_v63 = vperm.slane %v5791_v49, 6  ;;  %v4315_v49 = vsel %vm4245_vm3, %v4204_v46, 0.0 }
 0x6db   : > { %6506 = vst [vmem:[#allocation1 + $0x5] ss:$9 sm:$0xff] %v5979_v45  ;;  %8234 = vrsqrt.f32 %v10582_v44  ;;  %v5255_v19 = vmul.f32 0.5, %v5254_v61  ;;  %v3387_v45 = vadd.f32 %v10538_v32, %v3386_v40  ;;  %vm5268_vm15 = vweird.f32 %v10582_v44 }
 0x6dc   : > { %6507 = vst [vmem:[#allocation1 + $0x6] ss:$9 sm:$0xff] %v5980_v53 }
 0x6dd   : > { %6508 = vst [vmem:[#allocation1 + $0x7] ss:$9 sm:$0xff] %v5981_v22  ;;  %v5256_v39 = vsub.f32 1.5, %v5255_v19  ;;  %v5991_v22 = vperm.slane %v5792_v0, 1  ;;  %v3541_v12 = vmax.f32 %v3387_v45, 0.0 }
 0x6de   : > { %v4964_v45 = vmax.f32 %v10043_v24, 1e-16 }
 0x6df   : > { %v3614_v54 = vpack.c.bf16 %v3542_v23, %v3541_v12 }
 0x6e0   : > { %v4799_v25 = vpop.xlane.xlu0 %4798 }
 0x6e1   : > { %v10594_v53 = vpop.eup %8234  ;;  %v5027_v43 = vmax.f32 %v4799_v25, 1e-16  ;;  %v3391_v25 = vpop.f32.mrf.mxu0 }
 0x6e2   : > { %v5263_v29 = vmul.f32 %v10594_v53, %v10582_v44  ;;  %8032 = vmatmul.msk.bf16.gmra.mxu1 %vm3659_vm2, %v3614_v54  ;;  %vm5269_vm14 = vweird.f32 %v10594_v53  ;;  %v3392_v44 = vadd.f32 %v10538_v32, %v3391_v25 }
 0x6e3   : > { %v10607_v40 = vmul.f32 %v5027_v43, %v4963_v31  ;;  %vm5270_vm1 = vmor %vm5268_vm15, %vm5269_vm14 }
 0x6e4   : > { %v10573_v50 = vld [vmem:[#allocation1] sm:$0xff]  ;;  %v5264_v48 = vmul.f32 %v10594_v53, %v5263_v29 }
 0x6e5   : > { %6510 = vst [vmem:[#allocation1] ss:$9 sm:$0xff] %v5982_v3  ;;  %v10603_v3 = vpop.xlane.xlu1 %4286  ;;  %8236 = vrsqrt.f32 %v10607_v40  ;;  %vm5278_vm5 = vweird.f32 %v10607_v40 }
 0x6e6   : > { %6511 = vst [vmem:[#allocation1 + $0x1] ss:$9 sm:$0xff] %v5983_v35  ;;  %v5257_v35 = vmul.f32 %v10571_v41, %v5256_v39 }
 0x6e7   : > { %6512 = vst [vmem:[#allocation1 + $0x2] ss:$9 sm:$0xff] %v5984_v56  ;;  %v5995_v56 = vperm.slane %v5792_v0, 5 }
 0x6e8   : > { %6513 = vst [vmem:[#allocation1 + $0x3] ss:$9 sm:$0xff] %v5985_v42  ;;  %v5997_v42 = vperm.slane %v5792_v0, 7 }
 0x6e9   : > { %6514 = vst [vmem:[#allocation1 + $0x4] ss:$9 sm:$0xff] %v5986_v4  ;;  %v5261_v4 = vsel %vm5260_vm13, %v10571_v41, %v5257_v35  ;;  %v3393_v29 = vpop.f32.mrf.mxu0  ;;  %v10641_v35 = vld [vmem:[%s11708_s7] ss:$0 sm:$0xff] }
 0x6ea   : > { %6515 = vst [vmem:[#allocation1 + $0x5] ss:$9 sm:$0xff] %v5987_v26  ;;  %v5793_v26 = vmul.f32 %v5261_v4, %v10555_v18  ;;  %v3543_v4 = vmax.f32 %v3392_v44, 0.0 }
 0x6eb   : > { %6516 = vst [vmem:[#allocation1 + $0x6] ss:$9 sm:$0xff] %v5988_v63  ;;  %v5265_v63 = vmul.f32 0.5, %v5264_v48  ;;  %v10618_v61 = vpop.eup %8236 }
 0x6ec   : > { %6517 = vst [vmem:[#allocation1 + $0x7] ss:$9 sm:$0xff] %v5989_v20  ;;  %v10616_v20 = vpop.f32.mrf.mxu1  ;;  %v5998_v2 = vperm.slane %v5793_v26, 0  ;;  %v5999_v19 = vperm.slane %v5793_v26, 1  ;;  %v6000_v30 = vperm.slane %v5793_v26, 2  ;;  %v6001_v46 = vperm.slane %v5793_v26, 3 }
 0x6ed   : > { %v4802_v37 = vpop.xlane.xlu1 %4801  ;;  %v5266_v6 = vsub.f32 1.5, %v5265_v63  ;;  %v5273_v18 = vmul.f32 %v10618_v61, %v10607_v40  ;;  %v6002_v39 = vperm.slane %v5793_v26, 4  ;;  %v6005_v24 = vperm.slane %v5793_v26, 7 }
 0x6ee   : > { %v5028_v41 = vmax.f32 %v4802_v37, 1e-16  ;;  %vm5279_vm4 = vweird.f32 %v10618_v61 }
 0x6ef   : > { %v5267_v60 = vmul.f32 %v10594_v53, %v5266_v6  ;;  %v5274_v12 = vmul.f32 %v10618_v61, %v5273_v18  ;;  %v10654_v6 = vpop.xlane.xlu0 %4292  ;;  %vm5280_vm6 = vmor %vm5278_vm5, %vm5279_vm4 }
 0x6f0   : > { %v10629_v43 = vmul.f32 %v5028_v41, %v4964_v45 }
 0x6f1   : > { %v5271_v23 = vsel %vm5270_vm1, %v10594_v53, %v5267_v60 }
 0x6f2   : > { %8238 = vrsqrt.f32 %v10629_v43  ;;  %v5794_v31 = vmul.f32 %v5271_v23, %v10578_v11  ;;  %v3394_v11 = vadd.f32 %v10538_v32, %v3393_v29  ;;  %vm5288_vm8 = vweird.f32 %v10629_v43 }
 0x6f3   : > { %v10597_v62 = vld [vmem:[#allocation1] sm:$0xff] }
 0x6f4   : > { %6519 = vst [vmem:[#allocation1] ss:$9 sm:$0xff] %v5990_v34  ;;  %v10625_v34 = vpop.xlane.xlu2 %4289  ;;  %v6008_v48 = vperm.slane %v5794_v31, 2  ;;  %v6009_v37 = vperm.slane %v5794_v31, 3  ;;  %v6011_v18 = vperm.slane %v5794_v31, 5  ;;  %v6012_v60 = vperm.slane %v5794_v31, 6 }
 0x6f5   : > { %6520 = vst [vmem:[#allocation1 + $0x1] ss:$9 sm:$0xff] %v5991_v22  ;;  %4316 = vadd.xlane.f32.xlu2 %v4315_v49  ;;  %4828 = vadd.xlane.f32.xlu1 %v4827_v1  ;;  %v6003_v22 = vperm.slane %v5793_v26, 5  ;;  %v4088_v49 = vpop.f32.mrf.mxu1  ;;  %v3544_v1 = vmax.f32 %v3394_v11, 0.0 }
 0x6f6   : > { %6521 = vst [vmem:[#allocation1 + $0x2] ss:$9 sm:$0xff] %v5992_v51  ;;  %v6004_v51 = vperm.slane %v5793_v26, 6  ;;  %v10644_v53 = vadd.f32 %v10641_v35, %v4088_v49  ;;  %v11955_v26 = vld [vmem:[#allocation42_spill] sm:$0xff] }
 0x6f7   : > { %6522 = vst [vmem:[#allocation1 + $0x3] ss:$9 sm:$0xff] %v5993_v47  ;;  %v5275_v47 = vmul.f32 0.5, %v5274_v12  ;;  %v4965_v63 = vmax.f32 %v11955_v26, 1e-16 }
 0x6f8   : > { %6523 = vst [vmem:[#allocation1 + $0x4] ss:$9 sm:$0xff] %v5994_v21  ;;  %v10646_v54 = vpop.eup %8238 }
 0x6f9   : > { %6524 = vst [vmem:[#allocation1 + $0x5] ss:$9 sm:$0xff] %v5995_v56  ;;  %v6006_v56 = vperm.slane %v5794_v31, 0  ;;  %v5276_v5 = vsub.f32 1.5, %v5275_v47  ;;  %vm5289_vm7 = vweird.f32 %v10646_v54 }
 0x6fa   : > { %6525 = vst [vmem:[#allocation1 + $0x6] ss:$9 sm:$0xff] %v5996_v33  ;;  %vm5290_vm9 = vmor %vm5288_vm8, %vm5289_vm7 }
 0x6fb   : > { %6526 = vst [vmem:[#allocation1 + $0x7] ss:$9 sm:$0xff] %v5997_v42  ;;  %v5277_v45 = vmul.f32 %v10618_v61, %v5276_v5 }
 0x6fc   : > { %v4805_v21 = vpop.xlane.xlu2 %4804 }
 0x6fd   : > { %v5029_v42 = vmax.f32 %v4805_v21, 1e-16  ;;  %v4091_v25 = vpop.f32.mrf.mxu1  ;;  %v5281_v23 = vsel %vm5280_vm6, %v10618_v61, %v5277_v45 }
 0x702   : > { %v10620_v0 = vld [vmem:[#allocation1] sm:$0xff] }
 0x703   : > { %6528 = vst [vmem:[#allocation1] ss:$9 sm:$0xff] %v5998_v2  ;;  %v5283_v2 = vmul.f32 %v10646_v54, %v10629_v43 }
 0x704   : > { %6529 = vst [vmem:[#allocation1 + $0x1] ss:$9 sm:$0xff] %v5999_v19  ;;  %v11956_v19 = vld [vmem:[#allocation7_spill] sm:$0xff] }
 0x705   : > { %6530 = vst [vmem:[#allocation1 + $0x2] ss:$9 sm:$0xff] %v6000_v30  ;;  %v4208_v41 = vmul.f32 %v10644_v53, %v11956_v19  ;;  %v6010_v30 = vperm.slane %v5794_v31, 4 }
 0x706   : > { %6531 = vst [vmem:[#allocation1 + $0x3] ss:$9 sm:$0xff] %v6001_v46  ;;  %v3615_v46 = vpack.c.bf16 %v3544_v1, %v3543_v4  ;;  %v10683_v4 = vpop.xlane.xlu1 %4295 }
 0x707   : > { %6532 = vst [vmem:[#allocation1 + $0x4] ss:$9 sm:$0xff] %v6002_v39  ;;  %v10660_v39 = vmul.f32 %v5029_v42, %v4965_v63  ;;  %v4327_v12 = vsel %vm4245_vm3, %v4208_v41, 0.0 }
 0x708   : > { %6533 = vst [vmem:[#allocation1 + $0x5] ss:$9 sm:$0xff] %v6003_v22  ;;  %8033 = vmatmul.msk.bf16.gmra.mxu1 %vm3659_vm2, %v3615_v46  ;;  %v6013_v22 = vperm.slane %v5794_v31, 7  ;;  %4328 = vadd.xlane.f32.xlu0 %v4327_v12 }
 0x709   : > { %6534 = vst [vmem:[#allocation1 + $0x6] ss:$9 sm:$0xff] %v6004_v51  ;;  %v10666_v51 = vadd.f32 %v10641_v35, %v4091_v25  ;;  %8240 = vrsqrt.f32 %v10660_v39  ;;  %vm5298_vm11 = vweird.f32 %v10660_v39 }
 0x70a   : > { %6535 = vst [vmem:[#allocation1 + $0x7] ss:$9 sm:$0xff] %v6005_v24  ;;  %v5284_v24 = vmul.f32 %v10646_v54, %v5283_v2 }
 0x70b   : > { %v4722_v49 = vmul.f32 %v10666_v51, %v10666_v51 }
 0x70c   : > { %v5285_v40 = vmul.f32 0.5, %v5284_v24 }
 0x70d   : > { %7021 = vperm.xlu2 %8206, %v10489_v52   ;;  %v6007_v52 = vperm.slane %v5794_v31, 1  ;;  %v4808_v31 = vpop.xlane.xlu0 %4807  ;;  %v4842_v44 = vsel %vm4245_vm3, %v4722_v49, 0.0 }
 0x70e   : > { %7024 = vperm.xlu1 %8205, %v10514_v36   ;;  %v5795_v36 = vmul.f32 %v5281_v23, %v10603_v3  ;;  %v5286_v21 = vsub.f32 1.5, %v5285_v40  ;;  %v5030_v5 = vmax.f32 %v4808_v31, 1e-16  ;;  %v4966_v3 = vmax.f32 %v10116_v57, 1e-16  ;;  %v4811_v46 = vpop.xlane.xlu1 %4810 }
 0x70f   : > { %v10675_v47 = vpop.eup %8240 }
 0x710   : > { %v6014_v29 = vperm.slane %v5795_v36, 0  ;;  %v6015_v61 = vperm.slane %v5795_v36, 1  ;;  %4843 = vadd.xlane.f32.xlu0 %v4842_v44  ;;  %v6016_v11 = vperm.slane %v5795_v36, 2  ;;  %v6017_v42 = vperm.slane %v5795_v36, 3  ;;  %v10703_v44 = vpop.xlane.xlu2 %4298 }
 0x711   : > { %v10649_v33 = vld [vmem:[#allocation1] sm:$0xff]  ;;  %v6018_v1 = vperm.slane %v5795_v36, 4  ;;  %v5287_v26 = vmul.f32 %v10646_v54, %v5286_v21  ;;  %v6019_v63 = vperm.slane %v5795_v36, 5  ;;  %v6020_v2 = vperm.slane %v5795_v36, 6 }
 0x712   : > { %6537 = vst [vmem:[#allocation1] ss:$9 sm:$0xff] %v6006_v56  ;;  %v6021_v57 = vperm.slane %v5795_v36, 7  ;;  %vm5299_vm10 = vweird.f32 %v10675_v47 }
 0x713   : > { %6538 = vst [vmem:[#allocation1 + $0x1] ss:$9 sm:$0xff] %v6007_v52  ;;  %v3396_v52 = vpop.f32.mrf.mxu0  ;;  %v5291_v41 = vsel %vm5290_vm9, %v10646_v54, %v5287_v26  ;;  %v5031_v54 = vmax.f32 %v4811_v46, 1e-16  ;;  %vm5300_vm12 = vmor %vm5298_vm11, %vm5299_vm10 }
 0x714   : > { %6539 = vst [vmem:[#allocation1 + $0x2] ss:$9 sm:$0xff] %v6008_v48  ;;  %v5293_v48 = vmul.f32 %v10675_v47, %v10660_v39 }
 0x715   : > { %6540 = vst [vmem:[#allocation1 + $0x3] ss:$9 sm:$0xff] %v6009_v37  ;;  %v10687_v37 = vmul.f32 %v5030_v5, %v4966_v3 }
 0x716   : > { %6541 = vst [vmem:[#allocation1 + $0x4] ss:$9 sm:$0xff] %v6010_v30  ;;  %v5294_v19 = vmul.f32 %v10675_v47, %v5293_v48  ;;  %v5796_v30 = vmul.f32 %v5291_v41, %v10625_v34  ;;  %v11957_v34 = vld [vmem:[#allocation44_spill] sm:$0xff] }
 0x717   : > { %6542 = vst [vmem:[#allocation1 + $0x5] ss:$9 sm:$0xff] %v6011_v18  ;;  %8242 = vrsqrt.f32 %v10687_v37  ;;  %v3397_v18 = vadd.f32 %v10538_v32, %v3396_v52  ;;  %v4967_v31 = vmax.f32 %v11957_v34, 1e-16  ;;  %vm5308_vm14 = vweird.f32 %v10687_v37 }
 0x718   : > { %6543 = vst [vmem:[#allocation1 + $0x6] ss:$9 sm:$0xff] %v6012_v60  ;;  %v5295_v25 = vmul.f32 0.5, %v5294_v19  ;;  %v6022_v43 = vperm.slane %v5796_v30, 0  ;;  %v6023_v23 = vperm.slane %v5796_v30, 1  ;;  %v6024_v36 = vperm.slane %v5796_v30, 2 }
 0x719   : > { %6544 = vst [vmem:[#allocation1 + $0x7] ss:$9 sm:$0xff] %v6013_v22  ;;  %v3545_v40 = vmax.f32 %v3397_v18, 0.0  ;;  %v6026_v5 = vperm.slane %v5796_v30, 4  ;;  %v6027_v3 = vperm.slane %v5796_v30, 5  ;;  %v6028_v26 = vperm.slane %v5796_v30, 6 }
 0x71a   : > { %v5296_v22 = vsub.f32 1.5, %v5295_v25 }
 0x71b   : > { %v3398_v45 = vpop.f32.mrf.mxu0 }
 0x71c   : > { %v3399_v24 = vadd.f32 %v10538_v32, %v3398_v45  ;;  %v4814_v45 = vpop.xlane.xlu2 %4813 }
 0x71d   : > { %v10695_v60 = vpop.eup %8242 }
 0x71e   : > { %v3546_v49 = vmax.f32 %v3399_v24, 0.0  ;;  %v5303_v21 = vmul.f32 %v10695_v60, %v10687_v37  ;;  %vm5309_vm13 = vweird.f32 %v10695_v60 }
 0x71f   : > { %vm5310_vm15 = vmor %vm5308_vm14, %vm5309_vm13 }
 0x720   : > { %v10678_v56 = vld [vmem:[#allocation1] sm:$0xff]  ;;  %v3616_v52 = vpack.c.bf16 %v3546_v49, %v3545_v40  ;;  %v5032_v40 = vmax.f32 %v4814_v45, 1e-16 }
 0x721   : > { %6546 = vst [vmem:[#allocation1] ss:$9 sm:$0xff] %v6014_v29  ;;  %v6025_v29 = vperm.slane %v5796_v30, 3 }
 0x722   : > { %6547 = vst [vmem:[#allocation1 + $0x1] ss:$9 sm:$0xff] %v6015_v61  ;;  %v4718_v61 = vmul.f32 %v10510_v55, %v10510_v55  ;;  %8034 = vmatmul.msk.bf16.gmra.mxu1 %vm3659_vm2, %v3616_v52  ;;  %v4087_v55 = vadd.f32 %v10641_v35, %v10616_v20  ;;  %v11958_v20 = vld [vmem:[#allocation6_spill] sm:$0xff] }
 0x723   : > { %6548 = vst [vmem:[#allocation1 + $0x2] ss:$9 sm:$0xff] %v6016_v11  ;;  %v5297_v11 = vmul.f32 %v10675_v47, %v5296_v22  ;;  %v3401_v48 = vpop.f32.mrf.mxu0 }
 0x724   : > { %6549 = vst [vmem:[#allocation1 + $0x3] ss:$9 sm:$0xff] %v6017_v42  ;;  %v10709_v42 = vmul.f32 %v5031_v54, %v4967_v31  ;;  %7036 = vperm.xlu0 %8204, %v10620_v0   ;;  %v4207_v41 = vmul.f32 %v4087_v55, %v11958_v20  ;;  %v3402_v46 = vadd.f32 %v10538_v32, %v3401_v48 }
 0x725   : > { %6550 = vst [vmem:[#allocation1 + $0x4] ss:$9 sm:$0xff] %v6018_v1  ;;  %v10711_v1 = vpop.f32.mrf.mxu1  ;;  %v5301_v19 = vsel %vm5300_vm12, %v10675_v47, %v5297_v11 }
 0x726   : > { %6551 = vst [vmem:[#allocation1 + $0x5] ss:$9 sm:$0xff] %v6019_v63  ;;  %v6029_v63 = vperm.slane %v5796_v30, 7  ;;  %8244 = vrsqrt.f32 %v10709_v42  ;;  %v5797_v0 = vmul.f32 %v5301_v19, %v10654_v6  ;;  %v11959_v30 = vld [vmem:[#allocation5_spill] sm:$0xff]  ;;  %v3547_v34 = vmax.f32 %v3402_v46, 0.0 }
 0x727   : > { %6552 = vst [vmem:[#allocation1 + $0x6] ss:$9 sm:$0xff] %v6020_v2  ;;  %v5304_v2 = vmul.f32 %v10695_v60, %v5303_v21  ;;  %v4206_v25 = vmul.f32 %v10544_v58, %v11959_v30  ;;  %vm5318_vm4 = vweird.f32 %v10709_v42 }
 0x728   : > { %6553 = vst [vmem:[#allocation1 + $0x7] ss:$9 sm:$0xff] %v6021_v57  ;;  %v4830_v57 = vsel %vm4245_vm3, %v4718_v61, 0.0  ;;  %v6030_v22 = vperm.slane %v5797_v0, 0  ;;  %v6032_v49 = vperm.slane %v5797_v0, 2  ;;  %v6033_v61 = vperm.slane %v5797_v0, 3 }
 0x729   : > { %v5305_v39 = vmul.f32 0.5, %v5304_v2  ;;  %v4321_v58 = vsel %vm4245_vm3, %v4206_v25, 0.0  ;;  %v6034_v11 = vperm.slane %v5797_v0, 4  ;;  %v6035_v48 = vperm.slane %v5797_v0, 5 }
 0x72a   : > { %v6036_v2 = vperm.slane %v5797_v0, 6  ;;  %v6037_v19 = vperm.slane %v5797_v0, 7 }
 0x72b   : > { %v3403_v18 = vpop.f32.mrf.mxu0  ;;  %v5306_v47 = vsub.f32 1.5, %v5305_v39 }
 0x72c   : > { %v3404_v24 = vadd.f32 %v10538_v32, %v3403_v18 }
 0x72d   : > { %v10735_v6 = vpop.f32.mrf.mxu1  ;;  %v5307_v52 = vmul.f32 %v10695_v60, %v5306_v47 }
 0x72e   : > { %v3548_v31 = vmax.f32 %v3404_v24, 0.0 }
 0x72f   : > { %v10698_v12 = vld [vmem:[#allocation1] sm:$0xff]  ;;  %v5311_v20 = vsel %vm5310_vm15, %v10695_v60, %v5307_v52 }
 0x730   : > { %6555 = vst [vmem:[#allocation1] ss:$9 sm:$0xff] %v6022_v43  ;;  %v10729_v43 = vpop.eup %8244  ;;  %v5798_v37 = vmul.f32 %v5311_v20, %v10683_v4 }
 0x731   : > { %6556 = vst [vmem:[#allocation1 + $0x1] ss:$9 sm:$0xff] %v6023_v23  ;;  %v4324_v23 = vsel %vm4245_vm3, %v4207_v41, 0.0  ;;  %vm5319_vm1 = vweird.f32 %v10729_v43 }
 0x732   : > { %6557 = vst [vmem:[#allocation1 + $0x2] ss:$9 sm:$0xff] %v6024_v36  ;;  %v6031_v36 = vperm.slane %v5797_v0, 1  ;;  %v10752_v0 = vpop.xlane.xlu0 %4301  ;;  %v6038_v18 = vperm.slane %v5798_v37, 0  ;;  %v6039_v24 = vperm.slane %v5798_v37, 1  ;;  %v6041_v4 = vperm.slane %v5798_v37, 3  ;;  %vm5320_vm5 = vmor %vm5318_vm4, %vm5319_vm1 }
 0x733   : > { %6558 = vst [vmem:[#allocation1 + $0x3] ss:$9 sm:$0xff] %v6025_v29  ;;  %v11960_v29 = vld [vmem:[#allocation45_spill] sm:$0xff] }
 0x734   : > { %6559 = vst [vmem:[#allocation1 + $0x4] ss:$9 sm:$0xff] %v6026_v5  ;;  %v4968_v21 = vmax.f32 %v11960_v29, 1e-16  ;;  %v5313_v5 = vmul.f32 %v10729_v43, %v10709_v42  ;;  %v6043_v29 = vperm.slane %v5798_v37, 5 }
 0x735   : > { %6560 = vst [vmem:[#allocation1 + $0x5] ss:$9 sm:$0xff] %v6027_v3  ;;  %v3617_v3 = vpack.c.bf16 %v3548_v31, %v3547_v34  ;;  %v4098_v41 = vpop.f32.mrf.mxu1 }
 0x736   : > { %6561 = vst [vmem:[#allocation1 + $0x6] ss:$9 sm:$0xff] %v6028_v26  ;;  %4831 = vadd.xlane.f32.xlu2 %v4830_v57  ;;  %v10743_v26 = vmul.f32 %v5032_v40, %v4968_v21  ;;  %v3406_v57 = vpop.f32.mrf.mxu0  ;;  %v5314_v39 = vmul.f32 %v10729_v43, %v5313_v5  ;;  %v6044_v21 = vperm.slane %v5798_v37, 6 }
 0x737   : > { %6562 = vst [vmem:[#allocation1 + $0x7] ss:$9 sm:$0xff] %v6029_v63  ;;  %v4720_v63 = vmul.f32 %v4087_v55, %v4087_v55  ;;  %8035 = vmatmul.msk.bf16.gmra.mxu1 %vm3659_vm2, %v3617_v3  ;;  %v3407_v25 = vadd.f32 %v10538_v32, %v3406_v57  ;;  %v10778_v57 = vpop.xlane.xlu1 %4304 }
 0x738   : > { %4322 = vadd.xlane.f32.xlu1 %v4321_v58  ;;  %8246 = vrsqrt.f32 %v10743_v26  ;;  %v5315_v30 = vmul.f32 0.5, %v5314_v39  ;;  %vm5328_vm7 = vweird.f32 %v10743_v26 }
 0x739   : > { %v4836_v55 = vsel %vm4245_vm3, %v4720_v63, 0.0  ;;  %v10774_v63 = vadd.f32 %v10641_v35, %v10735_v6 }
 0x73a   : > { %v10767_v5 = vpop.permute.xlu0 %7006 }
 0x73e   : > { %v10733_v54 = vld [vmem:[#allocation1] sm:$0xff]  ;;  %4325 = vadd.xlane.f32.xlu2 %v4324_v23  ;;  %v3408_v45 = vpop.f32.mrf.mxu0  ;;  %v10755_v46 = vpop.eup %8246  ;;  %v6040_v23 = vperm.slane %v5798_v37, 2 }
 0x73f   : > { %6564 = vst [vmem:[#allocation1] ss:$9 sm:$0xff] %v6030_v22  ;;  %v5316_v22 = vsub.f32 1.5, %v5315_v30  ;;  %v3409_v60 = vadd.f32 %v10538_v32, %v3408_v45  ;;  %v5323_v58 = vmul.f32 %v10755_v46, %v10743_v26  ;;  %vm5329_vm6 = vweird.f32 %v10755_v46 }
 0x740   : > { %6565 = vst [vmem:[#allocation1 + $0x1] ss:$9 sm:$0xff] %v6031_v36  ;;  %4837 = vadd.xlane.f32.xlu1 %v4836_v55  ;;  %v3549_v36 = vmax.f32 %v3407_v25, 0.0  ;;  %v11962_v55 = vld [vmem:[#allocation55_spill] sm:$0xff]  ;;  %vm5330_vm8 = vmor %vm5328_vm7, %vm5329_vm6  ;;  %vm7206_vm6 = vcmask 195712   ;;  %vm7210_vm7 = vcmask 261312  }
 0x741   : > { %6566 = vst [vmem:[#allocation1 + $0x2] ss:$9 sm:$0xff] %v6032_v49  ;;  %v3550_v40 = vmax.f32 %v3409_v60, 0.0  ;;  %v6042_v49 = vperm.slane %v5798_v37, 4  ;;  %v5317_v34 = vmul.f32 %v10729_v43, %v5316_v22  ;;  %v5324_v52 = vmul.f32 %v10755_v46, %v5323_v58 }
 0x742   : > { %6567 = vst [vmem:[#allocation1 + $0x3] ss:$9 sm:$0xff] %v6033_v61  ;;  %v10764_v61 = vpop.f32.mrf.mxu1  ;;  %v10790_v60 = vadd.f32 %v10641_v35, %v4098_v41 }
 0x743   : > { %6568 = vst [vmem:[#allocation1 + $0x4] ss:$9 sm:$0xff] %v6034_v11  ;;  %v3618_v31 = vpack.c.bf16 %v3550_v40, %v3549_v36  ;;  %v6045_v11 = vperm.slane %v5798_v37, 7  ;;  %v4969_v37 = vmax.f32 %v11962_v55, 1e-16 }
 0x744   : > { %6569 = vst [vmem:[#allocation1 + $0x5] ss:$9 sm:$0xff] %v6035_v48  ;;  %v5321_v48 = vsel %vm5320_vm5, %v10729_v43, %v5317_v34  ;;  %v4817_v43 = vpop.xlane.xlu0 %4816  ;;  %vm7202_vm5 = vcmask 130112  }
 0x745   : > { %6570 = vst [vmem:[#allocation1 + $0x6] ss:$9 sm:$0xff] %v6036_v2  ;;  %v5799_v42 = vmul.f32 %v5321_v48, %v10703_v44  ;;  %v5325_v2 = vmul.f32 0.5, %v5324_v52  ;;  %v5033_v45 = vmax.f32 %v4817_v43, 1e-16  ;;  %v11963_v43 = vld [vmem:[#allocation47_spill] sm:$0xff] }
 0x746   : > { %6571 = vst [vmem:[#allocation1 + $0x7] ss:$9 sm:$0xff] %v6037_v19  ;;  %v3411_v3 = vpop.f32.mrf.mxu0  ;;  %v11961_v19 = vld [vmem:[#allocation10_spill] sm:$0xff]  ;;  %v4970_v55 = vmax.f32 %v11963_v43, 1e-16 }
 0x747   : > { %8036 = vmatmul.msk.bf16.gmra.mxu1 %vm3659_vm2, %v3618_v31  ;;  %v4211_v39 = vmul.f32 %v10774_v63, %v11961_v19  ;;  %v3412_v20 = vadd.f32 %v10538_v32, %v3411_v3  ;;  %v6046_v30 = vperm.slane %v5799_v42, 0  ;;  %v5326_v25 = vsub.f32 1.5, %v5325_v2 }
 0x748   : > { %v6049_v40 = vperm.slane %v5799_v42, 3  ;;  %v6051_v41 = vperm.slane %v5799_v42, 5  ;;  %v6053_v52 = vperm.slane %v5799_v42, 7 }
 0x749   : > { %v4336_v36 = vsel %vm4245_vm3, %v4211_v39, 0.0  ;;  %v5327_v34 = vmul.f32 %v10755_v46, %v5326_v25  ;;  %v10810_v39 = vpop.xlane.xlu2 %4307 }
 0x74a   : > { %v10786_v22 = vpop.f32.mrf.mxu1 }
 0x74b   : > { %v5331_v3 = vsel %vm5330_vm8, %v10755_v46, %v5327_v34  ;;  %vm7214_vm8 = vcmask 326912  }
 0x74c   : > { %v5800_v26 = vmul.f32 %v5331_v3, %v10752_v0 }
 0x74d   : > { %v10758_v47 = vld [vmem:[#allocation1] sm:$0xff] }
 0x74e   : > { %6573 = vst [vmem:[#allocation1] ss:$9 sm:$0xff] %v6038_v18  ;;  %v3413_v6 = vpop.f32.mrf.mxu0  ;;  %4337 = vadd.xlane.f32.xlu0 %v4336_v36  ;;  %v6056_v0 = vperm.slane %v5800_v26, 2 }
 0x74f   : > { %6574 = vst [vmem:[#allocation1 + $0x1] ss:$9 sm:$0xff] %v6039_v24  ;;  %v3414_v44 = vadd.f32 %v10538_v32, %v3413_v6  ;;  %v6048_v24 = vperm.slane %v5799_v42, 2 }
 0x750   : > { %6575 = vst [vmem:[#allocation1 + $0x2] ss:$9 sm:$0xff] %v6040_v23  ;;  %v10792_v23 = vmul.f32 %v5033_v45, %v4969_v37  ;;  %v6054_v37 = vperm.slane %v5800_v26, 0 }
 0x751   : > { %6576 = vst [vmem:[#allocation1 + $0x3] ss:$9 sm:$0xff] %v6041_v4  ;;  %v3551_v4 = vmax.f32 %v3412_v20, 0.0  ;;  %v3552_v58 = vmax.f32 %v3414_v44, 0.0  ;;  %v10827_v3 = vpop.permute.xlu2 %7012 }
 0x752   : > { %6577 = vst [vmem:[#allocation1 + $0x4] ss:$9 sm:$0xff] %v6042_v49  ;;  %v6050_v49 = vperm.slane %v5799_v42, 4  ;;  %8248 = vrsqrt.f32 %v10792_v23  ;;  %v10808_v19 = vpop.f32.mrf.mxu1  ;;  %vm5338_vm10 = vweird.f32 %v10792_v23 }
 0x753   : > { %6578 = vst [vmem:[#allocation1 + $0x5] ss:$9 sm:$0xff] %v6043_v29  ;;  %v3619_v31 = vpack.c.bf16 %v3552_v58, %v3551_v4  ;;  %v6052_v29 = vperm.slane %v5799_v42, 6  ;;  %v6057_v58 = vperm.slane %v5800_v26, 3 }
 0x754   : > { %6579 = vst [vmem:[#allocation1 + $0x6] ss:$9 sm:$0xff] %v6044_v21  ;;  %v10800_v21 = vpop.permute.xlu1 %7009 }
 0x755   : > { %6580 = vst [vmem:[#allocation1 + $0x7] ss:$9 sm:$0xff] %v6045_v11  ;;  %v4725_v11 = vmul.f32 %v10790_v60, %v10790_v60 }
 0x756   : > { %7030 = vperm.xlu2 %8206, %v10573_v50   ;;  %v6047_v50 = vperm.slane %v5799_v42, 1  ;;  %v3416_v48 = vpop.f32.mrf.mxu0 }
 0x757   : > { %8037 = vmatmul.msk.bf16.gmra.mxu1 %vm3659_vm2, %v3619_v31  ;;  %v4851_v2 = vsel %vm4245_vm3, %v4725_v11, 0.0  ;;  %v6060_v11 = vperm.slane %v5800_v26, 6 }
 0x758   : > { %4852 = vadd.xlane.f32.xlu0 %v4851_v2 }
 0x759   : > { %7033 = vperm.xlu1 %8205, %v10597_v62   ;;  %v8249_v62 = vpop.eup %8248 }
 0x75a   : > { %v5333_v42 = vmul.f32 %v8249_v62, %v10792_v23  ;;  %vm5339_vm9 = vweird.f32 %v8249_v62 }
 0x75b   : > { %vm5340_vm11 = vmor %vm5338_vm10, %vm5339_vm9 }
 0x75c   : > { %v10784_v18 = vld [vmem:[#allocation1] sm:$0xff]  ;;  %v5334_v20 = vmul.f32 %v8249_v62, %v5333_v42  ;;  %v4820_v46 = vpop.xlane.xlu1 %4819  ;;  %v6061_v42 = vperm.slane %v5800_v26, 7 }
 0x75d   : > { %6582 = vst [vmem:[#allocation1] ss:$9 sm:$0xff] %v6046_v30  ;;  %v3417_v30 = vadd.f32 %v10538_v32, %v3416_v48  ;;  %v5034_v6 = vmax.f32 %v4820_v46, 1e-16 }
 0x75e   : > { %6583 = vst [vmem:[#allocation1 + $0x1] ss:$9 sm:$0xff] %v6047_v50  ;;  %v5335_v25 = vmul.f32 0.5, %v5334_v20  ;;  %v6055_v50 = vperm.slane %v5800_v26, 1  ;;  %v3418_v44 = vpop.f32.mrf.mxu0 }
 0x75f   : > { %6584 = vst [vmem:[#allocation1 + $0x2] ss:$9 sm:$0xff] %v6048_v24  ;;  %v3419_v36 = vadd.f32 %v10538_v32, %v3418_v44  ;;  %v10820_v4 = vmul.f32 %v5034_v6, %v4970_v55  ;;  %v3553_v34 = vmax.f32 %v3417_v30, 0.0 }
 0x760   : > { %6585 = vst [vmem:[#allocation1 + $0x3] ss:$9 sm:$0xff] %v6049_v40  ;;  %v5336_v24 = vsub.f32 1.5, %v5335_v25  ;;  %v10818_v40 = vpop.xlane.xlu0 %4310  ;;  %v11964_v25 = vld [vmem:[#allocation48_spill] sm:$0xff] }
 0x761   : > { %6586 = vst [vmem:[#allocation1 + $0x4] ss:$9 sm:$0xff] %v6050_v49  ;;  %v6058_v49 = vperm.slane %v5800_v26, 4  ;;  %v3554_v31 = vmax.f32 %v3419_v36, 0.0  ;;  %8250 = vrsqrt.f32 %v10820_v4  ;;  %v4971_v6 = vmax.f32 %v11964_v25, 1e-16 }
 0x762   : > { %6587 = vst [vmem:[#allocation1 + $0x5] ss:$9 sm:$0xff] %v6051_v41  ;;  %v5337_v41 = vmul.f32 %v8249_v62, %v5336_v24  ;;  %v4972_v36 = vmax.f32 %v10148_v17, 1e-16  ;;  %v4094_v17 = vadd.f32 %v10641_v35, %v10711_v1  ;;  %vm5348_vm13 = vweird.f32 %v10820_v4 }
 0x763   : > { %6588 = vst [vmem:[#allocation1 + $0x6] ss:$9 sm:$0xff] %v6052_v29  ;;  %v6059_v29 = vperm.slane %v5800_v26, 5  ;;  %v3620_v2 = vpack.c.bf16 %v3554_v31, %v3553_v34 }
 0x764   : > { %6589 = vst [vmem:[#allocation1 + $0x7] ss:$9 sm:$0xff] %v6053_v52  ;;  %v10825_v52 = vpop.f32.mrf.mxu1  ;;  %v5341_v48 = vsel %vm5340_vm11, %v8249_v62, %v5337_v41  ;;  %v4823_v62 = vpop.xlane.xlu2 %4822  ;;  %v4721_v41 = vmul.f32 %v10644_v53, %v10644_v53 }
 0x765   : > { %v5801_v23 = vmul.f32 %v5341_v48, %v10778_v57  ;;  %v5035_v24 = vmax.f32 %v4823_v62, 1e-16 }
 0x766   : > { %v3421_v20 = vpop.f32.mrf.mxu0 }
 0x767   : > { %v8251_v43 = vpop.eup %8250  ;;  %8038 = vmatmul.msk.bf16.gmra.mxu1 %vm3659_vm2, %v3620_v2  ;;  %v3422_v34 = vadd.f32 %v10538_v32, %v3421_v20  ;;  %v6066_v31 = vperm.slane %v5801_v23, 4  ;;  %v6067_v2 = vperm.slane %v5801_v23, 5  ;;  %v10850_v32 = vld [vmem:[%s11706_s5] ss:$0 sm:$0xff] }
 0x768   : > { %v5343_v55 = vmul.f32 %v8251_v43, %v10820_v4  ;;  %v4826_v46 = vpop.xlane.xlu0 %4825  ;;  %vm5349_vm12 = vweird.f32 %v8251_v43 }
 0x769   : > { %v5036_v44 = vmax.f32 %v4826_v46, 1e-16  ;;  %v3555_v1 = vmax.f32 %v3422_v34, 0.0  ;;  %vm5350_vm14 = vmor %vm5348_vm13, %vm5349_vm12  ;;  %v4839_v46 = vsel %vm4245_vm3, %v4721_v41, 0.0  ;;  %v11751_v34 = vlaneseq }
 0x76a   : > { %v5344_v30 = vmul.f32 %v8251_v43, %v5343_v55  ;;  %v6069_v55 = vperm.slane %v5801_v23, 7 }
 0x76b   : > { %v10815_v45 = vld [vmem:[#allocation1] sm:$0xff]  ;;  %v10853_v20 = vmul.f32 %v5036_v44, %v4972_v36 }
 0x76c   : > { %6591 = vst [vmem:[#allocation1] ss:$9 sm:$0xff] %v6054_v37  ;;  %v6062_v37 = vperm.slane %v5801_v23, 0  ;;  %v5345_v26 = vmul.f32 0.5, %v5344_v30  ;;  %7045 = vperm.xlu0 %8204, %v10698_v12   ;;  %v6068_v12 = vperm.slane %v5801_v23, 6 }
 0x76d   : > { %6592 = vst [vmem:[#allocation1 + $0x1] ss:$9 sm:$0xff] %v6055_v50  ;;  %v6063_v50 = vperm.slane %v5801_v23, 1  ;;  %vm5368_vm10 = vweird.f32 %v10853_v20 }
 0x76e   : > { %6593 = vst [vmem:[#allocation1 + $0x2] ss:$9 sm:$0xff] %v6056_v0  ;;  %v6064_v0 = vperm.slane %v5801_v23, 2  ;;  %v3423_v48 = vpop.f32.mrf.mxu0 }
 0x76f   : > { %6594 = vst [vmem:[#allocation1 + $0x3] ss:$9 sm:$0xff] %v6057_v58  ;;  %v10836_v58 = vpop.f32.mrf.mxu1  ;;  %v3424_v53 = vadd.f32 %v10850_v32, %v3423_v48 }
 0x770   : > { %6595 = vst [vmem:[#allocation1 + $0x4] ss:$9 sm:$0xff] %v6058_v49  ;;  %v6065_v49 = vperm.slane %v5801_v23, 3 }
 0x771   : > { %6596 = vst [vmem:[#allocation1 + $0x5] ss:$9 sm:$0xff] %v6059_v29  ;;  %v5346_v29 = vsub.f32 1.5, %v5345_v26  ;;  %v3556_v4 = vmax.f32 %v3424_v53, 0.0  ;;  %v11966_v26 = vld [vmem:[#allocation8_spill] sm:$0xff] }
 0x772   : > { %6597 = vst [vmem:[#allocation1 + $0x6] ss:$9 sm:$0xff] %v6060_v11  ;;  %v10842_v11 = vmul.f32 %v5035_v24, %v4971_v6  ;;  %v11965_v6 = vld [vmem:[#allocation9_spill] sm:$0xff] }
 0x773   : > { %6598 = vst [vmem:[#allocation1 + $0x7] ss:$9 sm:$0xff] %v6061_v42  ;;  %v5347_v42 = vmul.f32 %v8251_v43, %v5346_v29  ;;  %v3621_v30 = vpack.c.bf16 %v3556_v4, %v3555_v1  ;;  %v4210_v23 = vmul.f32 %v4094_v17, %v11965_v6 }
 0x774   : > { %8252 = vrsqrt.f32 %v10842_v11  ;;  %vm5358_vm1 = vweird.f32 %v10842_v11 }
 0x775   : > { %8254 = vrsqrt.f32 %v10853_v20  ;;  %v4333_v36 = vsel %vm4245_vm3, %v4210_v23, 0.0  ;;  %v4723_v23 = vmul.f32 %v4094_v17, %v4094_v17 }
 0x777   : > { %v10861_v62 = vpop.f32.mrf.mxu1  ;;  %8039 = vmatmul.msk.bf16.gmra.mxu1 %vm3659_vm2, %v3621_v30  ;;  %v4845_v17 = vsel %vm4245_vm3, %v4723_v23, 0.0 }
 0x77a   : > { %v10834_v57 = vld [vmem:[#allocation1] sm:$0xff] }
 0x77b   : > { %6600 = vst [vmem:[#allocation1] ss:$9 sm:$0xff] %v6062_v37  ;;  %v5351_v37 = vsel %vm5350_vm14, %v8251_v43, %v5347_v42  ;;  %v4209_v43 = vmul.f32 %v10666_v51, %v11966_v26 }
 0x77c   : > { %6601 = vst [vmem:[#allocation1 + $0x1] ss:$9 sm:$0xff] %v6063_v50  ;;  %v5802_v25 = vmul.f32 %v5351_v37, %v10810_v39  ;;  %v8253_v50 = vpop.eup %8252  ;;  %v10878_v37 = vpop.xlane.xlu1 %4313 }
 0x77d   : > { %6602 = vst [vmem:[#allocation1 + $0x2] ss:$9 sm:$0xff] %v6064_v0  ;;  %v5353_v0 = vmul.f32 %v8253_v50, %v10842_v11  ;;  %v4330_v53 = vsel %vm4245_vm3, %v4209_v43, 0.0  ;;  %vm5359_vm15 = vweird.f32 %v8253_v50 }
 0x77e   : > { %6603 = vst [vmem:[#allocation1 + $0x3] ss:$9 sm:$0xff] %v6065_v49  ;;  %v6070_v44 = vperm.slane %v5802_v25, 0  ;;  %v10868_v49 = vpop.eup %8254  ;;  %v6071_v39 = vperm.slane %v5802_v25, 1  ;;  %v6072_v41 = vperm.slane %v5802_v25, 2  ;;  %v6073_v48 = vperm.slane %v5802_v25, 3  ;;  %vm5360_vm4 = vmor %vm5358_vm1, %vm5359_vm15 }
 0x77f   : > { %6604 = vst [vmem:[#allocation1 + $0x4] ss:$9 sm:$0xff] %v6066_v31  ;;  %4840 = vadd.xlane.f32.xlu2 %v4839_v46  ;;  %v5354_v24 = vmul.f32 %v8253_v50, %v5353_v0  ;;  %v5363_v51 = vmul.f32 %v10868_v49, %v10853_v20  ;;  %v6075_v1 = vperm.slane %v5802_v25, 5  ;;  %v6076_v4 = vperm.slane %v5802_v25, 6 }
 0x780   : > { %6605 = vst [vmem:[#allocation1 + $0x5] ss:$9 sm:$0xff] %v6067_v2  ;;  %v3426_v2 = vpop.f32.mrf.mxu2  ;;  %v6077_v6 = vperm.slane %v5802_v25, 7  ;;  %vm5369_vm9 = vweird.f32 %v10868_v49  ;;  %v10932_v20 = vadd.f32 %v10641_v35, %v10808_v19  ;;  %vm7222_vm15 = vcmask 458112  }
 0x781   : > { %6606 = vst [vmem:[#allocation1 + $0x6] ss:$9 sm:$0xff] %v6068_v12  ;;  %v5355_v31 = vmul.f32 0.5, %v5354_v24  ;;  %v6074_v12 = vperm.slane %v5802_v25, 4  ;;  %v5364_v0 = vmul.f32 %v10868_v49, %v5363_v51  ;;  %vm5370_vm11 = vmor %vm5368_vm10, %vm5369_vm9  ;;  %vm7226_vm1 = vcmask 523712  }
 0x782   : > { %6607 = vst [vmem:[#allocation1 + $0x7] ss:$9 sm:$0xff] %v6069_v55  ;;  %v10876_v55 = vand.u32 127, %v11751_v34 }
 0x783   : > { %v5356_v42 = vsub.f32 1.5, %v5355_v31  ;;  %4331 = vadd.xlane.f32.xlu1 %v4330_v53  ;;  %v5365_v11 = vmul.f32 0.5, %v5364_v0 }
 0x784   : > { %v10881_v30 = vadd.s32 4294967288, %v10876_v55  ;;  %v10890_v24 = vadd.s32 4294967272, %v10876_v55  ;;  %v10894_v25 = vadd.s32 4294967280, %v10876_v55  ;;  %v7019_v31 = vpop.permute.xlu1 %7018 }
 0x785   : > { %v5357_v46 = vmul.f32 %v8253_v50, %v5356_v42  ;;  %v5366_v42 = vsub.f32 1.5, %v5365_v11 }
 0x786   : > { %v7201_v43 = vperm.slane %v10800_v21, %v10881_v30  ;;  %v7205_v51 = vperm.slane %v10827_v3, %v10894_v25 }
 0x787   : > { %4334 = vadd.xlane.f32.xlu2 %v4333_v36  ;;  %v5361_v26 = vsel %vm5360_vm4, %v8253_v50, %v5357_v46  ;;  %v7016_v36 = vpop.permute.xlu2 %7015  ;;  %v7199_v50 = vperm.slane %v10767_v5, %v10876_v55 }
 0x788   : > { %v5803_v21 = vmul.f32 %v5361_v26, %v10818_v40  ;;  %v7209_v53 = vperm.slane %v7016_v36, %v10890_v24 }
 0x789   : > { %v10870_v29 = vld [vmem:[#allocation1] sm:$0xff] }
 0x78a   : > { %6609 = vst [vmem:[#allocation1] ss:$9 sm:$0xff] %v6070_v44  ;;  %v10887_v44 = vpop.f32.mrf.mxu1  ;;  %v6078_v5 = vperm.slane %v5803_v21, 0  ;;  %v6079_v46 = vperm.slane %v5803_v21, 1  ;;  %v6081_v26 = vperm.slane %v5803_v21, 3  ;;  %v6082_v36 = vperm.slane %v5803_v21, 4 }
 0x78b   : > { %6610 = vst [vmem:[#allocation1 + $0x1] ss:$9 sm:$0xff] %v6071_v39  ;;  %v3428_v39 = vpop.f32.mrf.mxu2  ;;  %4846 = vadd.xlane.f32.xlu1 %v4845_v17  ;;  %v10916_v17 = vadd.f32 %v10641_v35, %v10786_v22 }
 0x78c   : > { %6611 = vst [vmem:[#allocation1 + $0x2] ss:$9 sm:$0xff] %v6072_v41  ;;  %v3427_v41 = vadd.f32 %v10850_v32, %v3426_v2 }
 0x78d   : > { %6612 = vst [vmem:[#allocation1 + $0x3] ss:$9 sm:$0xff] %v6073_v48  ;;  %v7203_v48 = vsel %vm7202_vm5, %v7201_v43, %v7199_v50  ;;  %v11967_v50 = vld [vmem:[#allocation49_spill] sm:$0xff] }
 0x78e   : > { %6613 = vst [vmem:[#allocation1 + $0x4] ss:$9 sm:$0xff] %v6074_v12  ;;  %v3429_v12 = vadd.f32 %v10850_v32, %v3428_v39  ;;  %v3557_v40 = vmax.f32 %v3427_v41, 0.0  ;;  %v6080_v32 = vperm.slane %v5803_v21, 2  ;;  %v5367_v39 = vmul.f32 %v10868_v49, %v5366_v42 }
 0x78f   : > { %6614 = vst [vmem:[#allocation1 + $0x5] ss:$9 sm:$0xff] %v6075_v1  ;;  %v10906_v1 = vadd.s32 4294967264, %v10876_v55  ;;  %v4973_v41 = vmax.f32 %v11967_v50, 1e-16 }
 0x790   : > { %6615 = vst [vmem:[#allocation1 + $0x6] ss:$9 sm:$0xff] %v6076_v4  ;;  %v3558_v4 = vmax.f32 %v3429_v12, 0.0  ;;  %v6084_v12 = vperm.slane %v5803_v21, 6  ;;  %v5371_v42 = vsel %vm5370_vm11, %v10868_v49, %v5367_v39 }
 0x791   : > { %6616 = vst [vmem:[#allocation1 + $0x7] ss:$9 sm:$0xff] %v6077_v6  ;;  %v7207_v6 = vsel %vm7206_vm6, %v7205_v51, %v7203_v48  ;;  %v7213_v23 = vperm.slane %v7019_v31, %v10906_v1  ;;  %v6083_v31 = vperm.slane %v5803_v21, 5  ;;  %v4317_v48 = vpop.xlane.xlu2 %4316  ;;  %v6085_v51 = vperm.slane %v5803_v21, 7 }
 0x792   : > { %v7211_v3 = vsel %vm7210_vm7, %v7209_v53, %v7207_v6  ;;  %v3622_v0 = vpack.c.bf16 %v3558_v4, %v3557_v40  ;;  %v10918_v11 = vpop.f32.mrf.mxu1  ;;  %v4829_v53 = vpop.xlane.xlu1 %4828  ;;  %v11968_v40 = vld [vmem:[#allocation13_spill] sm:$0xff]  ;;  %v10936_v6 = vadd.s32 4294967256, %v10876_v55 }
 0x793   : > { %v7215_v43 = vsel %vm7214_vm8, %v7213_v23, %v7211_v3  ;;  %v5037_v22 = vmax.f32 %v4829_v53, 1e-16  ;;  %v4214_v4 = vmul.f32 %v10916_v17, %v11968_v40 }
 0x794   : > { %8040 = vmatmul.msk.bf16.gmra.mxu1 %vm3659_vm2, %v3622_v0  ;;  %vm7218_vm2 = vcmask 392512  }
 0x795   : > { %v4345_v21 = vsel %vm4245_vm3, %v4214_v4, 0.0  ;;  %v10947_v4 = vadd.s32 4294967248, %v10876_v55 }
 0x796   : > { %4346 = vadd.xlane.f32.xlu0 %v4345_v21 }
 0x798   : > { %v10908_v2 = vld [vmem:[#allocation1] sm:$0xff] }
 0x799   : > { %6618 = vst [vmem:[#allocation1] ss:$9 sm:$0xff] %v6078_v5  ;;  %v5101_v5 = vmul.f32 %v5037_v22, %v4973_v41  ;;  %v7022_v49 = vpop.permute.xlu2 %7021 }
 0x79a   : > { %6619 = vst [vmem:[#allocation1 + $0x1] ss:$9 sm:$0xff] %v6079_v46  ;;  %v5804_v46 = vmul.f32 %v5371_v42, %v10878_v37  ;;  %v7217_v0 = vperm.slane %v7022_v49, %v10936_v6  ;;  %v4728_v37 = vmul.f32 %v10932_v20, %v10932_v20  ;;  %v7025_v21 = vpop.permute.xlu1 %7024 }
 0x79b   : > { %6620 = vst [vmem:[#allocation1 + $0x2] ss:$9 sm:$0xff] %v6080_v32  ;;  %8256 = vrsqrt.f32 %v5101_v5  ;;  %vm5378_vm13 = vweird.f32 %v5101_v5 }
 0x79c   : > { %6621 = vst [vmem:[#allocation1 + $0x3] ss:$9 sm:$0xff] %v6081_v26  ;;  %v6086_v23 = vperm.slane %v5804_v46, 0  ;;  %v6088_v35 = vperm.slane %v5804_v46, 2  ;;  %v6089_v26 = vperm.slane %v5804_v46, 3  ;;  %v6090_v39 = vperm.slane %v5804_v46, 4 }
 0x79d   : > { %6622 = vst [vmem:[#allocation1 + $0x4] ss:$9 sm:$0xff] %v6082_v36  ;;  %v7219_v36 = vsel %vm7218_vm2, %v7217_v0, %v7215_v43  ;;  %v6091_v41 = vperm.slane %v5804_v46, 5  ;;  %v6092_v53 = vperm.slane %v5804_v46, 6  ;;  %v6093_v22 = vperm.slane %v5804_v46, 7 }
 0x79e   : > { %6623 = vst [vmem:[#allocation1 + $0x5] ss:$9 sm:$0xff] %v6083_v31  ;;  %v4860_v31 = vsel %vm4245_vm3, %v4728_v37, 0.0  ;;  %v7221_v37 = vperm.slane %v7025_v21, %v10947_v4 }
 0x79f   : > { %6624 = vst [vmem:[#allocation1 + $0x6] ss:$9 sm:$0xff] %v6084_v12  ;;  %7039 = vperm.xlu2 %8206, %v10649_v33   ;;  %v6087_v33 = vperm.slane %v5804_v46, 1  ;;  %4861 = vadd.xlane.f32.xlu0 %v4860_v31 }
 0x7a0   : > { %6625 = vst [vmem:[#allocation1 + $0x7] ss:$9 sm:$0xff] %v6085_v51 }
 0x7a1   : > { %v8257_v32 = vpop.eup %8256 }
 0x7a2   : > { %v5373_v19 = vmul.f32 %v8257_v32, %v5101_v5  ;;  %vm5379_vm12 = vweird.f32 %v8257_v32 }
 0x7a3   : > { %vm5380_vm14 = vmor %vm5378_vm13, %vm5379_vm12 }
 0x7a4   : > { %v5374_v50 = vmul.f32 %v8257_v32, %v5373_v19  ;;  %7042 = vperm.xlu1 %8205, %v10678_v56   ;;  %v4320_v19 = vpop.xlane.xlu0 %4319 }
 0x7a6   : > { %v5375_v12 = vmul.f32 0.5, %v5374_v50 }
 0x7a7   : > { %v10938_v3 = vld [vmem:[#allocation1] sm:$0xff] }
 0x7a8   : > { %6627 = vst [vmem:[#allocation1] ss:$9 sm:$0xff] %v6086_v23  ;;  %v5376_v51 = vsub.f32 1.5, %v5375_v12  ;;  %v11970_v12 = vld [vmem:[#allocation11_spill] sm:$0xff] }
 0x7a9   : > { %6628 = vst [vmem:[#allocation1 + $0x1] ss:$9 sm:$0xff] %v6087_v33 }
 0x7aa   : > { %6629 = vst [vmem:[#allocation1 + $0x2] ss:$9 sm:$0xff] %v6088_v35  ;;  %v5377_v43 = vmul.f32 %v8257_v32, %v5376_v51 }
 0x7ab   : > { %6630 = vst [vmem:[#allocation1 + $0x3] ss:$9 sm:$0xff] %v6089_v26  ;;  %v4724_v26 = vmul.f32 %v10774_v63, %v10774_v63  ;;  %v4212_v63 = vmul.f32 %v10790_v60, %v11970_v12 }
 0x7ac   : > { %6631 = vst [vmem:[#allocation1 + $0x4] ss:$9 sm:$0xff] %v6090_v39  ;;  %v5381_v42 = vsel %vm5380_vm14, %v8257_v32, %v5377_v43  ;;  %v10959_v39 = vld [vmem:[%s11708_s7] ss:$0 sm:$0xff]  ;;  %vm7230_vm14 = vcmask 589312  }
 0x7ad   : > { %6632 = vst [vmem:[#allocation1 + $0x5] ss:$9 sm:$0xff] %v6091_v41  ;;  %v5805_v40 = vmul.f32 %v5381_v42, %v4317_v48  ;;  %v7223_v48 = vsel %vm7222_vm15, %v7221_v37, %v7219_v36  ;;  %v4102_v36 = vadd.f32 %v10959_v39, %v10764_v61  ;;  %v4848_v50 = vsel %vm4245_vm3, %v4724_v26, 0.0  ;;  %v11969_v41 = vld [vmem:[#allocation12_spill] sm:$0xff] }
 0x7ae   : > { %6633 = vst [vmem:[#allocation1 + $0x6] ss:$9 sm:$0xff] %v6092_v53  ;;  %v4835_v53 = vpop.xlane.xlu0 %4834  ;;  %v4339_v51 = vsel %vm4245_vm3, %v4212_v63, 0.0 }
 0x7af   : > { %6634 = vst [vmem:[#allocation1 + $0x7] ss:$9 sm:$0xff] %v6093_v22  ;;  %v6094_v56 = vperm.slane %v5805_v40, 0  ;;  %v6095_v49 = vperm.slane %v5805_v40, 1  ;;  %v6096_v23 = vperm.slane %v5805_v40, 2  ;;  %v6097_v46 = vperm.slane %v5805_v40, 3 }
 0x7b0   : > { %v6098_v0 = vperm.slane %v5805_v40, 4  ;;  %v6099_v35 = vperm.slane %v5805_v40, 5  ;;  %v6100_v5 = vperm.slane %v5805_v40, 6  ;;  %v6101_v32 = vperm.slane %v5805_v40, 7 }
 0x7b1   : > { %v4213_v31 = vmul.f32 %v4102_v36, %v11969_v41  ;;  %v10969_v22 = vadd.s32 4294967240, %v10876_v55  ;;  %v4726_v42 = vmul.f32 %v4102_v36, %v4102_v36  ;;  %v5039_v40 = vmax.f32 %v4835_v53, 1e-16  ;;  %v4323_v53 = vpop.xlane.xlu1 %4322 }
 0x7b3   : > { %7054 = vperm.xlu0 %8204, %v10784_v18   ;;  %v4342_v18 = vsel %vm4245_vm3, %v4213_v31, 0.0  ;;  %v4854_v60 = vsel %vm4245_vm3, %v4726_v42, 0.0 }
 0x7b6   : > { %v10949_v33 = vld [vmem:[#allocation1] sm:$0xff]  ;;  %v7028_v43 = vpop.permute.xlu0 %7027 }
 0x7b7   : > { %6636 = vst [vmem:[#allocation1] ss:$9 sm:$0xff] %v6094_v56  ;;  %v7225_v61 = vperm.slane %v7028_v43, %v10969_v22  ;;  %v4975_v56 = vmax.f32 %v10159_v9, 1e-16 }
 0x7b8   : > { %6637 = vst [vmem:[#allocation1 + $0x1] ss:$9 sm:$0xff] %v6095_v49  ;;  %v4832_v49 = vpop.xlane.xlu2 %4831 }
 0x7b9   : > { %6638 = vst [vmem:[#allocation1 + $0x2] ss:$9 sm:$0xff] %v6096_v23  ;;  %v10974_v21 = vsel %vm7226_vm1, %v7225_v61, %v7223_v48  ;;  %v11971_v23 = vld [vmem:[#allocation50_spill] sm:$0xff]  ;;  %v5103_v37 = vmul.f32 %v5039_v40, %v4975_v56  ;;  %v4838_v40 = vpop.xlane.xlu1 %4837 }
 0x7ba   : > { %6639 = vst [vmem:[#allocation1 + $0x3] ss:$9 sm:$0xff] %v6097_v46  ;;  %v4974_v46 = vmax.f32 %v11971_v23, 1e-16  ;;  %v11973_v23 = vld [vmem:[#allocation51_spill] sm:$0xff] }
 0x7bb   : > { %6640 = vst [vmem:[#allocation1 + $0x4] ss:$9 sm:$0xff] %v6098_v0  ;;  %v5038_v0 = vmax.f32 %v4832_v49, 1e-16  ;;  %vm5398_vm12 = vweird.f32 %v5103_v37 }
 0x7bc   : > { %6641 = vst [vmem:[#allocation1 + $0x5] ss:$9 sm:$0xff] %v6099_v35 }
 0x7bd   : > { %6642 = vst [vmem:[#allocation1 + $0x6] ss:$9 sm:$0xff] %v6100_v5  ;;  %v5102_v35 = vmul.f32 %v5038_v0, %v4974_v46  ;;  %v10981_v5 = vadd.f32 %v10959_v39, %v10836_v58  ;;  %v4976_v46 = vmax.f32 %v11973_v23, 1e-16 }
 0x7be   : > { %6643 = vst [vmem:[#allocation1 + $0x7] ss:$9 sm:$0xff] %v6101_v32  ;;  %v11972_v32 = vld [vmem:[#allocation16_spill] sm:$0xff] }
 0x7bf   : > { %8258 = vrsqrt.f32 %v5102_v35  ;;  %v4217_v48 = vmul.f32 %v10981_v5, %v11972_v32  ;;  %vm5388_vm9 = vweird.f32 %v5102_v35 }
 0x7c0   : > { %8260 = vrsqrt.f32 %v5103_v37 }
 0x7c1   : > { %v4354_v41 = vsel %vm4245_vm3, %v4217_v48, 0.0 }
 0x7c5   : > { %v8259_v26 = vpop.eup %8258  ;;  %v10995_v0 = vld [vmem:[#allocation1] sm:$0xff] }
 0x7c6   : > { %v8261_v9 = vpop.eup %8260  ;;  %v5383_v36 = vmul.f32 %v8259_v26, %v5102_v35  ;;  %vm5389_vm4 = vweird.f32 %v8259_v26 }
 0x7c7   : > { %v5393_v58 = vmul.f32 %v8261_v9, %v5103_v37  ;;  %vm5390_vm10 = vmor %vm5388_vm9, %vm5389_vm4  ;;  %vm5399_vm11 = vweird.f32 %v8261_v9  ;;  %vm7234_vm4 = vcmask 654912  }
 0x7c8   : > { %4849 = vadd.xlane.f32.xlu2 %v4848_v50  ;;  %v10988_v50 = vadd.f32 %v10959_v39, %v10861_v62  ;;  %v5384_v31 = vmul.f32 %v8259_v26, %v5383_v36  ;;  %v5040_v36 = vmax.f32 %v4838_v40, 1e-16  ;;  %vm5400_vm13 = vmor %vm5398_vm12, %vm5399_vm11 }
 0x7ca   : > { %v4731_v12 = vmul.f32 %v10988_v50, %v10988_v50 }
 0x7ce   : > { %4340 = vadd.xlane.f32.xlu1 %v4339_v51  ;;  %v5394_v51 = vmul.f32 %v8261_v9, %v5393_v58 }
 0x7d0   : > { %4343 = vadd.xlane.f32.xlu2 %v4342_v18  ;;  %v5385_v18 = vmul.f32 0.5, %v5384_v31  ;;  %v5395_v42 = vmul.f32 0.5, %v5394_v51  ;;  %v5104_v31 = vmul.f32 %v5040_v36, %v4976_v46 }
 0x7d2   : > { %v5386_v63 = vsub.f32 1.5, %v5385_v18  ;;  %v5396_v35 = vsub.f32 1.5, %v5395_v42  ;;  %8262 = vrsqrt.f32 %v5104_v31 }
 0x7d4   : > { %v5387_v43 = vmul.f32 %v8259_v26, %v5386_v63  ;;  %v5397_v18 = vmul.f32 %v8261_v9, %v5396_v35 }
 0x7d6   : > { %4855 = vadd.xlane.f32.xlu1 %v4854_v60  ;;  %v5391_v62 = vsel %vm5390_vm10, %v8259_v26, %v5387_v43  ;;  %vm5408_vm10 = vweird.f32 %v5104_v31 }
 0x7d7   : > { %v5806_v61 = vmul.f32 %v5391_v62, %v4320_v19  ;;  %v4326_v19 = vpop.xlane.xlu2 %4325 }
 0x7d8   : > { %v8263_v51 = vpop.eup %8262 }
 0x7d9   : > { %v6102_v56 = vperm.slane %v5806_v61, 0  ;;  %v6103_v49 = vperm.slane %v5806_v61, 1  ;;  %v6104_v60 = vperm.slane %v5806_v61, 2  ;;  %v6105_v32 = vperm.slane %v5806_v61, 3 }
 0x7da   : > { %v6106_v48 = vperm.slane %v5806_v61, 4  ;;  %v6108_v26 = vperm.slane %v5806_v61, 6  ;;  %v6109_v58 = vperm.slane %v5806_v61, 7  ;;  %v5403_v43 = vmul.f32 %v8263_v51, %v5104_v31 }
 0x7db   : > { %6645 = vst [vmem:[#allocation1] ss:$9 sm:$0xff] %v6102_v56  ;;  %v7034_v56 = vpop.permute.xlu1 %7033  ;;  %vm5409_vm9 = vweird.f32 %v8263_v51  ;;  %v4109_v31 = vadd.f32 %v10959_v39, %v10825_v52 }
 0x7dc   : > { %6646 = vst [vmem:[#allocation1 + $0x1] ss:$9 sm:$0xff] %v6103_v49  ;;  %v5404_v40 = vmul.f32 %v8263_v51, %v5403_v43  ;;  %vm5410_vm11 = vmor %vm5408_vm10, %vm5409_vm9  ;;  %vm7238_vm10 = vcmask 720512  }
 0x7dd   : > { %4355 = vadd.xlane.f32.xlu0 %v4354_v41  ;;  %v6107_v41 = vperm.slane %v5806_v61, 5  ;;  %6647 = vst [vmem:[#allocation1 + $0x2] ss:$9 sm:$0xff] %v6104_v60  ;;  %v11004_v61 = vadd.s32 4294967224, %v10876_v55 }
 0x7de   : > { %6648 = vst [vmem:[#allocation1 + $0x3] ss:$9 sm:$0xff] %v6105_v32  ;;  %v5405_v23 = vmul.f32 0.5, %v5404_v40  ;;  %v4978_v40 = vmax.f32 %v10174_v10, 1e-16  ;;  %v11975_v10 = vld [vmem:[#allocation15_spill] sm:$0xff] }
 0x7df   : > { %6649 = vst [vmem:[#allocation1 + $0x4] ss:$9 sm:$0xff] %v6106_v48  ;;  %v7031_v62 = vpop.permute.xlu2 %7030 }
 0x7e0   : > { %6650 = vst [vmem:[#allocation1 + $0x5] ss:$9 sm:$0xff] %v6107_v41  ;;  %v5406_v35 = vsub.f32 1.5, %v5405_v23 }
 0x7e1   : > { %6651 = vst [vmem:[#allocation1 + $0x6] ss:$9 sm:$0xff] %v6108_v26 }
 0x7e2   : > { %6652 = vst [vmem:[#allocation1 + $0x7] ss:$9 sm:$0xff] %v6109_v58 }
 0x7e8   : > { %7048 = vperm.xlu2 %8206, %v10733_v54   ;;  %v4869_v54 = vsel %vm4245_vm3, %v4731_v12, 0.0  ;;  %v5401_v12 = vsel %vm5400_vm13, %v8261_v9, %v5397_v18  ;;  %v7233_v9 = vperm.slane %v7034_v56, %v11004_v61  ;;  %v5407_v18 = vmul.f32 %v8263_v51, %v5406_v35  ;;  %v11974_v56 = vld [vmem:[#allocation52_spill] sm:$0xff] }
 0x7e9   : > { %4870 = vadd.xlane.f32.xlu0 %v4869_v54  ;;  %v5807_v63 = vmul.f32 %v5401_v12, %v4323_v53  ;;  %v11001_v54 = vadd.s32 4294967232, %v10876_v55  ;;  %v11006_v37 = vld [vmem:[#allocation1] sm:$0xff] }
 0x7eb   : > { %v6110_v42 = vperm.slane %v5807_v63, 0  ;;  %v6111_v49 = vperm.slane %v5807_v63, 1  ;;  %v7229_v60 = vperm.slane %v7031_v62, %v11001_v54  ;;  %v6112_v53 = vperm.slane %v5807_v63, 2 }
 0x7ec   : > { %v6113_v46 = vperm.slane %v5807_v63, 3  ;;  %v6114_v48 = vperm.slane %v5807_v63, 4  ;;  %v6115_v26 = vperm.slane %v5807_v63, 5  ;;  %v6116_v58 = vperm.slane %v5807_v63, 6 }
 0x7ed   : > { %6654 = vst [vmem:[#allocation1] ss:$9 sm:$0xff] %v6110_v42  ;;  %v7231_v32 = vsel %vm7230_vm14, %v7229_v60, %v10974_v21  ;;  %v5411_v21 = vsel %vm5410_vm11, %v8263_v51, %v5407_v18  ;;  %v4727_v62 = vmul.f32 %v10916_v17, %v10916_v17 }
 0x7ee   : > { %6655 = vst [vmem:[#allocation1 + $0x1] ss:$9 sm:$0xff] %v6111_v49  ;;  %v11014_v36 = vsel %vm7234_vm4, %v7233_v9, %v7231_v32  ;;  %v4977_v49 = vmax.f32 %v11974_v56, 1e-16  ;;  %v5808_v60 = vmul.f32 %v5411_v21, %v4326_v19  ;;  %v11037_v56 = vadd.s32 4294967216, %v10876_v55 }
 0x7ef   : > { %7051 = vperm.xlu1 %8205, %v10758_v47   ;;  %v10998_v47 = vpop.xlane.xlu0 %4328  ;;  %6656 = vst [vmem:[#allocation1 + $0x2] ss:$9 sm:$0xff] %v6112_v53  ;;  %v4857_v9 = vsel %vm4245_vm3, %v4727_v62, 0.0 }
 0x7f0   : > { %6657 = vst [vmem:[#allocation1 + $0x3] ss:$9 sm:$0xff] %v6113_v46  ;;  %v6118_v51 = vperm.slane %v5808_v60, 0  ;;  %v6119_v23 = vperm.slane %v5808_v60, 1  ;;  %v4216_v46 = vmul.f32 %v4109_v31, %v11975_v10  ;;  %v6120_v32 = vperm.slane %v5808_v60, 2 }
 0x7f1   : > { %6658 = vst [vmem:[#allocation1 + $0x4] ss:$9 sm:$0xff] %v6114_v48  ;;  %v6121_v19 = vperm.slane %v5808_v60, 3  ;;  %v6122_v52 = vperm.slane %v5808_v60, 4  ;;  %v6123_v48 = vperm.slane %v5808_v60, 5  ;;  %v6125_v18 = vperm.slane %v5808_v60, 7 }
 0x7f2   : > { %6659 = vst [vmem:[#allocation1 + $0x5] ss:$9 sm:$0xff] %v6115_v26  ;;  %v4841_v12 = vpop.xlane.xlu2 %4840  ;;  %v4351_v35 = vsel %vm4245_vm3, %v4216_v46, 0.0  ;;  %v6124_v26 = vperm.slane %v5808_v60, 6 }
 0x7f3   : > { %6660 = vst [vmem:[#allocation1 + $0x6] ss:$9 sm:$0xff] %v6116_v58  ;;  %v5041_v42 = vmax.f32 %v4841_v12, 1e-16  ;;  %v11976_v12 = vld [vmem:[#allocation14_spill] sm:$0xff] }
 0x7f5   : > { %v5105_v53 = vmul.f32 %v5041_v42, %v4977_v49 }
 0x7f6   : > { %v4332_v62 = vpop.xlane.xlu1 %4331 }
 0x7f7   : > { %v4844_v41 = vpop.xlane.xlu0 %4843  ;;  %8264 = vrsqrt.f32 %v5105_v53  ;;  %vm5418_vm13 = vweird.f32 %v5105_v53 }
 0x7f8   : > { %v5042_v43 = vmax.f32 %v4844_v41, 1e-16 }
 0x7fd   : > { %7063 = vperm.xlu0 %8204, %v10870_v29   ;;  %v6117_v29 = vperm.slane %v5807_v63, 7  ;;  %v11022_v63 = vmul.f32 %v5042_v43, %v4978_v40  ;;  %v8265_v41 = vpop.eup %8264  ;;  %v4215_v43 = vmul.f32 %v10932_v20, %v11976_v12 }
 0x7fe   : > { %vm5419_vm12 = vweird.f32 %v8265_v41 }
 0x7ff   : > { %6661 = vst [vmem:[#allocation1 + $0x7] ss:$9 sm:$0xff] %v6117_v29  ;;  %8266 = vrsqrt.f32 %v11022_v63  ;;  %v5413_v29 = vmul.f32 %v8265_v41, %v5105_v53  ;;  %v4348_v49 = vsel %vm4245_vm3, %v4215_v43, 0.0  ;;  %vm5420_vm9 = vmor %vm5418_vm13, %vm5419_vm12  ;;  %vm5428_vm12 = vweird.f32 %v11022_v63 }
 0x801   : > { %v5414_v21 = vmul.f32 %v8265_v41, %v5413_v29  ;;  %v11977_v29 = vld [vmem:[#allocation53_spill] sm:$0xff] }
 0x803   : > { %v5415_v40 = vmul.f32 0.5, %v5414_v21 }
 0x805   : > { %v11030_v58 = vpop.eup %8266  ;;  %v5416_v60 = vsub.f32 1.5, %v5415_v40  ;;  %v4121_v40 = vpop.f32.mrf.mxu1 }
 0x806   : > { %v11026_v17 = vld [vmem:[#allocation1] sm:$0xff]  ;;  %v5423_v42 = vmul.f32 %v11030_v58, %v11022_v63  ;;  %vm5429_vm11 = vweird.f32 %v11030_v58  ;;  %v11076_v63 = vadd.s32 4294967200, %v10876_v55 }
 0x807   : > { %6663 = vst [vmem:[#allocation1] ss:$9 sm:$0xff] %v6118_v51  ;;  %v5417_v20 = vmul.f32 %v8265_v41, %v5416_v60  ;;  %v11978_v60 = vld [vmem:[#allocation19_spill] sm:$0xff]  ;;  %vm5430_vm13 = vmor %vm5428_vm12, %vm5429_vm11  ;;  %vm11750_vm11 = vcmask 851712  }
 0x808   : > { %6664 = vst [vmem:[#allocation1 + $0x1] ss:$9 sm:$0xff] %v6119_v23  ;;  %v5424_v51 = vmul.f32 %v11030_v58, %v5423_v42  ;;  %v4729_v23 = vmul.f32 %v4109_v31, %v4109_v31 }
 0x809   : > { %6665 = vst [vmem:[#allocation1 + $0x2] ss:$9 sm:$0xff] %v6120_v32  ;;  %v5421_v46 = vsel %vm5420_vm9, %v8265_v41, %v5417_v20  ;;  %v4979_v41 = vmax.f32 %v11977_v29, 1e-16  ;;  %vm11754_vm9 = vcmask 786112  }
 0x80a   : > { %6666 = vst [vmem:[#allocation1 + $0x3] ss:$9 sm:$0xff] %v6121_v19  ;;  %v5809_v32 = vmul.f32 %v5421_v46, %v10998_v47  ;;  %v5425_v19 = vmul.f32 0.5, %v5424_v51  ;;  %v11064_v46 = vadd.f32 %v10959_v39, %v4121_v40 }
 0x80b   : > { %6667 = vst [vmem:[#allocation1 + $0x4] ss:$9 sm:$0xff] %v6122_v52 }
 0x80c   : > { %6668 = vst [vmem:[#allocation1 + $0x5] ss:$9 sm:$0xff] %v6123_v48  ;;  %v4847_v48 = vpop.xlane.xlu1 %4846  ;;  %v6126_v31 = vperm.slane %v5809_v32, 0  ;;  %v6127_v53 = vperm.slane %v5809_v32, 1  ;;  %v6129_v47 = vperm.slane %v5809_v32, 3  ;;  %v6130_v43 = vperm.slane %v5809_v32, 4 }
 0x80d   : > { %6669 = vst [vmem:[#allocation1 + $0x6] ss:$9 sm:$0xff] %v6124_v26  ;;  %v11050_v26 = vadd.f32 %v10959_v39, %v10918_v11  ;;  %v5043_v21 = vmax.f32 %v4847_v48, 1e-16  ;;  %v6131_v42 = vperm.slane %v5809_v32, 5  ;;  %v11055_v11 = vpop.xlane.xlu2 %4334  ;;  %v4734_v48 = vmul.f32 %v11064_v46, %v11064_v46 }
 0x80e   : > { %6670 = vst [vmem:[#allocation1 + $0x7] ss:$9 sm:$0xff] %v6125_v18  ;;  %v6128_v18 = vperm.slane %v5809_v32, 2 }
 0x80f   : > { %v4220_v51 = vmul.f32 %v11050_v26, %v11978_v60 }
 0x811   : > { %4858 = vadd.xlane.f32.xlu2 %v4857_v9  ;;  %v7037_v9 = vpop.permute.xlu0 %7036 }
 0x812   : > { %v7237_v10 = vperm.slane %v7037_v9, %v11037_v56  ;;  %v5107_v9 = vmul.f32 %v5043_v21, %v4979_v41 }
 0x814   : > { %v11045_v52 = vsel %vm7238_vm10, %v7237_v10, %v11014_v36  ;;  %v5426_v36 = vsub.f32 1.5, %v5425_v19  ;;  %8268 = vrsqrt.f32 %v5107_v9  ;;  %v4363_v19 = vsel %vm4245_vm3, %v4220_v51, 0.0 }
 0x815   : > { %v11053_v12 = vld [vmem:[#allocation1] sm:$0xff]  ;;  %v7040_v29 = vpop.permute.xlu2 %7039 }
 0x816   : > { %6672 = vst [vmem:[#allocation1] ss:$9 sm:$0xff] %v6126_v31  ;;  %v5427_v10 = vmul.f32 %v11030_v58, %v5426_v36 }
 0x817   : > { %6673 = vst [vmem:[#allocation1 + $0x1] ss:$9 sm:$0xff] %v6127_v53 }
 0x818   : > { %6674 = vst [vmem:[#allocation1 + $0x2] ss:$9 sm:$0xff] %v6128_v18  ;;  %v11073_v18 = vadd.s32 4294967208, %v10876_v55 }
 0x819   : > { %4352 = vadd.xlane.f32.xlu2 %v4351_v35  ;;  %4349 = vadd.xlane.f32.xlu1 %v4348_v49  ;;  %v4863_v35 = vsel %vm4245_vm3, %v4729_v23, 0.0  ;;  %v6132_v49 = vperm.slane %v5809_v32, 6  ;;  %v11059_v20 = vpop.xlane.xlu0 %4337  ;;  %v6133_v23 = vperm.slane %v5809_v32, 7  ;;  %6675 = vst [vmem:[#allocation1 + $0x3] ss:$9 sm:$0xff] %v6129_v47  ;;  %v5431_v32 = vsel %vm5430_vm13, %v11030_v58, %v5427_v10  ;;  %v7043_v58 = vpop.permute.xlu1 %7042 }
 0x81a   : > { %6676 = vst [vmem:[#allocation1 + $0x4] ss:$9 sm:$0xff] %v6130_v43  ;;  %v8269_v31 = vpop.eup %8268  ;;  %vm5438_vm13 = vweird.f32 %v5107_v9 }
 0x81b   : > { %6677 = vst [vmem:[#allocation1 + $0x5] ss:$9 sm:$0xff] %v6131_v42  ;;  %v5433_v53 = vmul.f32 %v8269_v31, %v5107_v9  ;;  %v7245_v42 = vperm.slane %v7043_v58, %v11076_v63  ;;  %vm5439_vm12 = vweird.f32 %v8269_v31 }
 0x81c   : > { %6678 = vst [vmem:[#allocation1 + $0x6] ss:$9 sm:$0xff] %v6132_v49  ;;  %vm5440_vm0 = vmor %vm5438_vm13, %vm5439_vm12 }
 0x81d   : > { %6679 = vst [vmem:[#allocation1 + $0x7] ss:$9 sm:$0xff] %v6133_v23  ;;  %v5434_v43 = vmul.f32 %v8269_v31, %v5433_v53  ;;  %v11979_v53 = vld [vmem:[#allocation67_spill] sm:$0xff] }
 0x81f   : > { %v5435_v49 = vmul.f32 0.5, %v5434_v43 }
 0x821   : > { %4864 = vadd.xlane.f32.xlu1 %v4863_v35  ;;  %v5810_v35 = vmul.f32 %v5431_v32, %v4332_v62  ;;  %v4853_v41 = vpop.xlane.xlu0 %4852  ;;  %v7241_v62 = vperm.slane %v7040_v29, %v11073_v18  ;;  %v4981_v29 = vmax.f32 %v11979_v53, 1e-16 }
 0x822   : > { %v5045_v60 = vmax.f32 %v4853_v41, 1e-16 }
 0x823   : > { %v6134_v47 = vperm.slane %v5810_v35, 0  ;;  %v6135_v21 = vperm.slane %v5810_v35, 1  ;;  %v6136_v40 = vperm.slane %v5810_v35, 2  ;;  %v6137_v51 = vperm.slane %v5810_v35, 3 }
 0x824   : > { %v11079_v36 = vld [vmem:[#allocation1] sm:$0xff]  ;;  %v7243_v23 = vsel %vm11754_vm9, %v7241_v62, %v11045_v52  ;;  %v6138_v10 = vperm.slane %v5810_v35, 4  ;;  %v6141_v41 = vperm.slane %v5810_v35, 7  ;;  %v11980_v52 = vld [vmem:[#allocation54_spill] sm:$0xff] }
 0x825   : > { %6681 = vst [vmem:[#allocation1] ss:$9 sm:$0xff] %v6134_v47  ;;  %v11086_v32 = vsel %vm11750_vm11, %v7245_v42, %v7243_v23  ;;  %v6140_v47 = vperm.slane %v5810_v35, 6  ;;  %vm11753_vm11 = vcmask 917312  }
 0x826   : > { %6682 = vst [vmem:[#allocation1 + $0x1] ss:$9 sm:$0xff] %v6135_v21  ;;  %v11090_v21 = vmul.f32 %v5045_v60, %v4981_v29 }
 0x827   : > { %4364 = vadd.xlane.f32.xlu0 %v4363_v19  ;;  %6683 = vst [vmem:[#allocation1 + $0x2] ss:$9 sm:$0xff] %v6136_v40  ;;  %v5436_v19 = vsub.f32 1.5, %v5435_v49 }
 0x828   : > { %6684 = vst [vmem:[#allocation1 + $0x3] ss:$9 sm:$0xff] %v6137_v51  ;;  %8270 = vrsqrt.f32 %v11090_v21 }
 0x829   : > { %6685 = vst [vmem:[#allocation1 + $0x4] ss:$9 sm:$0xff] %v6138_v10  ;;  %v5437_v43 = vmul.f32 %v8269_v31, %v5436_v19 }
 0x82a   : > { %6687 = vst [vmem:[#allocation1 + $0x6] ss:$9 sm:$0xff] %v6140_v47 }
 0x82b   : > { %v5441_v62 = vsel %vm5440_vm0, %v8269_v31, %v5437_v43  ;;  %6688 = vst [vmem:[#allocation1 + $0x7] ss:$9 sm:$0xff] %v6141_v41 }
 0x82c   : > { %v5811_v40 = vmul.f32 %v5441_v62, %v11055_v11  ;;  %v4730_v62 = vmul.f32 %v10981_v5, %v10981_v5 }
 0x82e   : > { %v6142_v9 = vperm.slane %v5811_v40, 0  ;;  %v6144_v51 = vperm.slane %v5811_v40, 2  ;;  %v6145_v10 = vperm.slane %v5811_v40, 3  ;;  %v6146_v60 = vperm.slane %v5811_v40, 4  ;;  %v11097_v19 = vpop.eup %8270 }
 0x82f   : > { %v6147_v31 = vperm.slane %v5811_v40, 5  ;;  %v6148_v11 = vperm.slane %v5811_v40, 6  ;;  %v6149_v53 = vperm.slane %v5811_v40, 7  ;;  %v5453_v29 = vmul.f32 %v11097_v19, %v11090_v21 }
 0x830   : > { %v4866_v5 = vsel %vm4245_vm3, %v4730_v62, 0.0 }
 0x831   : > { %7057 = vperm.xlu2 %8206, %v10815_v45   ;;  %v4878_v45 = vsel %vm4245_vm3, %v4734_v48, 0.0  ;;  %v6139_v48 = vperm.slane %v5810_v35, 5  ;;  %v6143_v35 = vperm.slane %v5811_v40, 1  ;;  %v11108_v40 = vadd.s32 4294967192, %v10876_v55 }
 0x832   : > { %4879 = vadd.xlane.f32.xlu0 %v4878_v45  ;;  %v4980_v45 = vmax.f32 %v11980_v52, 1e-16 }
 0x833   : > { %6686 = vst [vmem:[#allocation1 + $0x5] ss:$9 sm:$0xff] %v6139_v48 }
 0x83a   : > { %7060 = vperm.xlu1 %8205, %v10834_v57   ;;  %v11095_v23 = vld [vmem:[#allocation1] sm:$0xff] }
 0x83b   : > { %v4850_v58 = vpop.xlane.xlu2 %4849  ;;  %6690 = vst [vmem:[#allocation1] ss:$9 sm:$0xff] %v6142_v9 }
 0x83c   : > { %v5044_v42 = vmax.f32 %v4850_v58, 1e-16  ;;  %6691 = vst [vmem:[#allocation1 + $0x1] ss:$9 sm:$0xff] %v6143_v35 }
 0x83d   : > { %6692 = vst [vmem:[#allocation1 + $0x2] ss:$9 sm:$0xff] %v6144_v51 }
 0x83e   : > { %v5108_v49 = vmul.f32 %v5044_v42, %v4980_v45  ;;  %6693 = vst [vmem:[#allocation1 + $0x3] ss:$9 sm:$0xff] %v6145_v10  ;;  %v5454_v45 = vmul.f32 %v11097_v19, %v5453_v29  ;;  %v11981_v10 = vld [vmem:[#allocation56_spill] sm:$0xff] }
 0x83f   : > { %6694 = vst [vmem:[#allocation1 + $0x4] ss:$9 sm:$0xff] %v6146_v60  ;;  %v4982_v60 = vmax.f32 %v11981_v10, 1e-16 }
 0x840   : > { %8272 = vrsqrt.f32 %v5108_v49  ;;  %6695 = vst [vmem:[#allocation1 + $0x5] ss:$9 sm:$0xff] %v6147_v31  ;;  %vm5448_vm12 = vweird.f32 %v5108_v49  ;;  %v5455_v35 = vmul.f32 0.5, %v5454_v45  ;;  %v11113_v31 = vadd.s32 4294967184, %v10876_v55 }
 0x841   : > { %v4341_v41 = vpop.xlane.xlu1 %4340  ;;  %6696 = vst [vmem:[#allocation1 + $0x6] ss:$9 sm:$0xff] %v6148_v11 }
 0x842   : > { %6697 = vst [vmem:[#allocation1 + $0x7] ss:$9 sm:$0xff] %v6149_v53 }
 0x843   : > { %v11102_v43 = vpop.xlane.xlu2 %4343 }
 0x846   : > { %v8273_v48 = vpop.eup %8272  ;;  %7072 = vperm.xlu0 %8204, %v10949_v33   ;;  %v7046_v33 = vpop.permute.xlu0 %7045 }
 0x847   : > { %v5443_v57 = vmul.f32 %v8273_v48, %v5108_v49  ;;  %vm5449_vm0 = vweird.f32 %v8273_v48  ;;  %v7249_v49 = vperm.slane %v7046_v33, %v11108_v40 }
 0x848   : > { %vm5450_vm13 = vmor %vm5448_vm12, %vm5449_vm0  ;;  %vm11752_vm0 = vcmask 982912   ;;  %vm5459_vm12 = vweird.f32 %v11097_v19 }
 0x849   : > { %v5444_v47 = vmul.f32 %v8273_v48, %v5443_v57  ;;  %v4856_v53 = vpop.xlane.xlu1 %4855 }
 0x84a   : > { %v5046_v33 = vmax.f32 %v4856_v53, 1e-16 }
 0x84b   : > { %v5445_v58 = vmul.f32 0.5, %v5444_v47  ;;  %v7049_v11 = vpop.permute.xlu2 %7048 }
 0x84c   : > { %v7253_v62 = vperm.slane %v7049_v11, %v11113_v31  ;;  %v5110_v34 = vmul.f32 %v5046_v33, %v4982_v60 }
 0x84d   : > { %v5446_v52 = vsub.f32 1.5, %v5445_v58 }
 0x84e   : > { %8274 = vrsqrt.f32 %v5110_v34 }
 0x84f   : > { %v5447_v42 = vmul.f32 %v8273_v48, %v5446_v52  ;;  %v5456_v52 = vsub.f32 1.5, %v5455_v35  ;;  %v11982_v35 = vld [vmem:[#allocation18_spill] sm:$0xff] }
 0x851   : > { %v5451_v9 = vsel %vm5450_vm13, %v8273_v48, %v5447_v42  ;;  %v11119_v48 = vadd.f32 %v10959_v39, %v10887_v44  ;;  %v7251_v42 = vsel %vm11753_vm11, %v7249_v49, %v11086_v32  ;;  %v11131_v32 = vpop.f32.mrf.mxu1  ;;  %vm5458_vm13 = vweird.f32 %v11090_v21 }
 0x852   : > { %v5812_v51 = vmul.f32 %v5451_v9, %v11059_v20  ;;  %v11121_v20 = vld [vmem:[#allocation1] sm:$0xff]  ;;  %v7255_v44 = vsel %vm11752_vm0, %v7253_v62, %v7251_v42  ;;  %vm5460_vm0 = vmor %vm5458_vm13, %vm5459_vm12  ;;  %v11137_v49 = vadd.s32 4294967176, %v10876_v55  ;;  %vm5468_vm13 = vweird.f32 %v5110_v34 }
 0x853   : > { %v4219_v15 = vmul.f32 %v11119_v48, %v11982_v35 }
 0x854   : > { %v6150_v57 = vperm.slane %v5812_v51, 0  ;;  %v6151_v29 = vperm.slane %v5812_v51, 1  ;;  %v6152_v47 = vperm.slane %v5812_v51, 2  ;;  %v6153_v58 = vperm.slane %v5812_v51, 3  ;;  %v8275_v53 = vpop.eup %8274 }
 0x855   : > { %v6154_v45 = vperm.slane %v5812_v51, 4  ;;  %v6155_v9 = vperm.slane %v5812_v51, 5  ;;  %v6156_v10 = vperm.slane %v5812_v51, 6  ;;  %v6157_v28 = vperm.slane %v5812_v51, 7 }
 0x856   : > { %6699 = vst [vmem:[#allocation1] ss:$9 sm:$0xff] %v6150_v57  ;;  %v5457_v57 = vmul.f32 %v11097_v19, %v5456_v52  ;;  %v4360_v60 = vsel %vm4245_vm3, %v4219_v15, 0.0  ;;  %vm5469_vm12 = vweird.f32 %v8275_v53 }
 0x857   : > { %6700 = vst [vmem:[#allocation1 + $0x1] ss:$9 sm:$0xff] %v6151_v29  ;;  %vm5470_vm11 = vmor %vm5468_vm13, %vm5469_vm12 }
 0x858   : > { %6701 = vst [vmem:[#allocation1 + $0x2] ss:$9 sm:$0xff] %v6152_v47  ;;  %v5461_v51 = vsel %vm5460_vm0, %v11097_v19, %v5457_v57  ;;  %vm7258_vm0 = vcmask 1048512  }
 0x859   : > { %6702 = vst [vmem:[#allocation1 + $0x3] ss:$9 sm:$0xff] %v6153_v58  ;;  %v5813_v11 = vmul.f32 %v5461_v51, %v4341_v41  ;;  %v11983_v58 = vld [vmem:[#allocation17_spill] sm:$0xff]  ;;  %v4126_v21 = vpop.f32.mrf.mxu1 }
 0x85a   : > { %4867 = vadd.xlane.f32.xlu2 %v4866_v5  ;;  %6703 = vst [vmem:[#allocation1 + $0x4] ss:$9 sm:$0xff] %v6154_v45  ;;  %v5463_v5 = vmul.f32 %v8275_v53, %v5110_v34  ;;  %v4218_v52 = vmul.f32 %v10988_v50, %v11983_v58  ;;  %v11984_v58 = vld [vmem:[#allocation22_spill] sm:$0xff] }
 0x85b   : > { %6704 = vst [vmem:[#allocation1 + $0x5] ss:$9 sm:$0xff] %v6155_v9  ;;  %v6158_v29 = vperm.slane %v5813_v11, 0  ;;  %v6160_v42 = vperm.slane %v5813_v11, 2  ;;  %v6161_v41 = vperm.slane %v5813_v11, 3  ;;  %v6162_v33 = vperm.slane %v5813_v11, 4 }
 0x85c   : > { %6705 = vst [vmem:[#allocation1 + $0x6] ss:$9 sm:$0xff] %v6156_v10  ;;  %v5464_v47 = vmul.f32 %v8275_v53, %v5463_v5  ;;  %v4357_v10 = vsel %vm4245_vm3, %v4218_v52, 0.0  ;;  %v6163_v50 = vperm.slane %v5813_v11, 5  ;;  %v6164_v57 = vperm.slane %v5813_v11, 6 }
 0x85d   : > { %6706 = vst [vmem:[#allocation1 + $0x7] ss:$9 sm:$0xff] %v6157_v28  ;;  %v6159_v28 = vperm.slane %v5813_v11, 1  ;;  %v6165_v5 = vperm.slane %v5813_v11, 7 }
 0x85e   : > { %v5465_v19 = vmul.f32 0.5, %v5464_v47 }
 0x860   : > { %v5466_v9 = vsub.f32 1.5, %v5465_v19  ;;  %v4347_v19 = vpop.xlane.xlu0 %4346 }
 0x861   : > { %v7052_v15 = vpop.permute.xlu1 %7051 }
 0x862   : > { %4361 = vadd.xlane.f32.xlu2 %v4360_v60  ;;  %v7257_v62 = vperm.slane %v7052_v15, %v11137_v49  ;;  %v5467_v51 = vmul.f32 %v8275_v53, %v5466_v9  ;;  %v11149_v60 = vadd.f32 %v10959_v39, %v4126_v21 }
 0x864   : > { %v11141_v45 = vld [vmem:[#allocation1] sm:$0xff]  ;;  %v11146_v35 = vsel %vm7258_vm0, %v7257_v62, %v7255_v44  ;;  %4358 = vadd.xlane.f32.xlu1 %v4357_v10  ;;  %v5471_v47 = vsel %vm5470_vm11, %v8275_v53, %v5467_v51  ;;  %v4223_v52 = vmul.f32 %v11149_v60, %v11984_v58 }
 0x865   : > { %6708 = vst [vmem:[#allocation1] ss:$9 sm:$0xff] %v6158_v29  ;;  %v4732_v29 = vmul.f32 %v11119_v48, %v11119_v48  ;;  %v5814_v44 = vmul.f32 %v5471_v47, %v11102_v43  ;;  %v11985_v47 = vld [vmem:[#allocation57_spill] sm:$0xff] }
 0x866   : > { %6709 = vst [vmem:[#allocation1 + $0x1] ss:$9 sm:$0xff] %v6159_v28  ;;  %v4128_v28 = vpop.f32.mrf.mxu1  ;;  %v4372_v48 = vsel %vm4245_vm3, %v4223_v52, 0.0  ;;  %v4983_v58 = vmax.f32 %v11985_v47, 1e-16  ;;  %v11986_v47 = vld [vmem:[#allocation58_spill] sm:$0xff] }
 0x867   : > { %6710 = vst [vmem:[#allocation1 + $0x2] ss:$9 sm:$0xff] %v6160_v42  ;;  %v4872_v34 = vsel %vm4245_vm3, %v4732_v29, 0.0  ;;  %v6166_v42 = vperm.slane %v5814_v44, 0  ;;  %v6167_v21 = vperm.slane %v5814_v44, 1  ;;  %v11158_v11 = vadd.f32 %v10959_v39, %v4128_v28 }
 0x868   : > { %6711 = vst [vmem:[#allocation1 + $0x3] ss:$9 sm:$0xff] %v6161_v41  ;;  %v6168_v15 = vperm.slane %v5814_v44, 2  ;;  %v6169_v41 = vperm.slane %v5814_v44, 3  ;;  %v6170_v43 = vperm.slane %v5814_v44, 4  ;;  %v6171_v62 = vperm.slane %v5814_v44, 5 }
 0x869   : > { %6712 = vst [vmem:[#allocation1 + $0x4] ss:$9 sm:$0xff] %v6162_v33  ;;  %v4737_v33 = vmul.f32 %v11158_v11, %v11158_v11  ;;  %v6172_v9 = vperm.slane %v5814_v44, 6  ;;  %v6173_v10 = vperm.slane %v5814_v44, 7 }
 0x86a   : > { %6713 = vst [vmem:[#allocation1 + $0x5] ss:$9 sm:$0xff] %v6163_v50 }
 0x86b   : > { %6714 = vst [vmem:[#allocation1 + $0x6] ss:$9 sm:$0xff] %v6164_v57  ;;  %v4887_v50 = vsel %vm4245_vm3, %v4737_v33, 0.0  ;;  %v4862_v57 = vpop.xlane.xlu0 %4861 }
 0x86c   : > { %6715 = vst [vmem:[#allocation1 + $0x7] ss:$9 sm:$0xff] %v6165_v5  ;;  %4873 = vadd.xlane.f32.xlu1 %v4872_v34  ;;  %v5048_v51 = vmax.f32 %v4862_v57, 1e-16  ;;  %v4984_v5 = vmax.f32 %v10200_v59, 1e-16 }
 0x86e   : > { %v5112_v28 = vmul.f32 %v5048_v51, %v4984_v5 }
 0x870   : > { %4373 = vadd.xlane.f32.xlu0 %v4372_v48 }
 0x873   : > { %v11161_v53 = vld [vmem:[#allocation1] sm:$0xff] }
 0x874   : > { %6717 = vst [vmem:[#allocation1] ss:$9 sm:$0xff] %v6166_v42 }
 0x875   : > { %6718 = vst [vmem:[#allocation1 + $0x1] ss:$9 sm:$0xff] %v6167_v21 }
 0x876   : > { %6719 = vst [vmem:[#allocation1 + $0x2] ss:$9 sm:$0xff] %v6168_v15 }
 0x877   : > { %6720 = vst [vmem:[#allocation1 + $0x3] ss:$9 sm:$0xff] %v6169_v41 }
 0x878   : > { %6721 = vst [vmem:[#allocation1 + $0x4] ss:$9 sm:$0xff] %v6170_v43  ;;  %4888 = vadd.xlane.f32.xlu0 %v4887_v50 }
 0x879   : > { %6722 = vst [vmem:[#allocation1 + $0x5] ss:$9 sm:$0xff] %v6171_v62 }
 0x87a   : > { %7066 = vperm.xlu2 %8206, %v10908_v2   ;;  %6723 = vst [vmem:[#allocation1 + $0x6] ss:$9 sm:$0xff] %v6172_v9 }
 0x87b   : > { %6724 = vst [vmem:[#allocation1 + $0x7] ss:$9 sm:$0xff] %v6173_v10  ;;  %v7055_v10 = vpop.permute.xlu0 %7054 }
 0x884   : > { %v4859_v29 = vpop.xlane.xlu2 %4858 }
 0x885   : > { %v5047_v52 = vmax.f32 %v4859_v29, 1e-16  ;;  %7069 = vperm.xlu1 %8205, %v10938_v3  }
 0x887   : > { %v5111_v44 = vmul.f32 %v5047_v52, %v4983_v58  ;;  %v4985_v58 = vmax.f32 %v11986_v47, 1e-16  ;;  %v7260_v52 = vperm.slane %v7055_v10, %v10876_v55  ;;  %v4124_v10 = vadd.f32 %v10959_v39, %v11131_v32 }
 0x889   : > { %8276 = vrsqrt.f32 %v5111_v44  ;;  %vm5478_vm12 = vweird.f32 %v5111_v44 }
 0x88a   : > { %8278 = vrsqrt.f32 %v5112_v28 }
 0x88c   : > { %7081 = vperm.xlu0 %8204, %v11026_v17   ;;  %v11171_v15 = vpop.xlane.xlu2 %4352  ;;  %v4350_v59 = vpop.xlane.xlu1 %4349 }
 0x88f   : > { %v8277_v2 = vpop.eup %8276 }
 0x890   : > { %v8279_v34 = vpop.eup %8278  ;;  %v5473_v42 = vmul.f32 %v8277_v2, %v5111_v44  ;;  %vm5479_vm11 = vweird.f32 %v8277_v2  ;;  %v4733_v44 = vmul.f32 %v11050_v26, %v11050_v26 }
 0x891   : > { %v5483_v48 = vmul.f32 %v8279_v34, %v5112_v28  ;;  %vm5480_vm13 = vmor %vm5478_vm12, %vm5479_vm11  ;;  %vm5489_vm11 = vweird.f32 %v8279_v34  ;;  %vm5488_vm12 = vweird.f32 %v5112_v28 }
 0x892   : > { %v5474_v21 = vmul.f32 %v8277_v2, %v5473_v42  ;;  %v11175_v42 = vld [vmem:[#allocation1] sm:$0xff]  ;;  %v4875_v26 = vsel %vm4245_vm3, %v4733_v44, 0.0 }
 0x893   : > { %v5484_v62 = vmul.f32 %v8279_v34, %v5483_v48 }
 0x894   : > { %v5475_v41 = vmul.f32 0.5, %v5474_v21  ;;  %v7058_v57 = vpop.permute.xlu2 %7057  ;;  %v4865_v51 = vpop.xlane.xlu1 %4864 }
 0x895   : > { %v5485_v50 = vmul.f32 0.5, %v5484_v62 }
 0x896   : > { %v5476_v43 = vsub.f32 1.5, %v5475_v41  ;;  %v5049_v41 = vmax.f32 %v4865_v51, 1e-16 }
 0x898   : > { %v5477_v33 = vmul.f32 %v8277_v2, %v5476_v43 }
 0x89a   : > { %v5481_v9 = vsel %vm5480_vm13, %v8277_v2, %v5477_v33  ;;  %v5486_v2 = vsub.f32 1.5, %v5485_v50  ;;  %v11184_v50 = vpop.f32.mrf.mxu1  ;;  %vm5490_vm13 = vmor %vm5488_vm12, %vm5489_vm11 }
 0x89b   : > { %v5815_v3 = vmul.f32 %v5481_v9, %v4347_v19  ;;  %v7261_v19 = vperm.slane %v7058_v57, %v10881_v30  ;;  %v5113_v9 = vmul.f32 %v5049_v41, %v4985_v58  ;;  %v11987_v57 = vld [vmem:[#allocation21_spill] sm:$0xff] }
 0x89c   : > { %v4222_v51 = vmul.f32 %v4124_v10, %v11987_v57 }
 0x89d   : > { %v6174_v5 = vperm.slane %v5815_v3, 0  ;;  %v6175_v17 = vperm.slane %v5815_v3, 1  ;;  %v6176_v29 = vperm.slane %v5815_v3, 2  ;;  %v6177_v21 = vperm.slane %v5815_v3, 3 }
 0x89e   : > { %v6178_v48 = vperm.slane %v5815_v3, 4  ;;  %v6179_v43 = vperm.slane %v5815_v3, 5  ;;  %v6180_v62 = vperm.slane %v5815_v3, 6  ;;  %v7262_v33 = vsel %vm7202_vm5, %v7261_v19, %v7260_v52 }
 0x89f   : > { %6726 = vst [vmem:[#allocation1] ss:$9 sm:$0xff] %v6174_v5  ;;  %v6181_v47 = vperm.slane %v5815_v3, 7  ;;  %v5487_v5 = vmul.f32 %v8279_v34, %v5486_v2  ;;  %8280 = vrsqrt.f32 %v5113_v9  ;;  %vm5498_vm12 = vweird.f32 %v5113_v9 }
 0x8a0   : > { %6727 = vst [vmem:[#allocation1 + $0x1] ss:$9 sm:$0xff] %v6175_v17 }
 0x8a1   : > { %6728 = vst [vmem:[#allocation1 + $0x2] ss:$9 sm:$0xff] %v6176_v29  ;;  %v5491_v17 = vsel %vm5490_vm13, %v8279_v34, %v5487_v5  ;;  %v4369_v29 = vsel %vm4245_vm3, %v4222_v51, 0.0  ;;  %v11195_v5 = vld [vmem:[%s11708_s7] ss:$0 sm:$0xff] }
 0x8a2   : > { %6729 = vst [vmem:[#allocation1 + $0x3] ss:$9 sm:$0xff] %v6177_v21  ;;  %v5816_v39 = vmul.f32 %v5491_v17, %v4350_v59  ;;  %v11988_v59 = vld [vmem:[#allocation20_spill] sm:$0xff] }
 0x8a3   : > { %6730 = vst [vmem:[#allocation1 + $0x4] ss:$9 sm:$0xff] %v6178_v48  ;;  %4876 = vadd.xlane.f32.xlu2 %v4875_v26  ;;  %v4133_v48 = vpop.f32.mrf.mxu1 }
 0x8a4   : > { %6731 = vst [vmem:[#allocation1 + $0x5] ss:$9 sm:$0xff] %v6179_v43  ;;  %v6182_v58 = vperm.slane %v5816_v39, 0  ;;  %v6183_v44 = vperm.slane %v5816_v39, 1  ;;  %v6184_v2 = vperm.slane %v5816_v39, 2  ;;  %v6185_v19 = vperm.slane %v5816_v39, 3 }
 0x8a5   : > { %6732 = vst [vmem:[#allocation1 + $0x6] ss:$9 sm:$0xff] %v6180_v62  ;;  %v8281_v32 = vpop.eup %8280  ;;  %v6186_v41 = vperm.slane %v5816_v39, 4  ;;  %v4221_v43 = vmul.f32 %v11064_v46, %v11988_v59  ;;  %v6187_v62 = vperm.slane %v5816_v39, 5  ;;  %v11198_v57 = vadd.f32 %v11195_v5, %v4133_v48 }
 0x8a6   : > { %6733 = vst [vmem:[#allocation1 + $0x7] ss:$9 sm:$0xff] %v6181_v47  ;;  %v5493_v3 = vmul.f32 %v8281_v32, %v5113_v9  ;;  %vm5499_vm11 = vweird.f32 %v8281_v32  ;;  %v6188_v47 = vperm.slane %v5816_v39, 6  ;;  %v6189_v51 = vperm.slane %v5816_v39, 7 }
 0x8a7   : > { %vm5500_vm13 = vmor %vm5498_vm12, %vm5499_vm11  ;;  %v4366_v9 = vsel %vm4245_vm3, %v4221_v43, 0.0  ;;  %v4735_v48 = vmul.f32 %v4124_v10, %v4124_v10  ;;  %v4356_v43 = vpop.xlane.xlu0 %4355 }
 0x8a8   : > { %v5494_v52 = vmul.f32 %v8281_v32, %v5493_v3 }
 0x8a9   : > { %v4881_v59 = vsel %vm4245_vm3, %v4735_v48, 0.0 }
 0x8aa   : > { %v5495_v28 = vmul.f32 0.5, %v5494_v52  ;;  %v11989_v52 = vld [vmem:[#allocation25_spill] sm:$0xff] }
 0x8ab   : > { %4370 = vadd.xlane.f32.xlu2 %v4369_v29  ;;  %v4136_v39 = vpop.f32.mrf.mxu1 }
 0x8ac   : > { %v5496_v34 = vsub.f32 1.5, %v5495_v28  ;;  %v7061_v17 = vpop.permute.xlu1 %7060 }
 0x8ad   : > { %v11188_v21 = vld [vmem:[#allocation1] sm:$0xff]  ;;  %v7263_v3 = vperm.slane %v7061_v17, %v10894_v25 }
 0x8ae   : > { %6735 = vst [vmem:[#allocation1] ss:$9 sm:$0xff] %v6182_v58  ;;  %v5497_v26 = vmul.f32 %v8281_v32, %v5496_v34 }
 0x8af   : > { %6736 = vst [vmem:[#allocation1 + $0x1] ss:$9 sm:$0xff] %v6183_v44  ;;  %v11204_v58 = vsel %vm7206_vm6, %v7263_v3, %v7262_v33  ;;  %4367 = vadd.xlane.f32.xlu1 %v4366_v9  ;;  %v4226_v44 = vmul.f32 %v11198_v57, %v11989_v52  ;;  %v4871_v17 = vpop.xlane.xlu0 %4870  ;;  %v4987_v3 = vmax.f32 %v10215_v7, 1e-16  ;;  %v11990_v52 = vld [vmem:[#allocation59_spill] sm:$0xff] }
 0x8b0   : > { %6737 = vst [vmem:[#allocation1 + $0x2] ss:$9 sm:$0xff] %v6184_v2  ;;  %v5501_v46 = vsel %vm5500_vm13, %v8281_v32, %v5497_v26  ;;  %v11209_v32 = vadd.f32 %v11195_v5, %v4136_v39 }
 0x8b1   : > { %6738 = vst [vmem:[#allocation1 + $0x3] ss:$9 sm:$0xff] %v6185_v19  ;;  %v5817_v29 = vmul.f32 %v5501_v46, %v11171_v15  ;;  %v5051_v46 = vmax.f32 %v4871_v17, 1e-16 }
 0x8b2   : > { %6739 = vst [vmem:[#allocation1 + $0x4] ss:$9 sm:$0xff] %v6186_v41  ;;  %v4381_v41 = vsel %vm4245_vm3, %v4226_v44, 0.0  ;;  %v4740_v10 = vmul.f32 %v11209_v32, %v11209_v32  ;;  %v4986_v44 = vmax.f32 %v11990_v52, 1e-16 }
 0x8b3   : > { %6740 = vst [vmem:[#allocation1 + $0x5] ss:$9 sm:$0xff] %v6187_v62  ;;  %v6190_v2 = vperm.slane %v5817_v29, 0  ;;  %v6191_v28 = vperm.slane %v5817_v29, 1  ;;  %v6192_v19 = vperm.slane %v5817_v29, 2  ;;  %v6193_v34 = vperm.slane %v5817_v29, 3 }
 0x8b4   : > { %6741 = vst [vmem:[#allocation1 + $0x6] ss:$9 sm:$0xff] %v6188_v47  ;;  %v6194_v33 = vperm.slane %v5817_v29, 4  ;;  %v6195_v62 = vperm.slane %v5817_v29, 5  ;;  %v6196_v47 = vperm.slane %v5817_v29, 6  ;;  %v6197_v26 = vperm.slane %v5817_v29, 7 }
 0x8b5   : > { %6742 = vst [vmem:[#allocation1 + $0x7] ss:$9 sm:$0xff] %v6189_v51  ;;  %v4896_v51 = vsel %vm4245_vm3, %v4740_v10, 0.0  ;;  %v5115_v48 = vmul.f32 %v5051_v46, %v4987_v3 }
 0x8b6   : > { %4382 = vadd.xlane.f32.xlu0 %v4381_v41 }
 0x8b7   : > { %4882 = vadd.xlane.f32.xlu1 %v4881_v59 }
 0x8bc   : > { %v11212_v15 = vld [vmem:[#allocation1] sm:$0xff] }
 0x8bd   : > { %6744 = vst [vmem:[#allocation1] ss:$9 sm:$0xff] %v6190_v2 }
 0x8be   : > { %6745 = vst [vmem:[#allocation1 + $0x1] ss:$9 sm:$0xff] %v6191_v28  ;;  %4897 = vadd.xlane.f32.xlu0 %v4896_v51 }
 0x8bf   : > { %6746 = vst [vmem:[#allocation1 + $0x2] ss:$9 sm:$0xff] %v6192_v19 }
 0x8c0   : > { %6747 = vst [vmem:[#allocation1 + $0x3] ss:$9 sm:$0xff] %v6193_v34 }
 0x8c1   : > { %6748 = vst [vmem:[#allocation1 + $0x4] ss:$9 sm:$0xff] %v6194_v33 }
 0x8c2   : > { %6749 = vst [vmem:[#allocation1 + $0x5] ss:$9 sm:$0xff] %v6195_v62  ;;  %v7064_v62 = vpop.permute.xlu0 %7063 }
 0x8c3   : > { %6750 = vst [vmem:[#allocation1 + $0x6] ss:$9 sm:$0xff] %v6196_v47  ;;  %7075 = vperm.xlu2 %8206, %v10995_v0  }
 0x8c4   : > { %6751 = vst [vmem:[#allocation1 + $0x7] ss:$9 sm:$0xff] %v6197_v26 }
 0x8cd   : > { %v4868_v9 = vpop.xlane.xlu2 %4867 }
 0x8ce   : > { %v5050_v39 = vmax.f32 %v4868_v9, 1e-16 }
 0x8d0   : > { %v5114_v29 = vmul.f32 %v5050_v39, %v4986_v44  ;;  %7078 = vperm.xlu1 %8205, %v11006_v37   ;;  %v7265_v37 = vperm.slane %v7064_v62, %v10890_v24  ;;  %v11991_v39 = vld [vmem:[#allocation60_spill] sm:$0xff] }
 0x8d2   : > { %8282 = vrsqrt.f32 %v5114_v29  ;;  %7090 = vperm.xlu0 %8204, %v11095_v23   ;;  %vm5508_vm12 = vweird.f32 %v5114_v29  ;;  %v7266_v46 = vsel %vm7210_vm7, %v7265_v37, %v11204_v58  ;;  %v11234_v58 = vpop.f32.mrf.mxu1 }
 0x8d3   : > { %8284 = vrsqrt.f32 %v5115_v48 }
 0x8d5   : > { %v11223_v41 = vpop.xlane.xlu2 %4361 }
 0x8d7   : > { %v4359_v33 = vpop.xlane.xlu1 %4358 }
 0x8d8   : > { %v8283_v2 = vpop.eup %8282 }
 0x8d9   : > { %v8285_v0 = vpop.eup %8284  ;;  %v5503_v28 = vmul.f32 %v8283_v2, %v5114_v29  ;;  %vm5509_vm11 = vweird.f32 %v8283_v2  ;;  %v11231_v29 = vld [vmem:[#allocation1] sm:$0xff] }
 0x8da   : > { %v5513_v34 = vmul.f32 %v8285_v0, %v5115_v48  ;;  %vm5510_vm13 = vmor %vm5508_vm12, %vm5509_vm11  ;;  %vm5519_vm11 = vweird.f32 %v8285_v0  ;;  %vm5518_vm12 = vweird.f32 %v5115_v48 }
 0x8db   : > { %v5504_v19 = vmul.f32 %v8283_v2, %v5503_v28  ;;  %v4988_v28 = vmax.f32 %v11991_v39, 1e-16  ;;  %v4141_v39 = vpop.f32.mrf.mxu1 }
 0x8dc   : > { %v5514_v10 = vmul.f32 %v8285_v0, %v5513_v34 }
 0x8dd   : > { %v5505_v7 = vmul.f32 0.5, %v5504_v19  ;;  %v7067_v17 = vpop.permute.xlu2 %7066  ;;  %v4736_v19 = vmul.f32 %v11149_v60, %v11149_v60  ;;  %v4132_v60 = vadd.f32 %v11195_v5, %v11184_v50 }
 0x8de   : > { %v5515_v23 = vmul.f32 0.5, %v5514_v10 }
 0x8df   : > { %v5506_v59 = vsub.f32 1.5, %v5505_v7  ;;  %v4874_v44 = vpop.xlane.xlu1 %4873 }
 0x8e1   : > { %v5507_v47 = vmul.f32 %v8283_v2, %v5506_v59  ;;  %v5052_v59 = vmax.f32 %v4874_v44, 1e-16 }
 0x8e3   : > { %v5511_v26 = vsel %vm5510_vm13, %v8283_v2, %v5507_v47  ;;  %v7267_v2 = vperm.slane %v7067_v17, %v10906_v1  ;;  %v5116_v37 = vmul.f32 %v5052_v59, %v4988_v28  ;;  %vm5520_vm13 = vmor %vm5518_vm12, %vm5519_vm11  ;;  %v11247_v59 = vadd.f32 %v11195_v5, %v4141_v39 }
 0x8e4   : > { %v5818_v51 = vmul.f32 %v5511_v26, %v4356_v43  ;;  %v5516_v43 = vsub.f32 1.5, %v5515_v23  ;;  %v4884_v23 = vsel %vm4245_vm3, %v4736_v19, 0.0 }
 0x8e5   : > { %v11237_v47 = vsel %vm7214_vm8, %v7267_v2, %v7266_v46  ;;  %8286 = vrsqrt.f32 %v5116_v37  ;;  %vm5528_vm12 = vweird.f32 %v5116_v37 }
 0x8e6   : > { %v6198_v3 = vperm.slane %v5818_v51, 0  ;;  %v6199_v9 = vperm.slane %v5818_v51, 1  ;;  %v6200_v52 = vperm.slane %v5818_v51, 2  ;;  %v6201_v34 = vperm.slane %v5818_v51, 3 }
 0x8e7   : > { %v6202_v7 = vperm.slane %v5818_v51, 4  ;;  %v6203_v62 = vperm.slane %v5818_v51, 5  ;;  %v6204_v10 = vperm.slane %v5818_v51, 6  ;;  %v6205_v26 = vperm.slane %v5818_v51, 7 }
 0x8e8   : > { %6753 = vst [vmem:[#allocation1] ss:$9 sm:$0xff] %v6198_v3  ;;  %v5517_v17 = vmul.f32 %v8285_v0, %v5516_v43  ;;  %v11992_v3 = vld [vmem:[#allocation24_spill] sm:$0xff] }
 0x8e9   : > { %6754 = vst [vmem:[#allocation1 + $0x1] ss:$9 sm:$0xff] %v6199_v9  ;;  %v4225_v9 = vmul.f32 %v4132_v60, %v11992_v3 }
 0x8ea   : > { %6755 = vst [vmem:[#allocation1 + $0x2] ss:$9 sm:$0xff] %v6200_v52  ;;  %v5521_v46 = vsel %vm5520_vm13, %v8285_v0, %v5517_v17 }
 0x8eb   : > { %6756 = vst [vmem:[#allocation1 + $0x3] ss:$9 sm:$0xff] %v6201_v34  ;;  %v5819_v52 = vmul.f32 %v5521_v46, %v4359_v33  ;;  %v8287_v44 = vpop.eup %8286  ;;  %v4378_v51 = vsel %vm4245_vm3, %v4225_v9, 0.0  ;;  %v11994_v9 = vld [vmem:[#allocation28_spill] sm:$0xff] }
 0x8ec   : > { %6757 = vst [vmem:[#allocation1 + $0x4] ss:$9 sm:$0xff] %v6202_v7  ;;  %4885 = vadd.xlane.f32.xlu2 %v4884_v23  ;;  %v5523_v50 = vmul.f32 %v8287_v44, %v5116_v37  ;;  %vm5529_vm11 = vweird.f32 %v8287_v44  ;;  %v11993_v23 = vld [vmem:[#allocation23_spill] sm:$0xff]  ;;  %v4229_v46 = vmul.f32 %v11247_v59, %v11994_v9 }
 0x8ed   : > { %6758 = vst [vmem:[#allocation1 + $0x5] ss:$9 sm:$0xff] %v6203_v62  ;;  %v6206_v28 = vperm.slane %v5819_v52, 0  ;;  %v6207_v7 = vperm.slane %v5819_v52, 1  ;;  %v6208_v43 = vperm.slane %v5819_v52, 2  ;;  %v6209_v2 = vperm.slane %v5819_v52, 3  ;;  %vm5530_vm13 = vmor %vm5528_vm12, %vm5529_vm11 }
 0x8ee   : > { %6759 = vst [vmem:[#allocation1 + $0x6] ss:$9 sm:$0xff] %v6204_v10  ;;  %v5524_v19 = vmul.f32 %v8287_v44, %v5523_v50  ;;  %v6210_v0 = vperm.slane %v5819_v52, 4  ;;  %v6211_v62 = vperm.slane %v5819_v52, 5  ;;  %v6212_v10 = vperm.slane %v5819_v52, 6 }
 0x8ef   : > { %6760 = vst [vmem:[#allocation1 + $0x7] ss:$9 sm:$0xff] %v6205_v26  ;;  %v4224_v17 = vmul.f32 %v11158_v11, %v11993_v23  ;;  %v6213_v3 = vperm.slane %v5819_v52, 7  ;;  %v4390_v11 = vsel %vm4245_vm3, %v4229_v46, 0.0  ;;  %v4990_v46 = vmax.f32 %v10229_v27, 1e-16 }
 0x8f0   : > { %v5525_v48 = vmul.f32 0.5, %v5524_v19 }
 0x8f1   : > { %v4375_v37 = vsel %vm4245_vm3, %v4224_v17, 0.0 }
 0x8f2   : > { %v5526_v33 = vsub.f32 1.5, %v5525_v48  ;;  %v4738_v48 = vmul.f32 %v4132_v60, %v4132_v60 }
 0x8f4   : > { %4379 = vadd.xlane.f32.xlu2 %v4378_v51  ;;  %v5527_v26 = vmul.f32 %v8287_v44, %v5526_v33  ;;  %v4143_v51 = vpop.f32.mrf.mxu1  ;;  %v4890_v17 = vsel %vm4245_vm3, %v4738_v48, 0.0 }
 0x8f6   : > { %v11244_v34 = vld [vmem:[#allocation1] sm:$0xff]  ;;  %v5531_v50 = vsel %vm5530_vm13, %v8287_v44, %v5527_v26 }
 0x8f7   : > { %6762 = vst [vmem:[#allocation1] ss:$9 sm:$0xff] %v6206_v28  ;;  %v5820_v39 = vmul.f32 %v5531_v50, %v11223_v41  ;;  %v7070_v28 = vpop.permute.xlu1 %7069 }
 0x8f8   : > { %6763 = vst [vmem:[#allocation1 + $0x1] ss:$9 sm:$0xff] %v6207_v7  ;;  %v7269_v19 = vperm.slane %v7070_v28, %v10936_v6  ;;  %v11257_v7 = vadd.f32 %v11195_v5, %v4143_v51  ;;  %v11995_v51 = vld [vmem:[#allocation66_spill] sm:$0xff] }
 0x8f9   : > { %6764 = vst [vmem:[#allocation1 + $0x2] ss:$9 sm:$0xff] %v6208_v43  ;;  %v6214_v52 = vperm.slane %v5820_v39, 0  ;;  %v6215_v43 = vperm.slane %v5820_v39, 1  ;;  %v6217_v33 = vperm.slane %v5820_v39, 3  ;;  %v6219_v26 = vperm.slane %v5820_v39, 5 }
 0x8fa   : > { %6765 = vst [vmem:[#allocation1 + $0x3] ss:$9 sm:$0xff] %v6209_v2  ;;  %4376 = vadd.xlane.f32.xlu1 %v4375_v37  ;;  %v7270_v44 = vsel %vm7218_vm2, %v7269_v19, %v11237_v47  ;;  %v6216_v2 = vperm.slane %v5820_v39, 2  ;;  %v4743_v41 = vmul.f32 %v11257_v7, %v11257_v7  ;;  %v6220_v23 = vperm.slane %v5820_v39, 6 }
 0x8fb   : > { %6766 = vst [vmem:[#allocation1 + $0x4] ss:$9 sm:$0xff] %v6210_v0  ;;  %v4989_v28 = vmax.f32 %v11995_v51, 1e-16  ;;  %v4739_v51 = vmul.f32 %v11198_v57, %v11198_v57 }
 0x8fc   : > { %6767 = vst [vmem:[#allocation1 + $0x5] ss:$9 sm:$0xff] %v6211_v62  ;;  %4391 = vadd.xlane.f32.xlu0 %v4390_v11  ;;  %v6218_v62 = vperm.slane %v5820_v39, 4  ;;  %v4905_v47 = vsel %vm4245_vm3, %v4743_v41, 0.0 }
 0x8fd   : > { %6768 = vst [vmem:[#allocation1 + $0x6] ss:$9 sm:$0xff] %v6212_v10  ;;  %v4365_v10 = vpop.xlane.xlu0 %4364 }
 0x8fe   : > { %6769 = vst [vmem:[#allocation1 + $0x7] ss:$9 sm:$0xff] %v6213_v3  ;;  %v6221_v3 = vperm.slane %v5820_v39, 7 }
 0x902   : > { %4891 = vadd.xlane.f32.xlu1 %v4890_v17 }
 0x904   : > { %4906 = vadd.xlane.f32.xlu0 %v4905_v47 }
 0x905   : > { %v11264_v0 = vld [vmem:[#allocation1] sm:$0xff]  ;;  %v4880_v60 = vpop.xlane.xlu0 %4879 }
 0x906   : > { %6771 = vst [vmem:[#allocation1] ss:$9 sm:$0xff] %v6214_v52  ;;  %v5054_v9 = vmax.f32 %v4880_v60, 1e-16 }
 0x907   : > { %6772 = vst [vmem:[#allocation1 + $0x1] ss:$9 sm:$0xff] %v6215_v43 }
 0x908   : > { %6773 = vst [vmem:[#allocation1 + $0x2] ss:$9 sm:$0xff] %v6216_v2  ;;  %v5118_v39 = vmul.f32 %v5054_v9, %v4990_v46 }
 0x909   : > { %6774 = vst [vmem:[#allocation1 + $0x3] ss:$9 sm:$0xff] %v6217_v33 }
 0x90a   : > { %6775 = vst [vmem:[#allocation1 + $0x4] ss:$9 sm:$0xff] %v6218_v62 }
 0x90b   : > { %6776 = vst [vmem:[#allocation1 + $0x5] ss:$9 sm:$0xff] %v6219_v26 }
 0x90c   : > { %6777 = vst [vmem:[#allocation1 + $0x6] ss:$9 sm:$0xff] %v6220_v23  ;;  %7084 = vperm.xlu2 %8206, %v11053_v12  }
 0x90d   : > { %6778 = vst [vmem:[#allocation1 + $0x7] ss:$9 sm:$0xff] %v6221_v3  ;;  %v7073_v33 = vpop.permute.xlu0 %7072 }
 0x916   : > { %v4877_v50 = vpop.xlane.xlu2 %4876 }
 0x917   : > { %v5053_v19 = vmax.f32 %v4877_v50, 1e-16 }
 0x918   : > { %7099 = vperm.xlu0 %8204, %v11161_v53   ;;  %v7271_v53 = vperm.slane %v7073_v33, %v10947_v4 }
 0x919   : > { %v5117_v37 = vmul.f32 %v5053_v19, %v4989_v28  ;;  %v11279_v28 = vpop.f32.mrf.mxu1  ;;  %v11281_v19 = vld [vmem:[#allocation1] sm:$0xff] }
 0x91b   : > { %8288 = vrsqrt.f32 %v5117_v37  ;;  %7087 = vperm.xlu1 %8205, %v11079_v36   ;;  %vm5538_vm12 = vweird.f32 %v5117_v37  ;;  %v7272_v36 = vsel %vm7222_vm15, %v7271_v53, %v7270_v44 }
 0x91c   : > { %8290 = vrsqrt.f32 %v5118_v39 }
 0x91e   : > { %v11273_v48 = vpop.xlane.xlu2 %4370 }
 0x921   : > { %v8289_v11 = vpop.eup %8288 }
 0x922   : > { %v8291_v52 = vpop.eup %8290  ;;  %v5533_v43 = vmul.f32 %v8289_v11, %v5117_v37  ;;  %vm5539_vm11 = vweird.f32 %v8289_v11  ;;  %v4368_v62 = vpop.xlane.xlu1 %4367 }
 0x923   : > { %v5543_v2 = vmul.f32 %v8291_v52, %v5118_v39  ;;  %vm5540_vm13 = vmor %vm5538_vm12, %vm5539_vm11  ;;  %vm5549_vm11 = vweird.f32 %v8291_v52  ;;  %vm5548_vm12 = vweird.f32 %v5118_v39 }
 0x924   : > { %v5534_v12 = vmul.f32 %v8289_v11, %v5533_v43  ;;  %v11996_v43 = vld [vmem:[#allocation61_spill] sm:$0xff] }
 0x925   : > { %v5544_v26 = vmul.f32 %v8291_v52, %v5543_v2 }
 0x926   : > { %v5535_v27 = vmul.f32 0.5, %v5534_v12  ;;  %v7076_v60 = vpop.permute.xlu2 %7075  ;;  %v4991_v12 = vmax.f32 %v11996_v43, 1e-16 }
 0x927   : > { %v5545_v47 = vmul.f32 0.5, %v5544_v26  ;;  %v11290_v26 = vadd.f32 %v11195_v5, %v11234_v58 }
 0x928   : > { %v5536_v41 = vsub.f32 1.5, %v5535_v27 }
 0x92a   : > { %v5537_v23 = vmul.f32 %v8289_v11, %v5536_v41  ;;  %v4883_v27 = vpop.xlane.xlu1 %4882 }
 0x92b   : > { %v5055_v41 = vmax.f32 %v4883_v27, 1e-16 }
 0x92c   : > { %v5541_v17 = vsel %vm5540_vm13, %v8289_v11, %v5537_v23  ;;  %v7273_v11 = vperm.slane %v7076_v60, %v10969_v22  ;;  %v11997_v60 = vld [vmem:[#allocation27_spill] sm:$0xff]  ;;  %vm5550_vm13 = vmor %vm5548_vm12, %vm5549_vm11 }
 0x92d   : > { %v5821_v3 = vmul.f32 %v5541_v17, %v4365_v10  ;;  %v5546_v10 = vsub.f32 1.5, %v5545_v47  ;;  %v5119_v53 = vmul.f32 %v5055_v41, %v4991_v12  ;;  %v4893_v17 = vsel %vm4245_vm3, %v4739_v51, 0.0 }
 0x92e   : > { %v11286_v57 = vsel %vm7226_vm1, %v7273_v11, %v7272_v36  ;;  %v4228_v36 = vmul.f32 %v11290_v26, %v11997_v60 }
 0x92f   : > { %v6222_v9 = vperm.slane %v5821_v3, 0  ;;  %v6223_v46 = vperm.slane %v5821_v3, 1  ;;  %v6224_v50 = vperm.slane %v5821_v3, 2  ;;  %v6225_v37 = vperm.slane %v5821_v3, 3 }
 0x930   : > { %v6226_v2 = vperm.slane %v5821_v3, 4  ;;  %v6227_v44 = vperm.slane %v5821_v3, 5  ;;  %v6228_v33 = vperm.slane %v5821_v3, 6  ;;  %v6229_v23 = vperm.slane %v5821_v3, 7 }
 0x931   : > { %6780 = vst [vmem:[#allocation1] ss:$9 sm:$0xff] %v6222_v9  ;;  %v5547_v47 = vmul.f32 %v8291_v52, %v5546_v10  ;;  %8292 = vrsqrt.f32 %v5119_v53  ;;  %v4148_v9 = vpop.f32.mrf.mxu1  ;;  %vm5558_vm12 = vweird.f32 %v5119_v53 }
 0x932   : > { %6781 = vst [vmem:[#allocation1 + $0x1] ss:$9 sm:$0xff] %v6223_v46  ;;  %v11297_v43 = vadd.f32 %v11195_v5, %v4148_v9 }
 0x933   : > { %6782 = vst [vmem:[#allocation1 + $0x2] ss:$9 sm:$0xff] %v6224_v50  ;;  %v5551_v58 = vsel %vm5550_vm13, %v8291_v52, %v5547_v47  ;;  %v4387_v50 = vsel %vm4245_vm3, %v4228_v36, 0.0  ;;  %v11999_v36 = vld [vmem:[#allocation26_spill] sm:$0xff] }
 0x934   : > { %6783 = vst [vmem:[#allocation1 + $0x3] ss:$9 sm:$0xff] %v6225_v37  ;;  %v5822_v3 = vmul.f32 %v5551_v58, %v4368_v62  ;;  %v11998_v62 = vld [vmem:[#allocation31_spill] sm:$0xff]  ;;  %v4227_v58 = vmul.f32 %v11209_v32, %v11999_v36 }
 0x935   : > { %6784 = vst [vmem:[#allocation1 + $0x4] ss:$9 sm:$0xff] %v6226_v2  ;;  %4894 = vadd.xlane.f32.xlu2 %v4893_v17 }
 0x936   : > { %6785 = vst [vmem:[#allocation1 + $0x5] ss:$9 sm:$0xff] %v6227_v44  ;;  %v6230_v37 = vperm.slane %v5822_v3, 0  ;;  %v6231_v39 = vperm.slane %v5822_v3, 1  ;;  %v6232_v10 = vperm.slane %v5822_v3, 2  ;;  %v6233_v11 = vperm.slane %v5822_v3, 3 }
 0x937   : > { %6786 = vst [vmem:[#allocation1 + $0x6] ss:$9 sm:$0xff] %v6228_v33  ;;  %v8293_v46 = vpop.eup %8292  ;;  %v6234_v27 = vperm.slane %v5822_v3, 4  ;;  %v4232_v44 = vmul.f32 %v11297_v43, %v11998_v62  ;;  %v6235_v41 = vperm.slane %v5822_v3, 5  ;;  %v6236_v17 = vperm.slane %v5822_v3, 6 }
 0x938   : > { %6787 = vst [vmem:[#allocation1 + $0x7] ss:$9 sm:$0xff] %v6229_v23  ;;  %v5553_v51 = vmul.f32 %v8293_v46, %v5119_v53  ;;  %vm5559_vm11 = vweird.f32 %v8293_v46  ;;  %v6237_v47 = vperm.slane %v5822_v3, 7 }
 0x939   : > { %v4151_v23 = vpop.f32.mrf.mxu1  ;;  %vm5560_vm13 = vmor %vm5558_vm12, %vm5559_vm11 }
 0x93a   : > { %v5554_v2 = vmul.f32 %v8293_v46, %v5553_v51  ;;  %v11306_v9 = vadd.f32 %v11195_v5, %v4151_v23  ;;  %v4399_v51 = vsel %vm4245_vm3, %v4232_v44, 0.0 }
 0x93c   : > { %v5555_v52 = vmul.f32 0.5, %v5554_v2  ;;  %v4746_v3 = vmul.f32 %v11306_v9, %v11306_v9  ;;  %v4384_v2 = vsel %vm4245_vm3, %v4227_v58, 0.0  ;;  %v12000_v58 = vld [vmem:[#allocation62_spill] sm:$0xff] }
 0x93d   : > { %4388 = vadd.xlane.f32.xlu2 %v4387_v50 }
 0x93e   : > { %v5556_v33 = vsub.f32 1.5, %v5555_v52  ;;  %v4914_v44 = vsel %vm4245_vm3, %v4746_v3, 0.0 }
 0x93f   : > { %v11299_v12 = vld [vmem:[#allocation1] sm:$0xff] }
 0x940   : > { %6789 = vst [vmem:[#allocation1] ss:$9 sm:$0xff] %v6230_v37  ;;  %v5557_v60 = vmul.f32 %v8293_v46, %v5556_v33 }
 0x941   : > { %6790 = vst [vmem:[#allocation1 + $0x1] ss:$9 sm:$0xff] %v6231_v39 }
 0x942   : > { %6791 = vst [vmem:[#allocation1 + $0x2] ss:$9 sm:$0xff] %v6232_v10  ;;  %v5561_v50 = vsel %vm5560_vm13, %v8293_v46, %v5557_v60  ;;  %4400 = vadd.xlane.f32.xlu0 %v4399_v51  ;;  %v7079_v39 = vpop.permute.xlu1 %7078  ;;  %v4993_v60 = vmax.f32 %v10247_v16, 1e-16 }
 0x943   : > { %6792 = vst [vmem:[#allocation1 + $0x3] ss:$9 sm:$0xff] %v6233_v11  ;;  %v5823_v37 = vmul.f32 %v5561_v50, %v11273_v48  ;;  %v7275_v32 = vperm.slane %v7079_v39, %v11001_v54  ;;  %v4741_v48 = vmul.f32 %v11290_v26, %v11290_v26  ;;  %v4992_v50 = vmax.f32 %v12000_v58, 1e-16 }
 0x944   : > { %6793 = vst [vmem:[#allocation1 + $0x4] ss:$9 sm:$0xff] %v6234_v27 }
 0x945   : > { %6794 = vst [vmem:[#allocation1 + $0x5] ss:$9 sm:$0xff] %v6235_v41  ;;  %v6238_v53 = vperm.slane %v5823_v37, 0  ;;  %v6239_v10 = vperm.slane %v5823_v37, 1  ;;  %4385 = vadd.xlane.f32.xlu1 %v4384_v2  ;;  %v6240_v11 = vperm.slane %v5823_v37, 2  ;;  %v6241_v46 = vperm.slane %v5823_v37, 3  ;;  %v4374_v41 = vpop.xlane.xlu0 %4373 }
 0x946   : > { %6795 = vst [vmem:[#allocation1 + $0x6] ss:$9 sm:$0xff] %v6236_v17  ;;  %v7276_v27 = vsel %vm7230_vm14, %v7275_v32, %v11286_v57  ;;  %v6242_v62 = vperm.slane %v5823_v37, 4  ;;  %v6243_v33 = vperm.slane %v5823_v37, 5  ;;  %v6244_v23 = vperm.slane %v5823_v37, 6 }
 0x947   : > { %6796 = vst [vmem:[#allocation1 + $0x7] ss:$9 sm:$0xff] %v6237_v47  ;;  %v6245_v17 = vperm.slane %v5823_v37, 7  ;;  %v4899_v47 = vsel %vm4245_vm3, %v4741_v48, 0.0 }
 0x94a   : > { %4915 = vadd.xlane.f32.xlu0 %v4914_v44 }
 0x94d   : > { %4900 = vadd.xlane.f32.xlu1 %v4899_v47  ;;  %v4889_v57 = vpop.xlane.xlu0 %4888 }
 0x94e   : > { %v11314_v52 = vld [vmem:[#allocation1] sm:$0xff]  ;;  %v5057_v26 = vmax.f32 %v4889_v57, 1e-16  ;;  %v11335_v57 = vpop.f32.mrf.mxu1 }
 0x94f   : > { %6798 = vst [vmem:[#allocation1] ss:$9 sm:$0xff] %v6238_v53 }
 0x950   : > { %6799 = vst [vmem:[#allocation1 + $0x1] ss:$9 sm:$0xff] %v6239_v10  ;;  %v5121_v39 = vmul.f32 %v5057_v26, %v4993_v60 }
 0x951   : > { %6800 = vst [vmem:[#allocation1 + $0x2] ss:$9 sm:$0xff] %v6240_v11 }
 0x952   : > { %6801 = vst [vmem:[#allocation1 + $0x3] ss:$9 sm:$0xff] %v6241_v46 }
 0x953   : > { %6802 = vst [vmem:[#allocation1 + $0x4] ss:$9 sm:$0xff] %v6242_v62 }
 0x954   : > { %6803 = vst [vmem:[#allocation1 + $0x5] ss:$9 sm:$0xff] %v6243_v33 }
 0x955   : > { %6804 = vst [vmem:[#allocation1 + $0x6] ss:$9 sm:$0xff] %v6244_v23  ;;  %7093 = vperm.xlu2 %8206, %v11121_v20   ;;  %v7082_v3 = vpop.permute.xlu0 %7081 }
 0x956   : > { %6805 = vst [vmem:[#allocation1 + $0x7] ss:$9 sm:$0xff] %v6245_v17  ;;  %v7277_v53 = vperm.slane %v7082_v3, %v11004_v61 }
 0x958   : > { %v7278_v20 = vsel %vm7234_vm4, %v7277_v53, %v7276_v27 }
 0x95e   : > { %7108 = vperm.xlu0 %8204, %v11212_v15  }
 0x95f   : > { %v4886_v36 = vpop.xlane.xlu2 %4885 }
 0x960   : > { %v5056_v51 = vmax.f32 %v4886_v36, 1e-16 }
 0x962   : > { %v5120_v37 = vmul.f32 %v5056_v51, %v4992_v50  ;;  %v4742_v50 = vmul.f32 %v11247_v59, %v11247_v59  ;;  %v11339_v51 = vld [vmem:[#allocation1] sm:$0xff] }
 0x964   : > { %8294 = vrsqrt.f32 %v5120_v37  ;;  %vm5568_vm12 = vweird.f32 %v5120_v37 }
 0x965   : > { %8296 = vrsqrt.f32 %v5121_v39 }
 0x966   : > { %7096 = vperm.xlu1 %8205, %v11141_v45  }
 0x967   : > { %v11327_v2 = vpop.xlane.xlu2 %4379 }
 0x96a   : > { %v8295_v10 = vpop.eup %8294 }
 0x96b   : > { %v8297_v32 = vpop.eup %8296  ;;  %v5563_v16 = vmul.f32 %v8295_v10, %v5120_v37  ;;  %vm5569_vm11 = vweird.f32 %v8295_v10 }
 0x96c   : > { %v5573_v46 = vmul.f32 %v8297_v32, %v5121_v39  ;;  %vm5570_vm13 = vmor %vm5568_vm12, %vm5569_vm11  ;;  %vm5579_vm11 = vweird.f32 %v8297_v32  ;;  %vm5578_vm12 = vweird.f32 %v5121_v39 }
 0x96d   : > { %v5564_v11 = vmul.f32 %v8295_v10, %v5563_v16  ;;  %v4377_v27 = vpop.xlane.xlu1 %4376 }
 0x96e   : > { %v5574_v33 = vmul.f32 %v8297_v32, %v5573_v46 }
 0x96f   : > { %v5565_v48 = vmul.f32 0.5, %v5564_v11  ;;  %v7085_v44 = vpop.permute.xlu2 %7084  ;;  %v11344_v11 = vadd.f32 %v11195_v5, %v11279_v28 }
 0x970   : > { %v7279_v15 = vperm.slane %v7085_v44, %v11037_v56  ;;  %v5575_v45 = vmul.f32 0.5, %v5574_v33 }
 0x971   : > { %v5566_v62 = vsub.f32 1.5, %v5565_v48  ;;  %v4902_v48 = vsel %vm4245_vm3, %v4742_v50, 0.0  ;;  %v12002_v50 = vld [vmem:[#allocation34_spill] sm:$0xff] }
 0x972   : > { %v11333_v17 = vsel %vm7238_vm10, %v7279_v15, %v7278_v20  ;;  %v5576_v53 = vsub.f32 1.5, %v5575_v45  ;;  %v4156_v15 = vpop.f32.mrf.mxu1 }
 0x973   : > { %v5567_v23 = vmul.f32 %v8295_v10, %v5566_v62 }
 0x974   : > { %v5577_v62 = vmul.f32 %v8297_v32, %v5576_v53 }
 0x975   : > { %v5571_v47 = vsel %vm5570_vm13, %v8295_v10, %v5567_v23  ;;  %v4994_v10 = vmax.f32 %v10190_v14, 1e-16  ;;  %v12001_v14 = vld [vmem:[#allocation30_spill] sm:$0xff]  ;;  %vm5580_vm13 = vmor %vm5578_vm12, %vm5579_vm11 }
 0x976   : > { %v5824_v26 = vmul.f32 %v5571_v47, %v4374_v41  ;;  %v4892_v41 = vpop.xlane.xlu1 %4891  ;;  %v4231_v33 = vmul.f32 %v11344_v11, %v12001_v14  ;;  %v5581_v28 = vsel %vm5580_vm13, %v8297_v32, %v5577_v62  ;;  %v11350_v47 = vadd.f32 %v11195_v5, %v4156_v15 }
 0x977   : > { %v5058_v59 = vmax.f32 %v4892_v41, 1e-16  ;;  %v5825_v23 = vmul.f32 %v5581_v28, %v4377_v27 }
 0x978   : > { %v6246_v60 = vperm.slane %v5824_v26, 0  ;;  %v6247_v36 = vperm.slane %v5824_v26, 1  ;;  %v6248_v58 = vperm.slane %v5824_v26, 2  ;;  %v6249_v3 = vperm.slane %v5824_v26, 3 }
 0x979   : > { %v6250_v37 = vperm.slane %v5824_v26, 4  ;;  %v6251_v20 = vperm.slane %v5824_v26, 5  ;;  %v6252_v16 = vperm.slane %v5824_v26, 6  ;;  %v6253_v46 = vperm.slane %v5824_v26, 7 }
 0x97a   : > { %6807 = vst [vmem:[#allocation1] ss:$9 sm:$0xff] %v6246_v60  ;;  %v5122_v44 = vmul.f32 %v5058_v59, %v4994_v10  ;;  %v4396_v26 = vsel %vm4245_vm3, %v4231_v33, 0.0  ;;  %v6254_v60 = vperm.slane %v5825_v23, 0  ;;  %v4158_v53 = vpop.f32.mrf.mxu1  ;;  %v6257_v32 = vperm.slane %v5825_v23, 3  ;;  %v12003_v33 = vld [vmem:[#allocation29_spill] sm:$0xff] }
 0x97b   : > { %6808 = vst [vmem:[#allocation1 + $0x1] ss:$9 sm:$0xff] %v6247_v36  ;;  %v6259_v10 = vperm.slane %v5825_v23, 5  ;;  %v11358_v41 = vadd.f32 %v11195_v5, %v4158_v53  ;;  %v4230_v28 = vmul.f32 %v11257_v7, %v12003_v33  ;;  %v4383_v7 = vpop.xlane.xlu0 %4382 }
 0x97c   : > { %6809 = vst [vmem:[#allocation1 + $0x2] ss:$9 sm:$0xff] %v6248_v58  ;;  %8298 = vrsqrt.f32 %v5122_v44  ;;  %v6255_v58 = vperm.slane %v5825_v23, 1  ;;  %vm5588_vm12 = vweird.f32 %v5122_v44 }
 0x97d   : > { %6810 = vst [vmem:[#allocation1 + $0x3] ss:$9 sm:$0xff] %v6249_v3  ;;  %v4235_v3 = vmul.f32 %v11350_v47, %v12002_v50  ;;  %v4749_v14 = vmul.f32 %v11358_v41, %v11358_v41 }
 0x97e   : > { %6811 = vst [vmem:[#allocation1 + $0x4] ss:$9 sm:$0xff] %v6250_v37  ;;  %4903 = vadd.xlane.f32.xlu2 %v4902_v48  ;;  %v6256_v37 = vperm.slane %v5825_v23, 2  ;;  %v6261_v48 = vperm.slane %v5825_v23, 7 }
 0x97f   : > { %6812 = vst [vmem:[#allocation1 + $0x5] ss:$9 sm:$0xff] %v6251_v20  ;;  %v6258_v20 = vperm.slane %v5825_v23, 4  ;;  %v4408_v59 = vsel %vm4245_vm3, %v4235_v3, 0.0  ;;  %v4923_v50 = vsel %vm4245_vm3, %v4749_v14, 0.0 }
 0x980   : > { %6813 = vst [vmem:[#allocation1 + $0x6] ss:$9 sm:$0xff] %v6252_v16 }
 0x981   : > { %6814 = vst [vmem:[#allocation1 + $0x7] ss:$9 sm:$0xff] %v6253_v46  ;;  %v6260_v46 = vperm.slane %v5825_v23, 6 }
 0x982   : > { %v8299_v45 = vpop.eup %8298 }
 0x983   : > { %v5583_v39 = vmul.f32 %v8299_v45, %v5122_v44  ;;  %vm5589_vm11 = vweird.f32 %v8299_v45 }
 0x984   : > { %vm5590_vm13 = vmor %vm5588_vm12, %vm5589_vm11  ;;  %vm12004_vm11 = vcmask 851712  }
 0x985   : > { %v5584_v27 = vmul.f32 %v8299_v45, %v5583_v39 }
 0x986   : > { %4397 = vadd.xlane.f32.xlu2 %v4396_v26 }
 0x987   : > { %v5585_v16 = vmul.f32 0.5, %v5584_v27 }
 0x988   : > { %v11353_v36 = vld [vmem:[#allocation1] sm:$0xff]  ;;  %4409 = vadd.xlane.f32.xlu0 %v4408_v59  ;;  %v4898_v59 = vpop.xlane.xlu0 %4897 }
 0x989   : > { %6816 = vst [vmem:[#allocation1] ss:$9 sm:$0xff] %v6254_v60  ;;  %v5586_v62 = vsub.f32 1.5, %v5585_v16 }
 0x98a   : > { %6817 = vst [vmem:[#allocation1 + $0x1] ss:$9 sm:$0xff] %v6255_v58 }
 0x98b   : > { %6818 = vst [vmem:[#allocation1 + $0x2] ss:$9 sm:$0xff] %v6256_v37  ;;  %v5587_v15 = vmul.f32 %v8299_v45, %v5586_v62  ;;  %v4393_v37 = vsel %vm4245_vm3, %v4230_v28, 0.0 }
 0x98c   : > { %6819 = vst [vmem:[#allocation1 + $0x3] ss:$9 sm:$0xff] %v6257_v32 }
 0x98d   : > { %6820 = vst [vmem:[#allocation1 + $0x4] ss:$9 sm:$0xff] %v6258_v20  ;;  %v5591_v26 = vsel %vm5590_vm13, %v8299_v45, %v5587_v15  ;;  %v7088_v58 = vpop.permute.xlu1 %7087  ;;  %v4744_v20 = vmul.f32 %v11344_v11, %v11344_v11  ;;  %v4995_v11 = vmax.f32 %v10192_v38, 1e-16 }
 0x98e   : > { %6821 = vst [vmem:[#allocation1 + $0x5] ss:$9 sm:$0xff] %v6259_v10  ;;  %v5826_v60 = vmul.f32 %v5591_v26, %v11327_v2  ;;  %v7281_v32 = vperm.slane %v7088_v58, %v11073_v18 }
 0x98f   : > { %6822 = vst [vmem:[#allocation1 + $0x6] ss:$9 sm:$0xff] %v6260_v46  ;;  %v4908_v46 = vsel %vm4245_vm3, %v4744_v20, 0.0 }
 0x990   : > { %6823 = vst [vmem:[#allocation1 + $0x7] ss:$9 sm:$0xff] %v6261_v48  ;;  %v6262_v23 = vperm.slane %v5826_v60, 0  ;;  %v6263_v39 = vperm.slane %v5826_v60, 1  ;;  %v6264_v3 = vperm.slane %v5826_v60, 2  ;;  %4924 = vadd.xlane.f32.xlu0 %v4923_v50  ;;  %v6265_v53 = vperm.slane %v5826_v60, 3  ;;  %4394 = vadd.xlane.f32.xlu1 %v4393_v37  ;;  %v7091_v28 = vpop.permute.xlu0 %7090 }
 0x991   : > { %v6266_v27 = vperm.slane %v5826_v60, 4  ;;  %v6267_v45 = vperm.slane %v5826_v60, 5  ;;  %v7282_v2 = vsel %vm11754_vm9, %v7281_v32, %v11333_v17  ;;  %v6268_v10 = vperm.slane %v5826_v60, 6  ;;  %v11386_v32 = vpop.f32.mrf.mxu1 }
 0x992   : > { %v6269_v16 = vperm.slane %v5826_v60, 7  ;;  %v5060_v48 = vmax.f32 %v4898_v59, 1e-16  ;;  %v4996_v17 = vmax.f32 %v10259_v8, 1e-16  ;;  %v7283_v26 = vperm.slane %v7091_v28, %v11076_v63 }
 0x993   : > { %vm12005_vm9 = vcmask 917312  }
 0x994   : > { %v5124_v14 = vmul.f32 %v5060_v48, %v4996_v17  ;;  %v7284_v60 = vsel %vm12004_vm11, %v7283_v26, %v7282_v2  ;;  %v4745_v48 = vmul.f32 %v11297_v43, %v11297_v43 }
 0x997   : > { %v11368_v44 = vld [vmem:[#allocation1] sm:$0xff] }
 0x998   : > { %6825 = vst [vmem:[#allocation1] ss:$9 sm:$0xff] %v6262_v23  ;;  %4909 = vadd.xlane.f32.xlu1 %v4908_v46 }
 0x999   : > { %6826 = vst [vmem:[#allocation1 + $0x1] ss:$9 sm:$0xff] %v6263_v39  ;;  %v4163_v26 = vpop.f32.mrf.mxu1 }
 0x99a   : > { %6827 = vst [vmem:[#allocation1 + $0x2] ss:$9 sm:$0xff] %v6264_v3 }
 0x99b   : > { %6828 = vst [vmem:[#allocation1 + $0x3] ss:$9 sm:$0xff] %v6265_v53 }
 0x99c   : > { %6829 = vst [vmem:[#allocation1 + $0x4] ss:$9 sm:$0xff] %v6266_v27 }
 0x99d   : > { %6830 = vst [vmem:[#allocation1 + $0x5] ss:$9 sm:$0xff] %v6267_v45 }
 0x99e   : > { %6831 = vst [vmem:[#allocation1 + $0x6] ss:$9 sm:$0xff] %v6268_v10  ;;  %7102 = vperm.xlu2 %8206, %v11175_v42  }
 0x99f   : > { %6832 = vst [vmem:[#allocation1 + $0x7] ss:$9 sm:$0xff] %v6269_v16 }
 0x9a4   : > { %7117 = vperm.xlu0 %8204, %v11264_v0  }
 0x9a6   : > { %v11393_v17 = vld [vmem:[#allocation1] sm:$0xff] }
 0x9a8   : > { %v4895_v62 = vpop.xlane.xlu2 %4894 }
 0x9a9   : > { %v5059_v15 = vmax.f32 %v4895_v62, 1e-16 }
 0x9ab   : > { %v5123_v33 = vmul.f32 %v5059_v15, %v4995_v11 }
 0x9ad   : > { %8300 = vrsqrt.f32 %v5123_v33  ;;  %vm5598_vm13 = vweird.f32 %v5123_v33 }
 0x9ae   : > { %8302 = vrsqrt.f32 %v5124_v14 }
 0x9b0   : > { %v11381_v42 = vpop.xlane.xlu2 %4388 }
 0x9b1   : > { %7105 = vperm.xlu1 %8205, %v11188_v21  }
 0x9b3   : > { %v8301_v58 = vpop.eup %8300 }
 0x9b4   : > { %v8303_v23 = vpop.eup %8302  ;;  %v5593_v8 = vmul.f32 %v8301_v58, %v5123_v33  ;;  %vm5599_vm12 = vweird.f32 %v8301_v58 }
 0x9b5   : > { %v5603_v50 = vmul.f32 %v8303_v23, %v5124_v14  ;;  %vm5600_vm11 = vmor %vm5598_vm13, %vm5599_vm12  ;;  %vm5608_vm12 = vweird.f32 %v5124_v14 }
 0x9b6   : > { %v5594_v39 = vmul.f32 %v8301_v58, %v5593_v8 }
 0x9b7   : > { %v5604_v53 = vmul.f32 %v8303_v23, %v5603_v50 }
 0x9b8   : > { %v5595_v38 = vmul.f32 0.5, %v5594_v39  ;;  %v7094_v3 = vpop.permute.xlu2 %7093  ;;  %v4386_v10 = vpop.xlane.xlu1 %4385  ;;  %v12006_v39 = vld [vmem:[#allocation63_spill] sm:$0xff] }
 0x9b9   : > { %v7285_v37 = vperm.slane %v7094_v3, %v11108_v40  ;;  %v5605_v16 = vmul.f32 0.5, %v5604_v53  ;;  %v4997_v50 = vmax.f32 %v12006_v39, 1e-16  ;;  %v12007_v3 = vld [vmem:[#allocation33_spill] sm:$0xff] }
 0x9ba   : > { %v5596_v0 = vsub.f32 1.5, %v5595_v38 }
 0x9bb   : > { %v11389_v45 = vsel %vm12005_vm9, %v7285_v37, %v7284_v60  ;;  %v5606_v15 = vsub.f32 1.5, %v5605_v16  ;;  %vm5609_vm9 = vweird.f32 %v8303_v23 }
 0x9bc   : > { %v5597_v27 = vmul.f32 %v8301_v58, %v5596_v0  ;;  %vm5610_vm13 = vmor %vm5608_vm12, %vm5609_vm9  ;;  %v11406_v0 = vld [vmem:[%s11708_s7] ss:$0 sm:$0xff] }
 0x9bd   : > { %v5607_v43 = vmul.f32 %v8303_v23, %v5606_v15  ;;  %v11409_v37 = vadd.f32 %v11406_v0, %v4163_v26 }
 0x9be   : > { %v5601_v2 = vsel %vm5600_vm11, %v8301_v58, %v5597_v27  ;;  %v4911_v58 = vsel %vm4245_vm3, %v4745_v48, 0.0 }
 0x9bf   : > { %v5827_v20 = vmul.f32 %v5601_v2, %v4383_v7  ;;  %v11397_v7 = vadd.f32 %v11195_v5, %v11335_v57  ;;  %v5611_v53 = vsel %vm5610_vm13, %v8303_v23, %v5607_v43  ;;  %v11411_v2 = vpop.xlane.xlu0 %4391  ;;  %vm12010_vm13 = vcmask 982912  }
 0x9c0   : > { %v4901_v8 = vpop.xlane.xlu1 %4900  ;;  %v5828_v27 = vmul.f32 %v5611_v53, %v4386_v10  ;;  %v12009_v53 = vld [vmem:[#allocation32_spill] sm:$0xff] }
 0x9c1   : > { %v6270_v46 = vperm.slane %v5827_v20, 0  ;;  %v6271_v21 = vperm.slane %v5827_v20, 1  ;;  %v6272_v59 = vperm.slane %v5827_v20, 2  ;;  %v6273_v62 = vperm.slane %v5827_v20, 3 }
 0x9c2   : > { %v6274_v11 = vperm.slane %v5827_v20, 4  ;;  %v6275_v33 = vperm.slane %v5827_v20, 5  ;;  %v6276_v28 = vperm.slane %v5827_v20, 6  ;;  %v6277_v60 = vperm.slane %v5827_v20, 7  ;;  %v12008_v20 = vld [vmem:[#allocation37_spill] sm:$0xff] }
 0x9c3   : > { %6834 = vst [vmem:[#allocation1] ss:$9 sm:$0xff] %v6270_v46  ;;  %v5061_v38 = vmax.f32 %v4901_v8, 1e-16  ;;  %v4234_v5 = vmul.f32 %v11397_v7, %v12007_v3  ;;  %v4238_v16 = vmul.f32 %v11409_v37, %v12008_v20  ;;  %v4166_v46 = vpop.f32.mrf.mxu1  ;;  %v6279_v48 = vperm.slane %v5828_v27, 1 }
 0x9c4   : > { %6835 = vst [vmem:[#allocation1 + $0x1] ss:$9 sm:$0xff] %v6271_v21  ;;  %v6278_v21 = vperm.slane %v5828_v27, 0  ;;  %v11419_v23 = vadd.f32 %v11406_v0, %v4166_v46  ;;  %v6281_v15 = vperm.slane %v5828_v27, 3  ;;  %v6283_v26 = vperm.slane %v5828_v27, 5 }
 0x9c5   : > { %6836 = vst [vmem:[#allocation1 + $0x2] ss:$9 sm:$0xff] %v6272_v59  ;;  %v5125_v57 = vmul.f32 %v5061_v38, %v4997_v50  ;;  %v4405_v14 = vsel %vm4245_vm3, %v4234_v5, 0.0  ;;  %v4417_v10 = vsel %vm4245_vm3, %v4238_v16, 0.0  ;;  %v6285_v8 = vperm.slane %v5828_v27, 7 }
 0x9c6   : > { %6837 = vst [vmem:[#allocation1 + $0x3] ss:$9 sm:$0xff] %v6273_v62  ;;  %v4752_v43 = vmul.f32 %v11419_v23, %v11419_v23 }
 0x9c7   : > { %6838 = vst [vmem:[#allocation1 + $0x4] ss:$9 sm:$0xff] %v6274_v11  ;;  %4912 = vadd.xlane.f32.xlu2 %v4911_v58  ;;  %8304 = vrsqrt.f32 %v5125_v57  ;;  %v6280_v11 = vperm.slane %v5828_v27, 2  ;;  %v6284_v58 = vperm.slane %v5828_v27, 6  ;;  %v4907_v50 = vpop.xlane.xlu0 %4906  ;;  %vm5618_vm9 = vweird.f32 %v5125_v57 }
 0x9c8   : > { %6839 = vst [vmem:[#allocation1 + $0x5] ss:$9 sm:$0xff] %v6275_v33  ;;  %v4932_v3 = vsel %vm4245_vm3, %v4752_v43, 0.0 }
 0x9c9   : > { %6840 = vst [vmem:[#allocation1 + $0x6] ss:$9 sm:$0xff] %v6276_v28  ;;  %v6282_v28 = vperm.slane %v5828_v27, 4 }
 0x9ca   : > { %6841 = vst [vmem:[#allocation1 + $0x7] ss:$9 sm:$0xff] %v6277_v60 }
 0x9cd   : > { %v8305_v62 = vpop.eup %8304 }
 0x9ce   : > { %v5613_v33 = vmul.f32 %v8305_v62, %v5125_v57  ;;  %4418 = vadd.xlane.f32.xlu0 %v4417_v10  ;;  %vm5619_vm11 = vweird.f32 %v8305_v62 }
 0x9cf   : > { %4406 = vadd.xlane.f32.xlu2 %v4405_v14  ;;  %vm5620_vm12 = vmor %vm5618_vm9, %vm5619_vm11  ;;  %v4233_v14 = vmul.f32 %v11306_v9, %v12009_v53  ;;  %v7100_v46 = vpop.permute.xlu0 %7099 }
 0x9d0   : > { %v5614_v60 = vmul.f32 %v8305_v62, %v5613_v33  ;;  %v7289_v9 = vperm.slane %v7100_v46, %v11137_v49 }
 0x9d1   : > { %v11416_v59 = vld [vmem:[#allocation1] sm:$0xff]  ;;  %v4402_v33 = vsel %vm4245_vm3, %v4233_v14, 0.0 }
 0x9d2   : > { %6843 = vst [vmem:[#allocation1] ss:$9 sm:$0xff] %v6278_v21  ;;  %v5615_v39 = vmul.f32 0.5, %v5614_v60  ;;  %v4747_v60 = vmul.f32 %v11397_v7, %v11397_v7 }
 0x9d3   : > { %6844 = vst [vmem:[#allocation1 + $0x1] ss:$9 sm:$0xff] %v6279_v48 }
 0x9d4   : > { %6845 = vst [vmem:[#allocation1 + $0x2] ss:$9 sm:$0xff] %v6280_v11  ;;  %v5616_v38 = vsub.f32 1.5, %v5615_v39  ;;  %v4999_v39 = vmax.f32 %v10272_v13, 1e-16 }
 0x9d5   : > { %6846 = vst [vmem:[#allocation1 + $0x3] ss:$9 sm:$0xff] %v6281_v15 }
 0x9d6   : > { %6847 = vst [vmem:[#allocation1 + $0x4] ss:$9 sm:$0xff] %v6282_v28  ;;  %v5617_v5 = vmul.f32 %v8305_v62, %v5616_v38  ;;  %4933 = vadd.xlane.f32.xlu0 %v4932_v3  ;;  %v12011_v38 = vld [vmem:[#allocation64_spill] sm:$0xff] }
 0x9d7   : > { %6848 = vst [vmem:[#allocation1 + $0x5] ss:$9 sm:$0xff] %v6283_v26  ;;  %v4998_v3 = vmax.f32 %v12011_v38, 1e-16 }
 0x9d8   : > { %6849 = vst [vmem:[#allocation1 + $0x6] ss:$9 sm:$0xff] %v6284_v58  ;;  %v5621_v20 = vsel %vm5620_vm12, %v8305_v62, %v5617_v5  ;;  %v7097_v27 = vpop.permute.xlu1 %7096 }
 0x9d9   : > { %6850 = vst [vmem:[#allocation1 + $0x7] ss:$9 sm:$0xff] %v6285_v8  ;;  %v5829_v16 = vmul.f32 %v5621_v20, %v11381_v42  ;;  %v7287_v57 = vperm.slane %v7097_v27, %v11113_v31  ;;  %v4917_v8 = vsel %vm4245_vm3, %v4747_v60, 0.0  ;;  %v11445_v27 = vpop.f32.mrf.mxu1 }
 0x9db   : > { %v6286_v21 = vperm.slane %v5829_v16, 0  ;;  %v6287_v48 = vperm.slane %v5829_v16, 1  ;;  %v6288_v11 = vperm.slane %v5829_v16, 2  ;;  %v6289_v15 = vperm.slane %v5829_v16, 3  ;;  %4403 = vadd.xlane.f32.xlu1 %v4402_v33 }
 0x9dc   : > { %v6290_v28 = vperm.slane %v5829_v16, 4  ;;  %v6291_v62 = vperm.slane %v5829_v16, 5  ;;  %v6292_v42 = vperm.slane %v5829_v16, 6  ;;  %v7288_v26 = vsel %vm12010_vm13, %v7287_v57, %v11389_v45 }
 0x9dd   : > { %v6293_v58 = vperm.slane %v5829_v16, 7  ;;  %v11438_v43 = vsel %vm7258_vm0, %v7289_v9, %v7288_v26  ;;  %v5063_v45 = vmax.f32 %v4907_v50, 1e-16  ;;  %v11453_v26 = vadd.f32 %v11406_v0, %v11386_v32 }
 0x9df   : > { %v5127_v53 = vmul.f32 %v5063_v45, %v4999_v39 }
 0x9e0   : > { %v11428_v10 = vld [vmem:[#allocation1] sm:$0xff] }
 0x9e1   : > { %6852 = vst [vmem:[#allocation1] ss:$9 sm:$0xff] %v6286_v21 }
 0x9e2   : > { %6853 = vst [vmem:[#allocation1 + $0x1] ss:$9 sm:$0xff] %v6287_v48 }
 0x9e3   : > { %6854 = vst [vmem:[#allocation1 + $0x2] ss:$9 sm:$0xff] %v6288_v11  ;;  %4918 = vadd.xlane.f32.xlu1 %v4917_v8 }
 0x9e4   : > { %6855 = vst [vmem:[#allocation1 + $0x3] ss:$9 sm:$0xff] %v6289_v15  ;;  %v4748_v15 = vmul.f32 %v11350_v47, %v11350_v47 }
 0x9e5   : > { %6856 = vst [vmem:[#allocation1 + $0x4] ss:$9 sm:$0xff] %v6290_v28  ;;  %v4171_v28 = vpop.f32.mrf.mxu1 }
 0x9e6   : > { %6857 = vst [vmem:[#allocation1 + $0x5] ss:$9 sm:$0xff] %v6291_v62  ;;  %v4920_v8 = vsel %vm4245_vm3, %v4748_v15, 0.0  ;;  %v11459_v39 = vadd.f32 %v11406_v0, %v4171_v28 }
 0x9e7   : > { %7111 = vperm.xlu2 %8206, %v11231_v29   ;;  %6858 = vst [vmem:[#allocation1 + $0x6] ss:$9 sm:$0xff] %v6292_v42 }
 0x9e8   : > { %6859 = vst [vmem:[#allocation1 + $0x7] ss:$9 sm:$0xff] %v6293_v58 }
 0x9ea   : > { %7126 = vperm.xlu0 %8204, %v11314_v52  }
 0x9ef   : > { %v11455_v60 = vld [vmem:[#allocation1] sm:$0xff] }
 0x9f1   : > { %v4904_v7 = vpop.xlane.xlu2 %4903 }
 0x9f2   : > { %v5062_v5 = vmax.f32 %v4904_v7, 1e-16  ;;  %v12012_v7 = vld [vmem:[#allocation68_spill] sm:$0xff] }
 0x9f3   : > { %v5000_v38 = vmax.f32 %v12012_v7, 1e-16 }
 0x9f4   : > { %v5126_v14 = vmul.f32 %v5062_v5, %v4998_v3  ;;  %v12013_v5 = vld [vmem:[#allocation36_spill] sm:$0xff] }
 0x9f6   : > { %8306 = vrsqrt.f32 %v5126_v14  ;;  %vm5628_vm9 = vweird.f32 %v5126_v14 }
 0x9f7   : > { %8308 = vrsqrt.f32 %v5127_v53 }
 0x9fc   : > { %v8307_v20 = vpop.eup %8306  ;;  %7114 = vperm.xlu1 %8205, %v11244_v34  }
 0x9fd   : > { %v8309_v29 = vpop.eup %8308  ;;  %v5623_v16 = vmul.f32 %v8307_v20, %v5126_v14  ;;  %vm5629_vm11 = vweird.f32 %v8307_v20  ;;  %v4237_v14 = vmul.f32 %v11453_v26, %v12013_v5 }
 0x9fe   : > { %v5633_v52 = vmul.f32 %v8309_v29, %v5127_v53  ;;  %vm5630_vm12 = vmor %vm5628_vm9, %vm5629_vm11  ;;  %vm5639_vm13 = vweird.f32 %v8309_v29  ;;  %vm5638_vm11 = vweird.f32 %v5127_v53 }
 0x9ff   : > { %v5624_v46 = vmul.f32 %v8307_v20, %v5623_v16  ;;  %vm5640_vm9 = vmor %vm5638_vm11, %vm5639_vm13 }
 0xa00   : > { %v5634_v13 = vmul.f32 %v8309_v29, %v5633_v52  ;;  %v12014_v52 = vld [vmem:[#allocation40_spill] sm:$0xff] }
 0xa01   : > { %v5625_v50 = vmul.f32 0.5, %v5624_v46 }
 0xa02   : > { %v5635_v9 = vmul.f32 0.5, %v5634_v13  ;;  %v4173_v13 = vpop.f32.mrf.mxu1 }
 0xa03   : > { %v5626_v21 = vsub.f32 1.5, %v5625_v50  ;;  %v4395_v11 = vpop.xlane.xlu1 %4394  ;;  %v4241_v50 = vmul.f32 %v11459_v39, %v12014_v52 }
 0xa04   : > { %v5636_v47 = vsub.f32 1.5, %v5635_v9 }
 0xa05   : > { %v5627_v48 = vmul.f32 %v8307_v20, %v5626_v21  ;;  %v4426_v28 = vsel %vm4245_vm3, %v4241_v50, 0.0 }
 0xa06   : > { %v5637_v46 = vmul.f32 %v8309_v29, %v5636_v47 }
 0xa07   : > { %v5631_v33 = vsel %vm5630_vm12, %v8307_v20, %v5627_v48  ;;  %v4414_v48 = vsel %vm4245_vm3, %v4237_v14, 0.0 }
 0xa08   : > { %v5830_v57 = vmul.f32 %v5631_v33, %v11411_v2  ;;  %v5641_v15 = vsel %vm5640_vm9, %v8309_v29, %v5637_v46  ;;  %v11468_v33 = vadd.f32 %v11406_v0, %v4173_v13  ;;  %v4398_v29 = vpop.xlane.xlu2 %4397  ;;  %vm12016_vm9 = vcmask 1040384  }
 0xa0a   : > { %v6294_v62 = vperm.slane %v5830_v57, 0  ;;  %v6295_v42 = vperm.slane %v5830_v57, 1  ;;  %v6296_v34 = vperm.slane %v5830_v57, 2  ;;  %v6297_v58 = vperm.slane %v5830_v57, 3 }
 0xa0b   : > { %v6298_v45 = vperm.slane %v5830_v57, 4  ;;  %v6299_v2 = vperm.slane %v5830_v57, 5  ;;  %v6300_v3 = vperm.slane %v5830_v57, 6  ;;  %v4910_v32 = vpop.xlane.xlu1 %4909  ;;  %v6301_v20 = vperm.slane %v5830_v57, 7 }
 0xa0c   : > { %6861 = vst [vmem:[#allocation1] ss:$9 sm:$0xff] %v6294_v62  ;;  %v5064_v16 = vmax.f32 %v4910_v32, 1e-16  ;;  %v5831_v57 = vmul.f32 %v5641_v15, %v4395_v11  ;;  %v4755_v62 = vmul.f32 %v11468_v33, %v11468_v33 }
 0xa0d   : > { %6862 = vst [vmem:[#allocation1 + $0x1] ss:$9 sm:$0xff] %v6295_v42 }
 0xa0e   : > { %6863 = vst [vmem:[#allocation1 + $0x2] ss:$9 sm:$0xff] %v6296_v34  ;;  %v5128_v21 = vmul.f32 %v5064_v16, %v5000_v38  ;;  %v6302_v42 = vperm.slane %v5831_v57, 0  ;;  %v6303_v34 = vperm.slane %v5831_v57, 1  ;;  %v4941_v11 = vsel %vm4245_vm3, %v4755_v62, 0.0 }
 0xa0f   : > { %6864 = vst [vmem:[#allocation1 + $0x3] ss:$9 sm:$0xff] %v6297_v58  ;;  %v6307_v7 = vperm.slane %v5831_v57, 5  ;;  %v6309_v32 = vperm.slane %v5831_v57, 7 }
 0xa10   : > { %4921 = vadd.xlane.f32.xlu2 %v4920_v8  ;;  %6865 = vst [vmem:[#allocation1 + $0x4] ss:$9 sm:$0xff] %v6298_v45  ;;  %8310 = vrsqrt.f32 %v5128_v21  ;;  %v6304_v8 = vperm.slane %v5831_v57, 2  ;;  %v6305_v45 = vperm.slane %v5831_v57, 3  ;;  %vm5648_vm13 = vweird.f32 %v5128_v21  ;;  %v7103_v50 = vpop.permute.xlu2 %7102 }
 0xa11   : > { %6866 = vst [vmem:[#allocation1 + $0x5] ss:$9 sm:$0xff] %v6299_v2  ;;  %v6306_v2 = vperm.slane %v5831_v57, 4 }
 0xa12   : > { %6867 = vst [vmem:[#allocation1 + $0x6] ss:$9 sm:$0xff] %v6300_v3  ;;  %v6308_v3 = vperm.slane %v5831_v57, 6 }
 0xa13   : > { %6868 = vst [vmem:[#allocation1 + $0x7] ss:$9 sm:$0xff] %v6301_v20  ;;  %v12015_v20 = vld [vmem:[#allocation35_spill] sm:$0xff] }
 0xa14   : > { %4427 = vadd.xlane.f32.xlu0 %v4426_v28  ;;  %v4236_v16 = vmul.f32 %v11358_v41, %v12015_v20  ;;  %v4401_v28 = vpop.xlane.xlu0 %4400 }
 0xa16   : > { %v8311_v9 = vpop.eup %8310  ;;  %v4411_v57 = vsel %vm4245_vm3, %v4236_v16, 0.0 }
 0xa17   : > { %v5643_v58 = vmul.f32 %v8311_v9, %v5128_v21  ;;  %vm5649_vm12 = vweird.f32 %v8311_v9 }
 0xa18   : > { %4415 = vadd.xlane.f32.xlu2 %v4414_v48  ;;  %vm5650_vm11 = vmor %vm5648_vm13, %vm5649_vm12 }
 0xa19   : > { %v5644_v47 = vmul.f32 %v8311_v9, %v5643_v58 }
 0xa1a   : > { %v11473_v53 = vld [vmem:[#allocation1] sm:$0xff] }
 0xa1b   : > { %6870 = vst [vmem:[#allocation1] ss:$9 sm:$0xff] %v6302_v42  ;;  %v5645_v38 = vmul.f32 0.5, %v5644_v47  ;;  %v7291_v42 = vperm.slane %v7103_v50, %v10876_v55  ;;  %v7353_v47 = vrot.slane %v11438_v43, 7 }
 0xa1c   : > { %6871 = vst [vmem:[#allocation1 + $0x1] ss:$9 sm:$0xff] %v6303_v34  ;;  %4942 = vadd.xlane.f32.xlu0 %v4941_v11 }
 0xa1d   : > { %6872 = vst [vmem:[#allocation1 + $0x2] ss:$9 sm:$0xff] %v6304_v8  ;;  %v5646_v5 = vsub.f32 1.5, %v5645_v38 }
 0xa1e   : > { %6873 = vst [vmem:[#allocation1 + $0x3] ss:$9 sm:$0xff] %v6305_v45 }
 0xa1f   : > { %6874 = vst [vmem:[#allocation1 + $0x4] ss:$9 sm:$0xff] %v6306_v2  ;;  %v5647_v14 = vmul.f32 %v8311_v9, %v5646_v5 }
 0xa20   : > { %6875 = vst [vmem:[#allocation1 + $0x5] ss:$9 sm:$0xff] %v6307_v7  ;;  %v11491_v7 = vsel %vm12016_vm9, %v11146_v35, %v7353_v47 }
 0xa21   : > { %6876 = vst [vmem:[#allocation1 + $0x6] ss:$9 sm:$0xff] %v6308_v3  ;;  %v5651_v46 = vsel %vm5650_vm11, %v8311_v9, %v5647_v14 }
 0xa22   : > { %6877 = vst [vmem:[#allocation1 + $0x7] ss:$9 sm:$0xff] %v6309_v32  ;;  %v5832_v52 = vmul.f32 %v5651_v46, %v4398_v29  ;;  %v4750_v29 = vmul.f32 %v11453_v26, %v11453_v26  ;;  %v4916_v26 = vpop.xlane.xlu0 %4915  ;;  %v12018_v32 = vld [vmem:[#allocation77_spill] sm:$0xff] }
 0xa23   : > { %v7106_v13 = vpop.permute.xlu1 %7105  ;;  %v5066_v38 = vmax.f32 %v4916_v26, 1e-16  ;;  %v5001_v5 = vmax.f32 %v12018_v32, 1e-16 }
 0xa24   : > { %v6310_v48 = vperm.slane %v5832_v52, 0  ;;  %v6311_v15 = vperm.slane %v5832_v52, 1  ;;  %v6312_v62 = vperm.slane %v5832_v52, 2  ;;  %v6313_v58 = vperm.slane %v5832_v52, 3 }
 0xa25   : > { %v7292_v21 = vperm.slane %v7106_v13, %v10881_v30  ;;  %v6314_v8 = vperm.slane %v5832_v52, 4  ;;  %v6315_v41 = vperm.slane %v5832_v52, 5  ;;  %v6316_v45 = vperm.slane %v5832_v52, 6 }
 0xa26   : > { %4412 = vadd.xlane.f32.xlu1 %v4411_v57  ;;  %v6317_v2 = vperm.slane %v5832_v52, 7  ;;  %v4926_v11 = vsel %vm4245_vm3, %v4750_v29, 0.0 }
 0xa27   : > { %v7293_v9 = vsel %vm7202_vm5, %v7292_v21, %v7291_v42 }
 0xa29   : > { %v11480_v34 = vld [vmem:[#allocation1] sm:$0xff] }
 0xa2a   : > { %6879 = vst [vmem:[#allocation1] ss:$9 sm:$0xff] %v6310_v48  ;;  %v7109_v46 = vpop.permute.xlu0 %7108 }
 0xa2b   : > { %6880 = vst [vmem:[#allocation1 + $0x1] ss:$9 sm:$0xff] %v6311_v15  ;;  %v7294_v52 = vperm.slane %v7109_v46, %v10894_v25 }
 0xa2c   : > { %6881 = vst [vmem:[#allocation1 + $0x2] ss:$9 sm:$0xff] %v6312_v62  ;;  %v11500_v62 = vpop.f32.mrf.mxu1 }
 0xa2d   : > { %6882 = vst [vmem:[#allocation1 + $0x3] ss:$9 sm:$0xff] %v6313_v58  ;;  %v7295_v35 = vsel %vm7206_vm6, %v7294_v52, %v7293_v9 }
 0xa2e   : > { %6883 = vst [vmem:[#allocation1 + $0x4] ss:$9 sm:$0xff] %v6314_v8  ;;  %4927 = vadd.xlane.f32.xlu1 %v4926_v11  ;;  %v4751_v11 = vmul.f32 %v11409_v37, %v11409_v37 }
 0xa2f   : > { %6884 = vst [vmem:[#allocation1 + $0x5] ss:$9 sm:$0xff] %v6315_v41 }
 0xa30   : > { %7120 = vperm.xlu2 %8206, %v11281_v19   ;;  %6885 = vst [vmem:[#allocation1 + $0x6] ss:$9 sm:$0xff] %v6316_v45  ;;  %7135 = vperm.xlu0 %8204, %v11368_v44   ;;  %v12017_v19 = vld [vmem:[#allocation69_spill] sm:$0xff]  ;;  %v4929_v52 = vsel %vm4245_vm3, %v4751_v11, 0.0 }
 0xa31   : > { %6886 = vst [vmem:[#allocation1 + $0x7] ss:$9 sm:$0xff] %v6317_v2  ;;  %v5002_v3 = vmax.f32 %v12017_v19, 1e-16 }
 0xa33   : > { %v5130_v20 = vmul.f32 %v5066_v38, %v5002_v3 }
 0xa34   : > { %v4178_v26 = vpop.f32.mrf.mxu1 }
 0xa3a   : > { %v4913_v43 = vpop.xlane.xlu2 %4912 }
 0xa3b   : > { %v5065_v14 = vmax.f32 %v4913_v43, 1e-16  ;;  %v11509_v43 = vld [vmem:[#allocation1] sm:$0xff] }
 0xa3d   : > { %v5129_v16 = vmul.f32 %v5065_v14, %v5001_v5 }
 0xa3f   : > { %8312 = vrsqrt.f32 %v5129_v16  ;;  %vm5658_vm13 = vweird.f32 %v5129_v16 }
 0xa40   : > { %8314 = vrsqrt.f32 %v5130_v20 }
 0xa42   : > { %v11497_v50 = vpop.xlane.xlu2 %4406 }
 0xa45   : > { %v8313_v13 = vpop.eup %8312 }
 0xa46   : > { %v8315_v44 = vpop.eup %8314  ;;  %v5653_v48 = vmul.f32 %v8313_v13, %v5129_v16  ;;  %vm5659_vm12 = vweird.f32 %v8313_v13  ;;  %v11512_v16 = vadd.f32 %v11406_v0, %v4178_v26 }
 0xa47   : > { %v5663_v57 = vmul.f32 %v8315_v44, %v5130_v20  ;;  %7123 = vperm.xlu1 %8205, %v11299_v12   ;;  %vm5660_vm11 = vmor %vm5658_vm13, %vm5659_vm12  ;;  %vm5669_vm9 = vweird.f32 %v8315_v44  ;;  %vm5668_vm12 = vweird.f32 %v5130_v20 }
 0xa48   : > { %v5654_v15 = vmul.f32 %v8313_v13, %v5653_v48  ;;  %v12019_v48 = vld [vmem:[#allocation46_spill] sm:$0xff]  ;;  %vm5670_vm13 = vmor %vm5668_vm12, %vm5669_vm9 }
 0xa49   : > { %v5664_v41 = vmul.f32 %v8315_v44, %v5663_v57  ;;  %v12020_v57 = vld [vmem:[#allocation39_spill] sm:$0xff] }
 0xa4a   : > { %v5655_v42 = vmul.f32 0.5, %v5654_v15  ;;  %v7112_v58 = vpop.permute.xlu2 %7111  ;;  %v4244_v15 = vmul.f32 %v11512_v16, %v12019_v48 }
 0xa4b   : > { %v7296_v8 = vperm.slane %v7112_v58, %v10890_v24  ;;  %v5665_v2 = vmul.f32 0.5, %v5664_v41  ;;  %v12021_v58 = vld [vmem:[#allocation78_spill] sm:$0xff] }
 0xa4c   : > { %v5656_v21 = vsub.f32 1.5, %v5655_v42 }
 0xa4d   : > { %v11505_v9 = vsel %vm7210_vm7, %v7296_v8, %v7295_v35  ;;  %v5666_v14 = vsub.f32 1.5, %v5665_v2 }
 0xa4e   : > { %v5657_v29 = vmul.f32 %v8313_v13, %v5656_v21  ;;  %v4404_v32 = vpop.xlane.xlu1 %4403  ;;  %v5003_v21 = vmax.f32 %v12021_v58, 1e-16 }
 0xa50   : > { %v5661_v45 = vsel %vm5660_vm11, %v8313_v13, %v5657_v29  ;;  %v5667_v13 = vmul.f32 %v8315_v44, %v5666_v14  ;;  %v4435_v29 = vsel %vm4245_vm3, %v4244_v15, 0.0 }
 0xa51   : > { %v5833_v47 = vmul.f32 %v5661_v45, %v4401_v28  ;;  %v11516_v28 = vadd.f32 %v11406_v0, %v11445_v27 }
 0xa52   : > { %v5671_v8 = vsel %vm5670_vm13, %v8315_v44, %v5667_v13  ;;  %v12022_v13 = vld [vmem:[#allocation38_spill] sm:$0xff] }
 0xa53   : > { %v6318_v38 = vperm.slane %v5833_v47, 0  ;;  %v6319_v19 = vperm.slane %v5833_v47, 1  ;;  %v6320_v3 = vperm.slane %v5833_v47, 2  ;;  %v6321_v12 = vperm.slane %v5833_v47, 3 }
 0xa54   : > { %v6322_v5 = vperm.slane %v5833_v47, 4  ;;  %v6323_v46 = vperm.slane %v5833_v47, 5  ;;  %v6324_v37 = vperm.slane %v5833_v47, 6  ;;  %v6325_v35 = vperm.slane %v5833_v47, 7 }
 0xa55   : > { %6888 = vst [vmem:[#allocation1] ss:$9 sm:$0xff] %v6318_v38  ;;  %v4240_v42 = vmul.f32 %v11516_v28, %v12020_v57  ;;  %v5834_v45 = vmul.f32 %v5671_v8, %v4404_v32  ;;  %v4239_v48 = vmul.f32 %v11419_v23, %v12022_v13  ;;  %v4410_v57 = vpop.xlane.xlu0 %4409 }
 0xa56   : > { %6889 = vst [vmem:[#allocation1 + $0x1] ss:$9 sm:$0xff] %v6319_v19  ;;  %v4919_v27 = vpop.xlane.xlu1 %4918 }
 0xa57   : > { %6890 = vst [vmem:[#allocation1 + $0x2] ss:$9 sm:$0xff] %v6320_v3  ;;  %v5067_v41 = vmax.f32 %v4919_v27, 1e-16  ;;  %v4423_v2 = vsel %vm4245_vm3, %v4240_v42, 0.0  ;;  %v6326_v11 = vperm.slane %v5834_v45, 0 }
 0xa58   : > { %6891 = vst [vmem:[#allocation1 + $0x3] ss:$9 sm:$0xff] %v6321_v12  ;;  %v6327_v20 = vperm.slane %v5834_v45, 1  ;;  %v6328_v38 = vperm.slane %v5834_v45, 2  ;;  %v6329_v19 = vperm.slane %v5834_v45, 3  ;;  %v6330_v3 = vperm.slane %v5834_v45, 4 }
 0xa59   : > { %4930 = vadd.xlane.f32.xlu2 %v4929_v52  ;;  %6892 = vst [vmem:[#allocation1 + $0x4] ss:$9 sm:$0xff] %v6322_v5  ;;  %v5131_v47 = vmul.f32 %v5067_v41, %v5003_v21  ;;  %v6331_v12 = vperm.slane %v5834_v45, 5  ;;  %v6332_v32 = vperm.slane %v5834_v45, 6  ;;  %v6333_v14 = vperm.slane %v5834_v45, 7 }
 0xa5a   : > { %6893 = vst [vmem:[#allocation1 + $0x5] ss:$9 sm:$0xff] %v6323_v46  ;;  %4436 = vadd.xlane.f32.xlu0 %v4435_v29  ;;  %v4420_v45 = vsel %vm4245_vm3, %v4239_v48, 0.0 }
 0xa5b   : > { %6894 = vst [vmem:[#allocation1 + $0x6] ss:$9 sm:$0xff] %v6324_v37  ;;  %8316 = vrsqrt.f32 %v5131_v47  ;;  %vm5678_vm9 = vweird.f32 %v5131_v47 }
 0xa5c   : > { %6895 = vst [vmem:[#allocation1 + $0x7] ss:$9 sm:$0xff] %v6325_v35 }
 0xa61   : > { %4424 = vadd.xlane.f32.xlu2 %v4423_v2  ;;  %v8317_v44 = vpop.eup %8316 }
 0xa62   : > { %v5673_v5 = vmul.f32 %v8317_v44, %v5131_v47  ;;  %vm5679_vm11 = vweird.f32 %v8317_v44 }
 0xa63   : > { %v11526_v26 = vld [vmem:[#allocation1] sm:$0xff]  ;;  %vm5680_vm12 = vmor %vm5678_vm9, %vm5679_vm11 }
 0xa64   : > { %6897 = vst [vmem:[#allocation1] ss:$9 sm:$0xff] %v6326_v11  ;;  %v5674_v46 = vmul.f32 %v8317_v44, %v5673_v5  ;;  %v4753_v11 = vmul.f32 %v11516_v28, %v11516_v28 }
 0xa65   : > { %6898 = vst [vmem:[#allocation1 + $0x1] ss:$9 sm:$0xff] %v6327_v20 }
 0xa66   : > { %6899 = vst [vmem:[#allocation1 + $0x2] ss:$9 sm:$0xff] %v6328_v38  ;;  %v5675_v37 = vmul.f32 0.5, %v5674_v46  ;;  %v4925_v38 = vpop.xlane.xlu0 %4924 }
 0xa67   : > { %6900 = vst [vmem:[#allocation1 + $0x3] ss:$9 sm:$0xff] %v6329_v19  ;;  %v4935_v19 = vsel %vm4245_vm3, %v4753_v11, 0.0 }
 0xa68   : > { %6901 = vst [vmem:[#allocation1 + $0x4] ss:$9 sm:$0xff] %v6330_v3  ;;  %v5676_v52 = vsub.f32 1.5, %v5675_v37  ;;  %v12023_v3 = vld [vmem:[#allocation79_spill] sm:$0xff] }
 0xa69   : > { %6902 = vst [vmem:[#allocation1 + $0x5] ss:$9 sm:$0xff] %v6331_v12 }
 0xa6a   : > { %6903 = vst [vmem:[#allocation1 + $0x6] ss:$9 sm:$0xff] %v6332_v32  ;;  %v5677_v35 = vmul.f32 %v8317_v44, %v5676_v52 }
 0xa6b   : > { %6904 = vst [vmem:[#allocation1 + $0x7] ss:$9 sm:$0xff] %v6333_v14 }
 0xa6c   : > { %v5681_v15 = vsel %vm5680_vm12, %v8317_v44, %v5677_v35  ;;  %v5005_v44 = vmax.f32 %v12023_v3, 1e-16 }
 0xa6d   : > { %v5835_v42 = vmul.f32 %v5681_v15, %v11497_v50 }
 0xa6e   : > { %7144 = vperm.xlu0 %8204, %v11428_v10   ;;  %v7115_v27 = vpop.permute.xlu1 %7114  ;;  %v7118_v46 = vpop.permute.xlu0 %7117 }
 0xa6f   : > { %v6334_v58 = vperm.slane %v5835_v42, 0  ;;  %v6335_v21 = vperm.slane %v5835_v42, 1  ;;  %v6336_v8 = vperm.slane %v5835_v42, 2  ;;  %v6337_v29 = vperm.slane %v5835_v42, 3 }
 0xa70   : > { %v6338_v2 = vperm.slane %v5835_v42, 4  ;;  %v7298_v47 = vperm.slane %v7115_v27, %v10906_v1  ;;  %v6339_v23 = vperm.slane %v5835_v42, 5  ;;  %v6340_v50 = vperm.slane %v5835_v42, 6 }
 0xa71   : > { %4421 = vadd.xlane.f32.xlu1 %v4420_v45  ;;  %v6341_v20 = vperm.slane %v5835_v42, 7 }
 0xa72   : > { %v6905_v41 = vld [vmem:[#allocation1] sm:$0xff]  ;;  %v7299_v10 = vsel %vm7214_vm8, %v7298_v47, %v11505_v9  ;;  %v12024_v9 = vld [vmem:[#allocation65_spill] sm:$0xff] }
 0xa73   : > { %6906 = vst [vmem:[#allocation1] ss:$9 sm:$0xff] %v6334_v58  ;;  %v5004_v32 = vmax.f32 %v12024_v9, 1e-16 }
 0xa74   : > { %6907 = vst [vmem:[#allocation1 + $0x1] ss:$9 sm:$0xff] %v6335_v21 }
 0xa75   : > { %6908 = vst [vmem:[#allocation1 + $0x2] ss:$9 sm:$0xff] %v6336_v8 }
 0xa76   : > { %6909 = vst [vmem:[#allocation1 + $0x3] ss:$9 sm:$0xff] %v6337_v29  ;;  %7153 = vperm.xlu0 %8204, %v11480_v34   ;;  %v7300_v34 = vperm.slane %v7118_v46, %v10936_v6 }
 0xa77   : > { %6910 = vst [vmem:[#allocation1 + $0x4] ss:$9 sm:$0xff] %v6338_v2 }
 0xa78   : > { %6911 = vst [vmem:[#allocation1 + $0x5] ss:$9 sm:$0xff] %v6339_v23  ;;  %v7301_v52 = vsel %vm7218_vm2, %v7300_v34, %v7299_v10 }
 0xa79   : > { %7129 = vperm.xlu2 %8206, %v11339_v51   ;;  %6912 = vst [vmem:[#allocation1 + $0x6] ss:$9 sm:$0xff] %v6340_v50  ;;  %4936 = vadd.xlane.f32.xlu1 %v4935_v19  ;;  %v5069_v51 = vmax.f32 %v4925_v38, 1e-16 }
 0xa7a   : > { %6913 = vst [vmem:[#allocation1 + $0x7] ss:$9 sm:$0xff] %v6341_v20  ;;  %v4754_v20 = vmul.f32 %v11459_v39, %v11459_v39 }
 0xa7b   : > { %v5133_v5 = vmul.f32 %v5069_v51, %v5005_v44 }
 0xa7e   : > { %7162 = vperm.xlu0 %8204, %v6905_v41  }
 0xa81   : > { %v11554_v38 = vld [vmem:[#allocation1] sm:$0xff] }
 0xa83   : > { %v4922_v12 = vpop.xlane.xlu2 %4921 }
 0xa84   : > { %v5068_v28 = vmax.f32 %v4922_v12, 1e-16 }
 0xa86   : > { %v5132_v14 = vmul.f32 %v5068_v28, %v5004_v32  ;;  %v4938_v32 = vsel %vm4245_vm3, %v4754_v20, 0.0  ;;  %v12025_v28 = vld [vmem:[#allocation43_spill] sm:$0xff] }
 0xa88   : > { %8318 = vrsqrt.f32 %v5132_v14  ;;  %vm5688_vm11 = vweird.f32 %v5132_v14 }
 0xa89   : > { %8320 = vrsqrt.f32 %v5133_v5 }
 0xa8b   : > { %v11544_v37 = vpop.xlane.xlu2 %4415 }
 0xa8e   : > { %v8319_v35 = vpop.eup %8318 }
 0xa8f   : > { %v8321_v13 = vpop.eup %8320  ;;  %v5683_v48 = vmul.f32 %v8319_v35, %v5132_v14  ;;  %vm5689_vm13 = vweird.f32 %v8319_v35 }
 0xa90   : > { %v5693_v42 = vmul.f32 %v8321_v13, %v5133_v5  ;;  %vm5690_vm9 = vmor %vm5688_vm11, %vm5689_vm13  ;;  %vm5699_vm12 = vweird.f32 %v8321_v13  ;;  %vm5698_vm13 = vweird.f32 %v5133_v5 }
 0xa91   : > { %v5684_v15 = vmul.f32 %v8319_v35, %v5683_v48  ;;  %vm5700_vm11 = vmor %vm5698_vm13, %vm5699_vm12 }
 0xa92   : > { %v5694_v41 = vmul.f32 %v8321_v13, %v5693_v42  ;;  %7132 = vperm.xlu1 %8205, %v11353_v36   ;;  %v11558_v36 = vadd.f32 %v11406_v0, %v11500_v62  ;;  %v12026_v62 = vld [vmem:[#allocation71_spill] sm:$0xff] }
 0xa93   : > { %v5685_v27 = vmul.f32 0.5, %v5684_v15  ;;  %v7121_v58 = vpop.permute.xlu2 %7120 }
 0xa94   : > { %v7302_v8 = vperm.slane %v7121_v58, %v10947_v4  ;;  %v5695_v23 = vmul.f32 0.5, %v5694_v41  ;;  %v4243_v14 = vmul.f32 %v11558_v36, %v12025_v28 }
 0xa95   : > { %v5686_v21 = vsub.f32 1.5, %v5685_v27 }
 0xa96   : > { %v11549_v45 = vsel %vm7222_vm15, %v7302_v8, %v7301_v52  ;;  %v5696_v3 = vsub.f32 1.5, %v5695_v23  ;;  %v5006_v52 = vmax.f32 %v12026_v62, 1e-16  ;;  %v4432_v48 = vsel %vm4245_vm3, %v4243_v14, 0.0 }
 0xa97   : > { %v5687_v29 = vmul.f32 %v8319_v35, %v5686_v21 }
 0xa98   : > { %v5697_v39 = vmul.f32 %v8321_v13, %v5696_v3 }
 0xa99   : > { %v5691_v2 = vsel %vm5690_vm9, %v8319_v35, %v5687_v29  ;;  %v4413_v9 = vpop.xlane.xlu1 %4412 }
 0xa9a   : > { %v5836_v47 = vmul.f32 %v5691_v2, %v4410_v57  ;;  %v5701_v46 = vsel %vm5700_vm11, %v8321_v13, %v5697_v39 }
 0xa9b   : > { %v5837_v34 = vmul.f32 %v5701_v46, %v4413_v9 }
 0xa9c   : > { %v6342_v50 = vperm.slane %v5836_v47, 0  ;;  %v6343_v10 = vperm.slane %v5836_v47, 1  ;;  %v6344_v11 = vperm.slane %v5836_v47, 2  ;;  %v6345_v19 = vperm.slane %v5836_v47, 3 }
 0xa9d   : > { %v6346_v51 = vperm.slane %v5836_v47, 4  ;;  %v6347_v44 = vperm.slane %v5836_v47, 5  ;;  %v6348_v12 = vperm.slane %v5836_v47, 6  ;;  %v6349_v57 = vperm.slane %v5836_v47, 7 }
 0xa9e   : > { %6915 = vst [vmem:[#allocation1] ss:$9 sm:$0xff] %v6342_v50  ;;  %v6350_v15 = vperm.slane %v5837_v34, 0  ;;  %v6351_v58 = vperm.slane %v5837_v34, 1  ;;  %v6352_v5 = vperm.slane %v5837_v34, 2  ;;  %v6353_v21 = vperm.slane %v5837_v34, 3  ;;  %v11567_v50 = vpop.xlane.xlu0 %4418 }
 0xa9f   : > { %6916 = vst [vmem:[#allocation1 + $0x1] ss:$9 sm:$0xff] %v6343_v10  ;;  %v6354_v8 = vperm.slane %v5837_v34, 4  ;;  %v6355_v13 = vperm.slane %v5837_v34, 5  ;;  %v6356_v41 = vperm.slane %v5837_v34, 6  ;;  %v6357_v29 = vperm.slane %v5837_v34, 7 }
 0xaa0   : > { %6917 = vst [vmem:[#allocation1 + $0x2] ss:$9 sm:$0xff] %v6344_v11 }
 0xaa1   : > { %6918 = vst [vmem:[#allocation1 + $0x3] ss:$9 sm:$0xff] %v6345_v19  ;;  %v4928_v0 = vpop.xlane.xlu1 %4927 }
 0xaa2   : > { %6919 = vst [vmem:[#allocation1 + $0x4] ss:$9 sm:$0xff] %v6346_v51  ;;  %4939 = vadd.xlane.f32.xlu2 %v4938_v32  ;;  %v5070_v35 = vmax.f32 %v4928_v0, 1e-16  ;;  %v12027_v51 = vld [vmem:[#allocation41_spill] sm:$0xff] }
 0xaa3   : > { %6920 = vst [vmem:[#allocation1 + $0x5] ss:$9 sm:$0xff] %v6347_v44  ;;  %v4242_v3 = vmul.f32 %v11468_v33, %v12027_v51 }
 0xaa4   : > { %6921 = vst [vmem:[#allocation1 + $0x6] ss:$9 sm:$0xff] %v6348_v12  ;;  %v5134_v42 = vmul.f32 %v5070_v35, %v5006_v52  ;;  %v4756_v52 = vmul.f32 %v11558_v36, %v11558_v36 }
 0xaa5   : > { %6922 = vst [vmem:[#allocation1 + $0x7] ss:$9 sm:$0xff] %v6349_v57  ;;  %v4429_v46 = vsel %vm4245_vm3, %v4242_v3, 0.0 }
 0xaa6   : > { %8322 = vrsqrt.f32 %v5134_v42  ;;  %vm5708_vm12 = vweird.f32 %v5134_v42  ;;  %v4934_v28 = vpop.xlane.xlu0 %4933 }
 0xaa7   : > { %v5072_v36 = vmax.f32 %v4934_v28, 1e-16 }
 0xaaa   : > { %4433 = vadd.xlane.f32.xlu2 %v4432_v48  ;;  %v4944_v48 = vsel %vm4245_vm3, %v4756_v52, 0.0 }
 0xaac   : > { %v11565_v27 = vld [vmem:[#allocation1] sm:$0xff]  ;;  %v8323_v2 = vpop.eup %8322 }
 0xaad   : > { %6924 = vst [vmem:[#allocation1] ss:$9 sm:$0xff] %v6350_v15  ;;  %v5703_v47 = vmul.f32 %v8323_v2, %v5134_v42  ;;  %vm5709_vm9 = vweird.f32 %v8323_v2  ;;  %v12028_v42 = vld [vmem:[#allocation70_spill] sm:$0xff] }
 0xaae   : > { %6925 = vst [vmem:[#allocation1 + $0x1] ss:$9 sm:$0xff] %v6351_v58  ;;  %vm5710_vm13 = vmor %vm5708_vm12, %vm5709_vm9  ;;  %v5007_v58 = vmax.f32 %v12028_v42, 1e-16  ;;  %v12030_v42 = vld [vmem:[#allocation72_spill] sm:$0xff] }
 0xaaf   : > { %6926 = vst [vmem:[#allocation1 + $0x2] ss:$9 sm:$0xff] %v6352_v5  ;;  %v5704_v23 = vmul.f32 %v8323_v2, %v5703_v47 }
 0xab0   : > { %6927 = vst [vmem:[#allocation1 + $0x3] ss:$9 sm:$0xff] %v6353_v21 }
 0xab1   : > { %6928 = vst [vmem:[#allocation1 + $0x4] ss:$9 sm:$0xff] %v6354_v8  ;;  %v5705_v10 = vmul.f32 0.5, %v5704_v23 }
 0xab2   : > { %6929 = vst [vmem:[#allocation1 + $0x5] ss:$9 sm:$0xff] %v6355_v13  ;;  %v12029_v13 = vld [vmem:[#allocation73_spill] sm:$0xff] }
 0xab3   : > { %6930 = vst [vmem:[#allocation1 + $0x6] ss:$9 sm:$0xff] %v6356_v41  ;;  %v5706_v11 = vsub.f32 1.5, %v5705_v10  ;;  %v5008_v41 = vmax.f32 %v12029_v13, 1e-16 }
 0xab4   : > { %6931 = vst [vmem:[#allocation1 + $0x7] ss:$9 sm:$0xff] %v6357_v29 }
 0xab5   : > { %v5707_v19 = vmul.f32 %v8323_v2, %v5706_v11 }
 0xab7   : > { %v5711_v44 = vsel %vm5710_vm13, %v8323_v2, %v5707_v19  ;;  %v5136_v2 = vmul.f32 %v5072_v36, %v5008_v41 }
 0xab8   : > { %v5838_v12 = vmul.f32 %v5711_v44, %v11544_v37 }
 0xab9   : > { %v7124_v9 = vpop.permute.xlu1 %7123  ;;  %vm5728_vm13 = vweird.f32 %v5136_v2 }
 0xaba   : > { %v6358_v57 = vperm.slane %v5838_v12, 0  ;;  %v6359_v32 = vperm.slane %v5838_v12, 1  ;;  %v6360_v39 = vperm.slane %v5838_v12, 2  ;;  %v6361_v14 = vperm.slane %v5838_v12, 3 }
 0xabb   : > { %v6932_v20 = vld [vmem:[#allocation1] sm:$0xff]  ;;  %v6362_v34 = vperm.slane %v5838_v12, 4  ;;  %v7304_v0 = vperm.slane %v7124_v9, %v10969_v22  ;;  %v6363_v62 = vperm.slane %v5838_v12, 5  ;;  %v6364_v33 = vperm.slane %v5838_v12, 6 }
 0xabc   : > { %7171 = vperm.xlu0 %8204, %v6932_v20   ;;  %6933 = vst [vmem:[#allocation1] ss:$9 sm:$0xff] %v6358_v57  ;;  %4430 = vadd.xlane.f32.xlu1 %v4429_v46  ;;  %v6365_v35 = vperm.slane %v5838_v12, 7 }
 0xabd   : > { %6934 = vst [vmem:[#allocation1 + $0x1] ss:$9 sm:$0xff] %v6359_v32  ;;  %v7305_v37 = vsel %vm7226_vm1, %v7304_v0, %v11549_v45  ;;  %v4757_v32 = vmul.f32 %v11512_v16, %v11512_v16 }
 0xabe   : > { %6935 = vst [vmem:[#allocation1 + $0x2] ss:$9 sm:$0xff] %v6360_v39 }
 0xabf   : > { %6936 = vst [vmem:[#allocation1 + $0x3] ss:$9 sm:$0xff] %v6361_v14 }
 0xac0   : > { %6937 = vst [vmem:[#allocation1 + $0x4] ss:$9 sm:$0xff] %v6362_v34  ;;  %v4947_v34 = vsel %vm4245_vm3, %v4757_v32, 0.0 }
 0xac1   : > { %6938 = vst [vmem:[#allocation1 + $0x5] ss:$9 sm:$0xff] %v6363_v62 }
 0xac2   : > { %7138 = vperm.xlu2 %8206, %v11393_v17   ;;  %6939 = vst [vmem:[#allocation1 + $0x6] ss:$9 sm:$0xff] %v6364_v33  ;;  %v7127_v17 = vpop.permute.xlu0 %7126 }
 0xac3   : > { %6940 = vst [vmem:[#allocation1 + $0x7] ss:$9 sm:$0xff] %v6365_v35  ;;  %v7306_v5 = vperm.slane %v7127_v17, %v11001_v54 }
 0xac4   : > { %4945 = vadd.xlane.f32.xlu1 %v4944_v48 }
 0xac5   : > { %v7307_v8 = vsel %vm7230_vm14, %v7306_v5, %v7305_v37 }
 0xaca   : > { %v11596_v52 = vld [vmem:[#allocation1] sm:$0xff] }
 0xacc   : > { %v4931_v15 = vpop.xlane.xlu2 %4930 }
 0xacd   : > { %v5071_v21 = vmax.f32 %v4931_v15, 1e-16 }
 0xacf   : > { %v5135_v45 = vmul.f32 %v5071_v21, %v5007_v58  ;;  %v5009_v58 = vmax.f32 %v12030_v42, 1e-16  ;;  %v12032_v42 = vld [vmem:[#allocation75_spill] sm:$0xff] }
 0xad1   : > { %8324 = vrsqrt.f32 %v5135_v45  ;;  %vm5718_vm9 = vweird.f32 %v5135_v45 }
 0xad2   : > { %8326 = vrsqrt.f32 %v5136_v2 }
 0xad4   : > { %v11584_v29 = vpop.xlane.xlu2 %4424 }
 0xad7   : > { %v8325_v47 = vpop.eup %8324 }
 0xad8   : > { %v5713_v23 = vmul.f32 %v8325_v47, %v5135_v45  ;;  %v8327_v3 = vpop.eup %8326  ;;  %vm5719_vm11 = vweird.f32 %v8325_v47 }
 0xad9   : > { %v5723_v9 = vmul.f32 %v8327_v3, %v5136_v2  ;;  %vm5720_vm12 = vmor %vm5718_vm9, %vm5719_vm11  ;;  %vm5729_vm3 = vweird.f32 %v8327_v3 }
 0xada   : > { %v5714_v10 = vmul.f32 %v8325_v47, %v5713_v23  ;;  %vm5730_vm11 = vmor %vm5728_vm13, %vm5729_vm3  ;;  %vm12033_vm13 = vcmask 786112  }
 0xadb   : > { %v5724_v28 = vmul.f32 %v8327_v3, %v5723_v9 }
 0xadc   : > { %v5715_v11 = vmul.f32 0.5, %v5714_v10  ;;  %v7130_v20 = vpop.permute.xlu2 %7129 }
 0xadd   : > { %v7308_v19 = vperm.slane %v7130_v20, %v11004_v61  ;;  %7141 = vperm.xlu1 %8205, %v11416_v59   ;;  %v5725_v46 = vmul.f32 0.5, %v5724_v28 }
 0xade   : > { %v5716_v51 = vsub.f32 1.5, %v5715_v11 }
 0xadf   : > { %v11588_v44 = vsel %vm7234_vm4, %v7308_v19, %v7307_v8  ;;  %v5726_v35 = vsub.f32 1.5, %v5725_v46 }
 0xae0   : > { %v5717_v12 = vmul.f32 %v8325_v47, %v5716_v51 }
 0xae1   : > { %v5727_v48 = vmul.f32 %v8327_v3, %v5726_v35 }
 0xae2   : > { %v5721_v57 = vsel %vm5720_vm12, %v8325_v47, %v5717_v12 }
 0xae3   : > { %v5839_v39 = vmul.f32 %v5721_v57, %v11567_v50  ;;  %v5731_v5 = vsel %vm5730_vm11, %v8327_v3, %v5727_v48 }
 0xae4   : > { %v4422_v62 = vpop.xlane.xlu1 %4421 }
 0xae5   : > { %v6366_v14 = vperm.slane %v5839_v39, 0  ;;  %v6367_v0 = vperm.slane %v5839_v39, 1  ;;  %v6368_v33 = vperm.slane %v5839_v39, 2  ;;  %7150 = vperm.xlu1 %8205, %v11473_v53   ;;  %v6369_v37 = vperm.slane %v5839_v39, 3 }
 0xae6   : > { %v6370_v59 = vperm.slane %v5839_v39, 4  ;;  %v6371_v16 = vperm.slane %v5839_v39, 5  ;;  %v6372_v50 = vperm.slane %v5839_v39, 6  ;;  %v6373_v17 = vperm.slane %v5839_v39, 7 }
 0xae7   : > { %6942 = vst [vmem:[#allocation1] ss:$9 sm:$0xff] %v6366_v14  ;;  %v5840_v45 = vmul.f32 %v5731_v5, %v4422_v62 }
 0xae8   : > { %6943 = vst [vmem:[#allocation1 + $0x1] ss:$9 sm:$0xff] %v6367_v0 }
 0xae9   : > { %6944 = vst [vmem:[#allocation1 + $0x2] ss:$9 sm:$0xff] %v6368_v33  ;;  %v6374_v8 = vperm.slane %v5840_v45, 0  ;;  %v6375_v36 = vperm.slane %v5840_v45, 1  ;;  %v6376_v41 = vperm.slane %v5840_v45, 2  ;;  %v6377_v23 = vperm.slane %v5840_v45, 3 }
 0xaea   : > { %6945 = vst [vmem:[#allocation1 + $0x3] ss:$9 sm:$0xff] %v6369_v37  ;;  %v6378_v2 = vperm.slane %v5840_v45, 4  ;;  %v6379_v11 = vperm.slane %v5840_v45, 5  ;;  %v6380_v20 = vperm.slane %v5840_v45, 6  ;;  %v6381_v51 = vperm.slane %v5840_v45, 7 }
 0xaeb   : > { %4948 = vadd.xlane.f32.xlu2 %v4947_v34  ;;  %6946 = vst [vmem:[#allocation1 + $0x4] ss:$9 sm:$0xff] %v6370_v59 }
 0xaec   : > { %v4937_v15 = vpop.xlane.xlu1 %4936  ;;  %6947 = vst [vmem:[#allocation1 + $0x5] ss:$9 sm:$0xff] %v6371_v16  ;;  %v12031_v16 = vld [vmem:[#allocation74_spill] sm:$0xff] }
 0xaed   : > { %v5073_v53 = vmax.f32 %v4937_v15, 1e-16  ;;  %7159 = vperm.xlu1 %8205, %v11526_v26   ;;  %6948 = vst [vmem:[#allocation1 + $0x6] ss:$9 sm:$0xff] %v6372_v50  ;;  %v11601_v26 = vpop.xlane.xlu0 %4427  ;;  %v5011_v50 = vmax.f32 %v12031_v16, 1e-16 }
 0xaee   : > { %6949 = vst [vmem:[#allocation1 + $0x7] ss:$9 sm:$0xff] %v6373_v17 }
 0xaef   : > { %v5137_v21 = vmul.f32 %v5073_v53, %v5009_v58  ;;  %v5010_v58 = vmax.f32 %v12032_v42, 1e-16 }
 0xaf1   : > { %8328 = vrsqrt.f32 %v5137_v21  ;;  %vm5738_vm12 = vweird.f32 %v5137_v21 }
 0xaf5   : > { %v6950_v13 = vld [vmem:[#allocation1] sm:$0xff]  ;;  %7168 = vperm.xlu1 %8205, %v11565_v27   ;;  %v4943_v57 = vpop.xlane.xlu0 %4942 }
 0xaf6   : > { %6951 = vst [vmem:[#allocation1] ss:$9 sm:$0xff] %v6374_v8  ;;  %v5075_v59 = vmax.f32 %v4943_v57, 1e-16 }
 0xaf7   : > { %v8329_v47 = vpop.eup %8328  ;;  %6952 = vst [vmem:[#allocation1 + $0x1] ss:$9 sm:$0xff] %v6375_v36 }
 0xaf8   : > { %v5733_v10 = vmul.f32 %v8329_v47, %v5137_v21  ;;  %6953 = vst [vmem:[#allocation1 + $0x2] ss:$9 sm:$0xff] %v6376_v41  ;;  %vm5739_vm9 = vweird.f32 %v8329_v47  ;;  %v5139_v17 = vmul.f32 %v5075_v59, %v5011_v50 }
 0xaf9   : > { %6954 = vst [vmem:[#allocation1 + $0x3] ss:$9 sm:$0xff] %v6377_v23  ;;  %vm5740_vm3 = vmor %vm5738_vm12, %vm5739_vm9  ;;  %vm12034_vm9 = vcmask 851712  }
 0xafa   : > { %v5734_v19 = vmul.f32 %v8329_v47, %v5733_v10  ;;  %6955 = vst [vmem:[#allocation1 + $0x4] ss:$9 sm:$0xff] %v6378_v2  ;;  %8330 = vrsqrt.f32 %v5139_v17 }
 0xafb   : > { %6956 = vst [vmem:[#allocation1 + $0x5] ss:$9 sm:$0xff] %v6379_v11 }
 0xafc   : > { %v5735_v3 = vmul.f32 0.5, %v5734_v19  ;;  %6957 = vst [vmem:[#allocation1 + $0x6] ss:$9 sm:$0xff] %v6380_v20 }
 0xafd   : > { %6958 = vst [vmem:[#allocation1 + $0x7] ss:$9 sm:$0xff] %v6381_v51  ;;  %7177 = vperm.xlu1 %8205, %v6950_v13  }
 0xafe   : > { %v5736_v27 = vsub.f32 1.5, %v5735_v3 }
 0xb00   : > { %v5737_v12 = vmul.f32 %v8329_v47, %v5736_v27  ;;  %v8331_v45 = vpop.eup %8330 }
 0xb01   : > { %v5753_v36 = vmul.f32 %v8331_v45, %v5139_v17 }
 0xb02   : > { %v5741_v9 = vsel %vm5740_vm3, %v8329_v47, %v5737_v12 }
 0xb03   : > { %7147 = vperm.xlu2 %8206, %v11455_v60   ;;  %v5841_v32 = vmul.f32 %v5741_v9, %v11584_v29  ;;  %v5754_v10 = vmul.f32 %v8331_v45, %v5753_v36 }
 0xb04   : > { %v6959_v39 = vld [vmem:[#allocation1] sm:$0xff]  ;;  %v7133_v28 = vpop.permute.xlu1 %7132 }
 0xb05   : > { %v6382_v14 = vperm.slane %v5841_v32, 0  ;;  %v6383_v46 = vperm.slane %v5841_v32, 1  ;;  %v6384_v34 = vperm.slane %v5841_v32, 2  ;;  %7180 = vperm.xlu0 %8204, %v6959_v39   ;;  %v6385_v60 = vperm.slane %v5841_v32, 3 }
 0xb06   : > { %v6386_v0 = vperm.slane %v5841_v32, 4  ;;  %v7310_v62 = vperm.slane %v7133_v28, %v11037_v56  ;;  %v6387_v33 = vperm.slane %v5841_v32, 5  ;;  %v6388_v37 = vperm.slane %v5841_v32, 6 }
 0xb07   : > { %6960 = vst [vmem:[#allocation1] ss:$9 sm:$0xff] %v6382_v14  ;;  %v6389_v35 = vperm.slane %v5841_v32, 7  ;;  %v5755_v19 = vmul.f32 0.5, %v5754_v10 }
 0xb08   : > { %6961 = vst [vmem:[#allocation1 + $0x1] ss:$9 sm:$0xff] %v6383_v46  ;;  %v7311_v29 = vsel %vm7238_vm10, %v7310_v62, %v11588_v44 }
 0xb09   : > { %6962 = vst [vmem:[#allocation1 + $0x2] ss:$9 sm:$0xff] %v6384_v34  ;;  %v5756_v57 = vsub.f32 1.5, %v5755_v19 }
 0xb0a   : > { %6963 = vst [vmem:[#allocation1 + $0x3] ss:$9 sm:$0xff] %v6385_v60 }
 0xb0b   : > { %7156 = vperm.xlu2 %8206, %v11509_v43   ;;  %v7136_v43 = vpop.permute.xlu0 %7135  ;;  %6964 = vst [vmem:[#allocation1 + $0x4] ss:$9 sm:$0xff] %v6386_v0  ;;  %v5757_v46 = vmul.f32 %v8331_v45, %v5756_v57 }
 0xb0c   : > { %6965 = vst [vmem:[#allocation1 + $0x5] ss:$9 sm:$0xff] %v6387_v33  ;;  %v7312_v48 = vperm.slane %v7136_v43, %v11073_v18 }
 0xb0d   : > { %6966 = vst [vmem:[#allocation1 + $0x6] ss:$9 sm:$0xff] %v6388_v37 }
 0xb0e   : > { %6967 = vst [vmem:[#allocation1 + $0x7] ss:$9 sm:$0xff] %v6389_v35  ;;  %v7313_v44 = vsel %vm12033_vm13, %v7312_v48, %v7311_v29  ;;  %vm5759_vm13 = vweird.f32 %v8331_v45  ;;  %v12035_v29 = vld [vmem:[#allocation80_spill] sm:$0xff] }
 0xb0f   : > { %v5012_v59 = vmax.f32 %v12035_v29, 1e-16 }
 0xb13   : > { %7165 = vperm.xlu2 %8206, %v11554_v38  }
 0xb15   : > { %v4940_v15 = vpop.xlane.xlu2 %4939  ;;  %v6968_v13 = vld [vmem:[#allocation1] sm:$0xff] }
 0xb16   : > { %v5074_v53 = vmax.f32 %v4940_v15, 1e-16 }
 0xb18   : > { %v5138_v5 = vmul.f32 %v5074_v53, %v5010_v58 }
 0xb1a   : > { %8332 = vrsqrt.f32 %v5138_v5  ;;  %vm5748_vm12 = vweird.f32 %v5138_v5 }
 0xb1b   : > { %7174 = vperm.xlu2 %8206, %v11596_v52  }
 0xb1d   : > { %v11615_v21 = vpop.xlane.xlu2 %4433 }
 0xb20   : > { %v8333_v38 = vpop.eup %8332 }
 0xb21   : > { %v5743_v8 = vmul.f32 %v8333_v38, %v5138_v5  ;;  %vm5749_vm11 = vweird.f32 %v8333_v38 }
 0xb22   : > { %vm5750_vm3 = vmor %vm5748_vm12, %vm5749_vm11  ;;  %vm5758_vm11 = vweird.f32 %v5139_v17 }
 0xb23   : > { %v5744_v41 = vmul.f32 %v8333_v38, %v5743_v8  ;;  %7183 = vperm.xlu2 %8206, %v6968_v13  }
 0xb25   : > { %v5745_v47 = vmul.f32 0.5, %v5744_v41  ;;  %v7139_v23 = vpop.permute.xlu2 %7138 }
 0xb26   : > { %v7314_v2 = vperm.slane %v7139_v23, %v11076_v63 }
 0xb27   : > { %v5746_v11 = vsub.f32 1.5, %v5745_v47 }
 0xb28   : > { %v11619_v20 = vsel %vm12034_vm9, %v7314_v2, %v7313_v44  ;;  %vm5760_vm9 = vmor %vm5758_vm11, %vm5759_vm13 }
 0xb29   : > { %v5747_v52 = vmul.f32 %v8333_v38, %v5746_v11  ;;  %v5761_v60 = vsel %vm5760_vm9, %v8331_v45, %v5757_v46 }
 0xb2b   : > { %v5751_v51 = vsel %vm5750_vm3, %v8333_v38, %v5747_v52 }
 0xb2c   : > { %v5842_v3 = vmul.f32 %v5751_v51, %v11601_v26 }
 0xb2e   : > { %v6390_v27 = vperm.slane %v5842_v3, 0  ;;  %v6391_v12 = vperm.slane %v5842_v3, 1  ;;  %v6392_v9 = vperm.slane %v5842_v3, 2  ;;  %v6393_v32 = vperm.slane %v5842_v3, 3 }
 0xb2f   : > { %v6394_v39 = vperm.slane %v5842_v3, 4  ;;  %v6395_v28 = vperm.slane %v5842_v3, 5  ;;  %v6396_v14 = vperm.slane %v5842_v3, 6  ;;  %v6397_v34 = vperm.slane %v5842_v3, 7  ;;  %v4431_v26 = vpop.xlane.xlu1 %4430 }
 0xb30   : > { %6969 = vst [vmem:[#allocation1] ss:$9 sm:$0xff] %v6390_v27  ;;  %v5843_v0 = vmul.f32 %v5761_v60, %v4431_v26  ;;  %v12036_v27 = vld [vmem:[#allocation76_spill] sm:$0xff]  ;;  %v4437_v26 = vpop.xlane.xlu0 %4436 }
 0xb31   : > { %6970 = vst [vmem:[#allocation1 + $0x1] ss:$9 sm:$0xff] %v6391_v12  ;;  %v5013_v12 = vmax.f32 %v12036_v27, 1e-16 }
 0xb32   : > { %6971 = vst [vmem:[#allocation1 + $0x2] ss:$9 sm:$0xff] %v6392_v9  ;;  %v6398_v62 = vperm.slane %v5843_v0, 0  ;;  %v6399_v33 = vperm.slane %v5843_v0, 1  ;;  %v6400_v37 = vperm.slane %v5843_v0, 2  ;;  %v6401_v35 = vperm.slane %v5843_v0, 3 }
 0xb33   : > { %6972 = vst [vmem:[#allocation1 + $0x3] ss:$9 sm:$0xff] %v6393_v32  ;;  %v6402_v50 = vperm.slane %v5843_v0, 4  ;;  %v6403_v17 = vperm.slane %v5843_v0, 5  ;;  %v6404_v15 = vperm.slane %v5843_v0, 6  ;;  %v6405_v58 = vperm.slane %v5843_v0, 7 }
 0xb34   : > { %6973 = vst [vmem:[#allocation1 + $0x4] ss:$9 sm:$0xff] %v6394_v39 }
 0xb35   : > { %6974 = vst [vmem:[#allocation1 + $0x5] ss:$9 sm:$0xff] %v6395_v28 }
 0xb36   : > { %6975 = vst [vmem:[#allocation1 + $0x6] ss:$9 sm:$0xff] %v6396_v14 }
 0xb37   : > { %6976 = vst [vmem:[#allocation1 + $0x7] ss:$9 sm:$0xff] %v6397_v34  ;;  %v4946_v16 = vpop.xlane.xlu1 %4945 }
 0xb38   : > { %v5076_v48 = vmax.f32 %v4946_v16, 1e-16 }
 0xb3a   : > { %v5140_v42 = vmul.f32 %v5076_v48, %v5012_v59 }
 0xb3c   : > { %8334 = vrsqrt.f32 %v5140_v42  ;;  %vm5768_vm3 = vweird.f32 %v5140_v42 }
 0xb3e   : > { %v6977_v43 = vld [vmem:[#allocation1] sm:$0xff] }
 0xb3f   : > { %7186 = vperm.xlu1 %8205, %v6977_v43   ;;  %6978 = vst [vmem:[#allocation1] ss:$9 sm:$0xff] %v6398_v62 }
 0xb40   : > { %6979 = vst [vmem:[#allocation1 + $0x1] ss:$9 sm:$0xff] %v6399_v33 }
 0xb41   : > { %6980 = vst [vmem:[#allocation1 + $0x2] ss:$9 sm:$0xff] %v6400_v37 }
 0xb42   : > { %6981 = vst [vmem:[#allocation1 + $0x3] ss:$9 sm:$0xff] %v6401_v35  ;;  %v8335_v53 = vpop.eup %8334 }
 0xb43   : > { %6982 = vst [vmem:[#allocation1 + $0x4] ss:$9 sm:$0xff] %v6402_v50  ;;  %v5763_v44 = vmul.f32 %v8335_v53, %v5140_v42  ;;  %vm5769_vm12 = vweird.f32 %v8335_v53 }
 0xb44   : > { %6983 = vst [vmem:[#allocation1 + $0x5] ss:$9 sm:$0xff] %v6403_v17  ;;  %vm5770_vm13 = vmor %vm5768_vm3, %vm5769_vm12 }
 0xb45   : > { %6984 = vst [vmem:[#allocation1 + $0x6] ss:$9 sm:$0xff] %v6404_v15  ;;  %v5764_v5 = vmul.f32 %v8335_v53, %v5763_v44  ;;  %v7145_v15 = vpop.permute.xlu0 %7144 }
 0xb46   : > { %6985 = vst [vmem:[#allocation1 + $0x7] ss:$9 sm:$0xff] %v6405_v58 }
 0xb47   : > { %v5765_v38 = vmul.f32 0.5, %v5764_v5 }
 0xb49   : > { %v5766_v8 = vsub.f32 1.5, %v5765_v38 }
 0xb4b   : > { %v5767_v36 = vmul.f32 %v8335_v53, %v5766_v8 }
 0xb4d   : > { %v6986_v45 = vld [vmem:[#allocation1] sm:$0xff]  ;;  %v5771_v13 = vsel %vm5770_vm13, %v8335_v53, %v5767_v36  ;;  %v7154_v53 = vpop.permute.xlu0 %7153 }
 0xb4e   : > { %7189 = vperm.xlu0 %8204, %v6986_v45   ;;  %v5844_v41 = vmul.f32 %v5771_v13, %v11615_v21  ;;  %v7323_v13 = vperm.slane %v7154_v53, %v10881_v30 }
 0xb4f   : > { %v7142_v48 = vpop.permute.xlu1 %7141 }
 0xb50   : > { %v6406_v47 = vperm.slane %v5844_v41, 0  ;;  %v6407_v23 = vperm.slane %v5844_v41, 1  ;;  %v6408_v2 = vperm.slane %v5844_v41, 2  ;;  %v6409_v10 = vperm.slane %v5844_v41, 3 }
 0xb51   : > { %v6410_v11 = vperm.slane %v5844_v41, 4  ;;  %v6411_v52 = vperm.slane %v5844_v41, 5  ;;  %v6412_v19 = vperm.slane %v5844_v41, 6  ;;  %v6413_v51 = vperm.slane %v5844_v41, 7 }
 0xb52   : > { %6987 = vst [vmem:[#allocation1] ss:$9 sm:$0xff] %v6406_v47 }
 0xb53   : > { %6988 = vst [vmem:[#allocation1 + $0x1] ss:$9 sm:$0xff] %v6407_v23 }
 0xb54   : > { %6989 = vst [vmem:[#allocation1 + $0x2] ss:$9 sm:$0xff] %v6408_v2 }
 0xb55   : > { %6990 = vst [vmem:[#allocation1 + $0x3] ss:$9 sm:$0xff] %v6409_v10  ;;  %v7163_v45 = vpop.permute.xlu0 %7162 }
 0xb56   : > { %6991 = vst [vmem:[#allocation1 + $0x4] ss:$9 sm:$0xff] %v6410_v11 }
 0xb57   : > { %6992 = vst [vmem:[#allocation1 + $0x5] ss:$9 sm:$0xff] %v6411_v52  ;;  %v7151_v42 = vpop.permute.xlu1 %7150 }
 0xb58   : > { %6993 = vst [vmem:[#allocation1 + $0x6] ss:$9 sm:$0xff] %v6412_v19  ;;  %v7322_v38 = vperm.slane %v7151_v42, %v10876_v55  ;;  %v7329_v19 = vperm.slane %v7163_v45, %v10906_v1 }
 0xb59   : > { %6994 = vst [vmem:[#allocation1 + $0x7] ss:$9 sm:$0xff] %v6413_v51 }
 0xb5a   : > { %v7324_v41 = vsel %vm7202_vm5, %v7323_v13, %v7322_v38  ;;  %vm12037_vm5 = vcmask 917312  }
 0xb5d   : > { %v7172_v23 = vpop.permute.xlu0 %7171 }
 0xb5e   : > { %v4949_v3 = vpop.xlane.xlu2 %4948 }
 0xb5f   : > { %v5077_v9 = vmax.f32 %v4949_v3, 1e-16  ;;  %v7160_v44 = vpop.permute.xlu1 %7159 }
 0xb60   : > { %v6995_v57 = vld [vmem:[#allocation1] sm:$0xff]  ;;  %v7327_v10 = vperm.slane %v7160_v44, %v10890_v24 }
 0xb61   : > { %v5141_v21 = vmul.f32 %v5077_v9, %v5013_v12  ;;  %7192 = vperm.xlu2 %8206, %v6995_v57   ;;  %v7335_v9 = vperm.slane %v7172_v23, %v10969_v22  ;;  %v7316_v57 = vperm.slane %v7142_v48, %v11108_v40 }
 0xb63   : > { %8336 = vrsqrt.f32 %v5141_v21  ;;  %vm5778_vm9 = vweird.f32 %v5141_v21 }
 0xb66   : > { %v7148_v17 = vpop.permute.xlu2 %7147 }
 0xb67   : > { %v7169_v8 = vpop.permute.xlu1 %7168 }
 0xb68   : > { %v7333_v3 = vperm.slane %v7169_v8, %v10947_v4 }
 0xb69   : > { %v8337_v32 = vpop.eup %8336 }
 0xb6a   : > { %v5773_v39 = vmul.f32 %v8337_v32, %v5141_v21  ;;  %vm5779_vm11 = vweird.f32 %v8337_v32 }
 0xb6b   : > { %vm5780_vm12 = vmor %vm5778_vm9, %vm5779_vm11 }
 0xb6c   : > { %v5774_v28 = vmul.f32 %v8337_v32, %v5773_v39 }
 0xb6e   : > { %v5775_v14 = vmul.f32 0.5, %v5774_v28  ;;  %v7157_v58 = vpop.permute.xlu2 %7156 }
 0xb6f   : > { %v7325_v36 = vperm.slane %v7157_v58, %v10894_v25  ;;  %v7178_v55 = vpop.permute.xlu1 %7177 }
 0xb70   : > { %v5776_v46 = vsub.f32 1.5, %v5775_v14 }
 0xb71   : > { %v7326_v2 = vsel %vm7206_vm6, %v7325_v36, %v7324_v41  ;;  %vm12038_vm6 = vcmask 786112  }
 0xb72   : > { %v5777_v34 = vmul.f32 %v8337_v32, %v5776_v46  ;;  %v7328_v11 = vsel %vm7210_vm7, %v7327_v10, %v7326_v2  ;;  %v7317_v46 = vsel %vm12037_vm5, %v7316_v57, %v11619_v20  ;;  %vm12039_vm7 = vcmask 982912  }
 0xb73   : > { %v7330_v25 = vsel %vm7214_vm8, %v7329_v19, %v7328_v11  ;;  %vm12040_vm8 = vcmask 851712  }
 0xb74   : > { %v5781_v60 = vsel %vm5780_vm12, %v8337_v32, %v5777_v34  ;;  %v7339_v32 = vperm.slane %v7178_v55, %v11004_v61  ;;  %v7320_v34 = vperm.slane %v7148_v17, %v11137_v49  ;;  %v7318_v61 = vperm.slane %v7145_v15, %v11113_v31 }
 0xb75   : > { %v5845_v0 = vmul.f32 %v5781_v60, %v4437_v26 }
 0xb76   : > { %v7166_v5 = vpop.permute.xlu2 %7165 }
 0xb77   : > { %v6414_v62 = vperm.slane %v5845_v0, 0  ;;  %v6415_v33 = vperm.slane %v5845_v0, 1  ;;  %v6416_v37 = vperm.slane %v5845_v0, 2  ;;  %v6417_v29 = vperm.slane %v5845_v0, 3  ;;  %v7181_v51 = vpop.permute.xlu0 %7180 }
 0xb78   : > { %v6418_v59 = vperm.slane %v5845_v0, 4  ;;  %v6419_v35 = vperm.slane %v5845_v0, 5  ;;  %v6420_v43 = vperm.slane %v5845_v0, 6  ;;  %v6421_v16 = vperm.slane %v5845_v0, 7 }
 0xb79   : > { %6996 = vst [vmem:[#allocation1] ss:$9 sm:$0xff] %v6414_v62  ;;  %v7331_v52 = vperm.slane %v7166_v5, %v10936_v6  ;;  %v7341_v22 = vperm.slane %v7181_v51, %v11037_v56 }
 0xb7a   : > { %6997 = vst [vmem:[#allocation1 + $0x1] ss:$9 sm:$0xff] %v6415_v33 }
 0xb7b   : > { %6998 = vst [vmem:[#allocation1 + $0x2] ss:$9 sm:$0xff] %v6416_v37  ;;  %v7332_v30 = vsel %vm7218_vm2, %v7331_v52, %v7330_v25  ;;  %vm12041_vm2 = vmmov %vm12037_vm5 }
 0xb7c   : > { %6999 = vst [vmem:[#allocation1 + $0x3] ss:$9 sm:$0xff] %v6417_v29  ;;  %v7334_v12 = vsel %vm7222_vm15, %v7333_v3, %v7332_v30  ;;  %vm12042_vm15 = vmmov %vm12039_vm7 }
 0xb7d   : > { %7000 = vst [vmem:[#allocation1 + $0x4] ss:$9 sm:$0xff] %v6418_v59  ;;  %v7336_v6 = vsel %vm7226_vm1, %v7335_v9, %v7334_v12  ;;  %vm7357_vm1 = vcmask 1042434  }
 0xb7e   : > { %7001 = vst [vmem:[#allocation1 + $0x5] ss:$9 sm:$0xff] %v6419_v35  ;;  %v7175_v47 = vpop.permute.xlu2 %7174  ;;  %v12043_v35 = vlaneseq }
 0xb7f   : > { %7002 = vst [vmem:[#allocation1 + $0x6] ss:$9 sm:$0xff] %v6420_v43  ;;  %v7337_v24 = vperm.slane %v7175_v47, %v11001_v54 }
 0xb80   : > { %7003 = vst [vmem:[#allocation1 + $0x7] ss:$9 sm:$0xff] %v6421_v16 }
 0xb81   : > { %v7338_v1 = vsel %vm7230_vm14, %v7337_v24, %v7336_v6  ;;  %vm7359_vm14 = vcmask 1041408  }
 0xb82   : > { %v7340_v4 = vsel %vm7234_vm4, %v7339_v32, %v7338_v1  ;;  %vm7364_vm4 = vcmp.lt.s32.totalorder %v12043_v35, 512 }
 0xb83   : > { %v7342_v60 = vsel %vm7238_vm10, %v7341_v22, %v7340_v4 }
 0xb86   : > { %v7184_v27 = vpop.permute.xlu2 %7183 }
 0xb87   : > { %v7004_v50 = vld [vmem:[#allocation1] sm:$0xff]  ;;  %v7343_v28 = vperm.slane %v7184_v27, %v11073_v18 }
 0xb88   : > { %7195 = vperm.xlu1 %8205, %v7004_v50  }
 0xb89   : > { %v7344_v56 = vsel %vm12038_vm6, %v7343_v28, %v7342_v60 }
 0xbb1   : > { %v7187_v21 = vpop.permute.xlu1 %7186 }
 0xbb2   : > { %v7345_v14 = vperm.slane %v7187_v21, %v11076_v63  ;;  %v7319_v63 = vsel %vm12039_vm7, %v7318_v61, %v7317_v46 }
 0xbb4   : > { %v7346_v0 = vsel %vm12040_vm8, %v7345_v14, %v7344_v56 }
 0xbbb   : > { %v7193_v54 = vpop.permute.xlu2 %7192 }
 0xbbc   : > { %v7349_v18 = vperm.slane %v7193_v54, %v11113_v31 }
 0xbc0   : > { %v7190_v39 = vpop.permute.xlu0 %7189 }
 0xbc1   : > { %v7347_v26 = vperm.slane %v7190_v39, %v11108_v40  ;;  %v7321_v40 = vsel %vm7258_vm0, %v7320_v34, %v7319_v63 }
 0xbc2   : > { %v7354_v29 = vrot.slane %v7321_v40, 6 }
 0xbc3   : > { %v7348_v62 = vsel %vm12041_vm2, %v7347_v26, %v7346_v0 }
 0xbc4   : > { %v7350_v31 = vsel %vm12042_vm15, %v7349_v18, %v7348_v62 }
 0xbfa   : > { %v7196_v20 = vpop.permute.xlu1 %7195 }
 0xbfb   : > { %v7351_v33 = vperm.slane %v7196_v20, %v11137_v49 }
 0xbfd   : > { %v7352_v37 = vsel %vm7258_vm0, %v7351_v33, %v7350_v31 }
 0xbfe   : > { %v7355_v59 = vrot.slane %v7352_v37, 5 }
 0xc00   : > { %v7358_v43 = vsel %vm7357_vm1, %v7354_v29, %v7355_v59 }
 0xc01   : > { %v7360_v49 = vsel %vm7359_vm14, %v11491_v7, %v7358_v43 }
 0xc02   : > { %7366 = vst.msk [vmem:[%s298_s9] sm:$0xf] %vm7364_vm4, %v7360_v49 }
 0xc03   : > { %8382 = shalt.err (!%p8379_p3)
}
 0xc04   : > { %8164 = dma.vmem_to_hbm [thread:$0]  (%p8503_p5), %s7381_s18, 64, %s7383_s19, %s7368_s20  }
 0xc05 PF: > { %p8170_p4 = scmp.ge.s32.totalorder %s8417_s30, 2  ;;  %s7394_s23 = sand.u32 1, %s8405_s27  }
 0xc06   : > { %s7395_s10 = scalar_lea.sflag [#allocation3], %s7394_s23 }
 0xc07   : > { %p8167_p7 = pnand %p8170_p4, %p8507_p6 }
 0xc09   : > { %p8168_p8 = pneg %p8167_p7 }
 0xc0b   : > { %8400 = dma.done.wait (%p8168_p8), %s7395_s10, 64  }
 0xc0c   : > { %8402 = vsyncadd (%p8168_p8), %s7395_s10, 4294967232  ;;  %p18_p9 = scmp.ge.s32.totalorder %s8490_s11, 4   ;;  %s12044_s27 = smov %s8409_s28 }
 0xc0d   : > { %s12045_s28 = smov %s8413_s29  ;;  %s12046_s29 = smov %s8501_s14 }
 0xc0e   : > { %s12047_s30 = smov %s8490_s11  ;;  %20 = sbr.rel (!%p18_p9) target bundleno = 3 (0x3), region = 94 }
 0xc13   :  { %7401 = vsyncpa [#allocation3], 1 }
 0xc14   :  { %7403 = vsyncpa [#allocation3 + $0x1], 1 }

</bundles_post_ra>
